<compile_context>
chip_gen: v7x
topology: tpu7x:2x2x1
jax: 0.10.0
libtpu: 0.0.40
codegen_flags: <defaults>
</compile_context>

<pallas_src>
import functools
import math

import jax
import jax.numpy as jnp
from jax.experimental import pallas as pl
from jax.experimental.pallas import tpu as pltpu

_BN_EPS = 1e-5
_PAD_ROWS = 8
_VMEM_LIMIT = 48 * 1024 * 1024


# -----------------------------------------------------------------------------
# Pallas kernels
# -----------------------------------------------------------------------------
def _conv_stats_kernel(x_ref, t_ref, sc_ref, sh_ref, o_ref, s_ref, big_ref,
                       xn_ref=None, *, Hin, Do, Ho, apply_in):
    """Conv3d(3x3x3, stride 1, valid) for one sample + BN partial statistics.

    x_ref : [Din*Hin + 8, W*Cin]  bf16  flattened sample slab (8 zero pad rows)
    t_ref : [9, W*Cin, Wo*Cout]   bf16  block-Toeplitz weights (index kd*3+kh)
    sc/sh : [1, W*Cin]            f32   input BN scale/shift (previous layer)
    o_ref : [Do*Ho + 8, Wo*Cout]  bf16  pre-BN conv output (compact + zero pad)
    s_ref : [2, Wo*Cout]          f32   per-sample sum / sum-of-squares
    big_ref: [Do*Hin, Wo*Cout]    f32   scratch: uncompacted accumulator
    xn_ref: [Din*Hin + 8, W*Cin]  bf16  scratch: BN+ReLU-applied input
    """
    ncol = o_ref.shape[-1]

    if apply_in:
        # Fused BN apply + ReLU of the *previous* layer (per-lane FMA + max).
        xn_ref[...] = jnp.maximum(
            x_ref[...].astype(jnp.float32) * sc_ref[...] + sh_ref[...],
            0.0).astype(jnp.bfloat16)
        src = xn_ref
    else:
        src = x_ref

    rows = Do * Hin
    acc = None
    for kd in range(3):                                  # 9 MXU matmuls, M = Do*Hin
        for kh in range(3):
            lhs = src[pl.ds(kd * Hin + kh, rows), :]
            d = jnp.dot(lhs, t_ref[kd * 3 + kh],
                        preferred_element_type=jnp.float32)
            acc = d if acc is None else acc + d
    big_ref[...] = acc

    # Compact the valid rows (h < Ho of every Hin-row plane) and accumulate the
    # per-lane batch statistics from the same loaded planes.
    s = jnp.zeros((1, ncol), jnp.float32)
    s2 = jnp.zeros((1, ncol), jnp.float32)
    for do in range(Do):
        plane = big_ref[pl.ds(do * Hin, Ho), :]
        o_ref[pl.ds(do * Ho, Ho), :] = plane.astype(o_ref.dtype)
        s = s + jnp.sum(plane, axis=0, keepdims=True)
        s2 = s2 + jnp.sum(plane * plane, axis=0, keepdims=True)
    o_ref[pl.ds(Do * Ho, _PAD_ROWS), :] = jnp.zeros((_PAD_ROWS, ncol), o_ref.dtype)
    s_ref[0:1, :] = s
    s_ref[1:2, :] = s2


def _stage_end_kernel(y_ref, sc_ref, sh_ref, he_ref, ho_ref, we_ref, wo_ref,
                      skip_ref, pool_ref, dh_ref, *, Do, Ho, Dp, Hp):
    """Fused BN apply + ReLU + skip emit + MaxPool3d(2) for one sample.

    y_ref   : [Do*Ho + 8, Wo*C] bf16  pre-BN output of the stage's last conv
    sc/sh   : [1, Wo*C]         f32   BN scale/shift of that conv
    he/ho   : [Hp, Ho]          bf16  0/1 row-selection (even / odd rows)
    we/wo   : [Wo*C, Wp*C]      bf16  0/1 lane-group selection (even / odd w)
    skip_ref: [Do*Ho, Wo*C]     bf16  post-activation stage output (skip)
    pool_ref: [Dp*Hp + 8, Wp*C] bf16  pooled output (next stage's input layout)
    dh_ref  : [Dp*Hp, Wo*C]     bf16  scratch: depth/height-reduced planes
    """
    a = jnp.maximum(
        y_ref[pl.ds(0, Do * Ho), :].astype(jnp.float32) * sc_ref[...] + sh_ref[...],
        0.0)
    skip_ref[...] = a.astype(skip_ref.dtype)

    # Depth-pair max (element-wise) + height-pair max (exact selection matmuls).
    for dp in range(Dp):
        v0 = skip_ref[pl.ds((2 * dp) * Ho, Ho), :]
        v1 = skip_ref[pl.ds((2 * dp + 1) * Ho, Ho), :]
        vm = jnp.maximum(v0, v1)
        hm = jnp.maximum(
            jnp.dot(he_ref[...], vm, preferred_element_type=jnp.float32),
            jnp.dot(ho_ref[...], vm, preferred_element_type=jnp.float32))
        dh_ref[pl.ds(dp * Hp, Hp), :] = hm.astype(dh_ref.dtype)

    # Width-pair max + lane compaction (exact selection matmuls).
    u = dh_ref[...]
    pm = jnp.maximum(
        jnp.dot(u, we_ref[...], preferred_element_type=jnp.float32),
        jnp.dot(u, wo_ref[...], preferred_element_type=jnp.float32))
    pool_ref[pl.ds(0, Dp * Hp), :] = pm.astype(pool_ref.dtype)
    pool_ref[pl.ds(Dp * Hp, _PAD_ROWS), :] = jnp.zeros(
        (_PAD_ROWS, pool_ref.shape[-1]), pool_ref.dtype)


# -----------------------------------------------------------------------------
# Wrappers
# -----------------------------------------------------------------------------
def _conv_bn_stats(x, w, gamma, beta, dims, in_scale, in_shift):
    """One Conv3d layer.  x: [N, D*H + 8, W*Cin] bf16 (flattened, padded).

    Returns (y, scale, shift, out_dims):
      y     : [N, Do*Ho + 8, Wo*Cout] bf16  pre-BN conv output
      scale : [1, Wo*Cout] f32  BN scale (tiled over Wo) for the consumer
      shift : [1, Wo*Cout] f32
    """
    N = x.shape[0]
    D, H, W, Cin = dims
    Cout = w.shape[4]
    Do, Ho, Wo = D - 2, H - 2, W - 2
    K, Ncol = W * Cin, Wo * Cout

    # Block-Toeplitz expansion of the kernel over the W axis:
    #   T[kd*3+kh, w*Cin+ci, wo*Cout+co] = w[kd, kh, w-wo, ci, co], 0 <= w-wo < 3
    sel = (jnp.arange(W)[None, :, None]
           == jnp.arange(Wo)[None, None, :] + jnp.arange(3)[:, None, None])
    tmat = jnp.einsum('dhkic,kwv->dhwivc', w, sel.astype(w.dtype))
    tmat = tmat.reshape(9, K, Ncol).astype(jnp.bfloat16)

    apply_in = in_scale is not None
    if not apply_in:
        in_scale = jnp.ones((1, K), jnp.float32)
        in_shift = jnp.zeros((1, K), jnp.float32)

    scratch = [pltpu.VMEM((Do * H, Ncol), jnp.float32)]
    if apply_in:
        scratch.append(pltpu.VMEM((D * H + _PAD_ROWS, K), jnp.bfloat16))

    kernel = functools.partial(_conv_stats_kernel, Hin=H, Do=Do, Ho=Ho,
                               apply_in=apply_in)
    y, psum = pl.pallas_call(
        kernel,
        out_shape=(jax.ShapeDtypeStruct((N, Do * Ho + _PAD_ROWS, Ncol),
                                        jnp.bfloat16),
                   jax.ShapeDtypeStruct((N, 2, Ncol), jnp.float32)),
        grid=(N,),
        in_specs=[pl.BlockSpec((None, D * H + _PAD_ROWS, K), lambda n: (n, 0, 0)),
                  pl.BlockSpec((9, K, Ncol), lambda n: (0, 0, 0)),
                  pl.BlockSpec((1, K), lambda n: (0, 0)),
                  pl.BlockSpec((1, K), lambda n: (0, 0))],
        out_specs=(pl.BlockSpec((None, Do * Ho + _PAD_ROWS, Ncol),
                                lambda n: (n, 0, 0)),
                   pl.BlockSpec((None, 2, Ncol), lambda n: (n, 0, 0))),
        scratch_shapes=scratch,
        compiler_params=pltpu.CompilerParams(
            dimension_semantics=("parallel",),
            vmem_limit_bytes=_VMEM_LIMIT),
    )(x, tmat, in_scale, in_shift)

    # Finalize training-mode batch statistics on the tiny [N, 2, Ncol] tensor.
    per_ch = psum.reshape(N, 2, Wo, Cout).sum(axis=(0, 2))       # [2, Cout]
    cnt = N * Do * Ho * Wo
    mean = per_ch[0] / cnt
    var = jnp.maximum(per_ch[1] / cnt - mean * mean, 0.0)        # biased batch var
    scale_c = gamma * jax.lax.rsqrt(var + _BN_EPS)
    shift_c = beta - mean * scale_c
    scale = jnp.tile(scale_c, Wo)[None, :]
    shift = jnp.tile(shift_c, Wo)[None, :]
    return y, scale, shift, (Do, Ho, Wo, Cout)


def _stage_end(y, scale, shift, dims):
    """Fused BN apply + ReLU + MaxPool3d(2).  Returns (skip, pooled, pool_dims)."""
    N = y.shape[0]
    Do, Ho, Wo, C = dims
    Dp, Hp, Wp = Do // 2, Ho // 2, Wo // 2
    Ncol = Wo * C

    # Exact 0/1 selection matrices for the H-pair and W-pair reductions.
    h_even = (jnp.arange(Ho)[None, :] == 2 * jnp.arange(Hp)[:, None]
              ).astype(jnp.bfloat16)
    h_odd = (jnp.arange(Ho)[None, :] == 2 * jnp.arange(Hp)[:, None] + 1
             ).astype(jnp.bfloat16)
    w_in, c_in = jnp.arange(Ncol) // C, jnp.arange(Ncol) % C
    w_out, c_out = jnp.arange(Wp * C) // C, jnp.arange(Wp * C) % C
    same_c = c_in[:, None] == c_out[None, :]
    w_even = ((w_in[:, None] == 2 * w_out[None, :]) & same_c).astype(jnp.bfloat16)
    w_odd = ((w_in[:, None] == 2 * w_out[None, :] + 1) & same_c
             ).astype(jnp.bfloat16)

    kernel = functools.partial(_stage_end_kernel, Do=Do, Ho=Ho, Dp=Dp, Hp=Hp)
    skip, pooled = pl.pallas_call(
        kernel,
        out_shape=(jax.ShapeDtypeStruct((N, Do * Ho, Ncol), jnp.bfloat16),
                   jax.ShapeDtypeStruct((N, Dp * Hp + _PAD_ROWS, Wp * C),
                                        jnp.bfloat16)),
        grid=(N,),
        in_specs=[pl.BlockSpec((None, Do * Ho + _PAD_ROWS, Ncol),
                               lambda n: (n, 0, 0)),
                  pl.BlockSpec((1, Ncol), lambda n: (0, 0)),
                  pl.BlockSpec((1, Ncol), lambda n: (0, 0)),
                  pl.BlockSpec((Hp, Ho), lambda n: (0, 0)),
                  pl.BlockSpec((Hp, Ho), lambda n: (0, 0)),
                  pl.BlockSpec((Ncol, Wp * C), lambda n: (0, 0)),
                  pl.BlockSpec((Ncol, Wp * C), lambda n: (0, 0))],
        out_specs=(pl.BlockSpec((None, Do * Ho, Ncol), lambda n: (n, 0, 0)),
                   pl.BlockSpec((None, Dp * Hp + _PAD_ROWS, Wp * C),
                                lambda n: (n, 0, 0))),
        scratch_shapes=[pltpu.VMEM((Dp * Hp, Ncol), jnp.bfloat16)],
        compiler_params=pltpu.CompilerParams(
            dimension_semantics=("parallel",),
            vmem_limit_bytes=_VMEM_LIMIT),
    )(y, scale, shift, h_even, h_odd, w_even, w_odd)
    return skip, pooled, (Dp, Hp, Wp, C)


def ucontracting_forward(x_ncdhw, stage_params):
    """Equivalent of UContracting.forward.  Returns (stages, x), all NCDHW f32."""
    # TODO(synk): BatchNorm running-stat buffer updates (a training-time side
    # effect) are not replicated; they do not affect the forward output.
    N, Cin, D, H, W = x_ncdhw.shape
    x = jnp.transpose(x_ncdhw, (0, 2, 3, 4, 1)).reshape(N, D * H, W * Cin)
    x = jnp.pad(x, ((0, 0), (0, _PAD_ROWS), (0, 0))).astype(jnp.bfloat16)
    dims = (D, H, W, Cin)
    in_scale = in_shift = None

    stages = []
    for convs in stage_params:                           # one UStageDown each
        for (w, b, gamma, beta) in convs:
            # Conv bias `b` is intentionally unused: training-mode BN subtracts
            # the batch mean right after the conv, so the bias cancels exactly.
            x, in_scale, in_shift, dims = _conv_bn_stats(
                x, w, gamma, beta, dims, in_scale, in_shift)
        Do, Ho, Wo, C = dims
        skip, x, dims = _stage_end(x, in_scale, in_shift, dims)
        in_scale = in_shift = None                       # pool output is post-BN/ReLU
        skip5 = skip.reshape(N, Do, Ho, Wo, C).astype(jnp.float32)
        stages.append(jnp.transpose(skip5, (0, 4, 1, 2, 3)))

    Dp, Hp, Wp, C = dims
    xz = x[:, :Dp * Hp, :].reshape(N, Dp, Hp, Wp, C).astype(jnp.float32)
    return stages, jnp.transpose(xz, (0, 4, 1, 2, 3))


# -----------------------------------------------------------------------------
# Deterministic parameter construction (mirrors UContracting.__init__)
# -----------------------------------------------------------------------------
def build_params(in_ch, conf, key):
    stage_params = []
    chs = [in_ch]
    for layer in conf:
        if isinstance(layer, int):
            chs.append(layer)
            in_ch = layer
        elif layer == 'd':
            convs = []
            ch_pre = chs[0]
            for ch in chs[1:]:
                key, kw_, kb_ = jax.random.split(key, 3)
                bound = 1.0 / math.sqrt(ch_pre * 27)        # Conv3d default-style init
                w = jax.random.uniform(kw_, (3, 3, 3, ch_pre, ch),
                                       minval=-bound, maxval=bound,
                                       dtype=jnp.float32)
                b = jax.random.uniform(kb_, (ch,), minval=-bound, maxval=bound,
                                       dtype=jnp.float32)
                gamma = jnp.ones((ch,), jnp.float32)        # BN default affine params
                beta = jnp.zeros((ch,), jnp.float32)
                convs.append((w, b, gamma, beta))
                ch_pre = ch
            stage_params.append(convs)
            chs = [in_ch]
    return stage_params


# -----------------------------------------------------------------------------
# Pure-JAX reference (for numerical verification)
# -----------------------------------------------------------------------------
def ref_forward(x, stage_params):
    stages = []
    for convs in stage_params:
        for (w, b, gamma, beta) in convs:
            y = jax.lax.conv_general_dilated(
                x, w, window_strides=(1, 1, 1), padding='VALID',
                dimension_numbers=('NCDHW', 'DHWIO', 'NCDHW'))
            y = y + b.reshape(1, -1, 1, 1, 1)
            mean = jnp.mean(y, axis=(0, 2, 3, 4), keepdims=True)
            var = jnp.mean((y - mean) ** 2, axis=(0, 2, 3, 4), keepdims=True)
            y = ((y - mean) * jax.lax.rsqrt(var + _BN_EPS)
                 * gamma.reshape(1, -1, 1, 1, 1) + beta.reshape(1, -1, 1, 1, 1))
            x = jnp.maximum(y, 0.0)
        stages.append(x)
        x = jax.lax.reduce_window(x, -jnp.inf, jax.lax.max,
                                  (1, 1, 2, 2, 2), (1, 1, 2, 2, 2), 'VALID')
    return stages, x


# -----------------------------------------------------------------------------
# Main
# -----------------------------------------------------------------------------
if __name__ == "__main__":
    key = jax.random.PRNGKey(0)
    kx, kp = jax.random.split(key)

    in_ch = 4
    conf = [8, 8, 'd', 16, 'd']                # two UStageDown stages, 2+1 convs
    x = jax.random.normal(kx, (2, in_ch, 16, 16, 16), dtype=jnp.float32)  # NCDHW

    params = build_params(in_ch, conf, kp)

    fwd = jax.jit(ucontracting_forward)
    stages, x_out = fwd(x, params)
    jax.block_until_ready(x_out)
    for s in stages:
        jax.block_until_ready(s)

    # Verify against the pure-JAX f32 reference (kernel path stores bf16).
    ref_stages, ref_x = ref_forward(x, params)
    assert x_out.shape == ref_x.shape, (x_out.shape, ref_x.shape)
    assert jnp.allclose(x_out, ref_x, atol=5e-2, rtol=5e-2), float(
        jnp.max(jnp.abs(x_out - ref_x)))
    for a, r in zip(stages, ref_stages):
        assert a.shape == r.shape, (a.shape, r.shape)
        assert jnp.allclose(a, r, atol=5e-2, rtol=5e-2), float(
            jnp.max(jnp.abs(a - r)))

    print("KERNEL_OK")
</pallas_src>

<mosaic_0001>
module attributes {stable_mosaic.version = 11 : i64} {
  func.func @_conv_stats_kernel(%arg0: i32, %arg1: memref<1x264x64xbf16, #tpu.memory_space<vmem>>, %arg2: memref<9x64x112xbf16, #tpu.memory_space<vmem>>, %arg3: memref<1x64xf32, #tpu.memory_space<vmem>>, %arg4: memref<1x64xf32, #tpu.memory_space<vmem>>, %arg5: memref<1x204x112xbf16, #tpu.memory_space<vmem>>, %arg6: memref<1x2x112xf32, #tpu.memory_space<vmem>>, %arg7: memref<224x112xf32, #tpu.memory_space<vmem>>) attributes {dimension_semantics = [#tpu.dimension_semantics<parallel>], iteration_bounds = array<i64: 2>, scalar_prefetch = 0 : i64, scratch_operands = 1 : i64, tpu.core_type = #tpu.core_type<tc>, window_params = [{transform_indices = @transform_0, window_bounds = array<i64: 1, 264, 64>}, {pipeline_mode = #tpu.pipeline_mode<synchronous>, transform_indices = @transform_1, window_bounds = array<i64: 9, 64, 112>}, {pipeline_mode = #tpu.pipeline_mode<synchronous>, transform_indices = @transform_2, window_bounds = array<i64: 1, 64>}, {pipeline_mode = #tpu.pipeline_mode<synchronous>, transform_indices = @transform_3, window_bounds = array<i64: 1, 64>}, {transform_indices = @transform_4, window_bounds = array<i64: 1, 204, 112>}, {transform_indices = @transform_5, window_bounds = array<i64: 1, 2, 112>}]} {
    %c0 = arith.constant 0 : index
    %c0_0 = arith.constant 0 : index
    %c0_1 = arith.constant 0 : index
    %0 = vector.load %arg1[%c0, %c0_0, %c0_1] : memref<1x264x64xbf16, #tpu.memory_space<vmem>>, vector<1x224x64xbf16>
    %1 = vector.shape_cast %0 : vector<1x224x64xbf16> to vector<224x64xbf16>
    %c0_2 = arith.constant 0 : index
    %c0_3 = arith.constant 0 : index
    %c0_4 = arith.constant 0 : index
    %2 = vector.load %arg2[%c0_2, %c0_3, %c0_4] : memref<9x64x112xbf16, #tpu.memory_space<vmem>>, vector<1x64x112xbf16>
    %3 = vector.shape_cast %2 : vector<1x64x112xbf16> to vector<64x112xbf16>
    %cst = arith.constant dense<0.000000e+00> : vector<224x112xf32>
    %4 = tpu.matmul %1, %3, %cst {dimension_numbers = #tpu.dot_dimension_numbers<[1], [0], [0], [1], [0, 0, 1, 1], [], []>} : vector<224x64xbf16>, vector<64x112xbf16>, vector<224x112xf32> -> vector<224x112xf32>
    %c0_5 = arith.constant 0 : index
    %c1 = arith.constant 1 : index
    %c0_6 = arith.constant 0 : index
    %5 = vector.load %arg1[%c0_5, %c1, %c0_6] : memref<1x264x64xbf16, #tpu.memory_space<vmem>>, vector<1x224x64xbf16>
    %6 = vector.shape_cast %5 : vector<1x224x64xbf16> to vector<224x64xbf16>
    %c1_7 = arith.constant 1 : index
    %c0_8 = arith.constant 0 : index
    %c0_9 = arith.constant 0 : index
    %7 = vector.load %arg2[%c1_7, %c0_8, %c0_9] : memref<9x64x112xbf16, #tpu.memory_space<vmem>>, vector<1x64x112xbf16>
    %8 = vector.shape_cast %7 : vector<1x64x112xbf16> to vector<64x112xbf16>
    %cst_10 = arith.constant dense<0.000000e+00> : vector<224x112xf32>
    %9 = tpu.matmul %6, %8, %cst_10 {dimension_numbers = #tpu.dot_dimension_numbers<[1], [0], [0], [1], [0, 0, 1, 1], [], []>} : vector<224x64xbf16>, vector<64x112xbf16>, vector<224x112xf32> -> vector<224x112xf32>
    %10 = arith.addf %4, %9 : vector<224x112xf32>
    %c0_11 = arith.constant 0 : index
    %c2 = arith.constant 2 : index
    %c0_12 = arith.constant 0 : index
    %11 = vector.load %arg1[%c0_11, %c2, %c0_12] : memref<1x264x64xbf16, #tpu.memory_space<vmem>>, vector<1x224x64xbf16>
    %12 = vector.shape_cast %11 : vector<1x224x64xbf16> to vector<224x64xbf16>
    %c2_13 = arith.constant 2 : index
    %c0_14 = arith.constant 0 : index
    %c0_15 = arith.constant 0 : index
    %13 = vector.load %arg2[%c2_13, %c0_14, %c0_15] : memref<9x64x112xbf16, #tpu.memory_space<vmem>>, vector<1x64x112xbf16>
    %14 = vector.shape_cast %13 : vector<1x64x112xbf16> to vector<64x112xbf16>
    %cst_16 = arith.constant dense<0.000000e+00> : vector<224x112xf32>
    %15 = tpu.matmul %12, %14, %cst_16 {dimension_numbers = #tpu.dot_dimension_numbers<[1], [0], [0], [1], [0, 0, 1, 1], [], []>} : vector<224x64xbf16>, vector<64x112xbf16>, vector<224x112xf32> -> vector<224x112xf32>
    %16 = arith.addf %10, %15 : vector<224x112xf32>
    %c0_17 = arith.constant 0 : index
    %c16 = arith.constant 16 : index
    %c0_18 = arith.constant 0 : index
    %17 = vector.load %arg1[%c0_17, %c16, %c0_18] : memref<1x264x64xbf16, #tpu.memory_space<vmem>>, vector<1x224x64xbf16>
    %18 = vector.shape_cast %17 : vector<1x224x64xbf16> to vector<224x64xbf16>
    %c3 = arith.constant 3 : index
    %c0_19 = arith.constant 0 : index
    %c0_20 = arith.constant 0 : index
    %19 = vector.load %arg2[%c3, %c0_19, %c0_20] : memref<9x64x112xbf16, #tpu.memory_space<vmem>>, vector<1x64x112xbf16>
    %20 = vector.shape_cast %19 : vector<1x64x112xbf16> to vector<64x112xbf16>
    %cst_21 = arith.constant dense<0.000000e+00> : vector<224x112xf32>
    %21 = tpu.matmul %18, %20, %cst_21 {dimension_numbers = #tpu.dot_dimension_numbers<[1], [0], [0], [1], [0, 0, 1, 1], [], []>} : vector<224x64xbf16>, vector<64x112xbf16>, vector<224x112xf32> -> vector<224x112xf32>
    %22 = arith.addf %16, %21 : vector<224x112xf32>
    %c0_22 = arith.constant 0 : index
    %c17 = arith.constant 17 : index
    %c0_23 = arith.constant 0 : index
    %23 = vector.load %arg1[%c0_22, %c17, %c0_23] : memref<1x264x64xbf16, #tpu.memory_space<vmem>>, vector<1x224x64xbf16>
    %24 = vector.shape_cast %23 : vector<1x224x64xbf16> to vector<224x64xbf16>
    %c4 = arith.constant 4 : index
    %c0_24 = arith.constant 0 : index
    %c0_25 = arith.constant 0 : index
    %25 = vector.load %arg2[%c4, %c0_24, %c0_25] : memref<9x64x112xbf16, #tpu.memory_space<vmem>>, vector<1x64x112xbf16>
    %26 = vector.shape_cast %25 : vector<1x64x112xbf16> to vector<64x112xbf16>
    %cst_26 = arith.constant dense<0.000000e+00> : vector<224x112xf32>
    %27 = tpu.matmul %24, %26, %cst_26 {dimension_numbers = #tpu.dot_dimension_numbers<[1], [0], [0], [1], [0, 0, 1, 1], [], []>} : vector<224x64xbf16>, vector<64x112xbf16>, vector<224x112xf32> -> vector<224x112xf32>
    %28 = arith.addf %22, %27 : vector<224x112xf32>
    %c0_27 = arith.constant 0 : index
    %c18 = arith.constant 18 : index
    %c0_28 = arith.constant 0 : index
    %29 = vector.load %arg1[%c0_27, %c18, %c0_28] : memref<1x264x64xbf16, #tpu.memory_space<vmem>>, vector<1x224x64xbf16>
    %30 = vector.shape_cast %29 : vector<1x224x64xbf16> to vector<224x64xbf16>
    %c5 = arith.constant 5 : index
    %c0_29 = arith.constant 0 : index
    %c0_30 = arith.constant 0 : index
    %31 = vector.load %arg2[%c5, %c0_29, %c0_30] : memref<9x64x112xbf16, #tpu.memory_space<vmem>>, vector<1x64x112xbf16>
    %32 = vector.shape_cast %31 : vector<1x64x112xbf16> to vector<64x112xbf16>
    %cst_31 = arith.constant dense<0.000000e+00> : vector<224x112xf32>
    %33 = tpu.matmul %30, %32, %cst_31 {dimension_numbers = #tpu.dot_dimension_numbers<[1], [0], [0], [1], [0, 0, 1, 1], [], []>} : vector<224x64xbf16>, vector<64x112xbf16>, vector<224x112xf32> -> vector<224x112xf32>
    %34 = arith.addf %28, %33 : vector<224x112xf32>
    %c0_32 = arith.constant 0 : index
    %c32 = arith.constant 32 : index
    %c0_33 = arith.constant 0 : index
    %35 = vector.load %arg1[%c0_32, %c32, %c0_33] : memref<1x264x64xbf16, #tpu.memory_space<vmem>>, vector<1x224x64xbf16>
    %36 = vector.shape_cast %35 : vector<1x224x64xbf16> to vector<224x64xbf16>
    %c6 = arith.constant 6 : index
    %c0_34 = arith.constant 0 : index
    %c0_35 = arith.constant 0 : index
    %37 = vector.load %arg2[%c6, %c0_34, %c0_35] : memref<9x64x112xbf16, #tpu.memory_space<vmem>>, vector<1x64x112xbf16>
    %38 = vector.shape_cast %37 : vector<1x64x112xbf16> to vector<64x112xbf16>
    %cst_36 = arith.constant dense<0.000000e+00> : vector<224x112xf32>
    %39 = tpu.matmul %36, %38, %cst_36 {dimension_numbers = #tpu.dot_dimension_numbers<[1], [0], [0], [1], [0, 0, 1, 1], [], []>} : vector<224x64xbf16>, vector<64x112xbf16>, vector<224x112xf32> -> vector<224x112xf32>
    %40 = arith.addf %34, %39 : vector<224x112xf32>
    %c0_37 = arith.constant 0 : index
    %c33 = arith.constant 33 : index
    %c0_38 = arith.constant 0 : index
    %41 = vector.load %arg1[%c0_37, %c33, %c0_38] : memref<1x264x64xbf16, #tpu.memory_space<vmem>>, vector<1x224x64xbf16>
    %42 = vector.shape_cast %41 : vector<1x224x64xbf16> to vector<224x64xbf16>
    %c7 = arith.constant 7 : index
    %c0_39 = arith.constant 0 : index
    %c0_40 = arith.constant 0 : index
    %43 = vector.load %arg2[%c7, %c0_39, %c0_40] : memref<9x64x112xbf16, #tpu.memory_space<vmem>>, vector<1x64x112xbf16>
    %44 = vector.shape_cast %43 : vector<1x64x112xbf16> to vector<64x112xbf16>
    %cst_41 = arith.constant dense<0.000000e+00> : vector<224x112xf32>
    %45 = tpu.matmul %42, %44, %cst_41 {dimension_numbers = #tpu.dot_dimension_numbers<[1], [0], [0], [1], [0, 0, 1, 1], [], []>} : vector<224x64xbf16>, vector<64x112xbf16>, vector<224x112xf32> -> vector<224x112xf32>
    %46 = arith.addf %40, %45 : vector<224x112xf32>
    %c0_42 = arith.constant 0 : index
    %c34 = arith.constant 34 : index
    %c0_43 = arith.constant 0 : index
    %47 = vector.load %arg1[%c0_42, %c34, %c0_43] : memref<1x264x64xbf16, #tpu.memory_space<vmem>>, vector<1x224x64xbf16>
    %48 = vector.shape_cast %47 : vector<1x224x64xbf16> to vector<224x64xbf16>
    %c8 = arith.constant 8 : index
    %c0_44 = arith.constant 0 : index
    %c0_45 = arith.constant 0 : index
    %49 = vector.load %arg2[%c8, %c0_44, %c0_45] : memref<9x64x112xbf16, #tpu.memory_space<vmem>>, vector<1x64x112xbf16>
    %50 = vector.shape_cast %49 : vector<1x64x112xbf16> to vector<64x112xbf16>
    %cst_46 = arith.constant dense<0.000000e+00> : vector<224x112xf32>
    %51 = tpu.matmul %48, %50, %cst_46 {dimension_numbers = #tpu.dot_dimension_numbers<[1], [0], [0], [1], [0, 0, 1, 1], [], []>} : vector<224x64xbf16>, vector<64x112xbf16>, vector<224x112xf32> -> vector<224x112xf32>
    %52 = arith.addf %46, %51 : vector<224x112xf32>
    %c0_47 = arith.constant 0 : index
    %c0_48 = arith.constant 0 : index
    %53 = vector.load %arg7[%c0_47, %c0_48] : memref<224x112xf32, #tpu.memory_space<vmem>>, vector<224x112xf32>
    tpu.vector_store %arg7[%c0_47, %c0_48], %52 {strides = array<i32>} : memref<224x112xf32, #tpu.memory_space<vmem>>, vector<224x112xf32>,
    %cst_49 = arith.constant 0.000000e+00 : f32
    %54 = vector.broadcast %cst_49 : f32 to vector<1x112xf32>
    %cst_50 = arith.constant 0.000000e+00 : f32
    %55 = vector.broadcast %cst_50 : f32 to vector<1x112xf32>
    %c0_51 = arith.constant 0 : index
    %c0_52 = arith.constant 0 : index
    %56 = vector.load %arg7[%c0_51, %c0_52] : memref<224x112xf32, #tpu.memory_space<vmem>>, vector<14x112xf32>
    %57 = arith.truncf %56 : vector<14x112xf32> to vector<14x112xbf16>
    %c0_53 = arith.constant 0 : index
    %c0_54 = arith.constant 0 : index
    %c0_55 = arith.constant 0 : index
    %58 = vector.load %arg5[%c0_53, %c0_54, %c0_55] : memref<1x204x112xbf16, #tpu.memory_space<vmem>>, vector<1x14x112xbf16>
    %59 = vector.shape_cast %58 : vector<1x14x112xbf16> to vector<14x112xbf16>
    %60 = vector.shape_cast %57 : vector<14x112xbf16> to vector<1x14x112xbf16>
    tpu.vector_store %arg5[%c0_53, %c0_54, %c0_55], %60 {strides = array<i32>} : memref<1x204x112xbf16, #tpu.memory_space<vmem>>, vector<1x14x112xbf16>,
    %cst_56 = arith.constant dense<0.000000e+00> : vector<112xf32>
    %61 = vector.multi_reduction <add>, %56, %cst_56 [0] : vector<14x112xf32> to vector<112xf32>
    %62 = vector.shape_cast %61 : vector<112xf32> to vector<1x112xf32>
    %63 = arith.addf %54, %62 : vector<1x112xf32>
    %64 = arith.mulf %56, %56 : vector<14x112xf32>
    %cst_57 = arith.constant dense<0.000000e+00> : vector<112xf32>
    %65 = vector.multi_reduction <add>, %64, %cst_57 [0] : vector<14x112xf32> to vector<112xf32>
    %66 = vector.shape_cast %65 : vector<112xf32> to vector<1x112xf32>
    %67 = arith.addf %55, %66 : vector<1x112xf32>
    %c16_58 = arith.constant 16 : index
    %c0_59 = arith.constant 0 : index
    %68 = vector.load %arg7[%c16_58, %c0_59] : memref<224x112xf32, #tpu.memory_space<vmem>>, vector<14x112xf32>
    %69 = arith.truncf %68 : vector<14x112xf32> to vector<14x112xbf16>
    %c0_60 = arith.constant 0 : index
    %c14 = arith.constant 14 : index
    %c0_61 = arith.constant 0 : index
    %70 = vector.load %arg5[%c0_60, %c14, %c0_61] : memref<1x204x112xbf16, #tpu.memory_space<vmem>>, vector<1x14x112xbf16>
    %71 = vector.shape_cast %70 : vector<1x14x112xbf16> to vector<14x112xbf16>
    %72 = vector.shape_cast %69 : vector<14x112xbf16> to vector<1x14x112xbf16>
    tpu.vector_store %arg5[%c0_60, %c14, %c0_61], %72 {strides = array<i32>} : memref<1x204x112xbf16, #tpu.memory_space<vmem>>, vector<1x14x112xbf16>,
    %cst_62 = arith.constant dense<0.000000e+00> : vector<112xf32>
    %73 = vector.multi_reduction <add>, %68, %cst_62 [0] : vector<14x112xf32> to vector<112xf32>
    %74 = vector.shape_cast %73 : vector<112xf32> to vector<1x112xf32>
    %75 = arith.addf %63, %74 : vector<1x112xf32>
    %76 = arith.mulf %68, %68 : vector<14x112xf32>
    %cst_63 = arith.constant dense<0.000000e+00> : vector<112xf32>
    %77 = vector.multi_reduction <add>, %76, %cst_63 [0] : vector<14x112xf32> to vector<112xf32>
    %78 = vector.shape_cast %77 : vector<112xf32> to vector<1x112xf32>
    %79 = arith.addf %67, %78 : vector<1x112xf32>
    %c32_64 = arith.constant 32 : index
    %c0_65 = arith.constant 0 : index
    %80 = vector.load %arg7[%c32_64, %c0_65] : memref<224x112xf32, #tpu.memory_space<vmem>>, vector<14x112xf32>
    %81 = arith.truncf %80 : vector<14x112xf32> to vector<14x112xbf16>
    %c0_66 = arith.constant 0 : index
    %c28 = arith.constant 28 : index
    %c0_67 = arith.constant 0 : index
    %82 = vector.load %arg5[%c0_66, %c28, %c0_67] : memref<1x204x112xbf16, #tpu.memory_space<vmem>>, vector<1x14x112xbf16>
    %83 = vector.shape_cast %82 : vector<1x14x112xbf16> to vector<14x112xbf16>
    %84 = vector.shape_cast %81 : vector<14x112xbf16> to vector<1x14x112xbf16>
    tpu.vector_store %arg5[%c0_66, %c28, %c0_67], %84 {strides = array<i32>} : memref<1x204x112xbf16, #tpu.memory_space<vmem>>, vector<1x14x112xbf16>,
    %cst_68 = arith.constant dense<0.000000e+00> : vector<112xf32>
    %85 = vector.multi_reduction <add>, %80, %cst_68 [0] : vector<14x112xf32> to vector<112xf32>
    %86 = vector.shape_cast %85 : vector<112xf32> to vector<1x112xf32>
    %87 = arith.addf %75, %86 : vector<1x112xf32>
    %88 = arith.mulf %80, %80 : vector<14x112xf32>
    %cst_69 = arith.constant dense<0.000000e+00> : vector<112xf32>
    %89 = vector.multi_reduction <add>, %88, %cst_69 [0] : vector<14x112xf32> to vector<112xf32>
    %90 = vector.shape_cast %89 : vector<112xf32> to vector<1x112xf32>
    %91 = arith.addf %79, %90 : vector<1x112xf32>
    %c48 = arith.constant 48 : index
    %c0_70 = arith.constant 0 : index
    %92 = vector.load %arg7[%c48, %c0_70] : memref<224x112xf32, #tpu.memory_space<vmem>>, vector<14x112xf32>
    %93 = arith.truncf %92 : vector<14x112xf32> to vector<14x112xbf16>
    %c0_71 = arith.constant 0 : index
    %c42 = arith.constant 42 : index
    %c0_72 = arith.constant 0 : index
    %94 = vector.load %arg5[%c0_71, %c42, %c0_72] : memref<1x204x112xbf16, #tpu.memory_space<vmem>>, vector<1x14x112xbf16>
    %95 = vector.shape_cast %94 : vector<1x14x112xbf16> to vector<14x112xbf16>
    %96 = vector.shape_cast %93 : vector<14x112xbf16> to vector<1x14x112xbf16>
    tpu.vector_store %arg5[%c0_71, %c42, %c0_72], %96 {strides = array<i32>} : memref<1x204x112xbf16, #tpu.memory_space<vmem>>, vector<1x14x112xbf16>,
    %cst_73 = arith.constant dense<0.000000e+00> : vector<112xf32>
    %97 = vector.multi_reduction <add>, %92, %cst_73 [0] : vector<14x112xf32> to vector<112xf32>
    %98 = vector.shape_cast %97 : vector<112xf32> to vector<1x112xf32>
    %99 = arith.addf %87, %98 : vector<1x112xf32>
    %100 = arith.mulf %92, %92 : vector<14x112xf32>
    %cst_74 = arith.constant dense<0.000000e+00> : vector<112xf32>
    %101 = vector.multi_reduction <add>, %100, %cst_74 [0] : vector<14x112xf32> to vector<112xf32>
    %102 = vector.shape_cast %101 : vector<112xf32> to vector<1x112xf32>
    %103 = arith.addf %91, %102 : vector<1x112xf32>
    %c64 = arith.constant 64 : index
    %c0_75 = arith.constant 0 : index
    %104 = vector.load %arg7[%c64, %c0_75] : memref<224x112xf32, #tpu.memory_space<vmem>>, vector<14x112xf32>
    %105 = arith.truncf %104 : vector<14x112xf32> to vector<14x112xbf16>
    %c0_76 = arith.constant 0 : index
    %c56 = arith.constant 56 : index
    %c0_77 = arith.constant 0 : index
    %106 = vector.load %arg5[%c0_76, %c56, %c0_77] : memref<1x204x112xbf16, #tpu.memory_space<vmem>>, vector<1x14x112xbf16>
    %107 = vector.shape_cast %106 : vector<1x14x112xbf16> to vector<14x112xbf16>
    %108 = vector.shape_cast %105 : vector<14x112xbf16> to vector<1x14x112xbf16>
    tpu.vector_store %arg5[%c0_76, %c56, %c0_77], %108 {strides = array<i32>} : memref<1x204x112xbf16, #tpu.memory_space<vmem>>, vector<1x14x112xbf16>,
    %cst_78 = arith.constant dense<0.000000e+00> : vector<112xf32>
    %109 = vector.multi_reduction <add>, %104, %cst_78 [0] : vector<14x112xf32> to vector<112xf32>
    %110 = vector.shape_cast %109 : vector<112xf32> to vector<1x112xf32>
    %111 = arith.addf %99, %110 : vector<1x112xf32>
    %112 = arith.mulf %104, %104 : vector<14x112xf32>
    %cst_79 = arith.constant dense<0.000000e+00> : vector<112xf32>
    %113 = vector.multi_reduction <add>, %112, %cst_79 [0] : vector<14x112xf32> to vector<112xf32>
    %114 = vector.shape_cast %113 : vector<112xf32> to vector<1x112xf32>
    %115 = arith.addf %103, %114 : vector<1x112xf32>
    %c80 = arith.constant 80 : index
    %c0_80 = arith.constant 0 : index
    %116 = vector.load %arg7[%c80, %c0_80] : memref<224x112xf32, #tpu.memory_space<vmem>>, vector<14x112xf32>
    %117 = arith.truncf %116 : vector<14x112xf32> to vector<14x112xbf16>
    %c0_81 = arith.constant 0 : index
    %c70 = arith.constant 70 : index
    %c0_82 = arith.constant 0 : index
    %118 = vector.load %arg5[%c0_81, %c70, %c0_82] : memref<1x204x112xbf16, #tpu.memory_space<vmem>>, vector<1x14x112xbf16>
    %119 = vector.shape_cast %118 : vector<1x14x112xbf16> to vector<14x112xbf16>
    %120 = vector.shape_cast %117 : vector<14x112xbf16> to vector<1x14x112xbf16>
    tpu.vector_store %arg5[%c0_81, %c70, %c0_82], %120 {strides = array<i32>} : memref<1x204x112xbf16, #tpu.memory_space<vmem>>, vector<1x14x112xbf16>,
    %cst_83 = arith.constant dense<0.000000e+00> : vector<112xf32>
    %121 = vector.multi_reduction <add>, %116, %cst_83 [0] : vector<14x112xf32> to vector<112xf32>
    %122 = vector.shape_cast %121 : vector<112xf32> to vector<1x112xf32>
    %123 = arith.addf %111, %122 : vector<1x112xf32>
    %124 = arith.mulf %116, %116 : vector<14x112xf32>
    %cst_84 = arith.constant dense<0.000000e+00> : vector<112xf32>
    %125 = vector.multi_reduction <add>, %124, %cst_84 [0] : vector<14x112xf32> to vector<112xf32>
    %126 = vector.shape_cast %125 : vector<112xf32> to vector<1x112xf32>
    %127 = arith.addf %115, %126 : vector<1x112xf32>
    %c96 = arith.constant 96 : index
    %c0_85 = arith.constant 0 : index
    %128 = vector.load %arg7[%c96, %c0_85] : memref<224x112xf32, #tpu.memory_space<vmem>>, vector<14x112xf32>
    %129 = arith.truncf %128 : vector<14x112xf32> to vector<14x112xbf16>
    %c0_86 = arith.constant 0 : index
    %c84 = arith.constant 84 : index
    %c0_87 = arith.constant 0 : index
    %130 = vector.load %arg5[%c0_86, %c84, %c0_87] : memref<1x204x112xbf16, #tpu.memory_space<vmem>>, vector<1x14x112xbf16>
    %131 = vector.shape_cast %130 : vector<1x14x112xbf16> to vector<14x112xbf16>
    %132 = vector.shape_cast %129 : vector<14x112xbf16> to vector<1x14x112xbf16>
    tpu.vector_store %arg5[%c0_86, %c84, %c0_87], %132 {strides = array<i32>} : memref<1x204x112xbf16, #tpu.memory_space<vmem>>, vector<1x14x112xbf16>,
    %cst_88 = arith.constant dense<0.000000e+00> : vector<112xf32>
    %133 = vector.multi_reduction <add>, %128, %cst_88 [0] : vector<14x112xf32> to vector<112xf32>
    %134 = vector.shape_cast %133 : vector<112xf32> to vector<1x112xf32>
    %135 = arith.addf %123, %134 : vector<1x112xf32>
    %136 = arith.mulf %128, %128 : vector<14x112xf32>
    %cst_89 = arith.constant dense<0.000000e+00> : vector<112xf32>
    %137 = vector.multi_reduction <add>, %136, %cst_89 [0] : vector<14x112xf32> to vector<112xf32>
    %138 = vector.shape_cast %137 : vector<112xf32> to vector<1x112xf32>
    %139 = arith.addf %127, %138 : vector<1x112xf32>
    %c112 = arith.constant 112 : index
    %c0_90 = arith.constant 0 : index
    %140 = vector.load %arg7[%c112, %c0_90] : memref<224x112xf32, #tpu.memory_space<vmem>>, vector<14x112xf32>
    %141 = arith.truncf %140 : vector<14x112xf32> to vector<14x112xbf16>
    %c0_91 = arith.constant 0 : index
    %c98 = arith.constant 98 : index
    %c0_92 = arith.constant 0 : index
    %142 = vector.load %arg5[%c0_91, %c98, %c0_92] : memref<1x204x112xbf16, #tpu.memory_space<vmem>>, vector<1x14x112xbf16>
    %143 = vector.shape_cast %142 : vector<1x14x112xbf16> to vector<14x112xbf16>
    %144 = vector.shape_cast %141 : vector<14x112xbf16> to vector<1x14x112xbf16>
    tpu.vector_store %arg5[%c0_91, %c98, %c0_92], %144 {strides = array<i32>} : memref<1x204x112xbf16, #tpu.memory_space<vmem>>, vector<1x14x112xbf16>,
    %cst_93 = arith.constant dense<0.000000e+00> : vector<112xf32>
    %145 = vector.multi_reduction <add>, %140, %cst_93 [0] : vector<14x112xf32> to vector<112xf32>
    %146 = vector.shape_cast %145 : vector<112xf32> to vector<1x112xf32>
    %147 = arith.addf %135, %146 : vector<1x112xf32>
    %148 = arith.mulf %140, %140 : vector<14x112xf32>
    %cst_94 = arith.constant dense<0.000000e+00> : vector<112xf32>
    %149 = vector.multi_reduction <add>, %148, %cst_94 [0] : vector<14x112xf32> to vector<112xf32>
    %150 = vector.shape_cast %149 : vector<112xf32> to vector<1x112xf32>
    %151 = arith.addf %139, %150 : vector<1x112xf32>
    %c128 = arith.constant 128 : index
    %c0_95 = arith.constant 0 : index
    %152 = vector.load %arg7[%c128, %c0_95] : memref<224x112xf32, #tpu.memory_space<vmem>>, vector<14x112xf32>
    %153 = arith.truncf %152 : vector<14x112xf32> to vector<14x112xbf16>
    %c0_96 = arith.constant 0 : index
    %c112_97 = arith.constant 112 : index
    %c0_98 = arith.constant 0 : index
    %154 = vector.load %arg5[%c0_96, %c112_97, %c0_98] : memref<1x204x112xbf16, #tpu.memory_space<vmem>>, vector<1x14x112xbf16>
    %155 = vector.shape_cast %154 : vector<1x14x112xbf16> to vector<14x112xbf16>
    %156 = vector.shape_cast %153 : vector<14x112xbf16> to vector<1x14x112xbf16>
    tpu.vector_store %arg5[%c0_96, %c112_97, %c0_98], %156 {strides = array<i32>} : memref<1x204x112xbf16, #tpu.memory_space<vmem>>, vector<1x14x112xbf16>,
    %cst_99 = arith.constant dense<0.000000e+00> : vector<112xf32>
    %157 = vector.multi_reduction <add>, %152, %cst_99 [0] : vector<14x112xf32> to vector<112xf32>
    %158 = vector.shape_cast %157 : vector<112xf32> to vector<1x112xf32>
    %159 = arith.addf %147, %158 : vector<1x112xf32>
    %160 = arith.mulf %152, %152 : vector<14x112xf32>
    %cst_100 = arith.constant dense<0.000000e+00> : vector<112xf32>
    %161 = vector.multi_reduction <add>, %160, %cst_100 [0] : vector<14x112xf32> to vector<112xf32>
    %162 = vector.shape_cast %161 : vector<112xf32> to vector<1x112xf32>
    %163 = arith.addf %151, %162 : vector<1x112xf32>
    %c144 = arith.constant 144 : index
    %c0_101 = arith.constant 0 : index
    %164 = vector.load %arg7[%c144, %c0_101] : memref<224x112xf32, #tpu.memory_space<vmem>>, vector<14x112xf32>
    %165 = arith.truncf %164 : vector<14x112xf32> to vector<14x112xbf16>
    %c0_102 = arith.constant 0 : index
    %c126 = arith.constant 126 : index
    %c0_103 = arith.constant 0 : index
    %166 = vector.load %arg5[%c0_102, %c126, %c0_103] : memref<1x204x112xbf16, #tpu.memory_space<vmem>>, vector<1x14x112xbf16>
    %167 = vector.shape_cast %166 : vector<1x14x112xbf16> to vector<14x112xbf16>
    %168 = vector.shape_cast %165 : vector<14x112xbf16> to vector<1x14x112xbf16>
    tpu.vector_store %arg5[%c0_102, %c126, %c0_103], %168 {strides = array<i32>} : memref<1x204x112xbf16, #tpu.memory_space<vmem>>, vector<1x14x112xbf16>,
    %cst_104 = arith.constant dense<0.000000e+00> : vector<112xf32>
    %169 = vector.multi_reduction <add>, %164, %cst_104 [0] : vector<14x112xf32> to vector<112xf32>
    %170 = vector.shape_cast %169 : vector<112xf32> to vector<1x112xf32>
    %171 = arith.addf %159, %170 : vector<1x112xf32>
    %172 = arith.mulf %164, %164 : vector<14x112xf32>
    %cst_105 = arith.constant dense<0.000000e+00> : vector<112xf32>
    %173 = vector.multi_reduction <add>, %172, %cst_105 [0] : vector<14x112xf32> to vector<112xf32>
    %174 = vector.shape_cast %173 : vector<112xf32> to vector<1x112xf32>
    %175 = arith.addf %163, %174 : vector<1x112xf32>
    %c160 = arith.constant 160 : index
    %c0_106 = arith.constant 0 : index
    %176 = vector.load %arg7[%c160, %c0_106] : memref<224x112xf32, #tpu.memory_space<vmem>>, vector<14x112xf32>
    %177 = arith.truncf %176 : vector<14x112xf32> to vector<14x112xbf16>
    %c0_107 = arith.constant 0 : index
    %c140 = arith.constant 140 : index
    %c0_108 = arith.constant 0 : index
    %178 = vector.load %arg5[%c0_107, %c140, %c0_108] : memref<1x204x112xbf16, #tpu.memory_space<vmem>>, vector<1x14x112xbf16>
    %179 = vector.shape_cast %178 : vector<1x14x112xbf16> to vector<14x112xbf16>
    %180 = vector.shape_cast %177 : vector<14x112xbf16> to vector<1x14x112xbf16>
    tpu.vector_store %arg5[%c0_107, %c140, %c0_108], %180 {strides = array<i32>} : memref<1x204x112xbf16, #tpu.memory_space<vmem>>, vector<1x14x112xbf16>,
    %cst_109 = arith.constant dense<0.000000e+00> : vector<112xf32>
    %181 = vector.multi_reduction <add>, %176, %cst_109 [0] : vector<14x112xf32> to vector<112xf32>
    %182 = vector.shape_cast %181 : vector<112xf32> to vector<1x112xf32>
    %183 = arith.addf %171, %182 : vector<1x112xf32>
    %184 = arith.mulf %176, %176 : vector<14x112xf32>
    %cst_110 = arith.constant dense<0.000000e+00> : vector<112xf32>
    %185 = vector.multi_reduction <add>, %184, %cst_110 [0] : vector<14x112xf32> to vector<112xf32>
    %186 = vector.shape_cast %185 : vector<112xf32> to vector<1x112xf32>
    %187 = arith.addf %175, %186 : vector<1x112xf32>
    %c176 = arith.constant 176 : index
    %c0_111 = arith.constant 0 : index
    %188 = vector.load %arg7[%c176, %c0_111] : memref<224x112xf32, #tpu.memory_space<vmem>>, vector<14x112xf32>
    %189 = arith.truncf %188 : vector<14x112xf32> to vector<14x112xbf16>
    %c0_112 = arith.constant 0 : index
    %c154 = arith.constant 154 : index
    %c0_113 = arith.constant 0 : index
    %190 = vector.load %arg5[%c0_112, %c154, %c0_113] : memref<1x204x112xbf16, #tpu.memory_space<vmem>>, vector<1x14x112xbf16>
    %191 = vector.shape_cast %190 : vector<1x14x112xbf16> to vector<14x112xbf16>
    %192 = vector.shape_cast %189 : vector<14x112xbf16> to vector<1x14x112xbf16>
    tpu.vector_store %arg5[%c0_112, %c154, %c0_113], %192 {strides = array<i32>} : memref<1x204x112xbf16, #tpu.memory_space<vmem>>, vector<1x14x112xbf16>,
    %cst_114 = arith.constant dense<0.000000e+00> : vector<112xf32>
    %193 = vector.multi_reduction <add>, %188, %cst_114 [0] : vector<14x112xf32> to vector<112xf32>
    %194 = vector.shape_cast %193 : vector<112xf32> to vector<1x112xf32>
    %195 = arith.addf %183, %194 : vector<1x112xf32>
    %196 = arith.mulf %188, %188 : vector<14x112xf32>
    %cst_115 = arith.constant dense<0.000000e+00> : vector<112xf32>
    %197 = vector.multi_reduction <add>, %196, %cst_115 [0] : vector<14x112xf32> to vector<112xf32>
    %198 = vector.shape_cast %197 : vector<112xf32> to vector<1x112xf32>
    %199 = arith.addf %187, %198 : vector<1x112xf32>
    %c192 = arith.constant 192 : index
    %c0_116 = arith.constant 0 : index
    %200 = vector.load %arg7[%c192, %c0_116] : memref<224x112xf32, #tpu.memory_space<vmem>>, vector<14x112xf32>
    %201 = arith.truncf %200 : vector<14x112xf32> to vector<14x112xbf16>
    %c0_117 = arith.constant 0 : index
    %c168 = arith.constant 168 : index
    %c0_118 = arith.constant 0 : index
    %202 = vector.load %arg5[%c0_117, %c168, %c0_118] : memref<1x204x112xbf16, #tpu.memory_space<vmem>>, vector<1x14x112xbf16>
    %203 = vector.shape_cast %202 : vector<1x14x112xbf16> to vector<14x112xbf16>
    %204 = vector.shape_cast %201 : vector<14x112xbf16> to vector<1x14x112xbf16>
    tpu.vector_store %arg5[%c0_117, %c168, %c0_118], %204 {strides = array<i32>} : memref<1x204x112xbf16, #tpu.memory_space<vmem>>, vector<1x14x112xbf16>,
    %cst_119 = arith.constant dense<0.000000e+00> : vector<112xf32>
    %205 = vector.multi_reduction <add>, %200, %cst_119 [0] : vector<14x112xf32> to vector<112xf32>
    %206 = vector.shape_cast %205 : vector<112xf32> to vector<1x112xf32>
    %207 = arith.addf %195, %206 : vector<1x112xf32>
    %208 = arith.mulf %200, %200 : vector<14x112xf32>
    %cst_120 = arith.constant dense<0.000000e+00> : vector<112xf32>
    %209 = vector.multi_reduction <add>, %208, %cst_120 [0] : vector<14x112xf32> to vector<112xf32>
    %210 = vector.shape_cast %209 : vector<112xf32> to vector<1x112xf32>
    %211 = arith.addf %199, %210 : vector<1x112xf32>
    %c208 = arith.constant 208 : index
    %c0_121 = arith.constant 0 : index
    %212 = vector.load %arg7[%c208, %c0_121] : memref<224x112xf32, #tpu.memory_space<vmem>>, vector<14x112xf32>
    %213 = arith.truncf %212 : vector<14x112xf32> to vector<14x112xbf16>
    %c0_122 = arith.constant 0 : index
    %c182 = arith.constant 182 : index
    %c0_123 = arith.constant 0 : index
    %214 = vector.load %arg5[%c0_122, %c182, %c0_123] : memref<1x204x112xbf16, #tpu.memory_space<vmem>>, vector<1x14x112xbf16>
    %215 = vector.shape_cast %214 : vector<1x14x112xbf16> to vector<14x112xbf16>
    %216 = vector.shape_cast %213 : vector<14x112xbf16> to vector<1x14x112xbf16>
    tpu.vector_store %arg5[%c0_122, %c182, %c0_123], %216 {strides = array<i32>} : memref<1x204x112xbf16, #tpu.memory_space<vmem>>, vector<1x14x112xbf16>,
    %cst_124 = arith.constant dense<0.000000e+00> : vector<112xf32>
    %217 = vector.multi_reduction <add>, %212, %cst_124 [0] : vector<14x112xf32> to vector<112xf32>
    %218 = vector.shape_cast %217 : vector<112xf32> to vector<1x112xf32>
    %219 = arith.addf %207, %218 : vector<1x112xf32>
    %220 = arith.mulf %212, %212 : vector<14x112xf32>
    %cst_125 = arith.constant dense<0.000000e+00> : vector<112xf32>
    %221 = vector.multi_reduction <add>, %220, %cst_125 [0] : vector<14x112xf32> to vector<112xf32>
    %222 = vector.shape_cast %221 : vector<112xf32> to vector<1x112xf32>
    %223 = arith.addf %211, %222 : vector<1x112xf32>
    %cst_126 = arith.constant 0.000000e+00 : bf16
    %224 = vector.broadcast %cst_126 : bf16 to vector<8x112xbf16>
    %c0_127 = arith.constant 0 : index
    %c196 = arith.constant 196 : index
    %c0_128 = arith.constant 0 : index
    %225 = vector.load %arg5[%c0_127, %c196, %c0_128] : memref<1x204x112xbf16, #tpu.memory_space<vmem>>, vector<1x8x112xbf16>
    %226 = vector.shape_cast %225 : vector<1x8x112xbf16> to vector<8x112xbf16>
    %227 = vector.shape_cast %224 : vector<8x112xbf16> to vector<1x8x112xbf16>
    tpu.vector_store %arg5[%c0_127, %c196, %c0_128], %227 {strides = array<i32>} : memref<1x204x112xbf16, #tpu.memory_space<vmem>>, vector<1x8x112xbf16>,
    %c0_129 = arith.constant 0 : index
    %c0_130 = arith.constant 0 : index
    %c0_131 = arith.constant 0 : index
    %228 = vector.load %arg6[%c0_129, %c0_130, %c0_131] : memref<1x2x112xf32, #tpu.memory_space<vmem>>, vector<1x1x112xf32>
    %229 = vector.shape_cast %228 : vector<1x1x112xf32> to vector<1x112xf32>
    %230 = vector.shape_cast %219 : vector<1x112xf32> to vector<1x1x112xf32>
    tpu.vector_store %arg6[%c0_129, %c0_130, %c0_131], %230 {strides = array<i32>} : memref<1x2x112xf32, #tpu.memory_space<vmem>>, vector<1x1x112xf32>,
    %c0_132 = arith.constant 0 : index
    %c1_133 = arith.constant 1 : index
    %c0_134 = arith.constant 0 : index
    %231 = vector.load %arg6[%c0_132, %c1_133, %c0_134] : memref<1x2x112xf32, #tpu.memory_space<vmem>>, vector<1x1x112xf32>
    %232 = vector.shape_cast %231 : vector<1x1x112xf32> to vector<1x112xf32>
    %233 = vector.shape_cast %223 : vector<1x112xf32> to vector<1x1x112xf32>
    tpu.vector_store %arg6[%c0_132, %c1_133, %c0_134], %233 {strides = array<i32>} : memref<1x2x112xf32, #tpu.memory_space<vmem>>, vector<1x1x112xf32>,
    return
  }
  func.func @transform_0(%arg0: i32) -> (i32, i32, i32) {
    %c0_i32 = arith.constant 0 : i32
    %c0_i32_0 = arith.constant 0 : i32
    %c0_i32_1 = arith.constant 0 : i32
    return %arg0, %c0_i32, %c0_i32_0 : i32, i32, i32
  }
  func.func @transform_1(%arg0: i32) -> (i32, i32, i32) {
    %c0_i32 = arith.constant 0 : i32
    %c0_i32_0 = arith.constant 0 : i32
    %c0_i32_1 = arith.constant 0 : i32
    %c0_i32_2 = arith.constant 0 : i32
    return %c0_i32, %c0_i32_0, %c0_i32_1 : i32, i32, i32
  }
  func.func @transform_2(%arg0: i32) -> (i32, i32) {
    %c0_i32 = arith.constant 0 : i32
    %c0_i32_0 = arith.constant 0 : i32
    %c0_i32_1 = arith.constant 0 : i32
    return %c0_i32, %c0_i32_0 : i32, i32
  }
  func.func @transform_3(%arg0: i32) -> (i32, i32) {
    %c0_i32 = arith.constant 0 : i32
    %c0_i32_0 = arith.constant 0 : i32
    %c0_i32_1 = arith.constant 0 : i32
    return %c0_i32, %c0_i32_0 : i32, i32
  }
  func.func @transform_4(%arg0: i32) -> (i32, i32, i32) {
    %c0_i32 = arith.constant 0 : i32
    %c0_i32_0 = arith.constant 0 : i32
    %c0_i32_1 = arith.constant 0 : i32
    return %arg0, %c0_i32, %c0_i32_0 : i32, i32, i32
  }
  func.func @transform_5(%arg0: i32) -> (i32, i32, i32) {
    %c0_i32 = arith.constant 0 : i32
    %c0_i32_0 = arith.constant 0 : i32
    %c0_i32_1 = arith.constant 0 : i32
    return %arg0, %c0_i32, %c0_i32_0 : i32, i32, i32
  }
}

module attributes {stable_mosaic.version = 11 : i64} {
  func.func @_conv_stats_kernel(%arg0: i32, %arg1: memref<1x204x112xbf16, #tpu.memory_space<vmem>>, %arg2: memref<9x112x96xbf16, #tpu.memory_space<vmem>>, %arg3: memref<1x112xf32, #tpu.memory_space<vmem>>, %arg4: memref<1x112xf32, #tpu.memory_space<vmem>>, %arg5: memref<1x152x96xbf16, #tpu.memory_space<vmem>>, %arg6: memref<1x2x96xf32, #tpu.memory_space<vmem>>, %arg7: memref<168x96xf32, #tpu.memory_space<vmem>>, %arg8: memref<204x112xbf16, #tpu.memory_space<vmem>>) attributes {dimension_semantics = [#tpu.dimension_semantics<parallel>], iteration_bounds = array<i64: 2>, scalar_prefetch = 0 : i64, scratch_operands = 2 : i64, tpu.core_type = #tpu.core_type<tc>, window_params = [{transform_indices = @transform_0, window_bounds = array<i64: 1, 204, 112>}, {pipeline_mode = #tpu.pipeline_mode<synchronous>, transform_indices = @transform_1, window_bounds = array<i64: 9, 112, 96>}, {pipeline_mode = #tpu.pipeline_mode<synchronous>, transform_indices = @transform_2, window_bounds = array<i64: 1, 112>}, {pipeline_mode = #tpu.pipeline_mode<synchronous>, transform_indices = @transform_3, window_bounds = array<i64: 1, 112>}, {transform_indices = @transform_4, window_bounds = array<i64: 1, 152, 96>}, {transform_indices = @transform_5, window_bounds = array<i64: 1, 2, 96>}]} {
    %c0 = arith.constant 0 : index
    %c0_0 = arith.constant 0 : index
    %c0_1 = arith.constant 0 : index
    %0 = vector.load %arg1[%c0, %c0_0, %c0_1] : memref<1x204x112xbf16, #tpu.memory_space<vmem>>, vector<1x204x112xbf16>
    %1 = vector.shape_cast %0 : vector<1x204x112xbf16> to vector<204x112xbf16>
    %2 = arith.extf %1 : vector<204x112xbf16> to vector<204x112xf32>
    %c0_2 = arith.constant 0 : index
    %c0_3 = arith.constant 0 : index
    %3 = vector.load %arg3[%c0_2, %c0_3] : memref<1x112xf32, #tpu.memory_space<vmem>>, vector<1x112xf32>
    %4 = vector.broadcast %3 : vector<1x112xf32> to vector<204x112xf32>
    %5 = arith.mulf %2, %4 : vector<204x112xf32>
    %c0_4 = arith.constant 0 : index
    %c0_5 = arith.constant 0 : index
    %6 = vector.load %arg4[%c0_4, %c0_5] : memref<1x112xf32, #tpu.memory_space<vmem>>, vector<1x112xf32>
    %7 = vector.broadcast %6 : vector<1x112xf32> to vector<204x112xf32>
    %8 = arith.addf %5, %7 : vector<204x112xf32>
    %cst = arith.constant 0.000000e+00 : f32
    %9 = vector.broadcast %cst : f32 to vector<204x112xf32>
    %10 = arith.maximumf %8, %9 : vector<204x112xf32>
    %11 = arith.truncf %10 : vector<204x112xf32> to vector<204x112xbf16>
    %c0_6 = arith.constant 0 : index
    %c0_7 = arith.constant 0 : index
    %12 = vector.load %arg8[%c0_6, %c0_7] : memref<204x112xbf16, #tpu.memory_space<vmem>>, vector<204x112xbf16>
    tpu.vector_store %arg8[%c0_6, %c0_7], %11 {strides = array<i32>} : memref<204x112xbf16, #tpu.memory_space<vmem>>, vector<204x112xbf16>,
    %c0_8 = arith.constant 0 : index
    %c0_9 = arith.constant 0 : index
    %13 = vector.load %arg8[%c0_8, %c0_9] : memref<204x112xbf16, #tpu.memory_space<vmem>>, vector<168x112xbf16>
    %c0_10 = arith.constant 0 : index
    %c0_11 = arith.constant 0 : index
    %c0_12 = arith.constant 0 : index
    %14 = vector.load %arg2[%c0_10, %c0_11, %c0_12] : memref<9x112x96xbf16, #tpu.memory_space<vmem>>, vector<1x112x96xbf16>
    %15 = vector.shape_cast %14 : vector<1x112x96xbf16> to vector<112x96xbf16>
    %cst_13 = arith.constant dense<0.000000e+00> : vector<168x96xf32>
    %16 = tpu.matmul %13, %15, %cst_13 {dimension_numbers = #tpu.dot_dimension_numbers<[1], [0], [0], [1], [0, 0, 1, 1], [], []>} : vector<168x112xbf16>, vector<112x96xbf16>, vector<168x96xf32> -> vector<168x96xf32>
    %c1 = arith.constant 1 : index
    %c0_14 = arith.constant 0 : index
    %17 = vector.load %arg8[%c1, %c0_14] : memref<204x112xbf16, #tpu.memory_space<vmem>>, vector<168x112xbf16>
    %c1_15 = arith.constant 1 : index
    %c0_16 = arith.constant 0 : index
    %c0_17 = arith.constant 0 : index
    %18 = vector.load %arg2[%c1_15, %c0_16, %c0_17] : memref<9x112x96xbf16, #tpu.memory_space<vmem>>, vector<1x112x96xbf16>
    %19 = vector.shape_cast %18 : vector<1x112x96xbf16> to vector<112x96xbf16>
    %cst_18 = arith.constant dense<0.000000e+00> : vector<168x96xf32>
    %20 = tpu.matmul %17, %19, %cst_18 {dimension_numbers = #tpu.dot_dimension_numbers<[1], [0], [0], [1], [0, 0, 1, 1], [], []>} : vector<168x112xbf16>, vector<112x96xbf16>, vector<168x96xf32> -> vector<168x96xf32>
    %21 = arith.addf %16, %20 : vector<168x96xf32>
    %c2 = arith.constant 2 : index
    %c0_19 = arith.constant 0 : index
    %22 = vector.load %arg8[%c2, %c0_19] : memref<204x112xbf16, #tpu.memory_space<vmem>>, vector<168x112xbf16>
    %c2_20 = arith.constant 2 : index
    %c0_21 = arith.constant 0 : index
    %c0_22 = arith.constant 0 : index
    %23 = vector.load %arg2[%c2_20, %c0_21, %c0_22] : memref<9x112x96xbf16, #tpu.memory_space<vmem>>, vector<1x112x96xbf16>
    %24 = vector.shape_cast %23 : vector<1x112x96xbf16> to vector<112x96xbf16>
    %cst_23 = arith.constant dense<0.000000e+00> : vector<168x96xf32>
    %25 = tpu.matmul %22, %24, %cst_23 {dimension_numbers = #tpu.dot_dimension_numbers<[1], [0], [0], [1], [0, 0, 1, 1], [], []>} : vector<168x112xbf16>, vector<112x96xbf16>, vector<168x96xf32> -> vector<168x96xf32>
    %26 = arith.addf %21, %25 : vector<168x96xf32>
    %c14 = arith.constant 14 : index
    %c0_24 = arith.constant 0 : index
    %27 = vector.load %arg8[%c14, %c0_24] : memref<204x112xbf16, #tpu.memory_space<vmem>>, vector<168x112xbf16>
    %c3 = arith.constant 3 : index
    %c0_25 = arith.constant 0 : index
    %c0_26 = arith.constant 0 : index
    %28 = vector.load %arg2[%c3, %c0_25, %c0_26] : memref<9x112x96xbf16, #tpu.memory_space<vmem>>, vector<1x112x96xbf16>
    %29 = vector.shape_cast %28 : vector<1x112x96xbf16> to vector<112x96xbf16>
    %cst_27 = arith.constant dense<0.000000e+00> : vector<168x96xf32>
    %30 = tpu.matmul %27, %29, %cst_27 {dimension_numbers = #tpu.dot_dimension_numbers<[1], [0], [0], [1], [0, 0, 1, 1], [], []>} : vector<168x112xbf16>, vector<112x96xbf16>, vector<168x96xf32> -> vector<168x96xf32>
    %31 = arith.addf %26, %30 : vector<168x96xf32>
    %c15 = arith.constant 15 : index
    %c0_28 = arith.constant 0 : index
    %32 = vector.load %arg8[%c15, %c0_28] : memref<204x112xbf16, #tpu.memory_space<vmem>>, vector<168x112xbf16>
    %c4 = arith.constant 4 : index
    %c0_29 = arith.constant 0 : index
    %c0_30 = arith.constant 0 : index
    %33 = vector.load %arg2[%c4, %c0_29, %c0_30] : memref<9x112x96xbf16, #tpu.memory_space<vmem>>, vector<1x112x96xbf16>
    %34 = vector.shape_cast %33 : vector<1x112x96xbf16> to vector<112x96xbf16>
    %cst_31 = arith.constant dense<0.000000e+00> : vector<168x96xf32>
    %35 = tpu.matmul %32, %34, %cst_31 {dimension_numbers = #tpu.dot_dimension_numbers<[1], [0], [0], [1], [0, 0, 1, 1], [], []>} : vector<168x112xbf16>, vector<112x96xbf16>, vector<168x96xf32> -> vector<168x96xf32>
    %36 = arith.addf %31, %35 : vector<168x96xf32>
    %c16 = arith.constant 16 : index
    %c0_32 = arith.constant 0 : index
    %37 = vector.load %arg8[%c16, %c0_32] : memref<204x112xbf16, #tpu.memory_space<vmem>>, vector<168x112xbf16>
    %c5 = arith.constant 5 : index
    %c0_33 = arith.constant 0 : index
    %c0_34 = arith.constant 0 : index
    %38 = vector.load %arg2[%c5, %c0_33, %c0_34] : memref<9x112x96xbf16, #tpu.memory_space<vmem>>, vector<1x112x96xbf16>
    %39 = vector.shape_cast %38 : vector<1x112x96xbf16> to vector<112x96xbf16>
    %cst_35 = arith.constant dense<0.000000e+00> : vector<168x96xf32>
    %40 = tpu.matmul %37, %39, %cst_35 {dimension_numbers = #tpu.dot_dimension_numbers<[1], [0], [0], [1], [0, 0, 1, 1], [], []>} : vector<168x112xbf16>, vector<112x96xbf16>, vector<168x96xf32> -> vector<168x96xf32>
    %41 = arith.addf %36, %40 : vector<168x96xf32>
    %c28 = arith.constant 28 : index
    %c0_36 = arith.constant 0 : index
    %42 = vector.load %arg8[%c28, %c0_36] : memref<204x112xbf16, #tpu.memory_space<vmem>>, vector<168x112xbf16>
    %c6 = arith.constant 6 : index
    %c0_37 = arith.constant 0 : index
    %c0_38 = arith.constant 0 : index
    %43 = vector.load %arg2[%c6, %c0_37, %c0_38] : memref<9x112x96xbf16, #tpu.memory_space<vmem>>, vector<1x112x96xbf16>
    %44 = vector.shape_cast %43 : vector<1x112x96xbf16> to vector<112x96xbf16>
    %cst_39 = arith.constant dense<0.000000e+00> : vector<168x96xf32>
    %45 = tpu.matmul %42, %44, %cst_39 {dimension_numbers = #tpu.dot_dimension_numbers<[1], [0], [0], [1], [0, 0, 1, 1], [], []>} : vector<168x112xbf16>, vector<112x96xbf16>, vector<168x96xf32> -> vector<168x96xf32>
    %46 = arith.addf %41, %45 : vector<168x96xf32>
    %c29 = arith.constant 29 : index
    %c0_40 = arith.constant 0 : index
    %47 = vector.load %arg8[%c29, %c0_40] : memref<204x112xbf16, #tpu.memory_space<vmem>>, vector<168x112xbf16>
    %c7 = arith.constant 7 : index
    %c0_41 = arith.constant 0 : index
    %c0_42 = arith.constant 0 : index
    %48 = vector.load %arg2[%c7, %c0_41, %c0_42] : memref<9x112x96xbf16, #tpu.memory_space<vmem>>, vector<1x112x96xbf16>
    %49 = vector.shape_cast %48 : vector<1x112x96xbf16> to vector<112x96xbf16>
    %cst_43 = arith.constant dense<0.000000e+00> : vector<168x96xf32>
    %50 = tpu.matmul %47, %49, %cst_43 {dimension_numbers = #tpu.dot_dimension_numbers<[1], [0], [0], [1], [0, 0, 1, 1], [], []>} : vector<168x112xbf16>, vector<112x96xbf16>, vector<168x96xf32> -> vector<168x96xf32>
    %51 = arith.addf %46, %50 : vector<168x96xf32>
    %c30 = arith.constant 30 : index
    %c0_44 = arith.constant 0 : index
    %52 = vector.load %arg8[%c30, %c0_44] : memref<204x112xbf16, #tpu.memory_space<vmem>>, vector<168x112xbf16>
    %c8 = arith.constant 8 : index
    %c0_45 = arith.constant 0 : index
    %c0_46 = arith.constant 0 : index
    %53 = vector.load %arg2[%c8, %c0_45, %c0_46] : memref<9x112x96xbf16, #tpu.memory_space<vmem>>, vector<1x112x96xbf16>
    %54 = vector.shape_cast %53 : vector<1x112x96xbf16> to vector<112x96xbf16>
    %cst_47 = arith.constant dense<0.000000e+00> : vector<168x96xf32>
    %55 = tpu.matmul %52, %54, %cst_47 {dimension_numbers = #tpu.dot_dimension_numbers<[1], [0], [0], [1], [0, 0, 1, 1], [], []>} : vector<168x112xbf16>, vector<112x96xbf16>, vector<168x96xf32> -> vector<168x96xf32>
    %56 = arith.addf %51, %55 : vector<168x96xf32>
    %c0_48 = arith.constant 0 : index
    %c0_49 = arith.constant 0 : index
    %57 = vector.load %arg7[%c0_48, %c0_49] : memref<168x96xf32, #tpu.memory_space<vmem>>, vector<168x96xf32>
    tpu.vector_store %arg7[%c0_48, %c0_49], %56 {strides = array<i32>} : memref<168x96xf32, #tpu.memory_space<vmem>>, vector<168x96xf32>,
    %cst_50 = arith.constant 0.000000e+00 : f32
    %58 = vector.broadcast %cst_50 : f32 to vector<1x96xf32>
    %cst_51 = arith.constant 0.000000e+00 : f32
    %59 = vector.broadcast %cst_51 : f32 to vector<1x96xf32>
    %c0_52 = arith.constant 0 : index
    %c0_53 = arith.constant 0 : index
    %60 = vector.load %arg7[%c0_52, %c0_53] : memref<168x96xf32, #tpu.memory_space<vmem>>, vector<12x96xf32>
    %61 = arith.truncf %60 : vector<12x96xf32> to vector<12x96xbf16>
    %c0_54 = arith.constant 0 : index
    %c0_55 = arith.constant 0 : index
    %c0_56 = arith.constant 0 : index
    %62 = vector.load %arg5[%c0_54, %c0_55, %c0_56] : memref<1x152x96xbf16, #tpu.memory_space<vmem>>, vector<1x12x96xbf16>
    %63 = vector.shape_cast %62 : vector<1x12x96xbf16> to vector<12x96xbf16>
    %64 = vector.shape_cast %61 : vector<12x96xbf16> to vector<1x12x96xbf16>
    tpu.vector_store %arg5[%c0_54, %c0_55, %c0_56], %64 {strides = array<i32>} : memref<1x152x96xbf16, #tpu.memory_space<vmem>>, vector<1x12x96xbf16>,
    %cst_57 = arith.constant dense<0.000000e+00> : vector<96xf32>
    %65 = vector.multi_reduction <add>, %60, %cst_57 [0] : vector<12x96xf32> to vector<96xf32>
    %66 = vector.shape_cast %65 : vector<96xf32> to vector<1x96xf32>
    %67 = arith.addf %58, %66 : vector<1x96xf32>
    %68 = arith.mulf %60, %60 : vector<12x96xf32>
    %cst_58 = arith.constant dense<0.000000e+00> : vector<96xf32>
    %69 = vector.multi_reduction <add>, %68, %cst_58 [0] : vector<12x96xf32> to vector<96xf32>
    %70 = vector.shape_cast %69 : vector<96xf32> to vector<1x96xf32>
    %71 = arith.addf %59, %70 : vector<1x96xf32>
    %c14_59 = arith.constant 14 : index
    %c0_60 = arith.constant 0 : index
    %72 = vector.load %arg7[%c14_59, %c0_60] : memref<168x96xf32, #tpu.memory_space<vmem>>, vector<12x96xf32>
    %73 = arith.truncf %72 : vector<12x96xf32> to vector<12x96xbf16>
    %c0_61 = arith.constant 0 : index
    %c12 = arith.constant 12 : index
    %c0_62 = arith.constant 0 : index
    %74 = vector.load %arg5[%c0_61, %c12, %c0_62] : memref<1x152x96xbf16, #tpu.memory_space<vmem>>, vector<1x12x96xbf16>
    %75 = vector.shape_cast %74 : vector<1x12x96xbf16> to vector<12x96xbf16>
    %76 = vector.shape_cast %73 : vector<12x96xbf16> to vector<1x12x96xbf16>
    tpu.vector_store %arg5[%c0_61, %c12, %c0_62], %76 {strides = array<i32>} : memref<1x152x96xbf16, #tpu.memory_space<vmem>>, vector<1x12x96xbf16>,
    %cst_63 = arith.constant dense<0.000000e+00> : vector<96xf32>
    %77 = vector.multi_reduction <add>, %72, %cst_63 [0] : vector<12x96xf32> to vector<96xf32>
    %78 = vector.shape_cast %77 : vector<96xf32> to vector<1x96xf32>
    %79 = arith.addf %67, %78 : vector<1x96xf32>
    %80 = arith.mulf %72, %72 : vector<12x96xf32>
    %cst_64 = arith.constant dense<0.000000e+00> : vector<96xf32>
    %81 = vector.multi_reduction <add>, %80, %cst_64 [0] : vector<12x96xf32> to vector<96xf32>
    %82 = vector.shape_cast %81 : vector<96xf32> to vector<1x96xf32>
    %83 = arith.addf %71, %82 : vector<1x96xf32>
    %c28_65 = arith.constant 28 : index
    %c0_66 = arith.constant 0 : index
    %84 = vector.load %arg7[%c28_65, %c0_66] : memref<168x96xf32, #tpu.memory_space<vmem>>, vector<12x96xf32>
    %85 = arith.truncf %84 : vector<12x96xf32> to vector<12x96xbf16>
    %c0_67 = arith.constant 0 : index
    %c24 = arith.constant 24 : index
    %c0_68 = arith.constant 0 : index
    %86 = vector.load %arg5[%c0_67, %c24, %c0_68] : memref<1x152x96xbf16, #tpu.memory_space<vmem>>, vector<1x12x96xbf16>
    %87 = vector.shape_cast %86 : vector<1x12x96xbf16> to vector<12x96xbf16>
    %88 = vector.shape_cast %85 : vector<12x96xbf16> to vector<1x12x96xbf16>
    tpu.vector_store %arg5[%c0_67, %c24, %c0_68], %88 {strides = array<i32>} : memref<1x152x96xbf16, #tpu.memory_space<vmem>>, vector<1x12x96xbf16>,
    %cst_69 = arith.constant dense<0.000000e+00> : vector<96xf32>
    %89 = vector.multi_reduction <add>, %84, %cst_69 [0] : vector<12x96xf32> to vector<96xf32>
    %90 = vector.shape_cast %89 : vector<96xf32> to vector<1x96xf32>
    %91 = arith.addf %79, %90 : vector<1x96xf32>
    %92 = arith.mulf %84, %84 : vector<12x96xf32>
    %cst_70 = arith.constant dense<0.000000e+00> : vector<96xf32>
    %93 = vector.multi_reduction <add>, %92, %cst_70 [0] : vector<12x96xf32> to vector<96xf32>
    %94 = vector.shape_cast %93 : vector<96xf32> to vector<1x96xf32>
    %95 = arith.addf %83, %94 : vector<1x96xf32>
    %c42 = arith.constant 42 : index
    %c0_71 = arith.constant 0 : index
    %96 = vector.load %arg7[%c42, %c0_71] : memref<168x96xf32, #tpu.memory_space<vmem>>, vector<12x96xf32>
    %97 = arith.truncf %96 : vector<12x96xf32> to vector<12x96xbf16>
    %c0_72 = arith.constant 0 : index
    %c36 = arith.constant 36 : index
    %c0_73 = arith.constant 0 : index
    %98 = vector.load %arg5[%c0_72, %c36, %c0_73] : memref<1x152x96xbf16, #tpu.memory_space<vmem>>, vector<1x12x96xbf16>
    %99 = vector.shape_cast %98 : vector<1x12x96xbf16> to vector<12x96xbf16>
    %100 = vector.shape_cast %97 : vector<12x96xbf16> to vector<1x12x96xbf16>
    tpu.vector_store %arg5[%c0_72, %c36, %c0_73], %100 {strides = array<i32>} : memref<1x152x96xbf16, #tpu.memory_space<vmem>>, vector<1x12x96xbf16>,
    %cst_74 = arith.constant dense<0.000000e+00> : vector<96xf32>
    %101 = vector.multi_reduction <add>, %96, %cst_74 [0] : vector<12x96xf32> to vector<96xf32>
    %102 = vector.shape_cast %101 : vector<96xf32> to vector<1x96xf32>
    %103 = arith.addf %91, %102 : vector<1x96xf32>
    %104 = arith.mulf %96, %96 : vector<12x96xf32>
    %cst_75 = arith.constant dense<0.000000e+00> : vector<96xf32>
    %105 = vector.multi_reduction <add>, %104, %cst_75 [0] : vector<12x96xf32> to vector<96xf32>
    %106 = vector.shape_cast %105 : vector<96xf32> to vector<1x96xf32>
    %107 = arith.addf %95, %106 : vector<1x96xf32>
    %c56 = arith.constant 56 : index
    %c0_76 = arith.constant 0 : index
    %108 = vector.load %arg7[%c56, %c0_76] : memref<168x96xf32, #tpu.memory_space<vmem>>, vector<12x96xf32>
    %109 = arith.truncf %108 : vector<12x96xf32> to vector<12x96xbf16>
    %c0_77 = arith.constant 0 : index
    %c48 = arith.constant 48 : index
    %c0_78 = arith.constant 0 : index
    %110 = vector.load %arg5[%c0_77, %c48, %c0_78] : memref<1x152x96xbf16, #tpu.memory_space<vmem>>, vector<1x12x96xbf16>
    %111 = vector.shape_cast %110 : vector<1x12x96xbf16> to vector<12x96xbf16>
    %112 = vector.shape_cast %109 : vector<12x96xbf16> to vector<1x12x96xbf16>
    tpu.vector_store %arg5[%c0_77, %c48, %c0_78], %112 {strides = array<i32>} : memref<1x152x96xbf16, #tpu.memory_space<vmem>>, vector<1x12x96xbf16>,
    %cst_79 = arith.constant dense<0.000000e+00> : vector<96xf32>
    %113 = vector.multi_reduction <add>, %108, %cst_79 [0] : vector<12x96xf32> to vector<96xf32>
    %114 = vector.shape_cast %113 : vector<96xf32> to vector<1x96xf32>
    %115 = arith.addf %103, %114 : vector<1x96xf32>
    %116 = arith.mulf %108, %108 : vector<12x96xf32>
    %cst_80 = arith.constant dense<0.000000e+00> : vector<96xf32>
    %117 = vector.multi_reduction <add>, %116, %cst_80 [0] : vector<12x96xf32> to vector<96xf32>
    %118 = vector.shape_cast %117 : vector<96xf32> to vector<1x96xf32>
    %119 = arith.addf %107, %118 : vector<1x96xf32>
    %c70 = arith.constant 70 : index
    %c0_81 = arith.constant 0 : index
    %120 = vector.load %arg7[%c70, %c0_81] : memref<168x96xf32, #tpu.memory_space<vmem>>, vector<12x96xf32>
    %121 = arith.truncf %120 : vector<12x96xf32> to vector<12x96xbf16>
    %c0_82 = arith.constant 0 : index
    %c60 = arith.constant 60 : index
    %c0_83 = arith.constant 0 : index
    %122 = vector.load %arg5[%c0_82, %c60, %c0_83] : memref<1x152x96xbf16, #tpu.memory_space<vmem>>, vector<1x12x96xbf16>
    %123 = vector.shape_cast %122 : vector<1x12x96xbf16> to vector<12x96xbf16>
    %124 = vector.shape_cast %121 : vector<12x96xbf16> to vector<1x12x96xbf16>
    tpu.vector_store %arg5[%c0_82, %c60, %c0_83], %124 {strides = array<i32>} : memref<1x152x96xbf16, #tpu.memory_space<vmem>>, vector<1x12x96xbf16>,
    %cst_84 = arith.constant dense<0.000000e+00> : vector<96xf32>
    %125 = vector.multi_reduction <add>, %120, %cst_84 [0] : vector<12x96xf32> to vector<96xf32>
    %126 = vector.shape_cast %125 : vector<96xf32> to vector<1x96xf32>
    %127 = arith.addf %115, %126 : vector<1x96xf32>
    %128 = arith.mulf %120, %120 : vector<12x96xf32>
    %cst_85 = arith.constant dense<0.000000e+00> : vector<96xf32>
    %129 = vector.multi_reduction <add>, %128, %cst_85 [0] : vector<12x96xf32> to vector<96xf32>
    %130 = vector.shape_cast %129 : vector<96xf32> to vector<1x96xf32>
    %131 = arith.addf %119, %130 : vector<1x96xf32>
    %c84 = arith.constant 84 : index
    %c0_86 = arith.constant 0 : index
    %132 = vector.load %arg7[%c84, %c0_86] : memref<168x96xf32, #tpu.memory_space<vmem>>, vector<12x96xf32>
    %133 = arith.truncf %132 : vector<12x96xf32> to vector<12x96xbf16>
    %c0_87 = arith.constant 0 : index
    %c72 = arith.constant 72 : index
    %c0_88 = arith.constant 0 : index
    %134 = vector.load %arg5[%c0_87, %c72, %c0_88] : memref<1x152x96xbf16, #tpu.memory_space<vmem>>, vector<1x12x96xbf16>
    %135 = vector.shape_cast %134 : vector<1x12x96xbf16> to vector<12x96xbf16>
    %136 = vector.shape_cast %133 : vector<12x96xbf16> to vector<1x12x96xbf16>
    tpu.vector_store %arg5[%c0_87, %c72, %c0_88], %136 {strides = array<i32>} : memref<1x152x96xbf16, #tpu.memory_space<vmem>>, vector<1x12x96xbf16>,
    %cst_89 = arith.constant dense<0.000000e+00> : vector<96xf32>
    %137 = vector.multi_reduction <add>, %132, %cst_89 [0] : vector<12x96xf32> to vector<96xf32>
    %138 = vector.shape_cast %137 : vector<96xf32> to vector<1x96xf32>
    %139 = arith.addf %127, %138 : vector<1x96xf32>
    %140 = arith.mulf %132, %132 : vector<12x96xf32>
    %cst_90 = arith.constant dense<0.000000e+00> : vector<96xf32>
    %141 = vector.multi_reduction <add>, %140, %cst_90 [0] : vector<12x96xf32> to vector<96xf32>
    %142 = vector.shape_cast %141 : vector<96xf32> to vector<1x96xf32>
    %143 = arith.addf %131, %142 : vector<1x96xf32>
    %c98 = arith.constant 98 : index
    %c0_91 = arith.constant 0 : index
    %144 = vector.load %arg7[%c98, %c0_91] : memref<168x96xf32, #tpu.memory_space<vmem>>, vector<12x96xf32>
    %145 = arith.truncf %144 : vector<12x96xf32> to vector<12x96xbf16>
    %c0_92 = arith.constant 0 : index
    %c84_93 = arith.constant 84 : index
    %c0_94 = arith.constant 0 : index
    %146 = vector.load %arg5[%c0_92, %c84_93, %c0_94] : memref<1x152x96xbf16, #tpu.memory_space<vmem>>, vector<1x12x96xbf16>
    %147 = vector.shape_cast %146 : vector<1x12x96xbf16> to vector<12x96xbf16>
    %148 = vector.shape_cast %145 : vector<12x96xbf16> to vector<1x12x96xbf16>
    tpu.vector_store %arg5[%c0_92, %c84_93, %c0_94], %148 {strides = array<i32>} : memref<1x152x96xbf16, #tpu.memory_space<vmem>>, vector<1x12x96xbf16>,
    %cst_95 = arith.constant dense<0.000000e+00> : vector<96xf32>
    %149 = vector.multi_reduction <add>, %144, %cst_95 [0] : vector<12x96xf32> to vector<96xf32>
    %150 = vector.shape_cast %149 : vector<96xf32> to vector<1x96xf32>
    %151 = arith.addf %139, %150 : vector<1x96xf32>
    %152 = arith.mulf %144, %144 : vector<12x96xf32>
    %cst_96 = arith.constant dense<0.000000e+00> : vector<96xf32>
    %153 = vector.multi_reduction <add>, %152, %cst_96 [0] : vector<12x96xf32> to vector<96xf32>
    %154 = vector.shape_cast %153 : vector<96xf32> to vector<1x96xf32>
    %155 = arith.addf %143, %154 : vector<1x96xf32>
    %c112 = arith.constant 112 : index
    %c0_97 = arith.constant 0 : index
    %156 = vector.load %arg7[%c112, %c0_97] : memref<168x96xf32, #tpu.memory_space<vmem>>, vector<12x96xf32>
    %157 = arith.truncf %156 : vector<12x96xf32> to vector<12x96xbf16>
    %c0_98 = arith.constant 0 : index
    %c96 = arith.constant 96 : index
    %c0_99 = arith.constant 0 : index
    %158 = vector.load %arg5[%c0_98, %c96, %c0_99] : memref<1x152x96xbf16, #tpu.memory_space<vmem>>, vector<1x12x96xbf16>
    %159 = vector.shape_cast %158 : vector<1x12x96xbf16> to vector<12x96xbf16>
    %160 = vector.shape_cast %157 : vector<12x96xbf16> to vector<1x12x96xbf16>
    tpu.vector_store %arg5[%c0_98, %c96, %c0_99], %160 {strides = array<i32>} : memref<1x152x96xbf16, #tpu.memory_space<vmem>>, vector<1x12x96xbf16>,
    %cst_100 = arith.constant dense<0.000000e+00> : vector<96xf32>
    %161 = vector.multi_reduction <add>, %156, %cst_100 [0] : vector<12x96xf32> to vector<96xf32>
    %162 = vector.shape_cast %161 : vector<96xf32> to vector<1x96xf32>
    %163 = arith.addf %151, %162 : vector<1x96xf32>
    %164 = arith.mulf %156, %156 : vector<12x96xf32>
    %cst_101 = arith.constant dense<0.000000e+00> : vector<96xf32>
    %165 = vector.multi_reduction <add>, %164, %cst_101 [0] : vector<12x96xf32> to vector<96xf32>
    %166 = vector.shape_cast %165 : vector<96xf32> to vector<1x96xf32>
    %167 = arith.addf %155, %166 : vector<1x96xf32>
    %c126 = arith.constant 126 : index
    %c0_102 = arith.constant 0 : index
    %168 = vector.load %arg7[%c126, %c0_102] : memref<168x96xf32, #tpu.memory_space<vmem>>, vector<12x96xf32>
    %169 = arith.truncf %168 : vector<12x96xf32> to vector<12x96xbf16>
    %c0_103 = arith.constant 0 : index
    %c108 = arith.constant 108 : index
    %c0_104 = arith.constant 0 : index
    %170 = vector.load %arg5[%c0_103, %c108, %c0_104] : memref<1x152x96xbf16, #tpu.memory_space<vmem>>, vector<1x12x96xbf16>
    %171 = vector.shape_cast %170 : vector<1x12x96xbf16> to vector<12x96xbf16>
    %172 = vector.shape_cast %169 : vector<12x96xbf16> to vector<1x12x96xbf16>
    tpu.vector_store %arg5[%c0_103, %c108, %c0_104], %172 {strides = array<i32>} : memref<1x152x96xbf16, #tpu.memory_space<vmem>>, vector<1x12x96xbf16>,
    %cst_105 = arith.constant dense<0.000000e+00> : vector<96xf32>
    %173 = vector.multi_reduction <add>, %168, %cst_105 [0] : vector<12x96xf32> to vector<96xf32>
    %174 = vector.shape_cast %173 : vector<96xf32> to vector<1x96xf32>
    %175 = arith.addf %163, %174 : vector<1x96xf32>
    %176 = arith.mulf %168, %168 : vector<12x96xf32>
    %cst_106 = arith.constant dense<0.000000e+00> : vector<96xf32>
    %177 = vector.multi_reduction <add>, %176, %cst_106 [0] : vector<12x96xf32> to vector<96xf32>
    %178 = vector.shape_cast %177 : vector<96xf32> to vector<1x96xf32>
    %179 = arith.addf %167, %178 : vector<1x96xf32>
    %c140 = arith.constant 140 : index
    %c0_107 = arith.constant 0 : index
    %180 = vector.load %arg7[%c140, %c0_107] : memref<168x96xf32, #tpu.memory_space<vmem>>, vector<12x96xf32>
    %181 = arith.truncf %180 : vector<12x96xf32> to vector<12x96xbf16>
    %c0_108 = arith.constant 0 : index
    %c120 = arith.constant 120 : index
    %c0_109 = arith.constant 0 : index
    %182 = vector.load %arg5[%c0_108, %c120, %c0_109] : memref<1x152x96xbf16, #tpu.memory_space<vmem>>, vector<1x12x96xbf16>
    %183 = vector.shape_cast %182 : vector<1x12x96xbf16> to vector<12x96xbf16>
    %184 = vector.shape_cast %181 : vector<12x96xbf16> to vector<1x12x96xbf16>
    tpu.vector_store %arg5[%c0_108, %c120, %c0_109], %184 {strides = array<i32>} : memref<1x152x96xbf16, #tpu.memory_space<vmem>>, vector<1x12x96xbf16>,
    %cst_110 = arith.constant dense<0.000000e+00> : vector<96xf32>
    %185 = vector.multi_reduction <add>, %180, %cst_110 [0] : vector<12x96xf32> to vector<96xf32>
    %186 = vector.shape_cast %185 : vector<96xf32> to vector<1x96xf32>
    %187 = arith.addf %175, %186 : vector<1x96xf32>
    %188 = arith.mulf %180, %180 : vector<12x96xf32>
    %cst_111 = arith.constant dense<0.000000e+00> : vector<96xf32>
    %189 = vector.multi_reduction <add>, %188, %cst_111 [0] : vector<12x96xf32> to vector<96xf32>
    %190 = vector.shape_cast %189 : vector<96xf32> to vector<1x96xf32>
    %191 = arith.addf %179, %190 : vector<1x96xf32>
    %c154 = arith.constant 154 : index
    %c0_112 = arith.constant 0 : index
    %192 = vector.load %arg7[%c154, %c0_112] : memref<168x96xf32, #tpu.memory_space<vmem>>, vector<12x96xf32>
    %193 = arith.truncf %192 : vector<12x96xf32> to vector<12x96xbf16>
    %c0_113 = arith.constant 0 : index
    %c132 = arith.constant 132 : index
    %c0_114 = arith.constant 0 : index
    %194 = vector.load %arg5[%c0_113, %c132, %c0_114] : memref<1x152x96xbf16, #tpu.memory_space<vmem>>, vector<1x12x96xbf16>
    %195 = vector.shape_cast %194 : vector<1x12x96xbf16> to vector<12x96xbf16>
    %196 = vector.shape_cast %193 : vector<12x96xbf16> to vector<1x12x96xbf16>
    tpu.vector_store %arg5[%c0_113, %c132, %c0_114], %196 {strides = array<i32>} : memref<1x152x96xbf16, #tpu.memory_space<vmem>>, vector<1x12x96xbf16>,
    %cst_115 = arith.constant dense<0.000000e+00> : vector<96xf32>
    %197 = vector.multi_reduction <add>, %192, %cst_115 [0] : vector<12x96xf32> to vector<96xf32>
    %198 = vector.shape_cast %197 : vector<96xf32> to vector<1x96xf32>
    %199 = arith.addf %187, %198 : vector<1x96xf32>
    %200 = arith.mulf %192, %192 : vector<12x96xf32>
    %cst_116 = arith.constant dense<0.000000e+00> : vector<96xf32>
    %201 = vector.multi_reduction <add>, %200, %cst_116 [0] : vector<12x96xf32> to vector<96xf32>
    %202 = vector.shape_cast %201 : vector<96xf32> to vector<1x96xf32>
    %203 = arith.addf %191, %202 : vector<1x96xf32>
    %cst_117 = arith.constant 0.000000e+00 : bf16
    %204 = vector.broadcast %cst_117 : bf16 to vector<8x96xbf16>
    %c0_118 = arith.constant 0 : index
    %c144 = arith.constant 144 : index
    %c0_119 = arith.constant 0 : index
    %205 = vector.load %arg5[%c0_118, %c144, %c0_119] : memref<1x152x96xbf16, #tpu.memory_space<vmem>>, vector<1x8x96xbf16>
    %206 = vector.shape_cast %205 : vector<1x8x96xbf16> to vector<8x96xbf16>
    %207 = vector.shape_cast %204 : vector<8x96xbf16> to vector<1x8x96xbf16>
    tpu.vector_store %arg5[%c0_118, %c144, %c0_119], %207 {strides = array<i32>} : memref<1x152x96xbf16, #tpu.memory_space<vmem>>, vector<1x8x96xbf16>,
    %c0_120 = arith.constant 0 : index
    %c0_121 = arith.constant 0 : index
    %c0_122 = arith.constant 0 : index
    %208 = vector.load %arg6[%c0_120, %c0_121, %c0_122] : memref<1x2x96xf32, #tpu.memory_space<vmem>>, vector<1x1x96xf32>
    %209 = vector.shape_cast %208 : vector<1x1x96xf32> to vector<1x96xf32>
    %210 = vector.shape_cast %199 : vector<1x96xf32> to vector<1x1x96xf32>
    tpu.vector_store %arg6[%c0_120, %c0_121, %c0_122], %210 {strides = array<i32>} : memref<1x2x96xf32, #tpu.memory_space<vmem>>, vector<1x1x96xf32>,
    %c0_123 = arith.constant 0 : index
    %c1_124 = arith.constant 1 : index
    %c0_125 = arith.constant 0 : index
    %211 = vector.load %arg6[%c0_123, %c1_124, %c0_125] : memref<1x2x96xf32, #tpu.memory_space<vmem>>, vector<1x1x96xf32>
    %212 = vector.shape_cast %211 : vector<1x1x96xf32> to vector<1x96xf32>
    %213 = vector.shape_cast %203 : vector<1x96xf32> to vector<1x1x96xf32>
    tpu.vector_store %arg6[%c0_123, %c1_124, %c0_125], %213 {strides = array<i32>} : memref<1x2x96xf32, #tpu.memory_space<vmem>>, vector<1x1x96xf32>,
    return
  }
  func.func @transform_0(%arg0: i32) -> (i32, i32, i32) {
    %c0_i32 = arith.constant 0 : i32
    %c0_i32_0 = arith.constant 0 : i32
    %c0_i32_1 = arith.constant 0 : i32
    return %arg0, %c0_i32, %c0_i32_0 : i32, i32, i32
  }
  func.func @transform_1(%arg0: i32) -> (i32, i32, i32) {
    %c0_i32 = arith.constant 0 : i32
    %c0_i32_0 = arith.constant 0 : i32
    %c0_i32_1 = arith.constant 0 : i32
    %c0_i32_2 = arith.constant 0 : i32
    return %c0_i32, %c0_i32_0, %c0_i32_1 : i32, i32, i32
  }
  func.func @transform_2(%arg0: i32) -> (i32, i32) {
    %c0_i32 = arith.constant 0 : i32
    %c0_i32_0 = arith.constant 0 : i32
    %c0_i32_1 = arith.constant 0 : i32
    return %c0_i32, %c0_i32_0 : i32, i32
  }
  func.func @transform_3(%arg0: i32) -> (i32, i32) {
    %c0_i32 = arith.constant 0 : i32
    %c0_i32_0 = arith.constant 0 : i32
    %c0_i32_1 = arith.constant 0 : i32
    return %c0_i32, %c0_i32_0 : i32, i32
  }
  func.func @transform_4(%arg0: i32) -> (i32, i32, i32) {
    %c0_i32 = arith.constant 0 : i32
    %c0_i32_0 = arith.constant 0 : i32
    %c0_i32_1 = arith.constant 0 : i32
    return %arg0, %c0_i32, %c0_i32_0 : i32, i32, i32
  }
  func.func @transform_5(%arg0: i32) -> (i32, i32, i32) {
    %c0_i32 = arith.constant 0 : i32
    %c0_i32_0 = arith.constant 0 : i32
    %c0_i32_1 = arith.constant 0 : i32
    return %arg0, %c0_i32, %c0_i32_0 : i32, i32, i32
  }
}

module attributes {stable_mosaic.version = 11 : i64} {
  func.func @_stage_end_kernel(%arg0: i32, %arg1: memref<1x152x96xbf16, #tpu.memory_space<vmem>>, %arg2: memref<1x96xf32, #tpu.memory_space<vmem>>, %arg3: memref<1x96xf32, #tpu.memory_space<vmem>>, %arg4: memref<6x12xbf16, #tpu.memory_space<vmem>>, %arg5: memref<6x12xbf16, #tpu.memory_space<vmem>>, %arg6: memref<96x48xbf16, #tpu.memory_space<vmem>>, %arg7: memref<96x48xbf16, #tpu.memory_space<vmem>>, %arg8: memref<1x144x96xbf16, #tpu.memory_space<vmem>>, %arg9: memref<1x44x48xbf16, #tpu.memory_space<vmem>>, %arg10: memref<36x96xbf16, #tpu.memory_space<vmem>>) attributes {dimension_semantics = [#tpu.dimension_semantics<parallel>], iteration_bounds = array<i64: 2>, scalar_prefetch = 0 : i64, scratch_operands = 1 : i64, tpu.core_type = #tpu.core_type<tc>, window_params = [{transform_indices = @transform_0, window_bounds = array<i64: 1, 152, 96>}, {pipeline_mode = #tpu.pipeline_mode<synchronous>, transform_indices = @transform_1, window_bounds = array<i64: 1, 96>}, {pipeline_mode = #tpu.pipeline_mode<synchronous>, transform_indices = @transform_2, window_bounds = array<i64: 1, 96>}, {pipeline_mode = #tpu.pipeline_mode<synchronous>, transform_indices = @transform_3, window_bounds = array<i64: 6, 12>}, {pipeline_mode = #tpu.pipeline_mode<synchronous>, transform_indices = @transform_4, window_bounds = array<i64: 6, 12>}, {pipeline_mode = #tpu.pipeline_mode<synchronous>, transform_indices = @transform_5, window_bounds = array<i64: 96, 48>}, {pipeline_mode = #tpu.pipeline_mode<synchronous>, transform_indices = @transform_6, window_bounds = array<i64: 96, 48>}, {transform_indices = @transform_7, window_bounds = array<i64: 1, 144, 96>}, {transform_indices = @transform_8, window_bounds = array<i64: 1, 44, 48>}]} {
    %c0 = arith.constant 0 : index
    %c0_0 = arith.constant 0 : index
    %c0_1 = arith.constant 0 : index
    %0 = vector.load %arg1[%c0, %c0_0, %c0_1] : memref<1x152x96xbf16, #tpu.memory_space<vmem>>, vector<1x144x96xbf16>
    %1 = vector.shape_cast %0 : vector<1x144x96xbf16> to vector<144x96xbf16>
    %2 = arith.extf %1 : vector<144x96xbf16> to vector<144x96xf32>
    %c0_2 = arith.constant 0 : index
    %c0_3 = arith.constant 0 : index
    %3 = vector.load %arg2[%c0_2, %c0_3] : memref<1x96xf32, #tpu.memory_space<vmem>>, vector<1x96xf32>
    %4 = vector.broadcast %3 : vector<1x96xf32> to vector<144x96xf32>
    %5 = arith.mulf %2, %4 : vector<144x96xf32>
    %c0_4 = arith.constant 0 : index
    %c0_5 = arith.constant 0 : index
    %6 = vector.load %arg3[%c0_4, %c0_5] : memref<1x96xf32, #tpu.memory_space<vmem>>, vector<1x96xf32>
    %7 = vector.broadcast %6 : vector<1x96xf32> to vector<144x96xf32>
    %8 = arith.addf %5, %7 : vector<144x96xf32>
    %cst = arith.constant 0.000000e+00 : f32
    %9 = vector.broadcast %cst : f32 to vector<144x96xf32>
    %10 = arith.maximumf %8, %9 : vector<144x96xf32>
    %11 = arith.truncf %10 : vector<144x96xf32> to vector<144x96xbf16>
    %c0_6 = arith.constant 0 : index
    %c0_7 = arith.constant 0 : index
    %c0_8 = arith.constant 0 : index
    %12 = vector.load %arg8[%c0_6, %c0_7, %c0_8] : memref<1x144x96xbf16, #tpu.memory_space<vmem>>, vector<1x144x96xbf16>
    %13 = vector.shape_cast %12 : vector<1x144x96xbf16> to vector<144x96xbf16>
    %14 = vector.shape_cast %11 : vector<144x96xbf16> to vector<1x144x96xbf16>
    tpu.vector_store %arg8[%c0_6, %c0_7, %c0_8], %14 {strides = array<i32>} : memref<1x144x96xbf16, #tpu.memory_space<vmem>>, vector<1x144x96xbf16>,
    %c0_9 = arith.constant 0 : index
    %c0_10 = arith.constant 0 : index
    %c0_11 = arith.constant 0 : index
    %15 = vector.load %arg8[%c0_9, %c0_10, %c0_11] : memref<1x144x96xbf16, #tpu.memory_space<vmem>>, vector<1x12x96xbf16>
    %16 = vector.shape_cast %15 : vector<1x12x96xbf16> to vector<12x96xbf16>
    %c0_12 = arith.constant 0 : index
    %c12 = arith.constant 12 : index
    %c0_13 = arith.constant 0 : index
    %17 = vector.load %arg8[%c0_12, %c12, %c0_13] : memref<1x144x96xbf16, #tpu.memory_space<vmem>>, vector<1x12x96xbf16>
    %18 = vector.shape_cast %17 : vector<1x12x96xbf16> to vector<12x96xbf16>
    %19 = arith.maximumf %16, %18 : vector<12x96xbf16>
    %c0_14 = arith.constant 0 : index
    %c0_15 = arith.constant 0 : index
    %20 = vector.load %arg4[%c0_14, %c0_15] : memref<6x12xbf16, #tpu.memory_space<vmem>>, vector<6x12xbf16>
    %cst_16 = arith.constant dense<0.000000e+00> : vector<6x96xf32>
    %21 = tpu.matmul %20, %19, %cst_16 {dimension_numbers = #tpu.dot_dimension_numbers<[1], [0], [0], [1], [0, 0, 1, 1], [], []>} : vector<6x12xbf16>, vector<12x96xbf16>, vector<6x96xf32> -> vector<6x96xf32>
    %c0_17 = arith.constant 0 : index
    %c0_18 = arith.constant 0 : index
    %22 = vector.load %arg5[%c0_17, %c0_18] : memref<6x12xbf16, #tpu.memory_space<vmem>>, vector<6x12xbf16>
    %cst_19 = arith.constant dense<0.000000e+00> : vector<6x96xf32>
    %23 = tpu.matmul %22, %19, %cst_19 {dimension_numbers = #tpu.dot_dimension_numbers<[1], [0], [0], [1], [0, 0, 1, 1], [], []>} : vector<6x12xbf16>, vector<12x96xbf16>, vector<6x96xf32> -> vector<6x96xf32>
    %24 = arith.maximumf %21, %23 : vector<6x96xf32>
    %25 = arith.truncf %24 : vector<6x96xf32> to vector<6x96xbf16>
    %c0_20 = arith.constant 0 : index
    %c0_21 = arith.constant 0 : index
    %26 = vector.load %arg10[%c0_20, %c0_21] : memref<36x96xbf16, #tpu.memory_space<vmem>>, vector<6x96xbf16>
    tpu.vector_store %arg10[%c0_20, %c0_21], %25 {strides = array<i32>} : memref<36x96xbf16, #tpu.memory_space<vmem>>, vector<6x96xbf16>,
    %c0_22 = arith.constant 0 : index
    %c24 = arith.constant 24 : index
    %c0_23 = arith.constant 0 : index
    %27 = vector.load %arg8[%c0_22, %c24, %c0_23] : memref<1x144x96xbf16, #tpu.memory_space<vmem>>, vector<1x12x96xbf16>
    %28 = vector.shape_cast %27 : vector<1x12x96xbf16> to vector<12x96xbf16>
    %c0_24 = arith.constant 0 : index
    %c36 = arith.constant 36 : index
    %c0_25 = arith.constant 0 : index
    %29 = vector.load %arg8[%c0_24, %c36, %c0_25] : memref<1x144x96xbf16, #tpu.memory_space<vmem>>, vector<1x12x96xbf16>
    %30 = vector.shape_cast %29 : vector<1x12x96xbf16> to vector<12x96xbf16>
    %31 = arith.maximumf %28, %30 : vector<12x96xbf16>
    %c0_26 = arith.constant 0 : index
    %c0_27 = arith.constant 0 : index
    %32 = vector.load %arg4[%c0_26, %c0_27] : memref<6x12xbf16, #tpu.memory_space<vmem>>, vector<6x12xbf16>
    %cst_28 = arith.constant dense<0.000000e+00> : vector<6x96xf32>
    %33 = tpu.matmul %32, %31, %cst_28 {dimension_numbers = #tpu.dot_dimension_numbers<[1], [0], [0], [1], [0, 0, 1, 1], [], []>} : vector<6x12xbf16>, vector<12x96xbf16>, vector<6x96xf32> -> vector<6x96xf32>
    %c0_29 = arith.constant 0 : index
    %c0_30 = arith.constant 0 : index
    %34 = vector.load %arg5[%c0_29, %c0_30] : memref<6x12xbf16, #tpu.memory_space<vmem>>, vector<6x12xbf16>
    %cst_31 = arith.constant dense<0.000000e+00> : vector<6x96xf32>
    %35 = tpu.matmul %34, %31, %cst_31 {dimension_numbers = #tpu.dot_dimension_numbers<[1], [0], [0], [1], [0, 0, 1, 1], [], []>} : vector<6x12xbf16>, vector<12x96xbf16>, vector<6x96xf32> -> vector<6x96xf32>
    %36 = arith.maximumf %33, %35 : vector<6x96xf32>
    %37 = arith.truncf %36 : vector<6x96xf32> to vector<6x96xbf16>
    %c6 = arith.constant 6 : index
    %c0_32 = arith.constant 0 : index
    %38 = vector.load %arg10[%c6, %c0_32] : memref<36x96xbf16, #tpu.memory_space<vmem>>, vector<6x96xbf16>
    tpu.vector_store %arg10[%c6, %c0_32], %37 {strides = array<i32>} : memref<36x96xbf16, #tpu.memory_space<vmem>>, vector<6x96xbf16>,
    %c0_33 = arith.constant 0 : index
    %c48 = arith.constant 48 : index
    %c0_34 = arith.constant 0 : index
    %39 = vector.load %arg8[%c0_33, %c48, %c0_34] : memref<1x144x96xbf16, #tpu.memory_space<vmem>>, vector<1x12x96xbf16>
    %40 = vector.shape_cast %39 : vector<1x12x96xbf16> to vector<12x96xbf16>
    %c0_35 = arith.constant 0 : index
    %c60 = arith.constant 60 : index
    %c0_36 = arith.constant 0 : index
    %41 = vector.load %arg8[%c0_35, %c60, %c0_36] : memref<1x144x96xbf16, #tpu.memory_space<vmem>>, vector<1x12x96xbf16>
    %42 = vector.shape_cast %41 : vector<1x12x96xbf16> to vector<12x96xbf16>
    %43 = arith.maximumf %40, %42 : vector<12x96xbf16>
    %c0_37 = arith.constant 0 : index
    %c0_38 = arith.constant 0 : index
    %44 = vector.load %arg4[%c0_37, %c0_38] : memref<6x12xbf16, #tpu.memory_space<vmem>>, vector<6x12xbf16>
    %cst_39 = arith.constant dense<0.000000e+00> : vector<6x96xf32>
    %45 = tpu.matmul %44, %43, %cst_39 {dimension_numbers = #tpu.dot_dimension_numbers<[1], [0], [0], [1], [0, 0, 1, 1], [], []>} : vector<6x12xbf16>, vector<12x96xbf16>, vector<6x96xf32> -> vector<6x96xf32>
    %c0_40 = arith.constant 0 : index
    %c0_41 = arith.constant 0 : index
    %46 = vector.load %arg5[%c0_40, %c0_41] : memref<6x12xbf16, #tpu.memory_space<vmem>>, vector<6x12xbf16>
    %cst_42 = arith.constant dense<0.000000e+00> : vector<6x96xf32>
    %47 = tpu.matmul %46, %43, %cst_42 {dimension_numbers = #tpu.dot_dimension_numbers<[1], [0], [0], [1], [0, 0, 1, 1], [], []>} : vector<6x12xbf16>, vector<12x96xbf16>, vector<6x96xf32> -> vector<6x96xf32>
    %48 = arith.maximumf %45, %47 : vector<6x96xf32>
    %49 = arith.truncf %48 : vector<6x96xf32> to vector<6x96xbf16>
    %c12_43 = arith.constant 12 : index
    %c0_44 = arith.constant 0 : index
    %50 = vector.load %arg10[%c12_43, %c0_44] : memref<36x96xbf16, #tpu.memory_space<vmem>>, vector<6x96xbf16>
    tpu.vector_store %arg10[%c12_43, %c0_44], %49 {strides = array<i32>} : memref<36x96xbf16, #tpu.memory_space<vmem>>, vector<6x96xbf16>,
    %c0_45 = arith.constant 0 : index
    %c72 = arith.constant 72 : index
    %c0_46 = arith.constant 0 : index
    %51 = vector.load %arg8[%c0_45, %c72, %c0_46] : memref<1x144x96xbf16, #tpu.memory_space<vmem>>, vector<1x12x96xbf16>
    %52 = vector.shape_cast %51 : vector<1x12x96xbf16> to vector<12x96xbf16>
    %c0_47 = arith.constant 0 : index
    %c84 = arith.constant 84 : index
    %c0_48 = arith.constant 0 : index
    %53 = vector.load %arg8[%c0_47, %c84, %c0_48] : memref<1x144x96xbf16, #tpu.memory_space<vmem>>, vector<1x12x96xbf16>
    %54 = vector.shape_cast %53 : vector<1x12x96xbf16> to vector<12x96xbf16>
    %55 = arith.maximumf %52, %54 : vector<12x96xbf16>
    %c0_49 = arith.constant 0 : index
    %c0_50 = arith.constant 0 : index
    %56 = vector.load %arg4[%c0_49, %c0_50] : memref<6x12xbf16, #tpu.memory_space<vmem>>, vector<6x12xbf16>
    %cst_51 = arith.constant dense<0.000000e+00> : vector<6x96xf32>
    %57 = tpu.matmul %56, %55, %cst_51 {dimension_numbers = #tpu.dot_dimension_numbers<[1], [0], [0], [1], [0, 0, 1, 1], [], []>} : vector<6x12xbf16>, vector<12x96xbf16>, vector<6x96xf32> -> vector<6x96xf32>
    %c0_52 = arith.constant 0 : index
    %c0_53 = arith.constant 0 : index
    %58 = vector.load %arg5[%c0_52, %c0_53] : memref<6x12xbf16, #tpu.memory_space<vmem>>, vector<6x12xbf16>
    %cst_54 = arith.constant dense<0.000000e+00> : vector<6x96xf32>
    %59 = tpu.matmul %58, %55, %cst_54 {dimension_numbers = #tpu.dot_dimension_numbers<[1], [0], [0], [1], [0, 0, 1, 1], [], []>} : vector<6x12xbf16>, vector<12x96xbf16>, vector<6x96xf32> -> vector<6x96xf32>
    %60 = arith.maximumf %57, %59 : vector<6x96xf32>
    %61 = arith.truncf %60 : vector<6x96xf32> to vector<6x96xbf16>
    %c18 = arith.constant 18 : index
    %c0_55 = arith.constant 0 : index
    %62 = vector.load %arg10[%c18, %c0_55] : memref<36x96xbf16, #tpu.memory_space<vmem>>, vector<6x96xbf16>
    tpu.vector_store %arg10[%c18, %c0_55], %61 {strides = array<i32>} : memref<36x96xbf16, #tpu.memory_space<vmem>>, vector<6x96xbf16>,
    %c0_56 = arith.constant 0 : index
    %c96 = arith.constant 96 : index
    %c0_57 = arith.constant 0 : index
    %63 = vector.load %arg8[%c0_56, %c96, %c0_57] : memref<1x144x96xbf16, #tpu.memory_space<vmem>>, vector<1x12x96xbf16>
    %64 = vector.shape_cast %63 : vector<1x12x96xbf16> to vector<12x96xbf16>
    %c0_58 = arith.constant 0 : index
    %c108 = arith.constant 108 : index
    %c0_59 = arith.constant 0 : index
    %65 = vector.load %arg8[%c0_58, %c108, %c0_59] : memref<1x144x96xbf16, #tpu.memory_space<vmem>>, vector<1x12x96xbf16>
    %66 = vector.shape_cast %65 : vector<1x12x96xbf16> to vector<12x96xbf16>
    %67 = arith.maximumf %64, %66 : vector<12x96xbf16>
    %c0_60 = arith.constant 0 : index
    %c0_61 = arith.constant 0 : index
    %68 = vector.load %arg4[%c0_60, %c0_61] : memref<6x12xbf16, #tpu.memory_space<vmem>>, vector<6x12xbf16>
    %cst_62 = arith.constant dense<0.000000e+00> : vector<6x96xf32>
    %69 = tpu.matmul %68, %67, %cst_62 {dimension_numbers = #tpu.dot_dimension_numbers<[1], [0], [0], [1], [0, 0, 1, 1], [], []>} : vector<6x12xbf16>, vector<12x96xbf16>, vector<6x96xf32> -> vector<6x96xf32>
    %c0_63 = arith.constant 0 : index
    %c0_64 = arith.constant 0 : index
    %70 = vector.load %arg5[%c0_63, %c0_64] : memref<6x12xbf16, #tpu.memory_space<vmem>>, vector<6x12xbf16>
    %cst_65 = arith.constant dense<0.000000e+00> : vector<6x96xf32>
    %71 = tpu.matmul %70, %67, %cst_65 {dimension_numbers = #tpu.dot_dimension_numbers<[1], [0], [0], [1], [0, 0, 1, 1], [], []>} : vector<6x12xbf16>, vector<12x96xbf16>, vector<6x96xf32> -> vector<6x96xf32>
    %72 = arith.maximumf %69, %71 : vector<6x96xf32>
    %73 = arith.truncf %72 : vector<6x96xf32> to vector<6x96xbf16>
    %c24_66 = arith.constant 24 : index
    %c0_67 = arith.constant 0 : index
    %74 = vector.load %arg10[%c24_66, %c0_67] : memref<36x96xbf16, #tpu.memory_space<vmem>>, vector<6x96xbf16>
    tpu.vector_store %arg10[%c24_66, %c0_67], %73 {strides = array<i32>} : memref<36x96xbf16, #tpu.memory_space<vmem>>, vector<6x96xbf16>,
    %c0_68 = arith.constant 0 : index
    %c120 = arith.constant 120 : index
    %c0_69 = arith.constant 0 : index
    %75 = vector.load %arg8[%c0_68, %c120, %c0_69] : memref<1x144x96xbf16, #tpu.memory_space<vmem>>, vector<1x12x96xbf16>
    %76 = vector.shape_cast %75 : vector<1x12x96xbf16> to vector<12x96xbf16>
    %c0_70 = arith.constant 0 : index
    %c132 = arith.constant 132 : index
    %c0_71 = arith.constant 0 : index
    %77 = vector.load %arg8[%c0_70, %c132, %c0_71] : memref<1x144x96xbf16, #tpu.memory_space<vmem>>, vector<1x12x96xbf16>
    %78 = vector.shape_cast %77 : vector<1x12x96xbf16> to vector<12x96xbf16>
    %79 = arith.maximumf %76, %78 : vector<12x96xbf16>
    %c0_72 = arith.constant 0 : index
    %c0_73 = arith.constant 0 : index
    %80 = vector.load %arg4[%c0_72, %c0_73] : memref<6x12xbf16, #tpu.memory_space<vmem>>, vector<6x12xbf16>
    %cst_74 = arith.constant dense<0.000000e+00> : vector<6x96xf32>
    %81 = tpu.matmul %80, %79, %cst_74 {dimension_numbers = #tpu.dot_dimension_numbers<[1], [0], [0], [1], [0, 0, 1, 1], [], []>} : vector<6x12xbf16>, vector<12x96xbf16>, vector<6x96xf32> -> vector<6x96xf32>
    %c0_75 = arith.constant 0 : index
    %c0_76 = arith.constant 0 : index
    %82 = vector.load %arg5[%c0_75, %c0_76] : memref<6x12xbf16, #tpu.memory_space<vmem>>, vector<6x12xbf16>
    %cst_77 = arith.constant dense<0.000000e+00> : vector<6x96xf32>
    %83 = tpu.matmul %82, %79, %cst_77 {dimension_numbers = #tpu.dot_dimension_numbers<[1], [0], [0], [1], [0, 0, 1, 1], [], []>} : vector<6x12xbf16>, vector<12x96xbf16>, vector<6x96xf32> -> vector<6x96xf32>
    %84 = arith.maximumf %81, %83 : vector<6x96xf32>
    %85 = arith.truncf %84 : vector<6x96xf32> to vector<6x96xbf16>
    %c30 = arith.constant 30 : index
    %c0_78 = arith.constant 0 : index
    %86 = vector.load %arg10[%c30, %c0_78] : memref<36x96xbf16, #tpu.memory_space<vmem>>, vector<6x96xbf16>
    tpu.vector_store %arg10[%c30, %c0_78], %85 {strides = array<i32>} : memref<36x96xbf16, #tpu.memory_space<vmem>>, vector<6x96xbf16>,
    %c0_79 = arith.constant 0 : index
    %c0_80 = arith.constant 0 : index
    %87 = vector.load %arg10[%c0_79, %c0_80] : memref<36x96xbf16, #tpu.memory_space<vmem>>, vector<36x96xbf16>
    %c0_81 = arith.constant 0 : index
    %c0_82 = arith.constant 0 : index
    %88 = vector.load %arg6[%c0_81, %c0_82] : memref<96x48xbf16, #tpu.memory_space<vmem>>, vector<96x48xbf16>
    %cst_83 = arith.constant dense<0.000000e+00> : vector<36x48xf32>
    %89 = tpu.matmul %87, %88, %cst_83 {dimension_numbers = #tpu.dot_dimension_numbers<[1], [0], [0], [1], [0, 0, 1, 1], [], []>} : vector<36x96xbf16>, vector<96x48xbf16>, vector<36x48xf32> -> vector<36x48xf32>
    %c0_84 = arith.constant 0 : index
    %c0_85 = arith.constant 0 : index
    %90 = vector.load %arg7[%c0_84, %c0_85] : memref<96x48xbf16, #tpu.memory_space<vmem>>, vector<96x48xbf16>
    %cst_86 = arith.constant dense<0.000000e+00> : vector<36x48xf32>
    %91 = tpu.matmul %87, %90, %cst_86 {dimension_numbers = #tpu.dot_dimension_numbers<[1], [0], [0], [1], [0, 0, 1, 1], [], []>} : vector<36x96xbf16>, vector<96x48xbf16>, vector<36x48xf32> -> vector<36x48xf32>
    %92 = arith.maximumf %89, %91 : vector<36x48xf32>
    %93 = arith.truncf %92 : vector<36x48xf32> to vector<36x48xbf16>
    %c0_87 = arith.constant 0 : index
    %c0_88 = arith.constant 0 : index
    %c0_89 = arith.constant 0 : index
    %94 = vector.load %arg9[%c0_87, %c0_88, %c0_89] : memref<1x44x48xbf16, #tpu.memory_space<vmem>>, vector<1x36x48xbf16>
    %95 = vector.shape_cast %94 : vector<1x36x48xbf16> to vector<36x48xbf16>
    %96 = vector.shape_cast %93 : vector<36x48xbf16> to vector<1x36x48xbf16>
    tpu.vector_store %arg9[%c0_87, %c0_88, %c0_89], %96 {strides = array<i32>} : memref<1x44x48xbf16, #tpu.memory_space<vmem>>, vector<1x36x48xbf16>,
    %cst_90 = arith.constant 0.000000e+00 : bf16
    %97 = vector.broadcast %cst_90 : bf16 to vector<8x48xbf16>
    %c0_91 = arith.constant 0 : index
    %c36_92 = arith.constant 36 : index
    %c0_93 = arith.constant 0 : index
    %98 = vector.load %arg9[%c0_91, %c36_92, %c0_93] : memref<1x44x48xbf16, #tpu.memory_space<vmem>>, vector<1x8x48xbf16>
    %99 = vector.shape_cast %98 : vector<1x8x48xbf16> to vector<8x48xbf16>
    %100 = vector.shape_cast %97 : vector<8x48xbf16> to vector<1x8x48xbf16>
    tpu.vector_store %arg9[%c0_91, %c36_92, %c0_93], %100 {strides = array<i32>} : memref<1x44x48xbf16, #tpu.memory_space<vmem>>, vector<1x8x48xbf16>,
    return
  }
  func.func @transform_0(%arg0: i32) -> (i32, i32, i32) {
    %c0_i32 = arith.constant 0 : i32
    %c0_i32_0 = arith.constant 0 : i32
    %c0_i32_1 = arith.constant 0 : i32
    return %arg0, %c0_i32, %c0_i32_0 : i32, i32, i32
  }
  func.func @transform_1(%arg0: i32) -> (i32, i32) {
    %c0_i32 = arith.constant 0 : i32
    %c0_i32_0 = arith.constant 0 : i32
    %c0_i32_1 = arith.constant 0 : i32
    return %c0_i32, %c0_i32_0 : i32, i32
  }
  func.func @transform_2(%arg0: i32) -> (i32, i32) {
    %c0_i32 = arith.constant 0 : i32
    %c0_i32_0 = arith.constant 0 : i32
    %c0_i32_1 = arith.constant 0 : i32
    return %c0_i32, %c0_i32_0 : i32, i32
  }
  func.func @transform_3(%arg0: i32) -> (i32, i32) {
    %c0_i32 = arith.constant 0 : i32
    %c0_i32_0 = arith.constant 0 : i32
    %c0_i32_1 = arith.constant 0 : i32
    return %c0_i32, %c0_i32_0 : i32, i32
  }
  func.func @transform_4(%arg0: i32) -> (i32, i32) {
    %c0_i32 = arith.constant 0 : i32
    %c0_i32_0 = arith.constant 0 : i32
    %c0_i32_1 = arith.constant 0 : i32
    return %c0_i32, %c0_i32_0 : i32, i32
  }
  func.func @transform_5(%arg0: i32) -> (i32, i32) {
    %c0_i32 = arith.constant 0 : i32
    %c0_i32_0 = arith.constant 0 : i32
    %c0_i32_1 = arith.constant 0 : i32
    return %c0_i32, %c0_i32_0 : i32, i32
  }
  func.func @transform_6(%arg0: i32) -> (i32, i32) {
    %c0_i32 = arith.constant 0 : i32
    %c0_i32_0 = arith.constant 0 : i32
    %c0_i32_1 = arith.constant 0 : i32
    return %c0_i32, %c0_i32_0 : i32, i32
  }
  func.func @transform_7(%arg0: i32) -> (i32, i32, i32) {
    %c0_i32 = arith.constant 0 : i32
    %c0_i32_0 = arith.constant 0 : i32
    %c0_i32_1 = arith.constant 0 : i32
    return %arg0, %c0_i32, %c0_i32_0 : i32, i32, i32
  }
  func.func @transform_8(%arg0: i32) -> (i32, i32, i32) {
    %c0_i32 = arith.constant 0 : i32
    %c0_i32_0 = arith.constant 0 : i32
    %c0_i32_1 = arith.constant 0 : i32
    return %arg0, %c0_i32, %c0_i32_0 : i32, i32, i32
  }
}

module attributes {stable_mosaic.version = 11 : i64} {
  func.func @_conv_stats_kernel(%arg0: i32, %arg1: memref<1x44x48xbf16, #tpu.memory_space<vmem>>, %arg2: memref<9x48x64xbf16, #tpu.memory_space<vmem>>, %arg3: memref<1x48xf32, #tpu.memory_space<vmem>>, %arg4: memref<1x48xf32, #tpu.memory_space<vmem>>, %arg5: memref<1x24x64xbf16, #tpu.memory_space<vmem>>, %arg6: memref<1x2x64xf32, #tpu.memory_space<vmem>>, %arg7: memref<24x64xf32, #tpu.memory_space<vmem>>) attributes {dimension_semantics = [#tpu.dimension_semantics<parallel>], iteration_bounds = array<i64: 2>, scalar_prefetch = 0 : i64, scratch_operands = 1 : i64, tpu.core_type = #tpu.core_type<tc>, window_params = [{transform_indices = @transform_0, window_bounds = array<i64: 1, 44, 48>}, {pipeline_mode = #tpu.pipeline_mode<synchronous>, transform_indices = @transform_1, window_bounds = array<i64: 9, 48, 64>}, {pipeline_mode = #tpu.pipeline_mode<synchronous>, transform_indices = @transform_2, window_bounds = array<i64: 1, 48>}, {pipeline_mode = #tpu.pipeline_mode<synchronous>, transform_indices = @transform_3, window_bounds = array<i64: 1, 48>}, {transform_indices = @transform_4, window_bounds = array<i64: 1, 24, 64>}, {transform_indices = @transform_5, window_bounds = array<i64: 1, 2, 64>}]} {
    %c0 = arith.constant 0 : index
    %c0_0 = arith.constant 0 : index
    %c0_1 = arith.constant 0 : index
    %0 = vector.load %arg1[%c0, %c0_0, %c0_1] : memref<1x44x48xbf16, #tpu.memory_space<vmem>>, vector<1x24x48xbf16>
    %1 = vector.shape_cast %0 : vector<1x24x48xbf16> to vector<24x48xbf16>
    %c0_2 = arith.constant 0 : index
    %c0_3 = arith.constant 0 : index
    %c0_4 = arith.constant 0 : index
    %2 = vector.load %arg2[%c0_2, %c0_3, %c0_4] : memref<9x48x64xbf16, #tpu.memory_space<vmem>>, vector<1x48x64xbf16>
    %3 = vector.shape_cast %2 : vector<1x48x64xbf16> to vector<48x64xbf16>
    %cst = arith.constant dense<0.000000e+00> : vector<24x64xf32>
    %4 = tpu.matmul %1, %3, %cst {dimension_numbers = #tpu.dot_dimension_numbers<[1], [0], [0], [1], [0, 0, 1, 1], [], []>} : vector<24x48xbf16>, vector<48x64xbf16>, vector<24x64xf32> -> vector<24x64xf32>
    %c0_5 = arith.constant 0 : index
    %c1 = arith.constant 1 : index
    %c0_6 = arith.constant 0 : index
    %5 = vector.load %arg1[%c0_5, %c1, %c0_6] : memref<1x44x48xbf16, #tpu.memory_space<vmem>>, vector<1x24x48xbf16>
    %6 = vector.shape_cast %5 : vector<1x24x48xbf16> to vector<24x48xbf16>
    %c1_7 = arith.constant 1 : index
    %c0_8 = arith.constant 0 : index
    %c0_9 = arith.constant 0 : index
    %7 = vector.load %arg2[%c1_7, %c0_8, %c0_9] : memref<9x48x64xbf16, #tpu.memory_space<vmem>>, vector<1x48x64xbf16>
    %8 = vector.shape_cast %7 : vector<1x48x64xbf16> to vector<48x64xbf16>
    %cst_10 = arith.constant dense<0.000000e+00> : vector<24x64xf32>
    %9 = tpu.matmul %6, %8, %cst_10 {dimension_numbers = #tpu.dot_dimension_numbers<[1], [0], [0], [1], [0, 0, 1, 1], [], []>} : vector<24x48xbf16>, vector<48x64xbf16>, vector<24x64xf32> -> vector<24x64xf32>
    %10 = arith.addf %4, %9 : vector<24x64xf32>
    %c0_11 = arith.constant 0 : index
    %c2 = arith.constant 2 : index
    %c0_12 = arith.constant 0 : index
    %11 = vector.load %arg1[%c0_11, %c2, %c0_12] : memref<1x44x48xbf16, #tpu.memory_space<vmem>>, vector<1x24x48xbf16>
    %12 = vector.shape_cast %11 : vector<1x24x48xbf16> to vector<24x48xbf16>
    %c2_13 = arith.constant 2 : index
    %c0_14 = arith.constant 0 : index
    %c0_15 = arith.constant 0 : index
    %13 = vector.load %arg2[%c2_13, %c0_14, %c0_15] : memref<9x48x64xbf16, #tpu.memory_space<vmem>>, vector<1x48x64xbf16>
    %14 = vector.shape_cast %13 : vector<1x48x64xbf16> to vector<48x64xbf16>
    %cst_16 = arith.constant dense<0.000000e+00> : vector<24x64xf32>
    %15 = tpu.matmul %12, %14, %cst_16 {dimension_numbers = #tpu.dot_dimension_numbers<[1], [0], [0], [1], [0, 0, 1, 1], [], []>} : vector<24x48xbf16>, vector<48x64xbf16>, vector<24x64xf32> -> vector<24x64xf32>
    %16 = arith.addf %10, %15 : vector<24x64xf32>
    %c0_17 = arith.constant 0 : index
    %c6 = arith.constant 6 : index
    %c0_18 = arith.constant 0 : index
    %17 = vector.load %arg1[%c0_17, %c6, %c0_18] : memref<1x44x48xbf16, #tpu.memory_space<vmem>>, vector<1x24x48xbf16>
    %18 = vector.shape_cast %17 : vector<1x24x48xbf16> to vector<24x48xbf16>
    %c3 = arith.constant 3 : index
    %c0_19 = arith.constant 0 : index
    %c0_20 = arith.constant 0 : index
    %19 = vector.load %arg2[%c3, %c0_19, %c0_20] : memref<9x48x64xbf16, #tpu.memory_space<vmem>>, vector<1x48x64xbf16>
    %20 = vector.shape_cast %19 : vector<1x48x64xbf16> to vector<48x64xbf16>
    %cst_21 = arith.constant dense<0.000000e+00> : vector<24x64xf32>
    %21 = tpu.matmul %18, %20, %cst_21 {dimension_numbers = #tpu.dot_dimension_numbers<[1], [0], [0], [1], [0, 0, 1, 1], [], []>} : vector<24x48xbf16>, vector<48x64xbf16>, vector<24x64xf32> -> vector<24x64xf32>
    %22 = arith.addf %16, %21 : vector<24x64xf32>
    %c0_22 = arith.constant 0 : index
    %c7 = arith.constant 7 : index
    %c0_23 = arith.constant 0 : index
    %23 = vector.load %arg1[%c0_22, %c7, %c0_23] : memref<1x44x48xbf16, #tpu.memory_space<vmem>>, vector<1x24x48xbf16>
    %24 = vector.shape_cast %23 : vector<1x24x48xbf16> to vector<24x48xbf16>
    %c4 = arith.constant 4 : index
    %c0_24 = arith.constant 0 : index
    %c0_25 = arith.constant 0 : index
    %25 = vector.load %arg2[%c4, %c0_24, %c0_25] : memref<9x48x64xbf16, #tpu.memory_space<vmem>>, vector<1x48x64xbf16>
    %26 = vector.shape_cast %25 : vector<1x48x64xbf16> to vector<48x64xbf16>
    %cst_26 = arith.constant dense<0.000000e+00> : vector<24x64xf32>
    %27 = tpu.matmul %24, %26, %cst_26 {dimension_numbers = #tpu.dot_dimension_numbers<[1], [0], [0], [1], [0, 0, 1, 1], [], []>} : vector<24x48xbf16>, vector<48x64xbf16>, vector<24x64xf32> -> vector<24x64xf32>
    %28 = arith.addf %22, %27 : vector<24x64xf32>
    %c0_27 = arith.constant 0 : index
    %c8 = arith.constant 8 : index
    %c0_28 = arith.constant 0 : index
    %29 = vector.load %arg1[%c0_27, %c8, %c0_28] : memref<1x44x48xbf16, #tpu.memory_space<vmem>>, vector<1x24x48xbf16>
    %30 = vector.shape_cast %29 : vector<1x24x48xbf16> to vector<24x48xbf16>
    %c5 = arith.constant 5 : index
    %c0_29 = arith.constant 0 : index
    %c0_30 = arith.constant 0 : index
    %31 = vector.load %arg2[%c5, %c0_29, %c0_30] : memref<9x48x64xbf16, #tpu.memory_space<vmem>>, vector<1x48x64xbf16>
    %32 = vector.shape_cast %31 : vector<1x48x64xbf16> to vector<48x64xbf16>
    %cst_31 = arith.constant dense<0.000000e+00> : vector<24x64xf32>
    %33 = tpu.matmul %30, %32, %cst_31 {dimension_numbers = #tpu.dot_dimension_numbers<[1], [0], [0], [1], [0, 0, 1, 1], [], []>} : vector<24x48xbf16>, vector<48x64xbf16>, vector<24x64xf32> -> vector<24x64xf32>
    %34 = arith.addf %28, %33 : vector<24x64xf32>
    %c0_32 = arith.constant 0 : index
    %c12 = arith.constant 12 : index
    %c0_33 = arith.constant 0 : index
    %35 = vector.load %arg1[%c0_32, %c12, %c0_33] : memref<1x44x48xbf16, #tpu.memory_space<vmem>>, vector<1x24x48xbf16>
    %36 = vector.shape_cast %35 : vector<1x24x48xbf16> to vector<24x48xbf16>
    %c6_34 = arith.constant 6 : index
    %c0_35 = arith.constant 0 : index
    %c0_36 = arith.constant 0 : index
    %37 = vector.load %arg2[%c6_34, %c0_35, %c0_36] : memref<9x48x64xbf16, #tpu.memory_space<vmem>>, vector<1x48x64xbf16>
    %38 = vector.shape_cast %37 : vector<1x48x64xbf16> to vector<48x64xbf16>
    %cst_37 = arith.constant dense<0.000000e+00> : vector<24x64xf32>
    %39 = tpu.matmul %36, %38, %cst_37 {dimension_numbers = #tpu.dot_dimension_numbers<[1], [0], [0], [1], [0, 0, 1, 1], [], []>} : vector<24x48xbf16>, vector<48x64xbf16>, vector<24x64xf32> -> vector<24x64xf32>
    %40 = arith.addf %34, %39 : vector<24x64xf32>
    %c0_38 = arith.constant 0 : index
    %c13 = arith.constant 13 : index
    %c0_39 = arith.constant 0 : index
    %41 = vector.load %arg1[%c0_38, %c13, %c0_39] : memref<1x44x48xbf16, #tpu.memory_space<vmem>>, vector<1x24x48xbf16>
    %42 = vector.shape_cast %41 : vector<1x24x48xbf16> to vector<24x48xbf16>
    %c7_40 = arith.constant 7 : index
    %c0_41 = arith.constant 0 : index
    %c0_42 = arith.constant 0 : index
    %43 = vector.load %arg2[%c7_40, %c0_41, %c0_42] : memref<9x48x64xbf16, #tpu.memory_space<vmem>>, vector<1x48x64xbf16>
    %44 = vector.shape_cast %43 : vector<1x48x64xbf16> to vector<48x64xbf16>
    %cst_43 = arith.constant dense<0.000000e+00> : vector<24x64xf32>
    %45 = tpu.matmul %42, %44, %cst_43 {dimension_numbers = #tpu.dot_dimension_numbers<[1], [0], [0], [1], [0, 0, 1, 1], [], []>} : vector<24x48xbf16>, vector<48x64xbf16>, vector<24x64xf32> -> vector<24x64xf32>
    %46 = arith.addf %40, %45 : vector<24x64xf32>
    %c0_44 = arith.constant 0 : index
    %c14 = arith.constant 14 : index
    %c0_45 = arith.constant 0 : index
    %47 = vector.load %arg1[%c0_44, %c14, %c0_45] : memref<1x44x48xbf16, #tpu.memory_space<vmem>>, vector<1x24x48xbf16>
    %48 = vector.shape_cast %47 : vector<1x24x48xbf16> to vector<24x48xbf16>
    %c8_46 = arith.constant 8 : index
    %c0_47 = arith.constant 0 : index
    %c0_48 = arith.constant 0 : index
    %49 = vector.load %arg2[%c8_46, %c0_47, %c0_48] : memref<9x48x64xbf16, #tpu.memory_space<vmem>>, vector<1x48x64xbf16>
    %50 = vector.shape_cast %49 : vector<1x48x64xbf16> to vector<48x64xbf16>
    %cst_49 = arith.constant dense<0.000000e+00> : vector<24x64xf32>
    %51 = tpu.matmul %48, %50, %cst_49 {dimension_numbers = #tpu.dot_dimension_numbers<[1], [0], [0], [1], [0, 0, 1, 1], [], []>} : vector<24x48xbf16>, vector<48x64xbf16>, vector<24x64xf32> -> vector<24x64xf32>
    %52 = arith.addf %46, %51 : vector<24x64xf32>
    %c0_50 = arith.constant 0 : index
    %c0_51 = arith.constant 0 : index
    %53 = vector.load %arg7[%c0_50, %c0_51] : memref<24x64xf32, #tpu.memory_space<vmem>>, vector<24x64xf32>
    tpu.vector_store %arg7[%c0_50, %c0_51], %52 {strides = array<i32>} : memref<24x64xf32, #tpu.memory_space<vmem>>, vector<24x64xf32>,
    %cst_52 = arith.constant 0.000000e+00 : f32
    %54 = vector.broadcast %cst_52 : f32 to vector<1x64xf32>
    %cst_53 = arith.constant 0.000000e+00 : f32
    %55 = vector.broadcast %cst_53 : f32 to vector<1x64xf32>
    %c0_54 = arith.constant 0 : index
    %c0_55 = arith.constant 0 : index
    %56 = vector.load %arg7[%c0_54, %c0_55] : memref<24x64xf32, #tpu.memory_space<vmem>>, vector<4x64xf32>
    %57 = arith.truncf %56 : vector<4x64xf32> to vector<4x64xbf16>
    %c0_56 = arith.constant 0 : index
    %c0_57 = arith.constant 0 : index
    %c0_58 = arith.constant 0 : index
    %58 = vector.load %arg5[%c0_56, %c0_57, %c0_58] : memref<1x24x64xbf16, #tpu.memory_space<vmem>>, vector<1x4x64xbf16>
    %59 = vector.shape_cast %58 : vector<1x4x64xbf16> to vector<4x64xbf16>
    %60 = vector.shape_cast %57 : vector<4x64xbf16> to vector<1x4x64xbf16>
    tpu.vector_store %arg5[%c0_56, %c0_57, %c0_58], %60 {strides = array<i32>} : memref<1x24x64xbf16, #tpu.memory_space<vmem>>, vector<1x4x64xbf16>,
    %cst_59 = arith.constant dense<0.000000e+00> : vector<64xf32>
    %61 = vector.multi_reduction <add>, %56, %cst_59 [0] : vector<4x64xf32> to vector<64xf32>
    %62 = vector.shape_cast %61 : vector<64xf32> to vector<1x64xf32>
    %63 = arith.addf %54, %62 : vector<1x64xf32>
    %64 = arith.mulf %56, %56 : vector<4x64xf32>
    %cst_60 = arith.constant dense<0.000000e+00> : vector<64xf32>
    %65 = vector.multi_reduction <add>, %64, %cst_60 [0] : vector<4x64xf32> to vector<64xf32>
    %66 = vector.shape_cast %65 : vector<64xf32> to vector<1x64xf32>
    %67 = arith.addf %55, %66 : vector<1x64xf32>
    %c6_61 = arith.constant 6 : index
    %c0_62 = arith.constant 0 : index
    %68 = vector.load %arg7[%c6_61, %c0_62] : memref<24x64xf32, #tpu.memory_space<vmem>>, vector<4x64xf32>
    %69 = arith.truncf %68 : vector<4x64xf32> to vector<4x64xbf16>
    %c0_63 = arith.constant 0 : index
    %c4_64 = arith.constant 4 : index
    %c0_65 = arith.constant 0 : index
    %70 = vector.load %arg5[%c0_63, %c4_64, %c0_65] : memref<1x24x64xbf16, #tpu.memory_space<vmem>>, vector<1x4x64xbf16>
    %71 = vector.shape_cast %70 : vector<1x4x64xbf16> to vector<4x64xbf16>
    %72 = vector.shape_cast %69 : vector<4x64xbf16> to vector<1x4x64xbf16>
    tpu.vector_store %arg5[%c0_63, %c4_64, %c0_65], %72 {strides = array<i32>} : memref<1x24x64xbf16, #tpu.memory_space<vmem>>, vector<1x4x64xbf16>,
    %cst_66 = arith.constant dense<0.000000e+00> : vector<64xf32>
    %73 = vector.multi_reduction <add>, %68, %cst_66 [0] : vector<4x64xf32> to vector<64xf32>
    %74 = vector.shape_cast %73 : vector<64xf32> to vector<1x64xf32>
    %75 = arith.addf %63, %74 : vector<1x64xf32>
    %76 = arith.mulf %68, %68 : vector<4x64xf32>
    %cst_67 = arith.constant dense<0.000000e+00> : vector<64xf32>
    %77 = vector.multi_reduction <add>, %76, %cst_67 [0] : vector<4x64xf32> to vector<64xf32>
    %78 = vector.shape_cast %77 : vector<64xf32> to vector<1x64xf32>
    %79 = arith.addf %67, %78 : vector<1x64xf32>
    %c12_68 = arith.constant 12 : index
    %c0_69 = arith.constant 0 : index
    %80 = vector.load %arg7[%c12_68, %c0_69] : memref<24x64xf32, #tpu.memory_space<vmem>>, vector<4x64xf32>
    %81 = arith.truncf %80 : vector<4x64xf32> to vector<4x64xbf16>
    %c0_70 = arith.constant 0 : index
    %c8_71 = arith.constant 8 : index
    %c0_72 = arith.constant 0 : index
    %82 = vector.load %arg5[%c0_70, %c8_71, %c0_72] : memref<1x24x64xbf16, #tpu.memory_space<vmem>>, vector<1x4x64xbf16>
    %83 = vector.shape_cast %82 : vector<1x4x64xbf16> to vector<4x64xbf16>
    %84 = vector.shape_cast %81 : vector<4x64xbf16> to vector<1x4x64xbf16>
    tpu.vector_store %arg5[%c0_70, %c8_71, %c0_72], %84 {strides = array<i32>} : memref<1x24x64xbf16, #tpu.memory_space<vmem>>, vector<1x4x64xbf16>,
    %cst_73 = arith.constant dense<0.000000e+00> : vector<64xf32>
    %85 = vector.multi_reduction <add>, %80, %cst_73 [0] : vector<4x64xf32> to vector<64xf32>
    %86 = vector.shape_cast %85 : vector<64xf32> to vector<1x64xf32>
    %87 = arith.addf %75, %86 : vector<1x64xf32>
    %88 = arith.mulf %80, %80 : vector<4x64xf32>
    %cst_74 = arith.constant dense<0.000000e+00> : vector<64xf32>
    %89 = vector.multi_reduction <add>, %88, %cst_74 [0] : vector<4x64xf32> to vector<64xf32>
    %90 = vector.shape_cast %89 : vector<64xf32> to vector<1x64xf32>
    %91 = arith.addf %79, %90 : vector<1x64xf32>
    %c18 = arith.constant 18 : index
    %c0_75 = arith.constant 0 : index
    %92 = vector.load %arg7[%c18, %c0_75] : memref<24x64xf32, #tpu.memory_space<vmem>>, vector<4x64xf32>
    %93 = arith.truncf %92 : vector<4x64xf32> to vector<4x64xbf16>
    %c0_76 = arith.constant 0 : index
    %c12_77 = arith.constant 12 : index
    %c0_78 = arith.constant 0 : index
    %94 = vector.load %arg5[%c0_76, %c12_77, %c0_78] : memref<1x24x64xbf16, #tpu.memory_space<vmem>>, vector<1x4x64xbf16>
    %95 = vector.shape_cast %94 : vector<1x4x64xbf16> to vector<4x64xbf16>
    %96 = vector.shape_cast %93 : vector<4x64xbf16> to vector<1x4x64xbf16>
    tpu.vector_store %arg5[%c0_76, %c12_77, %c0_78], %96 {strides = array<i32>} : memref<1x24x64xbf16, #tpu.memory_space<vmem>>, vector<1x4x64xbf16>,
    %cst_79 = arith.constant dense<0.000000e+00> : vector<64xf32>
    %97 = vector.multi_reduction <add>, %92, %cst_79 [0] : vector<4x64xf32> to vector<64xf32>
    %98 = vector.shape_cast %97 : vector<64xf32> to vector<1x64xf32>
    %99 = arith.addf %87, %98 : vector<1x64xf32>
    %100 = arith.mulf %92, %92 : vector<4x64xf32>
    %cst_80 = arith.constant dense<0.000000e+00> : vector<64xf32>
    %101 = vector.multi_reduction <add>, %100, %cst_80 [0] : vector<4x64xf32> to vector<64xf32>
    %102 = vector.shape_cast %101 : vector<64xf32> to vector<1x64xf32>
    %103 = arith.addf %91, %102 : vector<1x64xf32>
    %cst_81 = arith.constant 0.000000e+00 : bf16
    %104 = vector.broadcast %cst_81 : bf16 to vector<8x64xbf16>
    %c0_82 = arith.constant 0 : index
    %c16 = arith.constant 16 : index
    %c0_83 = arith.constant 0 : index
    %105 = vector.load %arg5[%c0_82, %c16, %c0_83] : memref<1x24x64xbf16, #tpu.memory_space<vmem>>, vector<1x8x64xbf16>
    %106 = vector.shape_cast %105 : vector<1x8x64xbf16> to vector<8x64xbf16>
    %107 = vector.shape_cast %104 : vector<8x64xbf16> to vector<1x8x64xbf16>
    tpu.vector_store %arg5[%c0_82, %c16, %c0_83], %107 {strides = array<i32>} : memref<1x24x64xbf16, #tpu.memory_space<vmem>>, vector<1x8x64xbf16>,
    %c0_84 = arith.constant 0 : index
    %c0_85 = arith.constant 0 : index
    %c0_86 = arith.constant 0 : index
    %108 = vector.load %arg6[%c0_84, %c0_85, %c0_86] : memref<1x2x64xf32, #tpu.memory_space<vmem>>, vector<1x1x64xf32>
    %109 = vector.shape_cast %108 : vector<1x1x64xf32> to vector<1x64xf32>
    %110 = vector.shape_cast %99 : vector<1x64xf32> to vector<1x1x64xf32>
    tpu.vector_store %arg6[%c0_84, %c0_85, %c0_86], %110 {strides = array<i32>} : memref<1x2x64xf32, #tpu.memory_space<vmem>>, vector<1x1x64xf32>,
    %c0_87 = arith.constant 0 : index
    %c1_88 = arith.constant 1 : index
    %c0_89 = arith.constant 0 : index
    %111 = vector.load %arg6[%c0_87, %c1_88, %c0_89] : memref<1x2x64xf32, #tpu.memory_space<vmem>>, vector<1x1x64xf32>
    %112 = vector.shape_cast %111 : vector<1x1x64xf32> to vector<1x64xf32>
    %113 = vector.shape_cast %103 : vector<1x64xf32> to vector<1x1x64xf32>
    tpu.vector_store %arg6[%c0_87, %c1_88, %c0_89], %113 {strides = array<i32>} : memref<1x2x64xf32, #tpu.memory_space<vmem>>, vector<1x1x64xf32>,
    return
  }
  func.func @transform_0(%arg0: i32) -> (i32, i32, i32) {
    %c0_i32 = arith.constant 0 : i32
    %c0_i32_0 = arith.constant 0 : i32
    %c0_i32_1 = arith.constant 0 : i32
    return %arg0, %c0_i32, %c0_i32_0 : i32, i32, i32
  }
  func.func @transform_1(%arg0: i32) -> (i32, i32, i32) {
    %c0_i32 = arith.constant 0 : i32
    %c0_i32_0 = arith.constant 0 : i32
    %c0_i32_1 = arith.constant 0 : i32
    %c0_i32_2 = arith.constant 0 : i32
    return %c0_i32, %c0_i32_0, %c0_i32_1 : i32, i32, i32
  }
  func.func @transform_2(%arg0: i32) -> (i32, i32) {
    %c0_i32 = arith.constant 0 : i32
    %c0_i32_0 = arith.constant 0 : i32
    %c0_i32_1 = arith.constant 0 : i32
    return %c0_i32, %c0_i32_0 : i32, i32
  }
  func.func @transform_3(%arg0: i32) -> (i32, i32) {
    %c0_i32 = arith.constant 0 : i32
    %c0_i32_0 = arith.constant 0 : i32
    %c0_i32_1 = arith.constant 0 : i32
    return %c0_i32, %c0_i32_0 : i32, i32
  }
  func.func @transform_4(%arg0: i32) -> (i32, i32, i32) {
    %c0_i32 = arith.constant 0 : i32
    %c0_i32_0 = arith.constant 0 : i32
    %c0_i32_1 = arith.constant 0 : i32
    return %arg0, %c0_i32, %c0_i32_0 : i32, i32, i32
  }
  func.func @transform_5(%arg0: i32) -> (i32, i32, i32) {
    %c0_i32 = arith.constant 0 : i32
    %c0_i32_0 = arith.constant 0 : i32
    %c0_i32_1 = arith.constant 0 : i32
    return %arg0, %c0_i32, %c0_i32_0 : i32, i32, i32
  }
}

module attributes {stable_mosaic.version = 11 : i64} {
  func.func @_stage_end_kernel(%arg0: i32, %arg1: memref<1x24x64xbf16, #tpu.memory_space<vmem>>, %arg2: memref<1x64xf32, #tpu.memory_space<vmem>>, %arg3: memref<1x64xf32, #tpu.memory_space<vmem>>, %arg4: memref<2x4xbf16, #tpu.memory_space<vmem>>, %arg5: memref<2x4xbf16, #tpu.memory_space<vmem>>, %arg6: memref<64x32xbf16, #tpu.memory_space<vmem>>, %arg7: memref<64x32xbf16, #tpu.memory_space<vmem>>, %arg8: memref<1x16x64xbf16, #tpu.memory_space<vmem>>, %arg9: memref<1x12x32xbf16, #tpu.memory_space<vmem>>, %arg10: memref<4x64xbf16, #tpu.memory_space<vmem>>) attributes {dimension_semantics = [#tpu.dimension_semantics<parallel>], iteration_bounds = array<i64: 2>, scalar_prefetch = 0 : i64, scratch_operands = 1 : i64, tpu.core_type = #tpu.core_type<tc>, window_params = [{transform_indices = @transform_0, window_bounds = array<i64: 1, 24, 64>}, {pipeline_mode = #tpu.pipeline_mode<synchronous>, transform_indices = @transform_1, window_bounds = array<i64: 1, 64>}, {pipeline_mode = #tpu.pipeline_mode<synchronous>, transform_indices = @transform_2, window_bounds = array<i64: 1, 64>}, {pipeline_mode = #tpu.pipeline_mode<synchronous>, transform_indices = @transform_3, window_bounds = array<i64: 2, 4>}, {pipeline_mode = #tpu.pipeline_mode<synchronous>, transform_indices = @transform_4, window_bounds = array<i64: 2, 4>}, {pipeline_mode = #tpu.pipeline_mode<synchronous>, transform_indices = @transform_5, window_bounds = array<i64: 64, 32>}, {pipeline_mode = #tpu.pipeline_mode<synchronous>, transform_indices = @transform_6, window_bounds = array<i64: 64, 32>}, {transform_indices = @transform_7, window_bounds = array<i64: 1, 16, 64>}, {transform_indices = @transform_8, window_bounds = array<i64: 1, 12, 32>}]} {
    %c0 = arith.constant 0 : index
    %c0_0 = arith.constant 0 : index
    %c0_1 = arith.constant 0 : index
    %0 = vector.load %arg1[%c0, %c0_0, %c0_1] : memref<1x24x64xbf16, #tpu.memory_space<vmem>>, vector<1x16x64xbf16>
    %1 = vector.shape_cast %0 : vector<1x16x64xbf16> to vector<16x64xbf16>
    %2 = arith.extf %1 : vector<16x64xbf16> to vector<16x64xf32>
    %c0_2 = arith.constant 0 : index
    %c0_3 = arith.constant 0 : index
    %3 = vector.load %arg2[%c0_2, %c0_3] : memref<1x64xf32, #tpu.memory_space<vmem>>, vector<1x64xf32>
    %4 = vector.broadcast %3 : vector<1x64xf32> to vector<16x64xf32>
    %5 = arith.mulf %2, %4 : vector<16x64xf32>
    %c0_4 = arith.constant 0 : index
    %c0_5 = arith.constant 0 : index
    %6 = vector.load %arg3[%c0_4, %c0_5] : memref<1x64xf32, #tpu.memory_space<vmem>>, vector<1x64xf32>
    %7 = vector.broadcast %6 : vector<1x64xf32> to vector<16x64xf32>
    %8 = arith.addf %5, %7 : vector<16x64xf32>
    %cst = arith.constant 0.000000e+00 : f32
    %9 = vector.broadcast %cst : f32 to vector<16x64xf32>
    %10 = arith.maximumf %8, %9 : vector<16x64xf32>
    %11 = arith.truncf %10 : vector<16x64xf32> to vector<16x64xbf16>
    %c0_6 = arith.constant 0 : index
    %c0_7 = arith.constant 0 : index
    %c0_8 = arith.constant 0 : index
    %12 = vector.load %arg8[%c0_6, %c0_7, %c0_8] : memref<1x16x64xbf16, #tpu.memory_space<vmem>>, vector<1x16x64xbf16>
    %13 = vector.shape_cast %12 : vector<1x16x64xbf16> to vector<16x64xbf16>
    %14 = vector.shape_cast %11 : vector<16x64xbf16> to vector<1x16x64xbf16>
    tpu.vector_store %arg8[%c0_6, %c0_7, %c0_8], %14 {strides = array<i32>} : memref<1x16x64xbf16, #tpu.memory_space<vmem>>, vector<1x16x64xbf16>,
    %c0_9 = arith.constant 0 : index
    %c0_10 = arith.constant 0 : index
    %c0_11 = arith.constant 0 : index
    %15 = vector.load %arg8[%c0_9, %c0_10, %c0_11] : memref<1x16x64xbf16, #tpu.memory_space<vmem>>, vector<1x4x64xbf16>
    %16 = vector.shape_cast %15 : vector<1x4x64xbf16> to vector<4x64xbf16>
    %c0_12 = arith.constant 0 : index
    %c4 = arith.constant 4 : index
    %c0_13 = arith.constant 0 : index
    %17 = vector.load %arg8[%c0_12, %c4, %c0_13] : memref<1x16x64xbf16, #tpu.memory_space<vmem>>, vector<1x4x64xbf16>
    %18 = vector.shape_cast %17 : vector<1x4x64xbf16> to vector<4x64xbf16>
    %19 = arith.maximumf %16, %18 : vector<4x64xbf16>
    %c0_14 = arith.constant 0 : index
    %c0_15 = arith.constant 0 : index
    %20 = vector.load %arg4[%c0_14, %c0_15] : memref<2x4xbf16, #tpu.memory_space<vmem>>, vector<2x4xbf16>
    %cst_16 = arith.constant dense<0.000000e+00> : vector<2x64xf32>
    %21 = tpu.matmul %20, %19, %cst_16 {dimension_numbers = #tpu.dot_dimension_numbers<[1], [0], [0], [1], [0, 0, 1, 1], [], []>} : vector<2x4xbf16>, vector<4x64xbf16>, vector<2x64xf32> -> vector<2x64xf32>
    %c0_17 = arith.constant 0 : index
    %c0_18 = arith.constant 0 : index
    %22 = vector.load %arg5[%c0_17, %c0_18] : memref<2x4xbf16, #tpu.memory_space<vmem>>, vector<2x4xbf16>
    %cst_19 = arith.constant dense<0.000000e+00> : vector<2x64xf32>
    %23 = tpu.matmul %22, %19, %cst_19 {dimension_numbers = #tpu.dot_dimension_numbers<[1], [0], [0], [1], [0, 0, 1, 1], [], []>} : vector<2x4xbf16>, vector<4x64xbf16>, vector<2x64xf32> -> vector<2x64xf32>
    %24 = arith.maximumf %21, %23 : vector<2x64xf32>
    %25 = arith.truncf %24 : vector<2x64xf32> to vector<2x64xbf16>
    %c0_20 = arith.constant 0 : index
    %c0_21 = arith.constant 0 : index
    %26 = vector.load %arg10[%c0_20, %c0_21] : memref<4x64xbf16, #tpu.memory_space<vmem>>, vector<2x64xbf16>
    tpu.vector_store %arg10[%c0_20, %c0_21], %25 {strides = array<i32>} : memref<4x64xbf16, #tpu.memory_space<vmem>>, vector<2x64xbf16>,
    %c0_22 = arith.constant 0 : index
    %c8 = arith.constant 8 : index
    %c0_23 = arith.constant 0 : index
    %27 = vector.load %arg8[%c0_22, %c8, %c0_23] : memref<1x16x64xbf16, #tpu.memory_space<vmem>>, vector<1x4x64xbf16>
    %28 = vector.shape_cast %27 : vector<1x4x64xbf16> to vector<4x64xbf16>
    %c0_24 = arith.constant 0 : index
    %c12 = arith.constant 12 : index
    %c0_25 = arith.constant 0 : index
    %29 = vector.load %arg8[%c0_24, %c12, %c0_25] : memref<1x16x64xbf16, #tpu.memory_space<vmem>>, vector<1x4x64xbf16>
    %30 = vector.shape_cast %29 : vector<1x4x64xbf16> to vector<4x64xbf16>
    %31 = arith.maximumf %28, %30 : vector<4x64xbf16>
    %c0_26 = arith.constant 0 : index
    %c0_27 = arith.constant 0 : index
    %32 = vector.load %arg4[%c0_26, %c0_27] : memref<2x4xbf16, #tpu.memory_space<vmem>>, vector<2x4xbf16>
    %cst_28 = arith.constant dense<0.000000e+00> : vector<2x64xf32>
    %33 = tpu.matmul %32, %31, %cst_28 {dimension_numbers = #tpu.dot_dimension_numbers<[1], [0], [0], [1], [0, 0, 1, 1], [], []>} : vector<2x4xbf16>, vector<4x64xbf16>, vector<2x64xf32> -> vector<2x64xf32>
    %c0_29 = arith.constant 0 : index
    %c0_30 = arith.constant 0 : index
    %34 = vector.load %arg5[%c0_29, %c0_30] : memref<2x4xbf16, #tpu.memory_space<vmem>>, vector<2x4xbf16>
    %cst_31 = arith.constant dense<0.000000e+00> : vector<2x64xf32>
    %35 = tpu.matmul %34, %31, %cst_31 {dimension_numbers = #tpu.dot_dimension_numbers<[1], [0], [0], [1], [0, 0, 1, 1], [], []>} : vector<2x4xbf16>, vector<4x64xbf16>, vector<2x64xf32> -> vector<2x64xf32>
    %36 = arith.maximumf %33, %35 : vector<2x64xf32>
    %37 = arith.truncf %36 : vector<2x64xf32> to vector<2x64xbf16>
    %c2 = arith.constant 2 : index
    %c0_32 = arith.constant 0 : index
    %38 = vector.load %arg10[%c2, %c0_32] : memref<4x64xbf16, #tpu.memory_space<vmem>>, vector<2x64xbf16>
    tpu.vector_store %arg10[%c2, %c0_32], %37 {strides = array<i32>} : memref<4x64xbf16, #tpu.memory_space<vmem>>, vector<2x64xbf16>,
    %c0_33 = arith.constant 0 : index
    %c0_34 = arith.constant 0 : index
    %39 = vector.load %arg10[%c0_33, %c0_34] : memref<4x64xbf16, #tpu.memory_space<vmem>>, vector<4x64xbf16>
    %c0_35 = arith.constant 0 : index
    %c0_36 = arith.constant 0 : index
    %40 = vector.load %arg6[%c0_35, %c0_36] : memref<64x32xbf16, #tpu.memory_space<vmem>>, vector<64x32xbf16>
    %cst_37 = arith.constant dense<0.000000e+00> : vector<4x32xf32>
    %41 = tpu.matmul %39, %40, %cst_37 {dimension_numbers = #tpu.dot_dimension_numbers<[1], [0], [0], [1], [0, 0, 1, 1], [], []>} : vector<4x64xbf16>, vector<64x32xbf16>, vector<4x32xf32> -> vector<4x32xf32>
    %c0_38 = arith.constant 0 : index
    %c0_39 = arith.constant 0 : index
    %42 = vector.load %arg7[%c0_38, %c0_39] : memref<64x32xbf16, #tpu.memory_space<vmem>>, vector<64x32xbf16>
    %cst_40 = arith.constant dense<0.000000e+00> : vector<4x32xf32>
    %43 = tpu.matmul %39, %42, %cst_40 {dimension_numbers = #tpu.dot_dimension_numbers<[1], [0], [0], [1], [0, 0, 1, 1], [], []>} : vector<4x64xbf16>, vector<64x32xbf16>, vector<4x32xf32> -> vector<4x32xf32>
    %44 = arith.maximumf %41, %43 : vector<4x32xf32>
    %45 = arith.truncf %44 : vector<4x32xf32> to vector<4x32xbf16>
    %c0_41 = arith.constant 0 : index
    %c0_42 = arith.constant 0 : index
    %c0_43 = arith.constant 0 : index
    %46 = vector.load %arg9[%c0_41, %c0_42, %c0_43] : memref<1x12x32xbf16, #tpu.memory_space<vmem>>, vector<1x4x32xbf16>
    %47 = vector.shape_cast %46 : vector<1x4x32xbf16> to vector<4x32xbf16>
    %48 = vector.shape_cast %45 : vector<4x32xbf16> to vector<1x4x32xbf16>
    tpu.vector_store %arg9[%c0_41, %c0_42, %c0_43], %48 {strides = array<i32>} : memref<1x12x32xbf16, #tpu.memory_space<vmem>>, vector<1x4x32xbf16>,
    %cst_44 = arith.constant 0.000000e+00 : bf16
    %49 = vector.broadcast %cst_44 : bf16 to vector<8x32xbf16>
    %c0_45 = arith.constant 0 : index
    %c4_46 = arith.constant 4 : index
    %c0_47 = arith.constant 0 : index
    %50 = vector.load %arg9[%c0_45, %c4_46, %c0_47] : memref<1x12x32xbf16, #tpu.memory_space<vmem>>, vector<1x8x32xbf16>
    %51 = vector.shape_cast %50 : vector<1x8x32xbf16> to vector<8x32xbf16>
    %52 = vector.shape_cast %49 : vector<8x32xbf16> to vector<1x8x32xbf16>
    tpu.vector_store %arg9[%c0_45, %c4_46, %c0_47], %52 {strides = array<i32>} : memref<1x12x32xbf16, #tpu.memory_space<vmem>>, vector<1x8x32xbf16>,
    return
  }
  func.func @transform_0(%arg0: i32) -> (i32, i32, i32) {
    %c0_i32 = arith.constant 0 : i32
    %c0_i32_0 = arith.constant 0 : i32
    %c0_i32_1 = arith.constant 0 : i32
    return %arg0, %c0_i32, %c0_i32_0 : i32, i32, i32
  }
  func.func @transform_1(%arg0: i32) -> (i32, i32) {
    %c0_i32 = arith.constant 0 : i32
    %c0_i32_0 = arith.constant 0 : i32
    %c0_i32_1 = arith.constant 0 : i32
    return %c0_i32, %c0_i32_0 : i32, i32
  }
  func.func @transform_2(%arg0: i32) -> (i32, i32) {
    %c0_i32 = arith.constant 0 : i32
    %c0_i32_0 = arith.constant 0 : i32
    %c0_i32_1 = arith.constant 0 : i32
    return %c0_i32, %c0_i32_0 : i32, i32
  }
  func.func @transform_3(%arg0: i32) -> (i32, i32) {
    %c0_i32 = arith.constant 0 : i32
    %c0_i32_0 = arith.constant 0 : i32
    %c0_i32_1 = arith.constant 0 : i32
    return %c0_i32, %c0_i32_0 : i32, i32
  }
  func.func @transform_4(%arg0: i32) -> (i32, i32) {
    %c0_i32 = arith.constant 0 : i32
    %c0_i32_0 = arith.constant 0 : i32
    %c0_i32_1 = arith.constant 0 : i32
    return %c0_i32, %c0_i32_0 : i32, i32
  }
  func.func @transform_5(%arg0: i32) -> (i32, i32) {
    %c0_i32 = arith.constant 0 : i32
    %c0_i32_0 = arith.constant 0 : i32
    %c0_i32_1 = arith.constant 0 : i32
    return %c0_i32, %c0_i32_0 : i32, i32
  }
  func.func @transform_6(%arg0: i32) -> (i32, i32) {
    %c0_i32 = arith.constant 0 : i32
    %c0_i32_0 = arith.constant 0 : i32
    %c0_i32_1 = arith.constant 0 : i32
    return %c0_i32, %c0_i32_0 : i32, i32
  }
  func.func @transform_7(%arg0: i32) -> (i32, i32, i32) {
    %c0_i32 = arith.constant 0 : i32
    %c0_i32_0 = arith.constant 0 : i32
    %c0_i32_1 = arith.constant 0 : i32
    return %arg0, %c0_i32, %c0_i32_0 : i32, i32, i32
  }
  func.func @transform_8(%arg0: i32) -> (i32, i32, i32) {
    %c0_i32 = arith.constant 0 : i32
    %c0_i32_0 = arith.constant 0 : i32
    %c0_i32_1 = arith.constant 0 : i32
    return %arg0, %c0_i32, %c0_i32_0 : i32, i32, i32
  }
}

</mosaic_0001>

<bundles_post_ra>
// kernel: tile.33
= control target key start
LH: loop header
LB: loop body
LE: loop exit
PB: predicated region body
PF: predicated region fallthrough
CT: control target
= control target key end

     0   :  { %s28_s0 = inlined_call_operand.vmem [shape: f32[8], index: 0, kind: input, shape index: {}]   ;;  %s29_s1 = inlined_call_operand.vmem [shape: f32[14,8], index: 1, kind: output, shape index: {}]  }
   0x1   :  { %v4_v0 = vld [vmem:[%s28_s0] ss:$0 sm:$0xff] }
   0x2   :  { %5 = vst [vmem:[%s29_s1] sm:$0xff] %v4_v0  ;;  %8 = vst [vmem:[%s29_s1 + $0x8] sm:$0xff] %v4_v0 }

// kernel: tile.34
= control target key start
LH: loop header
LB: loop body
LE: loop exit
PB: predicated region body
PF: predicated region fallthrough
CT: control target
= control target key end

     0   :  { %s115_s10 = smov 104   ;;  %s116_s11 = smov 88   ;;  %vm3_vm0 = vcmask 64512   ;;  %vm9_vm1 = vcmask 917312   ;;  %vm15_vm2 = vcmask 851712   ;;  %vm21_vm3 = vcmask 786112   ;;  %s183_s0 = inlined_call_operand.vmem [shape: f32[14,8], index: 0, kind: input, shape index: {}]   ;;  %s184_s1 = inlined_call_operand.vmem [shape: f32[1,112], index: 1, kind: output, shape index: {}]  }
   0x1   :  { %v89_v0 = vld [vmem:[%s183_s0 + $0xd] sm:$0x1]   ;;  %v91_v1 = vld [vmem:[%s183_s0 + $0xb] sm:$0x1]   ;;  %v90_v2 = vld [vmem:[%s183_s0 + $0xc] sm:$0x1]  }
   0x2   :  { %7 = vrot.lane.b32.xlu0 %v89_v0, %s115_s10  ;;  %19 = vrot.lane.b32.xlu1 %v91_v1, %s116_s11  ;;  %v92_v3 = vld [vmem:[%s183_s0 + $0xa] sm:$0x1]   ;;  %s117_s16 = smov 96   ;;  %s118_s17 = smov 80   ;;  %v93_v4 = vld [vmem:[%s183_s0 + $0x9] sm:$0x1]  }
   0x3   :  { %v94_v5 = vld [vmem:[%s183_s0 + $0x8] sm:$0x1]   ;;  %v2_v6 = vld [vmem:[%s183_s0] sm:$0x1]   ;;  %s119_s24 = smov 72   ;;  %s120_s25 = smov 64  }
   0x4   :  { %4 = vst.msk [vmem:[#allocation0] sm:$0x1] %vm3_vm0, %v2_v6   ;;  %v95_v7 = vld [vmem:[%s183_s0 + $0x7] sm:$0x1]   ;;  %v96_v8 = vld [vmem:[%s183_s0 + $0x6] sm:$0x1]  }
   0x5   :  { %s121_s30 = smov 56   ;;  %s122_s2 = smov 48   ;;  %v97_v9 = vld [vmem:[%s183_s0 + $0x5] sm:$0x1]   ;;  %v98_v10 = vld [vmem:[%s183_s0 + $0x4] sm:$0x1]  }
   0x6   :  { %13 = vrot.lane.b32.xlu0 %v90_v2, %s117_s16  ;;  %25 = vrot.lane.b32.xlu1 %v92_v3, %s118_s17  ;;  %s123_s7 = smov 40   ;;  %s124_s8 = smov 32   ;;  %v99_v11 = vld [vmem:[%s183_s0 + $0x3] sm:$0x1]   ;;  %v100_v12 = vld [vmem:[%s183_s0 + $0x2] sm:$0x1]  }
   0x7   :  { %s125_s13 = smov 24   ;;  %s126_s14 = smov 16   ;;  %v101_v13 = vld [vmem:[%s183_s0 + $0x1] sm:$0x1]   ;;  %vm27_vm4 = vcmask 720512   ;;  %vm33_vm5 = vcmask 654912  }
   0x8   :  { %s127_s0 = smov 8   ;;  %vm39_vm6 = vcmask 589312   ;;  %vm45_vm7 = vcmask 523712   ;;  %vm51_vm8 = vcmask 458112   ;;  %vm57_vm9 = vcmask 392512  }
   0x9   :  { %vm63_vm10 = vcmask 326912   ;;  %vm69_vm11 = vcmask 261312   ;;  %vm75_vm12 = vcmask 195712   ;;  %vm81_vm13 = vcmask 130112  }
   0xa   :  { %31 = vrot.lane.b32.xlu0 %v93_v4, %s119_s24  ;;  %37 = vrot.lane.b32.xlu1 %v94_v5, %s120_s25 }
   0xe   :  { %43 = vrot.lane.b32.xlu0 %v95_v7, %s121_s30  ;;  %49 = vrot.lane.b32.xlu1 %v96_v8, %s122_s2 }
  0x12   :  { %55 = vrot.lane.b32.xlu0 %v97_v9, %s123_s7  ;;  %61 = vrot.lane.b32.xlu1 %v98_v10, %s124_s8 }
  0x16   :  { %67 = vrot.lane.b32.xlu0 %v99_v11, %s125_s13  ;;  %73 = vrot.lane.b32.xlu1 %v100_v12, %s126_s14 }
  0x1a   :  { %79 = vrot.lane.b32.xlu0 %v101_v13, %s127_s0 }
  0x74   :  { %v8_v14 = vpop.permute.xlu0 %7   ;;  %v20_v15 = vpop.permute.xlu1 %19  }
  0x75   :  { %10 = vst.msk [vmem:[#allocation0] sm:$0x1] %vm9_vm1, %v8_v14  }
  0x78   :  { %v14_v16 = vpop.permute.xlu0 %13   ;;  %v26_v17 = vpop.permute.xlu1 %25  }
  0x79   :  { %16 = vst.msk [vmem:[#allocation0] sm:$0x1] %vm15_vm2, %v14_v16  }
  0x7a   :  { %22 = vst.msk [vmem:[#allocation0] sm:$0x1] %vm21_vm3, %v20_v15  }
  0x7b   :  { %28 = vst.msk [vmem:[#allocation0] sm:$0x1] %vm27_vm4, %v26_v17  }
  0x7c   :  { %v32_v18 = vpop.permute.xlu0 %31   ;;  %v38_v19 = vpop.permute.xlu1 %37  }
  0x7d   :  { %34 = vst.msk [vmem:[#allocation0] sm:$0x1] %vm33_vm5, %v32_v18  }
  0x7e   :  { %40 = vst.msk [vmem:[#allocation0] sm:$0x1] %vm39_vm6, %v38_v19  }
  0x80   :  { %v44_v20 = vpop.permute.xlu0 %43   ;;  %v50_v21 = vpop.permute.xlu1 %49  }
  0x81   :  { %46 = vst.msk [vmem:[#allocation0] sm:$0x1] %vm45_vm7, %v44_v20  }
  0x82   :  { %52 = vst.msk [vmem:[#allocation0] sm:$0x1] %vm51_vm8, %v50_v21  }
  0x84   :  { %v56_v22 = vpop.permute.xlu0 %55   ;;  %v62_v23 = vpop.permute.xlu1 %61  }
  0x85   :  { %58 = vst.msk [vmem:[#allocation0] sm:$0x1] %vm57_vm9, %v56_v22  }
  0x86   :  { %64 = vst.msk [vmem:[#allocation0] sm:$0x1] %vm63_vm10, %v62_v23  }
  0x88   :  { %v68_v24 = vpop.permute.xlu0 %67   ;;  %v74_v25 = vpop.permute.xlu1 %73  }
  0x89   :  { %70 = vst.msk [vmem:[#allocation0] sm:$0x1] %vm69_vm11, %v68_v24  }
  0x8a   :  { %76 = vst.msk [vmem:[#allocation0] sm:$0x1] %vm75_vm12, %v74_v25  }
  0x8c   :  { %v80_v26 = vpop.permute.xlu0 %79  }
  0x8d   :  { %82 = vst.msk [vmem:[#allocation0] sm:$0x1] %vm81_vm13, %v80_v26  }
  0x94   :  { %v86_v27 = vld [vmem:[#allocation0] sm:$0x1] }
  0x95   :  { %88 = vst [vmem:[%s184_s1] sm:$0x1] %v86_v27 }

// kernel: ucontracting_forward.5
= control target key start
LH: loop header
LB: loop body
LE: loop exit
PB: predicated region body
PF: predicated region fallthrough
CT: control target
= control target key end

     0   :  { %s5276_s18 = smov 0   ;;  %s6299_s0 = inlined_call_operand.vmem [shape: bf16[2,264,64], index: 0, kind: input, shape index: {}]   ;;  %s6300_s1 = inlined_call_operand.vmem [shape: bf16[9,64,112], index: 1, kind: input, shape index: {}]   ;;  %s6301_s2 = inlined_call_operand.vmem [shape: f32[1,64], index: 2, kind: input, shape index: {}]   ;;  %s6302_s3 = inlined_call_operand.vmem [shape: f32[1,64], index: 3, kind: input, shape index: {}]   ;;  %s6303_s4 = inlined_call_operand.vmem [shape: bf16[2,204,112], index: 4, kind: output, shape index: {0}]   ;;  %s6304_s5 = inlined_call_operand.vmem [shape: f32[2,2,112], index: 5, kind: output, shape index: {1}]  }
   0x1 LB: > { %s4023_s2 = sadd.s32 4294967295, %s5243_s18   ;;  %p4027_p0 = scmp.ge.s32.totalorder %s5243_s18, 1  ;;  %s5243_s18 = sphi %s5276_s18, %s16_s18  }
   0x2   : > { %p190_p1 = scmp.lt.s32.totalorder %s5243_s18, 3 }
   0x4   : > { %p191_p2 = pnand %p4027_p0, %p190_p1 }
   0x5   : > { %v5120_v0 = vld [vmem:[%s6300_s1 + $0x20] sm:$0xff] (!%p191_p2)   ;;  %p222_p3 = scmp.lt.s32.totalorder (!%p191_p2), %s4023_s2, 1  ;;  %v5122_v2 = vld [vmem:[%s6300_s1 + $0x28] sm:$0xff] (!%p191_p2)   ;;  %v5124_v4 = vld [vmem:[%s6300_s1 + $0x30] sm:$0xff] (!%p191_p2)   ;;  %vm497_vm0 = vcmask (!%p191_p2), 523264   ;;  %vm895_vm2 = vcmask (!%p191_p2), 1046528  }
   0x6   : > { %194 = sbr.rel (%p191_p2) target bundleno = 563 (0x233), region = 36  ;;  %v5121_v1 = vld [vmem:[%s6300_s1 + $0x80] sm:$0xff] (!%p191_p2)   ;;  %4553 = vmatprep.subr.bf16.mxu1 (!%p191_p2), %v5120_v0  ;;  %v5123_v3 = vld [vmem:[%s6300_s1 + $0x88] sm:$0xff] (!%p191_p2)   ;;  %v5125_v5 = vld [vmem:[%s6300_s1 + $0x90] sm:$0xff] (!%p191_p2)   ;;  %vm356_vm1 = vsmask.f32 (!%p191_p2), 7424 }
   0x7   : > { %4697 = vmatprep.subr.bf16.mxu0 (!%p191_p2), %v5121_v1  ;;  %4554 = vmatpush3.bf16.msra.mxu1 (!%p191_p2), %v5120_v0  ;;  %v5126_v6 = vld [vmem:[%s6300_s1 + $0x38] sm:$0xff] (!%p191_p2)   ;;  %v5134_v29 = vld [vmem:[%s6300_s1 + $0xa0] sm:$0xff] (!%p191_p2)   ;;  %v5140_v0 = vld [vmem:[%s6300_s1 + $0xa8] sm:$0xff] (!%p191_p2)   ;;  %vm3438_vm3 = vcmask (!%p191_p2), 910336   ;;  %vm3481_vm4 = vcmask (!%p191_p2), 912386   ;;  %vm3350_vm5 = vcmask (!%p191_p2), 916480  }
   0x8   : > { %4698 = vmatpush3.bf16.msra.mxu0 (!%p191_p2), %v5121_v1  ;;  %4555 = vmatprep.subr.bf16.mxu1 (!%p191_p2), %v5122_v2  ;;  %v5127_v7 = vld [vmem:[%s6300_s1 + $0x98] sm:$0xff] (!%p191_p2)   ;;  %v5138_v54 = vld [vmem:[%s6300_s1] sm:$0xff] (!%p191_p2)   ;;  %vm3389_vm6 = vcmask (!%p191_p2), 912384   ;;  %vm3394_vm7 = vcmask (!%p191_p2), 914432   ;;  %vm3435_vm8 = vcmask (!%p191_p2), 912387   ;;  %vm3424_vm9 = vcmask (!%p191_p2), 1042432  }
   0x9   : > { %4699 = vmatprep.subr.bf16.mxu0 (!%p191_p2), %v5123_v3  ;;  %vm3425_vm10 = vcmask (!%p191_p2), 1046532   ;;  %vm3391_vm11 = vcmask (!%p191_p2), 911360   ;;  %vm3525_vm12 = vcmask (!%p191_p2), 912385   ;;  %vm3516_vm13 = vcmask (!%p191_p2), 1040384  }
   0xa   : > { %vm3517_vm14 = vcmask (!%p191_p2), 1044484   ;;  %vm5999_vm15 = vmor (!%p191_p2), %vm3424_vm9, %vm3425_vm10 }
   0xb   : > { %4556 = vmatpush3.bf16.msra.mxu1 (!%p191_p2), %v5122_v2  ;;  %vm6039_vm9 = vmor (!%p191_p2), %vm3516_vm13, %vm3517_vm14 }
   0xc   : > { %4700 = vmatpush3.bf16.msra.mxu0 (!%p191_p2), %v5123_v3  ;;  %4557 = vmatprep.subr.bf16.mxu1 (!%p191_p2), %v5124_v4 }
   0xd   : > { %s6312_s2 = smov (!%p222_p3, %s4023_s2), 1  ;;  %4701 = vmatprep.subr.bf16.mxu0 %v5125_v5 }
   0xe   : > { %s5109_s28 = smul.u32 132, %s6312_s2  ;;  %s4030_s7 = sshll.u32 %s6312_s2, 1 }
   0xf   : > { %4558 = vmatpush3.bf16.msra.mxu1 %v5124_v4  ;;  %s235_s11 = scalar_lea.vmem %s6304_s5, %s4030_s7 }
  0x10   : > { %s5311_s10 = scalar_lea.vmem %s6299_s0, %s5109_s28  ;;  %4702 = vmatpush3.bf16.msra.mxu0 %v5125_v5  ;;  %4559 = vmatprep.subr.bf16.mxu1 %v5126_v6 }
  0x11   : > { %v237_v8 = vld [vmem:[%s5311_s10] sm:$0xf]  ;;  %v5318_v9 = vld [vmem:[%s5311_s10 + $0x4] sm:$0xf]  ;;  %v5324_v11 = vld [vmem:[%s5311_s10 + $0x8] sm:$0xff]   ;;  %4703 = vmatprep.subr.bf16.mxu0 %v5127_v7 }
  0x12   : > { %v5321_v10 = vcombine.low %v237_v8, %v5318_v9  ;;  %v5327_v12 = vld [vmem:[%s5311_s10 + $0x10] sm:$0xff]   ;;  %v1510_v13 = vld [vmem:[%s5311_s10 + $0x8] sm:$0xf]  ;;  %v5331_v14 = vld [vmem:[%s5311_s10 + $0xc] sm:$0xf]  ;;  %v365_v17 = vshll.u32 %v5324_v11, 16 }
  0x13   : > { %v369_v18 = vshrl.u32 %v5324_v11, 16  ;;  %v4165_v19 = vcombine.low %v1510_v13, %v5331_v14  ;;  %v1629_v20 = vshll.u32 %v5327_v12, 16  ;;  %v1633_v21 = vshrl.u32 %v5327_v12, 16  ;;  %v5341_v24 = vld [vmem:[%s5311_s10 + $0x10] sm:$0xff]   ;;  %v5344_v25 = vld [vmem:[%s5311_s10 + $0x18] sm:$0xff]   ;;  %4560 = vmatpush3.bf16.msra.mxu1 %v5126_v6  ;;  %v5357_v41 = vld [vmem:[%s5311_s10 + $0x20] sm:$0xff]  }
  0x14   : > { %v358_v15 = vshrl.u32 %v5321_v10, 16  ;;  %v360_v16 = vshll.u32 %v5321_v10, 16  ;;  %v367_v23 = vrot.slane %v365_v17, 1  ;;  %v373_v32 = vshll.u32 %v5341_v24, 16  ;;  %4704 = vmatpush3.bf16.msra.mxu0 %v5127_v7  ;;  %v5352_v36 = vld [vmem:[%s5311_s10 + $0x18] sm:$0xff]   ;;  %v5366_v49 = vld [vmem:[%s5311_s10 + $0x20] sm:$0xff]   ;;  %4589 = vmatprep.subr.bf16.mxu1 %v5138_v54 }
  0x15   : > { %v1622_v26 = vshrl.u32 %v4165_v19, 16  ;;  %v1624_v27 = vshll.u32 %v4165_v19, 16  ;;  %v1631_v28 = vrot.slane %v1629_v20, 1  ;;  %v1637_v33 = vshll.u32 %v5344_v25, 16  ;;  %4733 = vmatprep.subr.bf16.mxu0 %v5134_v29  ;;  %v5375_v55 = vld [vmem:[%s5311_s10 + $0x28] sm:$0xff]   ;;  %v5394_v5 = vld [vmem:[%s5311_s10 + $0x30] sm:$0xff]  }
  0x16   : > { %v362_v22 = vrot.slane %v360_v16, 1  ;;  %v371_v31 = vor.u32 %v369_v18, %v367_v23  ;;  %v375_v38 = vrot.slane %v373_v32, 1  ;;  %v377_v40 = vshrl.u32 %v5341_v24, 16  ;;  %v5390_v3 = vld [vmem:[%s5311_s10 + $0x28] sm:$0xff]   ;;  %v5399_v8 = vld [vmem:[%s5311_s10 + $0x30] sm:$0xff]  }
  0x17   : > { %v1626_v34 = vrot.slane %v1624_v27, 1  ;;  %v1635_v35 = vor.u32 %v1633_v21, %v1631_v28  ;;  %v1639_v39 = vrot.slane %v1637_v33, 1  ;;  %v381_v43 = vshll.u32 %v5352_v36, 16  ;;  %v5407_v21 = vld [vmem:[%s5311_s10 + $0x38] sm:$0xff]  }
  0x18   : > { %v363_v30 = vor.u32 %v362_v22, %v358_v15  ;;  %v1641_v44 = vshrl.u32 %v5344_v25, 16  ;;  %v376_v45 = vsel %vm356_vm1, %v371_v31, %v375_v38  ;;  %v379_v47 = vor.u32 %v377_v40, %v375_v38 }
  0x19   : > { %v1627_v42 = vor.u32 %v1626_v34, %v1622_v26  ;;  %v1640_v46 = vsel %vm356_vm1, %v1635_v35, %v1639_v39  ;;  %v1645_v48 = vshll.u32 %v5357_v41, 16  ;;  %v383_v51 = vrot.slane %v381_v43, 1 }
  0x1a   : > { %v368_v37 = vsel %vm356_vm1, %v363_v30, %v367_v23  ;;  %v1643_v52 = vor.u32 %v1641_v44, %v1639_v39  ;;  %v385_v53 = vshrl.u32 %v5352_v36, 16  ;;  %v389_v57 = vshll.u32 %v5366_v49, 16  ;;  %v5146_v30 = vld [vmem:[%s6300_s1 + $0x8] sm:$0xff]   ;;  %v5428_v39 = vld [vmem:[%s5311_s10 + $0x40] sm:$0xff]  }
  0x1b   : > { %4561 = vmatprep.mubr.msk.bf16.mxu1 %vm497_vm0, %v368_v37  ;;  %v1632_v50 = vsel %vm356_vm1, %v1627_v42, %v1631_v28  ;;  %v1647_v56 = vrot.slane %v1645_v48, 1  ;;  %v384_v58 = vsel %vm356_vm1, %v379_v47, %v383_v51  ;;  %v1649_v60 = vshrl.u32 %v5357_v41, 16  ;;  %v5424_v37 = vld [vmem:[%s5311_s10 + $0x38] sm:$0xff]   ;;  %v5432_v42 = vld [vmem:[%s5311_s10 + $0x40] sm:$0xff]  }
  0x1c   : > { %4562 = vmatmul.mubr.msk.bf16.vlgmr.msra.gmra.mrb[0].mxu1 %vm497_vm0, %v376_v45  ;;  %4705 = vmatprep.mubr.msk.bf16.mxu0 %vm497_vm0, %v1632_v50  ;;  %v387_v59 = vor.u32 %v385_v53, %v383_v51  ;;  %v1653_v61 = vshll.u32 %v5375_v55, 16  ;;  %v391_v63 = vrot.slane %v389_v57, 1  ;;  %v393_v4 = vshrl.u32 %v5366_v49, 16  ;;  %v5440_v51 = vld [vmem:[%s5311_s10 + $0x48] sm:$0xff]  }
  0x1d   : > { %4706 = vmatmul.mubr.msk.bf16.vlgmr.msra.gmra.mrb[0].mxu0 %vm497_vm0, %v1640_v46  ;;  %4565 = vmatprep.mubr.msk.bf16.mxu1 %vm497_vm0, %v384_v58  ;;  %v1648_v62 = vsel %vm356_vm1, %v1643_v52, %v1647_v56  ;;  %v1651_v1 = vor.u32 %v1649_v60, %v1647_v56  ;;  %v1657_v7 = vshrl.u32 %v5375_v55, 16  ;;  %v397_v16 = vshll.u32 %v5390_v3, 16  ;;  %v5450_v60 = vld [vmem:[%s5311_s10 + $0x48] sm:$0xff]  }
  0x1e   : > { %4734 = vmatpush3.bf16.msra.mxu0 %v5134_v29  ;;  %4709 = vmatprep.mubr.msk.bf16.mxu0 %vm497_vm0, %v1648_v62  ;;  %v1655_v2 = vrot.slane %v1653_v61, 1  ;;  %v392_v6 = vsel %vm356_vm1, %v387_v59, %v391_v63  ;;  %v395_v15 = vor.u32 %v393_v4, %v391_v63  ;;  %v1661_v17 = vshll.u32 %v5394_v5, 16  ;;  %v5145_v29 = vld [vmem:[%s6300_s1 + $0xb0] sm:$0xff]   ;;  %v5151_v59 = vld [vmem:[%s6300_s1 + $0xb8] sm:$0xff]  }
  0x1f   : > { %4590 = vmatpush3.bf16.msra.mxu1 %v5138_v54  ;;  %4735 = vmatprep.subr.bf16.mxu0 %v5140_v0  ;;  %v401_v19 = vshrl.u32 %v5390_v3, 16  ;;  %v405_v20 = vshll.u32 %v5399_v8, 16  ;;  %v1665_v22 = vshrl.u32 %v5394_v5, 16  ;;  %v399_v23 = vrot.slane %v397_v16, 1 }
  0x20   : > { %v1656_v13 = vsel %vm356_vm1, %v1651_v1, %v1655_v2  ;;  %v1659_v18 = vor.u32 %v1657_v7, %v1655_v2  ;;  %v1663_v26 = vrot.slane %v1661_v17, 1  ;;  %v1669_v28 = vshll.u32 %v5407_v21, 16  ;;  %4591 = vmatprep.subr.bf16.mxu1 %v5146_v30  ;;  %v5155_v17 = vld [vmem:[%s6300_s1 + $0xc0] sm:$0xff]  }
  0x21   : > { %v407_v27 = vrot.slane %v405_v20, 1  ;;  %v400_v31 = vsel %vm356_vm1, %v395_v15, %v399_v23  ;;  %v403_v33 = vor.u32 %v401_v19, %v399_v23  ;;  %v409_v38 = vshrl.u32 %v5399_v8, 16 }
  0x22   : > { %4736 = vmatpush3.bf16.msra.mxu0 %v5140_v0  ;;  %v1664_v32 = vsel %vm356_vm1, %v1659_v18, %v1663_v26  ;;  %v1667_v34 = vor.u32 %v1665_v22, %v1663_v26  ;;  %v1671_v35 = vrot.slane %v1669_v28, 1  ;;  %v1673_v40 = vshrl.u32 %v5407_v21, 16  ;;  %v1976_v0 = vld [vmem:[%s5311_s10 + $0x8] sm:$0xe]  ;;  %v5478_v26 = vld [vmem:[%s5311_s10 + $0x58] sm:$0xff]  }
  0x23   : > { %4737 = vmatprep.subr.bf16.mxu0 %v5145_v29  ;;  %v408_v43 = vsel %vm356_vm1, %v403_v33, %v407_v27  ;;  %v411_v44 = vor.u32 %v409_v38, %v407_v27  ;;  %v413_v45 = vshll.u32 %v5424_v37, 16  ;;  %4592 = vmatpush3.bf16.msra.mxu1 %v5146_v30  ;;  %v1677_v46 = vshll.u32 %v5428_v39, 16  ;;  %v5492_v38 = vld [vmem:[%s5311_s10 + $0x68] sm:$0xff]  }
  0x24   : > { %4566 = vmatmul.mubr.msk.bf16.gmra.mrb[4].mxu1 %vm497_vm0, %v392_v6  ;;  %v1675_v47 = vor.u32 %v1673_v40, %v1671_v35  ;;  %v417_v48 = vshrl.u32 %v5424_v37, 16  ;;  %v421_v50 = vshll.u32 %v5432_v42, 16  ;;  %v1681_v52 = vshrl.u32 %v5428_v39, 16  ;;  %v5461_v6 = vld [vmem:[%s5311_s10 + $0x50] sm:$0xff]  }
  0x25   : > { %4710 = vmatmul.mubr.msk.bf16.gmra.mrb[4].mxu0 %vm497_vm0, %v1656_v13  ;;  %4569 = vmatprep.mubr.msk.bf16.mxu1 %vm497_vm0, %v400_v31  ;;  %v1672_v53 = vsel %vm356_vm1, %v1667_v34, %v1671_v35  ;;  %v415_v54 = vrot.slane %v413_v45, 1  ;;  %v1679_v56 = vrot.slane %v1677_v46, 1  ;;  %v1685_v58 = vshll.u32 %v5440_v51, 16 }
  0x26   : > { %4713 = vmatprep.mubr.msk.bf16.mxu0 %vm497_vm0, %v1664_v32  ;;  %4738 = vmatpush3.bf16.msra.mxu0 %v5145_v29  ;;  %v423_v57 = vrot.slane %v421_v50, 1  ;;  %v425_v1 = vshrl.u32 %v5432_v42, 16  ;;  %v429_v2 = vshll.u32 %v5450_v60, 16  ;;  %v4206_v4 = vcombine.low %v1976_v0, %v5331_v14  ;;  %v5484_v29 = vld [vmem:[%s5311_s10 + $0x60] sm:$0xff]   ;;  %v5159_v50 = vld [vmem:[%s6300_s1 + $0xc8] sm:$0xff]   ;;  %v5163_v0 = vld [vmem:[%s6300_s1 + $0xd0] sm:$0xff]  }
  0x27   : > { %v416_v61 = vsel %vm356_vm1, %v411_v44, %v415_v54  ;;  %v1680_v62 = vsel %vm356_vm1, %v1675_v47, %v1679_v56  ;;  %v419_v63 = vor.u32 %v417_v48, %v415_v54  ;;  %v1683_v7 = vor.u32 %v1681_v52, %v1679_v56  ;;  %4739 = vmatprep.subr.bf16.mxu0 %v5151_v59  ;;  %v5162_v44 = vld [vmem:[%s6300_s1 + $0x18] sm:$0xff]   ;;  %v5165_v56 = vld [vmem:[%s6300_s1 + $0x40] sm:$0xff]  }
  0x28   : > { %v5464_v13 = vrot.slane %v1685_v58, 1  ;;  %v1990_v15 = vrot.slane %v5327_v12, 1  ;;  %v433_v16 = vshrl.u32 %v5450_v60, 16  ;;  %v427_v14 = vor.u32 %v425_v1, %v423_v57  ;;  %v5156_v12 = vld [vmem:[%s6300_s1 + $0x10] sm:$0xff]  }
  0x29   : > { %v431_v18 = vrot.slane %v429_v2, 1  ;;  %v1989_v19 = vrot.slane %v4206_v4, 1  ;;  %v424_v20 = vsel %vm356_vm1, %v419_v63, %v423_v57  ;;  %v437_v22 = vshll.u32 %v5461_v6, 16  ;;  %4593 = vmatprep.subr.bf16.mxu1 %v5156_v12 }
  0x2a   : > { %4740 = vmatpush3.bf16.msra.mxu0 %v5151_v59  ;;  %v441_v27 = vshrl.u32 %v5461_v6, 16  ;;  %v1688_v28 = vsel %vm356_vm1, %v1683_v7, %v5464_v13  ;;  %v445_v32 = vshll.u32 %v5478_v26, 16  ;;  %4594 = vmatpush3.bf16.msra.mxu1 %v5156_v12  ;;  %v1992_v40 = vrot.slane %v5344_v25, 1  ;;  %v5551_v12 = vld [vmem:[%s5311_s10 + $0x50] sm:$0xff]  }
  0x2b   : > { %4769 = vmatprep.subr.bf16.mxu0 %v5155_v17  ;;  %v432_v23 = vsel %vm356_vm1, %v427_v14, %v431_v18  ;;  %v1991_v30 = vsel %vm895_vm2, %v1989_v19, %v1990_v15  ;;  %v439_v31 = vrot.slane %v437_v22, 1  ;;  %v435_v33 = vor.u32 %v433_v16, %v431_v18  ;;  %4595 = vmatprep.subr.bf16.mxu1 %v5162_v44  ;;  %v5544_v19 = vld [vmem:[%s6300_s1 + $0xe0] sm:$0xff]  }
  0x2c   : > { %4570 = vmatmul.mubr.msk.bf16.gmra.mrb[8].mxu1 %vm497_vm0, %v408_v43  ;;  %v447_v35 = vrot.slane %v445_v32, 1  ;;  %v453_v43 = vshll.u32 %v5484_v29, 16  ;;  %v1994_v45 = vrot.slane %v5357_v41, 1  ;;  %v449_v47 = vshrl.u32 %v5478_v26, 16 }
  0x2d   : > { %4714 = vmatmul.mubr.msk.bf16.gmra.mrb[8].mxu0 %vm497_vm0, %v1672_v53  ;;  %4573 = vmatprep.mubr.msk.bf16.mxu1 %vm497_vm0, %v416_v61  ;;  %v443_v34 = vor.u32 %v441_v27, %v439_v31  ;;  %v440_v46 = vsel %vm356_vm1, %v435_v33, %v439_v31  ;;  %v457_v25 = vshrl.u32 %v5484_v29, 16  ;;  %v461_v52 = vshll.u32 %v5492_v38, 16  ;;  %v5511_v41 = vld [vmem:[%s5311_s10 + $0x70] ss:$0 sps:$4 sm:$0x11]   ;;  %v5170_v27 = vld [vmem:[%s6300_s1 + $0x48] sm:$0xff]  }
  0x2e   : > { %4717 = vmatprep.mubr.msk.bf16.mxu0 %vm497_vm0, %v1680_v62  ;;  %4596 = vmatpush3.bf16.msra.mxu1 %v5162_v44  ;;  %v1993_v53 = vsel %vm895_vm2, %v1990_v15, %v1992_v40  ;;  %v455_v54 = vrot.slane %v453_v43, 1  ;;  %v1995_v57 = vsel %vm895_vm2, %v1992_v40, %v1994_v45  ;;  %v451_v58 = vor.u32 %v449_v47, %v447_v35  ;;  %v5571_v31 = vld [vmem:[%s5311_s10 + $0x60] sm:$0xff]   ;;  %v5587_v40 = vld [vmem:[%s5311_s10 + $0x68] sm:$0xff]   ;;  %v5593_v44 = vld [vmem:[%s5311_s10 + $0x70] sm:$0xff]  }
  0x2f   : > { %v448_v48 = vsel %vm356_vm1, %v443_v34, %v447_v35  ;;  %4625 = vmatprep.subr.bf16.mxu1 %v5165_v56  ;;  %v463_v61 = vrot.slane %v461_v52, 1  ;;  %v1996_v62 = vrot.slane %v5375_v55, 1  ;;  %v1998_v63 = vrot.slane %v5394_v5, 1  ;;  %v5169_v5 = vld [vmem:[%s6300_s1 + $0xd8] sm:$0xff]  }
  0x30   : > { %v459_v59 = vor.u32 %v457_v25, %v455_v54  ;;  %v456_v1 = vsel %vm356_vm1, %v451_v58, %v455_v54  ;;  %v465_v2 = vshrl.u32 %v5492_v38, 16  ;;  %v469_v4 = vshll.u32 %v5511_v41, 16  ;;  %v5182_v34 = vld [vmem:[%s6300_s1 + $0x58] sm:$0xff]   ;;  %v5173_v54 = vld [vmem:[%s5311_s10 + $0x10] sm:$0xff]   ;;  %v5179_v58 = vld [vmem:[%s6300_s1 + $0xe8] sm:$0xff]  }
  0x31   : > { %v1997_v15 = vsel %vm895_vm2, %v1994_v45, %v1996_v62  ;;  %v1999_v55 = vsel %vm895_vm2, %v1996_v62, %v1998_v63  ;;  %v2000_v14 = vrot.slane %v5407_v21, 1  ;;  %v2002_v18 = vrot.slane %v5428_v39, 1  ;;  %v5601_v45 = vld [vmem:[%s6300_s1 + $0x60] sm:$0xff]   ;;  %v5178_v62 = vld [vmem:[%s5311_s10 + $0x28] sm:$0xff]  }
  0x32   : > { %v464_v7 = vsel %vm356_vm1, %v459_v59, %v463_v61  ;;  %v467_v16 = vor.u32 %v465_v2, %v463_v61  ;;  %v2004_v39 = vrot.slane %v5440_v51, 1  ;;  %v5176_v51 = vld [vmem:[%s6300_s1 + $0x50] sm:$0xff]   ;;  %v2010_v33 = vrot.slane %v5571_v31, 1  ;;  %v882_v59 = vld [vmem:[%s5311_s10] sm:$0xe] }
  0x33   : > { %v2001_v22 = vsel %vm895_vm2, %v1998_v63, %v2000_v14  ;;  %v2003_v21 = vsel %vm895_vm2, %v2000_v14, %v2002_v18  ;;  %v2014_v47 = vrot.slane %v5593_v44, 1  ;;  %v5186_v61 = vld [vmem:[%s6300_s1 + $0xf0] sm:$0xff]   ;;  %v4098_v63 = vcombine.low %v882_v59, %v5318_v9  ;;  %v5659_v9 = vld [vmem:[%s6300_s1 + $0x100] sm:$0xff]  }
  0x34   : > { %4574 = vmatmul.mubr.msk.bf16.gmra.mrb[12].mxu1 %vm497_vm0, %v424_v20 }
  0x35   : > { %4577 = vmatprep.mubr.msk.bf16.mxu1 %vm497_vm0, %v432_v23  ;;  %4718 = vmatmul.mubr.msk.bf16.gmra.mrb[12].mxu0 %vm497_vm0, %v1688_v28  ;;  %v2006_v23 = vrot.slane %v5551_v12, 1  ;;  %v2005_v28 = vsel %vm895_vm2, %v2002_v18, %v2004_v39  ;;  %v896_v2 = vrot.slane %v4098_v63, 1  ;;  %v5193_v18 = vld [vmem:[%s6300_s1 + $0x68] sm:$0xff]  }
  0x36   : > { %4741 = vmatprep.mubr.msk.bf16.mxu0 %vm497_vm0, %v1991_v30  ;;  %v5565_v30 = vld [vmem:[%s5311_s10 + $0x58] sm:$0xff]  }
  0x37   : > { %v2008_v32 = vrot.slane %v5565_v30, 1 }
  0x39   : > { %v2009_v35 = vsel %vm895_vm2, %v2006_v23, %v2008_v32  ;;  %v2011_v43 = vsel %vm895_vm2, %v2008_v32, %v2010_v33  ;;  %v5708_v32 = vld [vmem:[%s5311_s10 + $0x18] sm:$0xff]  }
  0x3c   : > { %4578 = vmatmul.mubr.msk.bf16.gmra.mrb[16].mxu1 %vm497_vm0, %v440_v46  ;;  %v2012_v46 = vrot.slane %v5587_v40, 1 }
  0x3d   : > { %4581 = vmatprep.mubr.msk.bf16.mxu1 %vm497_vm0, %v448_v48  ;;  %4742 = vmatmul.mubr.msk.bf16.vlgmr.msra.gmra.mrb[0].mxu0 %vm497_vm0, %v1993_v53  ;;  %v5607_v48 = vld [vmem:[%s5311_s10 + $0x78] ss:$0 sps:$4 sm:$0x11]  }
  0x3e   : > { %4770 = vmatpush3.bf16.msra.mxu0 %v5155_v17  ;;  %4745 = vmatprep.mubr.msk.bf16.mxu0 %vm497_vm0, %v1995_v57  ;;  %v471_v17 = vrot.slane %v469_v4, 1  ;;  %v2015_v25 = vsel %vm895_vm2, %v2012_v46, %v2014_v47  ;;  %v2016_v52 = vrot.slane %v5607_v48, 1  ;;  %v5177_v57 = vld [vmem:[%s5311_s10 + $0x20] sm:$0xff]   ;;  %v897_v4 = vrot.slane %v5324_v11, 1 }
  0x3f   : > { %4771 = vmatprep.subr.bf16.mxu0 %v5159_v50 }
  0x40   : > { %v472_v20 = vsel %vm356_vm1, %v467_v16, %v471_v17  ;;  %v2017_v53 = vsel %vm895_vm2, %v2014_v47, %v2016_v52  ;;  %v5185_v17 = vld [vmem:[%s5311_s10 + $0x48] sm:$0xff]   ;;  %v2722_v47 = vshll.u32 %v5708_v32, 16  ;;  %v5727_v52 = vld [vmem:[%s5311_s10 + $0x20] sm:$0xff]  }
  0x42   : > { %4772 = vmatpush3.bf16.msra.mxu0 %v5159_v50  ;;  %v2013_v50 = vsel %vm895_vm2, %v2010_v33, %v2012_v46 }
  0x43   : > { %4773 = vmatprep.subr.bf16.mxu0 %v5163_v0 }
  0x44   : > { %4582 = vmatmul.mubr.msk.bf16.gmra.mrb[20].mxu1 %vm497_vm0, %v456_v1  ;;  %v5192_v1 = vld [vmem:[%s6300_s1 + $0xf8] sm:$0xff]  }
  0x45   : > { %4585 = vmatprep.mubr.msk.bf16.mxu1 %vm497_vm0, %v464_v7  ;;  %4746 = vmatmul.mubr.msk.bf16.gmra.mrb[4].mxu0 %vm497_vm0, %v1997_v15  ;;  %v5181_v7 = vld [vmem:[%s5311_s10 + $0x38] sm:$0xff]   ;;  %v898_v15 = vsel %vm895_vm2, %v896_v2, %v897_v4  ;;  %v917_v2 = vrot.slane %v5478_v26, 1 }
  0x46   : > { %4749 = vmatprep.mubr.msk.bf16.mxu0 %vm497_vm0, %v1999_v55  ;;  %4774 = vmatpush3.bf16.msra.mxu0 %v5163_v0  ;;  %v5180_v0 = vld [vmem:[%s5311_s10 + $0x30] sm:$0xff]   ;;  %v5184_v55 = vld [vmem:[%s5311_s10 + $0x40] sm:$0xff]  }
  0x47   : > { %4775 = vmatprep.subr.bf16.mxu0 %v5169_v5 }
  0x4a   : > { %4776 = vmatpush3.bf16.msra.mxu0 %v5169_v5  ;;  %v901_v5 = vrot.slane %v5352_v36, 1 }
  0x4b   : > { %4805 = vmatprep.subr.bf16.mxu0 %v5544_v19 }
  0x4c   : > { %4586 = vmatmul.mubr.msk.bf16.gmra.mrb[24].mxu1 %vm497_vm0, %v472_v20  ;;  %v5200_v20 = vld [vmem:[%s6300_s1 + $0x70] sm:$0xff]  }
  0x4d   : > { %4597 = vmatprep.mubr.msk.bf16.mxu1 %vm497_vm0, %v5321_v10  ;;  %4750 = vmatmul.mubr.msk.bf16.gmra.mrb[8].mxu0 %vm497_vm0, %v2001_v22  ;;  %v2007_v10 = vsel %vm895_vm2, %v2004_v39, %v2006_v23  ;;  %v5692_v39 = vld [vmem:[%s5311_s10 + $0x14] sm:$0xf] }
  0x4e   : > { %4753 = vmatprep.mubr.msk.bf16.mxu0 %vm497_vm0, %v2003_v21  ;;  %v2603_v21 = vld [vmem:[%s5311_s10 + $0x10] sm:$0xf] }
  0x54   : > { %4598 = vmatmul.mubr.msk.bf16.vlgmr.msra.gmra.mrb[0].mxu1 %vm497_vm0, %v5324_v11  ;;  %v899_v11 = vrot.slane %v5341_v24, 1 }
  0x55   : > { %4601 = vmatprep.mubr.msk.bf16.mxu1 %vm497_vm0, %v5341_v24  ;;  %4626 = vmatpush3.bf16.msra.mxu1 %v5165_v56  ;;  %v5174_v56 = vld [vmem:[%s5311_s10 + $0x18] sm:$0xff]   ;;  %v903_v24 = vrot.slane %v5366_v49, 1 }
  0x56   : > { %4754 = vmatmul.mubr.msk.bf16.gmra.mrb[12].mxu0 %vm497_vm0, %v2005_v28  ;;  %4627 = vmatprep.subr.bf16.mxu1 %v5170_v27  ;;  %v900_v16 = vsel %vm895_vm2, %v897_v4, %v899_v11  ;;  %v902_v14 = vsel %vm895_vm2, %v899_v11, %v901_v5  ;;  %v4273_v28 = vcombine.low %v2603_v21, %v5692_v39  ;;  %v5747_v4 = vld [vmem:[%s5311_s10 + $0x30] sm:$0xff]   ;;  %v5751_v11 = vld [vmem:[%s5311_s10 + $0x38] sm:$0xff]   ;;  %v5770_v21 = vld [vmem:[%s5311_s10 + $0x40] sm:$0xff]  }
  0x57   : > { %4757 = vmatprep.mubr.msk.bf16.mxu0 %vm497_vm0, %v2007_v10  ;;  %v904_v22 = vsel %vm895_vm2, %v901_v5, %v903_v24  ;;  %v907_v10 = vrot.slane %v5399_v8, 1 }
  0x58   : > { %v2717_v33 = vshll.u32 %v4273_v28, 16 }
  0x59   : > { %4628 = vmatpush3.bf16.msra.mxu1 %v5170_v27  ;;  %v5190_v27 = vld [vmem:[%s5311_s10 + $0x60] sm:$0xff]  }
  0x5a   : > { %4629 = vmatprep.subr.bf16.mxu1 %v5176_v51  ;;  %v2719_v46 = vrot.slane %v2717_v33, 1 }
  0x5c   : > { %4602 = vmatmul.mubr.msk.bf16.gmra.mrb[4].mxu1 %vm497_vm0, %v5352_v36  ;;  %v905_v36 = vrot.slane %v5390_v3, 1 }
  0x5d   : > { %4605 = vmatprep.mubr.msk.bf16.mxu1 %vm497_vm0, %v5366_v49  ;;  %4630 = vmatpush3.bf16.msra.mxu1 %v5176_v51  ;;  %v5189_v49 = vld [vmem:[%s5311_s10 + $0x58] sm:$0xff]   ;;  %v909_v51 = vrot.slane %v5424_v37, 1 }
  0x5e   : > { %4758 = vmatmul.mubr.msk.bf16.gmra.mrb[16].mxu0 %vm497_vm0, %v2009_v35  ;;  %4631 = vmatprep.subr.bf16.mxu1 %v5182_v34  ;;  %v906_v23 = vsel %vm895_vm2, %v903_v24, %v905_v36  ;;  %v5191_v35 = vld [vmem:[%s5311_s10 + $0x68] sm:$0xff]   ;;  %v2754_v24 = vshll.u32 %v5751_v11, 16 }
  0x5f   : > { %4761 = vmatprep.mubr.msk.bf16.mxu0 %vm497_vm0, %v2011_v43  ;;  %v910_v43 = vsel %vm895_vm2, %v907_v10, %v909_v51 }
  0x61   : > { %4632 = vmatpush3.bf16.msra.mxu1 %v5182_v34  ;;  %v908_v34 = vsel %vm895_vm2, %v905_v36, %v907_v10  ;;  %v919_v36 = vrot.slane %v5484_v29, 1  ;;  %v2762_v10 = vshll.u32 %v5770_v21, 16 }
  0x62   : > { %4661 = vmatprep.subr.bf16.mxu1 %v5601_v45 }
  0x64   : > { %4606 = vmatmul.mubr.msk.bf16.gmra.mrb[8].mxu1 %vm497_vm0, %v5390_v3  ;;  %v5206_v3 = vld [vmem:[%s6300_s1 + $0x78] sm:$0xff]  }
  0x65   : > { %4609 = vmatprep.mubr.msk.bf16.mxu1 %vm497_vm0, %v5399_v8  ;;  %v5716_v8 = vld [vmem:[%s6300_s1 + $0x80] sm:$0xff]  }
  0x66   : > { %4762 = vmatmul.mubr.msk.bf16.gmra.mrb[20].mxu0 %vm497_vm0, %v2013_v50  ;;  %v911_v50 = vrot.slane %v5432_v42, 1 }
  0x67   : > { %4765 = vmatprep.mubr.msk.bf16.mxu0 %vm497_vm0, %v2015_v25  ;;  %v913_v25 = vrot.slane %v5450_v60, 1 }
  0x69   : > { %v914_v59 = vsel %vm895_vm2, %v911_v50, %v913_v25 }
  0x6c   : > { %4610 = vmatmul.mubr.msk.bf16.gmra.mrb[12].mxu1 %vm497_vm0, %v5424_v37  ;;  %v5194_v37 = vld [vmem:[%s5311_s10 + $0x70] sm:$0xff]  }
  0x6d   : > { %4613 = vmatprep.mubr.msk.bf16.mxu1 %vm497_vm0, %v5432_v42  ;;  %v2730_v42 = vshll.u32 %v5727_v52, 16 }
  0x6e   : > { %4766 = vmatmul.mubr.msk.bf16.gmra.mrb[24].mxu0 %vm497_vm0, %v2017_v53 }
  0x6f   : > { %4777 = vmatprep.mubr.msk.bf16.mxu0 %vm497_vm0, %v5173_v54  ;;  %v2724_v54 = vrot.slane %v2722_v47, 1 }
  0x74   : > { %4614 = vmatmul.mubr.msk.bf16.gmra.mrb[16].mxu1 %vm497_vm0, %v5450_v60 }
  0x75   : > { %4617 = vmatprep.mubr.msk.bf16.mxu1 %vm497_vm0, %v5461_v6 }
  0x76   : > { %4778 = vmatmul.mubr.msk.bf16.vlgmr.msra.gmra.mrb[0].mxu0 %vm497_vm0, %v5174_v56  ;;  %v5731_v56 = vld [vmem:[%s5311_s10 + $0x28] sm:$0xff]  }
  0x77   : > { %4806 = vmatpush3.bf16.msra.mxu0 %v5544_v19  ;;  %4781 = vmatprep.mubr.msk.bf16.mxu0 %vm497_vm0, %v5177_v57  ;;  %v5187_v19 = vld [vmem:[%s5311_s10 + $0x50] sm:$0xff]   ;;  %v912_v57 = vsel %vm895_vm2, %v909_v51, %v911_v50  ;;  %v2738_v63 = vshll.u32 %v5731_v56, 16  ;;  %v2758_v51 = vshrl.u32 %v5751_v11, 16 }
  0x78   : > { %4807 = vmatprep.subr.bf16.mxu0 %v5179_v58 }
  0x7b   : > { %4808 = vmatpush3.bf16.msra.mxu0 %v5179_v58  ;;  %v5195_v58 = vld [vmem:[%s5311_s10 + $0x78] sm:$0xff]  }
  0x7c   : > { %4618 = vmatmul.mubr.msk.bf16.gmra.mrb[20].mxu1 %vm497_vm0, %v5478_v26  ;;  %4809 = vmatprep.subr.bf16.mxu0 %v5186_v61  ;;  %v2742_v26 = vshrl.u32 %v5731_v56, 16 }
  0x7d   : > { %4621 = vmatprep.mubr.msk.bf16.mxu1 %vm497_vm0, %v5484_v29  ;;  %v5211_v29 = vld [vmem:[%s6300_s1 + $0x110] sm:$0xff]  }
  0x7e   : > { %4782 = vmatmul.mubr.msk.bf16.gmra.mrb[4].mxu0 %vm497_vm0, %v5178_v62  ;;  %v2734_v62 = vshrl.u32 %v5727_v52, 16 }
  0x7f   : > { %4785 = vmatprep.mubr.msk.bf16.mxu0 %vm497_vm0, %v5180_v0  ;;  %4810 = vmatpush3.bf16.msra.mxu0 %v5186_v61  ;;  %v2726_v61 = vshrl.u32 %v5708_v32, 16  ;;  %v915_v0 = vrot.slane %v5461_v6, 1  ;;  %v2746_v6 = vshll.u32 %v5747_v4, 16 }
  0x80   : > { %4811 = vmatprep.subr.bf16.mxu0 %v5192_v1 }
  0x81   : > { %v916_v5 = vsel %vm895_vm2, %v913_v25, %v915_v0 }
  0x83   : > { %4812 = vmatpush3.bf16.msra.mxu0 %v5192_v1  ;;  %v2732_v1 = vrot.slane %v2730_v42, 1 }
  0x84   : > { %4622 = vmatmul.mubr.msk.bf16.gmra.mrb[24].mxu1 %vm497_vm0, %v5492_v38  ;;  %4841 = vmatprep.subr.bf16.mxu0 %v5659_v9 }
  0x85   : > { %4633 = vmatprep.mubr.msk.bf16.mxu1 %vm497_vm0, %v898_v15  ;;  %v2736_v15 = vor.u32 %v2734_v62, %v2732_v1 }
  0x86   : > { %4786 = vmatmul.mubr.msk.bf16.gmra.mrb[8].mxu0 %vm497_vm0, %v5181_v7  ;;  %v2728_v7 = vor.u32 %v2726_v61, %v2724_v54 }
  0x87   : > { %4789 = vmatprep.mubr.msk.bf16.mxu0 %vm497_vm0, %v5184_v55  ;;  %v2740_v55 = vrot.slane %v2738_v63, 1  ;;  %v5814_v63 = vld [vmem:[%s5311_s10 + $0x60] sm:$0xff]  }
  0x8c   : > { %4634 = vmatmul.mubr.msk.bf16.vlgmr.msra.gmra.mrb[0].mxu1 %vm497_vm0, %v900_v16  ;;  %v918_v16 = vsel %vm895_vm2, %v915_v0, %v917_v2 }
  0x8d   : > { %4637 = vmatprep.mubr.msk.bf16.mxu1 %vm497_vm0, %v902_v14  ;;  %4662 = vmatpush3.bf16.msra.mxu1 %v5601_v45  ;;  %v2715_v45 = vshrl.u32 %v4273_v28, 16  ;;  %v2741_v14 = vsel %vm356_vm1, %v2736_v15, %v2740_v55  ;;  %v920_v28 = vsel %vm895_vm2, %v917_v2, %v919_v36  ;;  %v5819_v15 = vld [vmem:[%s5311_s10 + $0x68] sm:$0xff]  }
  0x8e   : > { %4790 = vmatmul.mubr.msk.bf16.gmra.mrb[12].mxu0 %vm497_vm0, %v5185_v17  ;;  %4663 = vmatprep.subr.bf16.mxu1 %v5193_v18  ;;  %v2733_v17 = vsel %vm356_vm1, %v2728_v7, %v2732_v1  ;;  %v5209_v1 = vld [vmem:[%s5311_s10 + $0x10] sm:$0xff]  }
  0x8f   : > { %4793 = vmatprep.mubr.msk.bf16.mxu0 %vm497_vm0, %v5187_v19  ;;  %v2720_v53 = vor.u32 %v2719_v46, %v2715_v45  ;;  %v2750_v19 = vshrl.u32 %v5747_v4, 16  ;;  %v2764_v45 = vrot.slane %v2762_v10, 1  ;;  %v5796_v46 = vld [vmem:[%s5311_s10 + $0x50] sm:$0xff]  }
  0x90   : > { %v2782_v61 = vshrl.u32 %v5796_v46, 16 }
  0x91   : > { %4664 = vmatpush3.bf16.msra.mxu1 %v5193_v18  ;;  %v2725_v60 = vsel %vm356_vm1, %v2720_v53, %v2724_v54  ;;  %v5203_v18 = vld [vmem:[%s6300_s1 + $0x108] sm:$0xff]   ;;  %v5800_v53 = vld [vmem:[%s5311_s10 + $0x58] sm:$0xff]  }
  0x92   : > { %4665 = vmatprep.subr.bf16.mxu1 %v5200_v20 }
  0x94   : > { %4638 = vmatmul.mubr.msk.bf16.gmra.mrb[4].mxu1 %vm497_vm0, %v904_v22  ;;  %v921_v22 = vrot.slane %v5492_v38, 1 }
  0x95   : > { %4641 = vmatprep.mubr.msk.bf16.mxu1 %vm497_vm0, %v906_v23  ;;  %4666 = vmatpush3.bf16.msra.mxu1 %v5200_v20  ;;  %v2748_v20 = vrot.slane %v2746_v6, 1  ;;  %v2790_v6 = vshrl.u32 %v5800_v53, 16 }
  0x96   : > { %4794 = vmatmul.mubr.msk.bf16.gmra.mrb[16].mxu0 %vm497_vm0, %v5189_v49  ;;  %4667 = vmatprep.subr.bf16.mxu1 %v5206_v3  ;;  %v2744_v49 = vor.u32 %v2742_v26, %v2740_v55  ;;  %v922_v38 = vsel %vm895_vm2, %v919_v36, %v921_v22  ;;  %v5212_v55 = vld [vmem:[%s5311_s10 + $0x18] sm:$0xff]   ;;  %v2798_v26 = vshrl.u32 %v5814_v63, 16 }
  0x97   : > { %4797 = vmatprep.mubr.msk.bf16.mxu0 %vm497_vm0, %v5190_v27  ;;  %v2752_v23 = vor.u32 %v2750_v19, %v2748_v20  ;;  %v5775_v27 = vld [vmem:[%s5311_s10 + $0x48] sm:$0xff]   ;;  %v5833_v19 = vld [vmem:[%s5311_s10 + $0x70] sm:$0xff]  }
  0x99   : > { %4668 = vmatpush3.bf16.msra.mxu1 %v5206_v3  ;;  %v2756_v3 = vrot.slane %v2754_v24, 1  ;;  %v5233_v24 = vld [vmem:[%s6300_s1 + $0x88] sm:$0xff]  }
  0x9a   : > { %4877 = vmatprep.subr.bf16.mxu1 %v5716_v8 }
  0x9b   : > { %v2757_v33 = vsel %vm356_vm1, %v2752_v23, %v2756_v3  ;;  %v2760_v47 = vor.u32 %v2758_v51, %v2756_v3  ;;  %v5841_v23 = vld [vmem:[%s5311_s10 + $0x78] sm:$0xff]   ;;  %v5216_v3 = vld [vmem:[%s5311_s10 + $0x28] sm:$0xff]  }
  0x9c   : > { %4642 = vmatmul.mubr.msk.bf16.gmra.mrb[8].mxu1 %vm497_vm0, %v908_v34  ;;  %v2766_v34 = vshrl.u32 %v5770_v21, 16  ;;  %v2818_v51 = vshll.u32 %v5841_v23, 16 }
  0x9d   : > { %4645 = vmatprep.mubr.msk.bf16.mxu1 %vm497_vm0, %v910_v43  ;;  %v5220_v43 = vld [vmem:[%s6300_s1 + $0x118] sm:$0xff]  }
  0x9e   : > { %4798 = vmatmul.mubr.msk.bf16.gmra.mrb[20].mxu0 %vm497_vm0, %v5191_v35  ;;  %v2770_v35 = vshll.u32 %v5775_v27, 16  ;;  %v2768_v50 = vor.u32 %v2766_v34, %v2764_v45  ;;  %v5235_v34 = vld [vmem:[%s6300_s1 + $0x98] sm:$0xff]  }
  0x9f   : > { %4801 = vmatprep.mubr.msk.bf16.mxu0 %vm497_vm0, %v5194_v37  ;;  %v923_v37 = vrot.slane %v5511_v41, 1  ;;  %v2778_v41 = vshll.u32 %v5796_v46, 16 }
  0xa0   : > { %v2772_v25 = vrot.slane %v2770_v35, 1 }
  0xa1   : > { %v924_v54 = vsel %vm895_vm2, %v921_v22, %v923_v37  ;;  %v2780_v62 = vrot.slane %v2778_v41, 1  ;;  %v5218_v37 = vld [vmem:[%s5311_s10 + $0x30] sm:$0xff]  }
  0xa2   : > { %v2773_v42 = vsel %vm356_vm1, %v2768_v50, %v2772_v25  ;;  %v5221_v50 = vld [vmem:[%s5311_s10 + $0x38] sm:$0xff]  }
  0xa3   : > { %v2784_v2 = vor.u32 %v2782_v61, %v2780_v62 }
  0xa4   : > { %4646 = vmatmul.mubr.msk.bf16.gmra.mrb[12].mxu1 %vm497_vm0, %v912_v57  ;;  %v5207_v57 = vld [vmem:[%s5311_s10 + $0x8] sm:$0xff]  }
  0xa5   : > { %4649 = vmatprep.mubr.msk.bf16.mxu1 %vm497_vm0, %v914_v59  ;;  %v2774_v59 = vshrl.u32 %v5775_v27, 16 }
  0xa6   : > { %4802 = vmatmul.mubr.msk.bf16.gmra.mrb[24].mxu0 %vm497_vm0, %v5195_v58  ;;  %v2765_v58 = vsel %vm356_vm1, %v2760_v47, %v2764_v45  ;;  %v2820_v47 = vrot.slane %v2818_v51, 1 }
  0xa7   : > { %4813 = vmatprep.mubr.msk.bf16.mxu0 %vm497_vm0, %v2725_v60  ;;  %v2786_v60 = vshll.u32 %v5800_v53, 16  ;;  %v2776_v0 = vor.u32 %v2774_v59, %v2772_v25  ;;  %v3069_v25 = vld [vmem:[%s5311_s10 + $0x10] sm:$0xe] }
  0xa8   : > { %v4314_v59 = vcombine.low %v3069_v25, %v5692_v39 }
  0xa9   : > { %v2788_v7 = vrot.slane %v2786_v60, 1  ;;  %v5223_v60 = vld [vmem:[%s5311_s10 + $0x40] sm:$0xff]  }
  0xab   : > { %v2792_v36 = vor.u32 %v2790_v6, %v2788_v7 }
  0xac   : > { %4650 = vmatmul.mubr.msk.bf16.gmra.mrb[16].mxu1 %vm497_vm0, %v916_v5  ;;  %v2794_v5 = vshll.u32 %v5814_v63, 16 }
  0xad   : > { %4653 = vmatprep.mubr.msk.bf16.mxu1 %vm497_vm0, %v918_v16  ;;  %v2781_v16 = vsel %vm356_vm1, %v2776_v0, %v2780_v62  ;;  %v3082_v62 = vrot.slane %v4314_v59, 1  ;;  %v3083_v0 = vrot.slane %v5708_v32, 1  ;;  %v3087_v32 = vrot.slane %v5731_v56, 1  ;;  %v5230_v56 = vld [vmem:[%s5311_s10 + $0x68] sm:$0xff]  }
  0xae   : > { %4814 = vmatmul.mubr.msk.bf16.vlgmr.msra.gmra.mrb[0].mxu0 %vm497_vm0, %v2733_v17  ;;  %v2789_v17 = vsel %vm356_vm1, %v2784_v2, %v2788_v7  ;;  %v3085_v7 = vrot.slane %v5727_v52, 1  ;;  %v5229_v52 = vld [vmem:[%s5311_s10 + $0x60] sm:$0xff]   ;;  %v1729_v59 = vshrl.u32 %v5593_v44, 16 }
  0xaf   : > { %4842 = vmatpush3.bf16.msra.mxu0 %v5659_v9  ;;  %4817 = vmatprep.mubr.msk.bf16.mxu0 %vm497_vm0, %v2741_v14  ;;  %v2749_v9 = vsel %vm356_vm1, %v2744_v49, %v2748_v20  ;;  %v2802_v14 = vshll.u32 %v5819_v15, 16  ;;  %v5214_v20 = vld [vmem:[%s5311_s10 + $0x20] sm:$0xff]   ;;  %v3084_v39 = vsel %vm895_vm2, %v3082_v62, %v3083_v0 }
  0xb0   : > { %4843 = vmatprep.subr.bf16.mxu0 %v5203_v18  ;;  %v3088_v6 = vsel %vm895_vm2, %v3085_v7, %v3087_v32 }
  0xb1   : > { %v2804_v49 = vrot.slane %v2802_v14, 1  ;;  %v5236_v14 = vld [vmem:[%s5311_s10 + $0x48] sm:$0xff]  }
  0xb3   : > { %4844 = vmatpush3.bf16.msra.mxu0 %v5203_v18  ;;  %v2796_v18 = vrot.slane %v2794_v5, 1  ;;  %v5228_v5 = vld [vmem:[%s5311_s10 + $0x58] sm:$0xff]  }
  0xb4   : > { %4654 = vmatmul.mubr.msk.bf16.gmra.mrb[20].mxu1 %vm497_vm0, %v920_v28  ;;  %4845 = vmatprep.subr.bf16.mxu0 %v5211_v29 }
  0xb5   : > { %4657 = vmatprep.mubr.msk.bf16.mxu1 %vm497_vm0, %v922_v38  ;;  %v2800_v22 = vor.u32 %v2798_v26, %v2796_v18  ;;  %v2797_v28 = vsel %vm356_vm1, %v2792_v36, %v2796_v18  ;;  %v2806_v38 = vshrl.u32 %v5819_v15, 16  ;;  %v3091_v26 = vrot.slane %v5751_v11, 1 }
  0xb6   : > { %4818 = vmatmul.mubr.msk.bf16.gmra.mrb[4].mxu0 %vm497_vm0, %v2749_v9  ;;  %v2814_v9 = vshrl.u32 %v5833_v19, 16  ;;  %v1689_v18 = vshrl.u32 %v5236_v14, 16  ;;  %v3093_v11 = vrot.slane %v5770_v21, 1 }
  0xb7   : > { %4821 = vmatprep.mubr.msk.bf16.mxu0 %vm497_vm0, %v2757_v33  ;;  %4846 = vmatpush3.bf16.msra.mxu0 %v5211_v29  ;;  %v5234_v29 = vld [vmem:[%s6300_s1 + $0x90] sm:$0xff]   ;;  %v2805_v10 = vsel %vm356_vm1, %v2800_v22, %v2804_v49  ;;  %v2808_v35 = vor.u32 %v2806_v38, %v2804_v49  ;;  %v1705_v38 = vshrl.u32 %v5565_v30, 16 }
  0xb8   : > { %4847 = vmatprep.subr.bf16.mxu0 %v5220_v43  ;;  %v5231_v49 = vld [vmem:[%s5311_s10 + $0x70] sm:$0xff]  }
  0xbb   : > { %4848 = vmatpush3.bf16.msra.mxu0 %v5220_v43  ;;  %v5861_v43 = vld [vmem:[%s5311_s10 + $0x80] ss:$0 sps:$4 sm:$0x11]  }
  0xbc   : > { %4658 = vmatmul.mubr.msk.bf16.gmra.mrb[24].mxu1 %vm497_vm0, %v924_v54  ;;  %v2826_v41 = vshll.u32 %v5861_v43, 16 }
  0xbd   : > { %4669 = vmatprep.mubr.msk.bf16.mxu1 %vm497_vm0, %v5207_v57  ;;  %v2822_v57 = vshrl.u32 %v5841_v23, 16 }
  0xbe   : > { %4822 = vmatmul.mubr.msk.bf16.gmra.mrb[8].mxu0 %vm497_vm0, %v2765_v58  ;;  %v2828_v61 = vrot.slane %v2826_v41, 1  ;;  %v3103_v41 = vrot.slane %v5819_v15, 1 }
  0xbf   : > { %4825 = vmatprep.mubr.msk.bf16.mxu0 %vm497_vm0, %v2773_v42  ;;  %v2824_v42 = vor.u32 %v2822_v57, %v2820_v47 }
  0xc1   : > { %v2829_v2 = vsel %vm356_vm1, %v2824_v42, %v2828_v61  ;;  %v1733_v42 = vshll.u32 %v5607_v48, 16  ;;  %v3107_v48 = vrot.slane %v5841_v23, 1 }
  0xc4   : > { %4670 = vmatmul.mubr.msk.bf16.vlgmr.msra.gmra.mrb[0].mxu1 %vm497_vm0, %v5209_v1  ;;  %v5225_v1 = vld [vmem:[%s5311_s10 + $0x48] sm:$0xff]  }
  0xc5   : > { %4673 = vmatprep.mubr.msk.bf16.mxu1 %vm497_vm0, %v5212_v55  ;;  %4881 = vmatpush3.bf16.msra.mxu1 %v5716_v8  ;;  %v2810_v8 = vshll.u32 %v5833_v19, 16  ;;  %v5227_v55 = vld [vmem:[%s5311_s10 + $0x50] sm:$0xff]   ;;  %s5110_s10 = smul.u32 104, %s6312_s2 }
  0xc6   : > { %4826 = vmatmul.mubr.msk.bf16.gmra.mrb[12].mxu0 %vm497_vm0, %v2781_v16  ;;  %4878 = vmatprep.subr.bf16.mxu1 %v5233_v24  ;;  %v3086_v16 = vsel %vm895_vm2, %v3083_v0, %v3085_v7  ;;  %v1735_v0 = vrot.slane %v1733_v42, 1 }
  0xc7   : > { %4829 = vmatprep.mubr.msk.bf16.mxu0 %vm497_vm0, %v2789_v17  ;;  %v2812_v33 = vrot.slane %v2810_v8, 1  ;;  %v3089_v17 = vrot.slane %v5747_v4, 1  ;;  %v1691_v4 = vor.u32 %v1689_v18, %v5464_v13  ;;  %v1701_v8 = vshll.u32 %v5565_v30, 16  ;;  %s5962_s6 = scalar_lea.vmem %s6303_s4, %s5110_s10 }
  0xc8   : > { %v3094_v13 = vsel %vm895_vm2, %v3091_v26, %v3093_v11  ;;  %v3097_v30 = vrot.slane %v5796_v46, 1 }
  0xc9   : > { %4882 = vmatpush3.bf16.msra.mxu1 %v5233_v24  ;;  %v2816_v45 = vor.u32 %v2814_v9, %v2812_v33  ;;  %v2813_v54 = vsel %vm356_vm1, %v2808_v35, %v2812_v33  ;;  %v1693_v24 = vshll.u32 %v5551_v12, 16  ;;  %v3090_v36 = vsel %vm895_vm2, %v3087_v32, %v3089_v17 }
  0xca   : > { %4879 = vmatprep.subr.bf16.mxu1 %v5234_v29  ;;  %v1703_v21 = vrot.slane %v1701_v8, 1  ;;  %v3099_v33 = vrot.slane %v5800_v53, 1 }
  0xcb   : > { %v2821_v58 = vsel %vm356_vm1, %v2816_v45, %v2820_v47  ;;  %v1695_v22 = vrot.slane %v1693_v24, 1  ;;  %v1721_v47 = vshrl.u32 %v5587_v40, 16 }
  0xcc   : > { %4674 = vmatmul.mubr.msk.bf16.gmra.mrb[4].mxu1 %vm497_vm0, %v5214_v20  ;;  %v3092_v20 = vsel %vm895_vm2, %v3089_v17, %v3091_v26  ;;  %v3100_v46 = vsel %vm895_vm2, %v3097_v30, %v3099_v33 }
  0xcd   : > { %4677 = vmatprep.mubr.msk.bf16.mxu1 %vm497_vm0, %v5216_v3  ;;  %4883 = vmatpush3.bf16.msra.mxu1 %v5234_v29  ;;  %v3095_v3 = vrot.slane %v5775_v27, 1  ;;  %v1697_v29 = vshrl.u32 %v5551_v12, 16  ;;  %v1707_v27 = vor.u32 %v1705_v38, %v1703_v21 }
  0xce   : > { %4830 = vmatmul.mubr.msk.bf16.gmra.mrb[16].mxu0 %vm497_vm0, %v2797_v28  ;;  %4880 = vmatprep.subr.bf16.mxu1 %v5235_v34  ;;  %v1696_v28 = vsel %vm356_vm1, %v1691_v4, %v1695_v22 }
  0xcf   : > { %4833 = vmatprep.mubr.msk.bf16.mxu0 %vm497_vm0, %v2805_v10  ;;  %v1709_v10 = vshll.u32 %v5571_v31, 16  ;;  %v3096_v9 = vsel %vm895_vm2, %v3093_v11, %v3095_v3  ;;  %v1699_v51 = vor.u32 %v1697_v29, %v1695_v22  ;;  %v3098_v25 = vsel %vm895_vm2, %v3095_v3, %v3097_v30 }
  0xd1   : > { %4884 = vmatpush3.bf16.msra.mxu1 %v5235_v34  ;;  %v1711_v12 = vrot.slane %v1709_v10, 1  ;;  %v1717_v34 = vshll.u32 %v5587_v40, 16  ;;  %v1704_v35 = vsel %vm356_vm1, %v1699_v51, %v1703_v21  ;;  %v3101_v40 = vrot.slane %v5814_v63, 1 }
  0xd3   : > { %v1712_v45 = vsel %vm356_vm1, %v1707_v27, %v1711_v12  ;;  %v3104_v62 = vsel %vm895_vm2, %v3101_v40, %v3103_v41 }
  0xd4   : > { %4678 = vmatmul.mubr.msk.bf16.gmra.mrb[8].mxu1 %vm497_vm0, %v5218_v37  ;;  %v1713_v37 = vshrl.u32 %v5571_v31, 16 }
  0xd5   : > { %4681 = vmatprep.mubr.msk.bf16.mxu1 %vm497_vm0, %v5221_v50  ;;  %v1725_v50 = vshll.u32 %v5593_v44, 16  ;;  %v3105_v44 = vrot.slane %v5833_v19, 1  ;;  %v5245_v19 = vmov 0  }
  0xd6   : > { %4834 = vmatmul.mubr.msk.bf16.gmra.mrb[20].mxu0 %vm497_vm0, %v2813_v54  ;;  %v1719_v54 = vrot.slane %v1717_v34, 1  ;;  %v1715_v53 = vor.u32 %v1713_v37, %v1711_v12  ;;  %3933 = vst.msk [vmem:[%s5962_s6 + $0x60] sm:$0xc] %vm3481_vm4, %v5245_v19 }
  0xd7   : > { %4837 = vmatprep.mubr.msk.bf16.mxu0 %vm497_vm0, %v2821_v58  ;;  %v1727_v31 = vrot.slane %v1725_v50, 1  ;;  %3934 = vst.msk [vmem:[%s5962_s6 + $0x64] sm:$0x3] %vm3438_vm3, %v5245_v19 }
  0xd8   : > { %v1723_v57 = vor.u32 %v1721_v47, %v1719_v54  ;;  %v1720_v58 = vsel %vm356_vm1, %v1715_v53, %v1719_v54 }
  0xd9   : > { %v1731_v63 = vor.u32 %v1729_v59, %v1727_v31 }
  0xda   : > { %v1728_v61 = vsel %vm356_vm1, %v1723_v57, %v1727_v31 }
  0xdb   : > { %v1736_v15 = vsel %vm356_vm1, %v1731_v63, %v1735_v0  ;;  %vm3471_vm1 = vcmask 1045508  }
  0xdc   : > { %4682 = vmatmul.mubr.msk.bf16.gmra.mrb[12].mxu1 %vm497_vm0, %v5223_v60  ;;  %v3102_v60 = vsel %vm895_vm2, %v3099_v33, %v3101_v40 }
  0xdd   : > { %4685 = vmatprep.mubr.msk.bf16.mxu1 %vm497_vm0, %v5225_v1  ;;  %v3106_v1 = vsel %vm895_vm2, %v3103_v41, %v3105_v44 }
  0xde   : > { %4838 = vmatmul.mubr.msk.bf16.gmra.mrb[24].mxu0 %vm497_vm0, %v2829_v2  ;;  %v3108_v2 = vsel %vm895_vm2, %v3105_v44, %v3107_v48 }
  0xdf   : > { %4849 = vmatprep.mubr.msk.bf16.mxu0 %vm497_vm0, %v3084_v39  ;;  %v3109_v39 = vrot.slane %v5861_v43, 1 }
  0xe1   : > { %v3110_v7 = vsel %vm895_vm2, %v3107_v48, %v3109_v39  ;;  %vm3484_vm2 = vcmask 909312  }
  0xe4   : > { %4686 = vmatmul.mubr.msk.bf16.gmra.mrb[16].mxu1 %vm497_vm0, %v5227_v55 }
  0xe5   : > { %4689 = vmatprep.mubr.msk.bf16.mxu1 %vm497_vm0, %v5228_v5 }
  0xe6   : > { %4850 = vmatmul.mubr.msk.bf16.vlgmr.msra.gmra.mrb[0].mxu0 %vm497_vm0, %v3086_v16 }
  0xe7   : > { %4853 = vmatprep.mubr.msk.bf16.mxu0 %vm497_vm0, %v3088_v6 }
  0xec   : > { %4690 = vmatmul.mubr.msk.bf16.gmra.mrb[20].mxu1 %vm497_vm0, %v5229_v52 }
  0xed   : > { %4693 = vmatprep.mubr.msk.bf16.mxu1 %vm497_vm0, %v5230_v56 }
  0xee   : > { %4854 = vmatmul.mubr.msk.bf16.gmra.mrb[4].mxu0 %vm497_vm0, %v3090_v36 }
  0xef   : > { %4857 = vmatprep.mubr.msk.bf16.mxu0 %vm497_vm0, %v3092_v20 }
  0xf4   : > { %4694 = vmatmul.mubr.msk.bf16.gmra.mrb[24].mxu1 %vm497_vm0, %v5231_v49 }
  0xf5   : > { %4721 = vmatprep.mubr.msk.bf16.mxu1 %vm497_vm0, %v1696_v28 }
  0xf6   : > { %4858 = vmatmul.mubr.msk.bf16.gmra.mrb[8].mxu0 %vm497_vm0, %v3094_v13 }
  0xf7   : > { %4861 = vmatprep.mubr.msk.bf16.mxu0 %vm497_vm0, %v3096_v9 }
  0xfc   : > { %4722 = vmatmul.mubr.msk.bf16.vlgmr.msra.gmra.mrb[16].mxu1 %vm497_vm0, %v1704_v35 }
  0xfd   : > { %4725 = vmatprep.mubr.msk.bf16.mxu1 %vm497_vm0, %v1712_v45 }
  0xfe   : > { %4862 = vmatmul.mubr.msk.bf16.gmra.mrb[12].mxu0 %vm497_vm0, %v3098_v25 }
  0xff   : > { %4865 = vmatprep.mubr.msk.bf16.mxu0 %vm497_vm0, %v3100_v46 }
 0x104   : > { %4726 = vmatmul.mubr.msk.bf16.gmra.mrb[20].mxu1 %vm497_vm0, %v1720_v58 }
 0x105   : > { %4729 = vmatprep.mubr.msk.bf16.mxu1 %vm497_vm0, %v1728_v61 }
 0x106   : > { %4866 = vmatmul.mubr.msk.bf16.gmra.mrb[16].mxu0 %vm497_vm0, %v3102_v60 }
 0x107   : > { %4869 = vmatprep.mubr.msk.bf16.mxu0 %vm497_vm0, %v3104_v62 }
 0x10c   : > { %4730 = vmatmul.mubr.msk.bf16.gmra.mrb[24].mxu1 %vm497_vm0, %v1736_v15 }
 0x10e   : > { %4870 = vmatmul.mubr.msk.bf16.gmra.mrb[20].mxu0 %vm497_vm0, %v3106_v1 }
 0x10f   : > { %4873 = vmatprep.mubr.msk.bf16.mxu0 %vm497_vm0, %v3108_v2 }
 0x116   : > { %4874 = vmatmul.mubr.msk.bf16.gmra.mrb[24].mxu0 %vm497_vm0, %v3110_v7  ;;  %vm3470_vm0 = vcmask 1041408  }
 0x117   : > { %vm6058_vm10 = vmor %vm3470_vm0, %vm3471_vm1 }
 0x197   : > { %v4671_v23 = vpop.f32.mrb[0].mxu1 }
 0x198   : > { %v1371_v43 = vpop.f32.mrb[1].mxu1 }
 0x199   : > { %v4672_v55 = vpop.f32.mrb[2].mxu1 }
 0x19a   : > { %v1374_v32 = vpop.f32.mrb[3].mxu1 }
 0x19f   : > { %v4675_v5 = vpop.f32.mrb[4].mxu1 }
 0x1a0   : > { %v1387_v16 = vpop.f32.mrb[5].mxu1 }
 0x1a1   : > { %v4676_v6 = vpop.f32.mrb[6].mxu1 }
 0x1a2   : > { %v1390_v17 = vpop.f32.mrb[7].mxu1 }
 0x1a7   : > { %v5968_v52 = vpop.f32.mrb[8].mxu1 }
 0x1a8   : > { %v5970_v26 = vpop.f32.mrb[9].mxu1 }
 0x1a9   : > { %v5972_v56 = vpop.f32.mrb[10].mxu1 }
 0x1aa   : > { %v5974_v14 = vpop.f32.mrb[11].mxu1 }
 0x1af   : > { %v5976_v18 = vpop.f32.mrb[12].mxu1 }
 0x1b0   : > { %v5978_v24 = vpop.f32.mrb[13].mxu1 }
 0x1b1   : > { %v5980_v36 = vpop.f32.mrb[14].mxu1 }
 0x1b2   : > { %v5982_v20 = vpop.f32.mrb[15].mxu1 }
 0x1b9   : > { %v4851_v4 = vpop.f32.mrb[0].mxu0 }
 0x1ba   : > { %v4885_v22 = vadd.f32 %v4851_v4, %v4671_v23  ;;  %v3211_v11 = vpop.f32.mrb[1].mxu0 }
 0x1bb   : > { %v4886_v49 = vadd.f32 %v3211_v11, %v1371_v43  ;;  %v4852_v3 = vpop.f32.mrb[2].mxu0 }
 0x1bc   : > { %3353 = vst.msk [vmem:[#allocation2 + $0x10] sm:$0xff] %vm3350_vm5, %v4885_v22  ;;  %v4887_v8 = vadd.f32 %v4852_v3, %v4672_v55  ;;  %v3214_v29 = vpop.f32.mrb[3].mxu0 }
 0x1bd   : > { %3351 = vst.msk [vmem:[#allocation2] sm:$0xff] %vm3350_vm5, %v4886_v49  ;;  %v4888_v28 = vadd.f32 %v3214_v29, %v1374_v32 }
 0x1be   : > { %3354 = vst.msk [vmem:[#allocation2 + $0x18] sm:$0xff] %vm3350_vm5, %v4887_v8 }
 0x1bf   : > { %3352 = vst.msk [vmem:[#allocation2 + $0x8] sm:$0xff] %vm3350_vm5, %v4888_v28 }
 0x1c1   : > { %v4855_v38 = vpop.f32.mrb[4].mxu0 }
 0x1c2   : > { %v4889_v10 = vadd.f32 %v4855_v38, %v4675_v5  ;;  %v3227_v13 = vpop.f32.mrb[5].mxu0 }
 0x1c3   : > { %v3416_v9 = vld [vmem:[#allocation2 + $0x10] sm:$0xff]  ;;  %v4890_v21 = vadd.f32 %v3227_v13, %v1387_v16  ;;  %v4856_v51 = vpop.f32.mrb[6].mxu0 }
 0x1c4   : > { %v4365_v27 = vpack.c.bf16 %v3416_v9, %v3416_v9  ;;  %v3450_v12 = vmul.f32 %v3416_v9, %v3416_v9  ;;  %v3379_v30 = vld [vmem:[#allocation2] sm:$0xff]  ;;  %3357 = vst.msk [vmem:[#allocation2 + $0x30] sm:$0xff] %vm3350_vm5, %v4889_v10  ;;  %v4891_v33 = vadd.f32 %v4856_v51, %v4676_v6  ;;  %v3230_v34 = vpop.f32.mrb[7].mxu0  ;;  %v3440_v35 = vsel %vm3350_vm5, %v3416_v9, 0.0 }
 0x1c5   : > { %v4363_v37 = vpack.c.bf16 %v3379_v30, %v3379_v30  ;;  %v3404_v45 = vmul.f32 %v3379_v30, %v3379_v30  ;;  %v3417_v47 = vld [vmem:[#allocation2 + $0x18] sm:$0x3f]  ;;  %3355 = vst.msk [vmem:[#allocation2 + $0x20] sm:$0xff] %vm3350_vm5, %v4890_v21  ;;  %v4892_v50 = vadd.f32 %v3230_v34, %v1390_v17  ;;  %v3393_v46 = vsel %vm3350_vm5, %v3379_v30, 0.0 }
 0x1c6   : > { %v3427_v25 = vrot.slane %v4365_v27, 5  ;;  %v4366_v54 = vpack.c.bf16 %v3417_v47, %v3417_v47  ;;  %v3441_v53 = vsel %vm3394_vm7, %v3417_v47, 0.0  ;;  %v3380_v57 = vld [vmem:[#allocation2 + $0x8] sm:$0x3f]  ;;  %3358 = vst.msk [vmem:[#allocation2 + $0x38] sm:$0xff] %vm3350_vm5, %v4891_v33  ;;  %v3452_v31 = vsel %vm3350_vm5, %v3450_v12, 0.0 }
 0x1c7   : > { %3390 = vst.msk [vmem:[%s5962_s6] sm:$0xf] %vm3389_vm6, %v4363_v37  ;;  %v3442_v41 = vadd.f32 %v3441_v53, %v3440_v35  ;;  %v3451_v58 = vmul.f32 %v3417_v47, %v3417_v47  ;;  %v4364_v59 = vpack.c.bf16 %v3380_v57, %v3380_v57  ;;  %v3395_v60 = vsel %vm3394_vm7, %v3380_v57, 0.0 }
 0x1c8   : > { %3356 = vst.msk [vmem:[#allocation2 + $0x28] sm:$0xff] %vm3350_vm5, %v4892_v50  ;;  %v3428_v42 = vrot.slane %v3427_v25, 4  ;;  %v3429_v61 = vrot.slane %v4366_v54, 5  ;;  %v3405_v62 = vmul.f32 %v3380_v57, %v3380_v57  ;;  %v3406_v63 = vsel %vm3350_vm5, %v3404_v45, 0.0 }
 0x1c9   : > { %3436 = vst.msk [vmem:[%s5962_s6 + $0x4] sm:$0x8] %vm3435_vm8, %v3427_v25  ;;  %v3443_v0 = vrot.slane %v3442_v41, 4  ;;  %v3453_v44 = vsel %vm3394_vm7, %v3451_v58, 0.0  ;;  %v3396_v48 = vadd.f32 %v3395_v60, %v3393_v46  ;;  %v4859_v15 = vpop.f32.mrb[8].mxu0 }
 0x1ca   : > { %3392 = vst.msk [vmem:[%s5962_s6 + $0x4] sm:$0x7] %vm3391_vm11, %v4364_v59  ;;  %v3430_v1 = vsel %vm5999_vm15, %v3428_v42, %v3429_v61  ;;  %v3431_v2 = vrot.slane %v3429_v61, 4  ;;  %v3454_v39 = vadd.f32 %v3453_v44, %v3452_v31  ;;  %v3407_v7 = vsel %vm3394_vm7, %v3405_v62, 0.0  ;;  %v6014_v19 = vpop.f32.mrb[9].mxu0 }
 0x1cb   : > { %3437 = vst.msk [vmem:[%s5962_s6 + $0x8] sm:$0xf] %vm3389_vm6, %v3430_v1  ;;  %v3444_v23 = vadd.f32 %v3443_v0, %v3442_v41  ;;  %v3397_v43 = vrot.slane %v3396_v48, 4  ;;  %v3408_v55 = vadd.f32 %v3407_v7, %v3406_v63  ;;  %v3508_v32 = vld [vmem:[#allocation2 + $0x30] sm:$0xff]  ;;  %v4893_v5 = vadd.f32 %v4859_v15, %v5968_v52  ;;  %v6019_v16 = vpop.f32.mrb[10].mxu0 }
 0x1cc   : > { %3439 = vst.msk [vmem:[%s5962_s6 + $0xc] sm:$0x3] %vm3438_vm3, %v3431_v2  ;;  %v3455_v6 = vrot.slane %v3454_v39, 4  ;;  %v4369_v17 = vpack.c.bf16 %v3508_v32, %v3508_v32  ;;  %v3538_v4 = vmul.f32 %v3508_v32, %v3508_v32  ;;  %v3462_v22 = vld [vmem:[#allocation2 + $0x20] sm:$0xff]  ;;  %v6023_v11 = vpop.f32.mrb[11].mxu0  ;;  %v3528_v10 = vsel %vm3350_vm5, %v3508_v32, 0.0 }
 0x1cd   : > { %v3445_v49 = vrot.slane %v3444_v23, 2  ;;  %v3398_v3 = vadd.f32 %v3397_v43, %v3396_v48  ;;  %v3409_v8 = vrot.slane %v3408_v55, 4  ;;  %v4367_v29 = vpack.c.bf16 %v3462_v22, %v3462_v22  ;;  %v3509_v28 = vld [vmem:[#allocation2 + $0x38] sm:$0x3f]  ;;  %3361 = vst.msk [vmem:[#allocation2 + $0x50] sm:$0xff] %vm3350_vm5, %v4893_v5 }
 0x1ce   : > { %v3456_v52 = vadd.f32 %v3455_v6, %v3454_v39  ;;  %v3519_v38 = vrot.slane %v4369_v17, 7  ;;  %v3540_v13 = vsel %vm3350_vm5, %v3538_v4, 0.0  ;;  %v3486_v34 = vsel %vm3350_vm5, %v3462_v22, 0.0 }
 0x1cf   : > { %v3446_v9 = vadd.f32 %v3445_v49, %v3444_v23  ;;  %v3399_v21 = vrot.slane %v3398_v3, 2  ;;  %v3410_v51 = vadd.f32 %v3409_v8, %v3408_v55  ;;  %v3473_v27 = vrot.slane %v4367_v29, 6  ;;  %v6028_v12 = vpop.f32.mrb[16].mxu1  ;;  %v3463_v54 = vld [vmem:[#allocation2 + $0x28] sm:$0x3f] }
 0x1d0   : > { %v3457_v30 = vrot.slane %v3456_v52, 2  ;;  %v3520_v33 = vrot.slane %v3519_v38, 4  ;;  %3526 = vst.msk [vmem:[%s5962_s6 + $0x14] sm:$0xe] %vm3525_vm12, %v3519_v38  ;;  %v4370_v35 = vpack.c.bf16 %v3509_v28, %v3509_v28  ;;  %v6033_v37 = vpop.f32.mrb[17].mxu1  ;;  %v3496_v25 = vmul.f32 %v3462_v22, %v3462_v22 }
 0x1d1   : > { %v3447_v45 = vrot.slane %v3446_v9, 1  ;;  %v3400_v47 = vadd.f32 %v3399_v21, %v3398_v3  ;;  %v3411_v50 = vrot.slane %v3410_v51, 2  ;;  %3482 = vst.msk [vmem:[%s5962_s6 + $0xc] sm:$0xc] %vm3481_vm4, %v3473_v27  ;;  %v6043_v53 = vpop.f32.mrb[12].mxu0  ;;  %v6045_v57 = vpop.f32.mrb[18].mxu1  ;;  %v3539_v1 = vmul.f32 %v3509_v28, %v3509_v28 }
 0x1d2   : > { %v3458_v31 = vadd.f32 %v3457_v30, %v3456_v52  ;;  %v3474_v41 = vrot.slane %v3473_v27, 4  ;;  %v3521_v58 = vrot.slane %v4370_v35, 7  ;;  %v3529_v59 = vsel %vm3394_vm7, %v3509_v28, 0.0  ;;  %v6048_v42 = vpop.f32.mrb[13].mxu0  ;;  %v6050_v61 = vpop.f32.mrb[19].mxu1 }
 0x1d3   : > { %v3448_v60 = vadd.f32 %v3447_v45, %v3446_v9  ;;  %v3401_v62 = vrot.slane %v3400_v47, 1  ;;  %v3412_v63 = vadd.f32 %v3411_v50, %v3410_v51  ;;  %v3530_v0 = vadd.f32 %v3529_v59, %v3528_v10  ;;  %v4864_v44 = vpop.f32.mrb[14].mxu0 }
 0x1d4   : > { %v3459_v48 = vrot.slane %v3458_v31, 1  ;;  %v3522_v15 = vsel %vm6039_vm9, %v3520_v33, %v3521_v58  ;;  %v4368_v2 = vpack.c.bf16 %v3463_v54, %v3463_v54  ;;  %v3262_v39 = vpop.f32.mrb[15].mxu0  ;;  %v3487_v32 = vsel %vm3394_vm7, %v3463_v54, 0.0  ;;  %v6064_v22 = vld [vmem:[#allocation2 + $0x50] sm:$0xff] }
 0x1d5   : > { %v3402_v7 = vadd.f32 %v3401_v62, %v3400_v47  ;;  %v3413_v23 = vrot.slane %v3412_v63, 1  ;;  %3527 = vst.msk [vmem:[%s5962_s6 + $0x18] sm:$0xf] %vm3389_vm6, %v3522_v15  ;;  %v3531_v43 = vrot.slane %v3530_v0, 4  ;;  %v3541_v6 = vsel %vm3394_vm7, %v3539_v1, 0.0 }
 0x1d6   : > { %v3460_v5 = vadd.f32 %v3459_v48, %v3458_v31  ;;  %v3475_v17 = vrot.slane %v4368_v2, 6  ;;  %v3488_v4 = vadd.f32 %v3487_v32, %v3486_v34  ;;  %v3542_v29 = vadd.f32 %v3541_v6, %v3540_v13 }
 0x1d7   : > { %v3414_v49 = vadd.f32 %v3413_v23, %v3412_v63  ;;  %v6066_v3 = vadd.f32 %v3448_v60, %v3402_v7  ;;  %v3532_v8 = vadd.f32 %v3531_v43, %v3530_v0  ;;  %v4727_v28 = vpop.f32.mrb[20].mxu1  ;;  %v3497_v9 = vmul.f32 %v3463_v54, %v3463_v54 }
 0x1d8   : > { %v3476_v52 = vsel %vm6058_vm10, %v3474_v41, %v3475_v17  ;;  %v3477_v38 = vrot.slane %v3475_v17, 4  ;;  %v3489_v10 = vrot.slane %v3488_v4, 4  ;;  %v6070_v21 = vpop.f32.mrb[21].mxu1  ;;  %v3543_v30 = vrot.slane %v3542_v29, 4 }
 0x1d9   : > { %v6072_v51 = vadd.f32 %v3460_v5, %v3414_v49  ;;  %v3533_v27 = vrot.slane %v3532_v8, 2  ;;  %3483 = vst.msk [vmem:[%s5962_s6 + $0x10] sm:$0xf] %vm3389_vm6, %v3476_v52  ;;  %v4373_v33 = vpack.c.bf16 %v6064_v22, %v6064_v22  ;;  %v4867_v34 = vpop.f32.mrb[16].mxu0  ;;  %v4728_v13 = vpop.f32.mrb[22].mxu1  ;;  %v3498_v35 = vsel %vm3350_vm5, %v3496_v25, 0.0 }
 0x1da   : > { %3485 = vst.msk [vmem:[%s5962_s6 + $0x14] sm:$0x1] %vm3484_vm2, %v3477_v38  ;;  %v3490_v45 = vadd.f32 %v3489_v10, %v3488_v4  ;;  %v3499_v47 = vsel %vm3394_vm7, %v3497_v9, 0.0  ;;  %v3275_v50 = vpop.f32.mrb[17].mxu0  ;;  %v6082_v54 = vpop.f32.mrb[23].mxu1  ;;  %v3544_v31 = vadd.f32 %v3543_v30, %v3542_v29  ;;  %v4894_v62 = vadd.f32 %v6014_v19, %v5970_v26 }
 0x1db   : > { %v3500_v41 = vadd.f32 %v3499_v47, %v3498_v35  ;;  %v6084_v58 = vrot.slane %v4373_v33, 5  ;;  %v4868_v59 = vpop.f32.mrb[18].mxu0  ;;  %v4895_v25 = vadd.f32 %v6019_v16, %v5972_v56  ;;  %v3534_v0 = vadd.f32 %v3533_v27, %v3532_v8 }
 0x1dc   : > { %v3491_v60 = vrot.slane %v3490_v45, 2  ;;  %v3278_v63 = vpop.f32.mrb[19].mxu0  ;;  %v3545_v48 = vrot.slane %v3544_v31, 2  ;;  %3359 = vst.msk [vmem:[#allocation2 + $0x40] sm:$0xff] %vm3350_vm5, %v4894_v62  ;;  %v4896_v2 = vadd.f32 %v6023_v11, %v5974_v14  ;;  %v4897_v26 = vadd.f32 %v6043_v53, %v5976_v18 }
 0x1dd   : > { %v3501_v15 = vrot.slane %v3500_v41, 4  ;;  %3600 = vst.msk [vmem:[%s5962_s6 + $0x20] sm:$0x8] %vm3435_vm8, %v6084_v58  ;;  %v4898_v56 = vadd.f32 %v6048_v42, %v5978_v24  ;;  %v3613_v7 = vmul.f32 %v6064_v22, %v6064_v22  ;;  %v4899_v23 = vadd.f32 %v4864_v44, %v5980_v36 }
 0x1de   : > { %v3492_v1 = vadd.f32 %v3491_v60, %v3490_v45  ;;  %3362 = vst.msk [vmem:[#allocation2 + $0x58] sm:$0xff] %vm3350_vm5, %v4895_v25  ;;  %v3546_v19 = vadd.f32 %v3545_v48, %v3544_v31  ;;  %3360 = vst.msk [vmem:[#allocation2 + $0x48] sm:$0xff] %vm3350_vm5, %v4896_v2  ;;  %v4900_v14 = vadd.f32 %v3262_v39, %v5982_v20  ;;  %v3535_v53 = vrot.slane %v3534_v0, 1 }
 0x1df   : > { %v3502_v16 = vadd.f32 %v3501_v15, %v3500_v41  ;;  %v6104_v43 = vpop.f32.mrb[24].mxu1  ;;  %3365 = vst.msk [vmem:[#allocation2 + $0x70] sm:$0xff] %vm3350_vm5, %v4897_v26  ;;  %3363 = vst.msk [vmem:[#allocation2 + $0x60] sm:$0xff] %vm3350_vm5, %v4898_v56  ;;  %v4901_v18 = vadd.f32 %v4867_v34, %v6028_v12  ;;  %v4902_v24 = vadd.f32 %v3275_v50, %v6033_v37  ;;  %v3603_v8 = vsel %vm3350_vm5, %v6064_v22, 0.0 }
 0x1e0   : > { %v3493_v32 = vrot.slane %v3492_v1, 1  ;;  %v6112_v11 = vpop.f32.mrb[25].mxu1  ;;  %3366 = vst.msk [vmem:[#allocation2 + $0x78] sm:$0xff] %vm3350_vm5, %v4899_v23  ;;  %v4903_v36 = vadd.f32 %v4868_v59, %v6045_v57  ;;  %v4904_v44 = vadd.f32 %v3278_v63, %v6050_v61  ;;  %v3547_v17 = vrot.slane %v3546_v19, 1  ;;  %3364 = vst.msk [vmem:[#allocation2 + $0x68] sm:$0xff] %vm3350_vm5, %v4900_v14 }
 0x1e1   : > { %v3503_v42 = vrot.slane %v3502_v16, 2  ;;  %v4871_v5 = vpop.f32.mrb[20].mxu0  ;;  %v6117_v6 = vpop.f32.mrb[26].mxu1  ;;  %3369 = vst.msk [vmem:[#allocation2 + $0x90] sm:$0xff] %vm3350_vm5, %v4901_v18  ;;  %3367 = vst.msk [vmem:[#allocation2 + $0x80] sm:$0xff] %vm3350_vm5, %v4902_v24  ;;  %v3615_v29 = vsel %vm3350_vm5, %v3613_v7, 0.0  ;;  %v3536_v38 = vadd.f32 %v3535_v53, %v3534_v0 }
 0x1e2   : > { %v3494_v4 = vadd.f32 %v3493_v32, %v3492_v1  ;;  %v4905_v20 = vadd.f32 %v4871_v5, %v4727_v28  ;;  %v3291_v12 = vpop.f32.mrb[21].mxu0  ;;  %v6122_v37 = vpop.f32.mrb[27].mxu1  ;;  %3370 = vst.msk [vmem:[#allocation2 + $0x98] sm:$0xff] %vm3350_vm5, %v4903_v36  ;;  %3368 = vst.msk [vmem:[#allocation2 + $0x88] sm:$0xff] %vm3350_vm5, %v4904_v44  ;;  %v3593_v9 = vrot.slane %v6084_v58, 4 }
 0x1e3   : > { %v3504_v39 = vadd.f32 %v3503_v42, %v3502_v16  ;;  %v4906_v57 = vadd.f32 %v3291_v12, %v6070_v21  ;;  %v4872_v61 = vpop.f32.mrb[22].mxu0  ;;  %v3550_v27 = vld [vmem:[#allocation2 + $0x40] sm:$0xff]  ;;  %v3548_v21 = vadd.f32 %v3547_v17, %v3546_v19 }
 0x1e4   : > { %v3495_v49 = vadd.f32 %v3494_v4, %v6066_v3  ;;  %3373 = vst.msk [vmem:[#allocation2 + $0xb0] sm:$0xff] %vm3350_vm5, %v4905_v20  ;;  %v4907_v28 = vadd.f32 %v4872_v61, %v4728_v13  ;;  %v3294_v52 = vpop.f32.mrb[23].mxu0  ;;  %v4371_v33 = vpack.c.bf16 %v3550_v27, %v3550_v27  ;;  %v3572_v22 = vmul.f32 %v3550_v27, %v3550_v27 }
 0x1e5   : > { %v3505_v10 = vrot.slane %v3504_v39, 1  ;;  %v3585_v30 = vld [vmem:[#allocation2 + $0x58] sm:$0x3f]  ;;  %3371 = vst.msk [vmem:[#allocation2 + $0xa0] sm:$0xff] %vm3350_vm5, %v4906_v57  ;;  %v4908_v3 = vadd.f32 %v3294_v52, %v6082_v54  ;;  %v3551_v50 = vld [vmem:[#allocation2 + $0x48] sm:$0x3f] }
 0x1e6   : > { %v4374_v34 = vpack.c.bf16 %v3585_v30, %v3585_v30  ;;  %3374 = vst.msk [vmem:[#allocation2 + $0xb8] sm:$0xff] %vm3350_vm5, %v4907_v28  ;;  %v3604_v13 = vsel %vm3394_vm7, %v3585_v30, 0.0  ;;  %v3614_v45 = vmul.f32 %v3585_v30, %v3585_v30  ;;  %v6137_v47 = vadd.f32 %v3536_v38, %v3495_v49  ;;  %v3666_v59 = vld [vmem:[#allocation2 + $0x70] sm:$0xff]  ;;  %v3625_v2 = vld [vmem:[#allocation2 + $0x60] sm:$0xff] }
 0x1e7   : > { %v3506_v35 = vadd.f32 %v3505_v10, %v3504_v39  ;;  %3372 = vst.msk [vmem:[#allocation2 + $0xa8] sm:$0xff] %vm3350_vm5, %v4908_v3  ;;  %v3562_v54 = vsel %vm3350_vm5, %v3550_v27, 0.0  ;;  %v3574_v31 = vsel %vm3350_vm5, %v3572_v22, 0.0  ;;  %v4372_v58 = vpack.c.bf16 %v3551_v50, %v3551_v50  ;;  %v3667_v36 = vld [vmem:[#allocation2 + $0x78] sm:$0x3f] }
 0x1e8   : > { %3560 = vst.msk [vmem:[%s5962_s6 + $0x1c] sm:$0xf] %vm3389_vm6, %v4371_v33  ;;  %v3594_v41 = vrot.slane %v4374_v34, 5  ;;  %v3616_v62 = vsel %vm3394_vm7, %v3614_v45, 0.0  ;;  %v3563_v25 = vsel %vm3394_vm7, %v3551_v50, 0.0  ;;  %v3573_v63 = vmul.f32 %v3551_v50, %v3551_v50 }
 0x1e9   : > { %v3507_v60 = vadd.f32 %v3506_v35, %v6072_v51  ;;  %v3605_v15 = vadd.f32 %v3604_v13, %v3603_v8  ;;  %v3617_v1 = vadd.f32 %v3616_v62, %v3615_v29  ;;  %3561 = vst.msk [vmem:[%s5962_s6 + $0x20] sm:$0x7] %vm3391_vm11, %v4372_v58  ;;  %v3564_v56 = vadd.f32 %v3563_v25, %v3562_v54  ;;  %v6154_v16 = vpop.f32.mrb[24].mxu0  ;;  %v3626_v61 = vld [vmem:[#allocation2 + $0x68] sm:$0x3f] }
 0x1ea   : > { %v3595_v0 = vsel %vm5999_vm15, %v3593_v9, %v3594_v41  ;;  %v3596_v48 = vrot.slane %v3594_v41, 4  ;;  %v3575_v51 = vsel %vm3394_vm7, %v3573_v63, 0.0  ;;  %v4377_v19 = vpack.c.bf16 %v3666_v59, %v3666_v59  ;;  %v6158_v32 = vpop.f32.mrb[25].mxu0  ;;  %v6176_v41 = vld [vmem:[#allocation2 + $0x90] sm:$0xff] }
 0x1eb   : > { %3601 = vst.msk [vmem:[%s5962_s6 + $0x24] sm:$0xf] %vm3389_vm6, %v3595_v0  ;;  %v3549_v26 = vadd.f32 %v3548_v21, %v3507_v60  ;;  %v3618_v7 = vrot.slane %v3617_v1, 4  ;;  %v3576_v23 = vadd.f32 %v3575_v51, %v3574_v31  ;;  %v4375_v18 = vpack.c.bf16 %v3625_v2, %v3625_v2  ;;  %v6160_v24 = vpop.f32.mrb[26].mxu0  ;;  %v3704_v51 = vld [vmem:[#allocation2 + $0x80] sm:$0xff] }
 0x1ec   : > { %3602 = vst.msk [vmem:[%s5962_s6 + $0x28] sm:$0x3] %vm3438_vm3, %v3596_v48  ;;  %v3674_v14 = vrot.slane %v4377_v19, 7  ;;  %v6162_v44 = vpop.f32.mrb[27].mxu0  ;;  %v3606_v5 = vrot.slane %v3605_v15, 4  ;;  %v3565_v17 = vrot.slane %v3564_v56, 4  ;;  %v4378_v57 = vpack.c.bf16 %v3667_v36, %v3667_v36 }
 0x1ed   : > { %v3619_v53 = vadd.f32 %v3618_v7, %v3617_v1  ;;  %v3577_v42 = vrot.slane %v3576_v23, 4  ;;  %v3633_v4 = vrot.slane %v4375_v18, 6  ;;  %v3654_v9 = vmul.f32 %v3625_v2, %v3625_v2 }
 0x1ee   : > { %3680 = vst.msk [vmem:[%s5962_s6 + $0x30] sm:$0xe] %vm3525_vm12, %v3674_v14  ;;  %v3675_v39 = vrot.slane %v3674_v14, 4  ;;  %v3607_v29 = vadd.f32 %v3606_v5, %v3605_v15  ;;  %v3566_v28 = vadd.f32 %v3565_v17, %v3564_v56  ;;  %v3676_v52 = vrot.slane %v4378_v57, 7  ;;  %v3739_v5 = vld [vmem:[#allocation2 + $0x98] sm:$0x3f] }
 0x1ef   : > { %v3620_v20 = vrot.slane %v3619_v53, 2  ;;  %v3578_v12 = vadd.f32 %v3577_v42, %v3576_v23  ;;  %3641 = vst.msk [vmem:[%s5962_s6 + $0x28] sm:$0xc] %vm3481_vm4, %v3633_v4  ;;  %v3634_v10 = vrot.slane %v3633_v4, 4  ;;  %v4376_v27 = vpack.c.bf16 %v3626_v61, %v3626_v61 }
 0x1f0   : > { %v3682_v30 = vsel %vm3350_vm5, %v3666_v59, 0.0  ;;  %v3692_v3 = vmul.f32 %v3666_v59, %v3666_v59  ;;  %v3677_v21 = vsel %vm6039_vm9, %v3675_v39, %v3676_v52  ;;  %v3693_v33 = vmul.f32 %v3667_v36, %v3667_v36  ;;  %v3705_v39 = vld [vmem:[#allocation2 + $0x88] sm:$0x3f] }
 0x1f1   : > { %v3621_v49 = vadd.f32 %v3620_v20, %v3619_v53  ;;  %v3579_v8 = vrot.slane %v3578_v12, 2  ;;  %3681 = vst.msk [vmem:[%s5962_s6 + $0x34] sm:$0xf] %vm3389_vm6, %v3677_v21  ;;  %v3683_v35 = vsel %vm3394_vm7, %v3667_v36, 0.0  ;;  %v3635_v13 = vrot.slane %v4376_v27, 6 }
 0x1f2   : > { %v3567_v45 = vrot.slane %v3566_v28, 2  ;;  %v3644_v50 = vsel %vm3350_vm5, %v3625_v2, 0.0  ;;  %v3645_v54 = vsel %vm3394_vm7, %v3626_v61, 0.0  ;;  %v3655_v31 = vmul.f32 %v3626_v61, %v3626_v61 }
 0x1f3   : > { %v3580_v38 = vadd.f32 %v3579_v8, %v3578_v12  ;;  %v3622_v22 = vrot.slane %v3621_v49, 1  ;;  %v3656_v59 = vsel %vm3350_vm5, %v3654_v9, 0.0  ;;  %v3636_v60 = vsel %vm6058_vm10, %v3634_v10, %v3635_v13 }
 0x1f4   : > { %v3637_v62 = vrot.slane %v3635_v13, 4  ;;  %v3684_v25 = vadd.f32 %v3683_v35, %v3682_v30  ;;  %v3695_v63 = vsel %vm3394_vm7, %v3693_v33, 0.0  ;;  %3642 = vst.msk [vmem:[%s5962_s6 + $0x2c] sm:$0xf] %vm3389_vm6, %v3636_v60  ;;  %v3646_v0 = vadd.f32 %v3645_v54, %v3644_v50 }
 0x1f5   : > { %v3581_v34 = vrot.slane %v3580_v38, 1  ;;  %v3657_v48 = vsel %vm3394_vm7, %v3655_v31, 0.0  ;;  %v3623_v15 = vadd.f32 %v3622_v22, %v3621_v49  ;;  %v4381_v56 = vpack.c.bf16 %v6176_v41, %v6176_v41 }
 0x1f6   : > { %3643 = vst.msk [vmem:[%s5962_s6 + $0x30] sm:$0x1] %vm3484_vm2, %v3637_v62  ;;  %v3658_v2 = vadd.f32 %v3657_v48, %v3656_v59  ;;  %v3568_v19 = vadd.f32 %v3567_v45, %v3566_v28  ;;  %v3647_v7 = vrot.slane %v3646_v0, 4  ;;  %v3694_v23 = vsel %vm3350_vm5, %v3692_v3, 0.0  ;;  %v6197_v3 = vld [vmem:[#allocation2 + $0xb0] sm:$0xff] }
 0x1f7   : > { %v3582_v58 = vadd.f32 %v3581_v34, %v3580_v38  ;;  %v3746_v53 = vrot.slane %v4381_v56, 5  ;;  %v3685_v42 = vrot.slane %v3684_v25, 4  ;;  %v3696_v36 = vadd.f32 %v3695_v63, %v3694_v23  ;;  %v3821_v23 = vld [vmem:[#allocation2 + $0xb8] sm:$0x3f] }
 0x1f8   : > { %v3659_v18 = vrot.slane %v3658_v2, 4  ;;  %v3608_v17 = vrot.slane %v3607_v29, 2  ;;  %v3569_v4 = vrot.slane %v3568_v19, 1  ;;  %v3648_v20 = vadd.f32 %v3647_v7, %v3646_v0 }
 0x1f9   : > { %v3583_v1 = vadd.f32 %v3582_v58, %v3549_v26  ;;  %v4379_v26 = vpack.c.bf16 %v3704_v51, %v3704_v51  ;;  %3754 = vst.msk [vmem:[%s5962_s6 + $0x3c] sm:$0x8] %vm3435_vm8, %v3746_v53  ;;  %v3747_v57 = vrot.slane %v3746_v53, 4  ;;  %v4382_v61 = vpack.c.bf16 %v3739_v5, %v3739_v5 }
 0x1fa   : > { %v3660_v12 = vadd.f32 %v3659_v18, %v3658_v2  ;;  %v3686_v49 = vadd.f32 %v3685_v42, %v3684_v25  ;;  %v3697_v8 = vrot.slane %v3696_v36, 4  ;;  %v3609_v28 = vadd.f32 %v3608_v17, %v3607_v29 }
 0x1fb   : > { %v6190_v14 = vadd.f32 %v3623_v15, %v3583_v1  ;;  %3714 = vst.msk [vmem:[%s5962_s6 + $0x38] sm:$0xf] %vm3389_vm6, %v4379_v26  ;;  %v3748_v52 = vrot.slane %v4382_v61, 5  ;;  %v4380_v38 = vpack.c.bf16 %v3705_v39, %v3705_v39  ;;  %v3570_v10 = vadd.f32 %v3569_v4, %v3568_v19  ;;  %v3779_v15 = vld [vmem:[#allocation2 + $0xa0] sm:$0xff] }
 0x1fc   : > { %v3649_v9 = vrot.slane %v3648_v20, 2  ;;  %v3661_v27 = vrot.slane %v3660_v12, 2  ;;  %v3717_v30 = vsel %vm3394_vm7, %v3705_v39, 0.0  ;;  %v3716_v21 = vsel %vm3350_vm5, %v3704_v51, 0.0 }
 0x1fd   : > { %v3749_v33 = vsel %vm5999_vm15, %v3747_v57, %v3748_v52  ;;  %v3750_v22 = vrot.slane %v3748_v52, 4  ;;  %v3758_v34 = vsel %vm3394_vm7, %v3739_v5, 0.0  ;;  %3715 = vst.msk [vmem:[%s5962_s6 + $0x3c] sm:$0x7] %vm3391_vm11, %v4380_v38  ;;  %v3687_v29 = vrot.slane %v3686_v49, 2 }
 0x1fe   : > { %v3698_v35 = vadd.f32 %v3697_v8, %v3696_v36  ;;  %3755 = vst.msk [vmem:[%s5962_s6 + $0x40] sm:$0xf] %vm3389_vm6, %v3749_v33  ;;  %v3718_v13 = vadd.f32 %v3717_v30, %v3716_v21  ;;  %v3727_v45 = vmul.f32 %v3705_v39, %v3705_v39  ;;  %v3757_v50 = vsel %vm3350_vm5, %v6176_v41, 0.0  ;;  %v3780_v39 = vld [vmem:[#allocation2 + $0xa8] sm:$0x3f] }
 0x1ff   : > { %v3726_v54 = vmul.f32 %v3704_v51, %v3704_v51  ;;  %3756 = vst.msk [vmem:[%s5962_s6 + $0x44] sm:$0x3] %vm3438_vm3, %v3750_v22  ;;  %v3768_v31 = vmul.f32 %v3739_v5, %v3739_v5  ;;  %v4385_v58 = vpack.c.bf16 %v6197_v3, %v6197_v3  ;;  %v3650_v59 = vadd.f32 %v3649_v9, %v3648_v20 }
 0x200   : > { %v3662_v60 = vadd.f32 %v3661_v27, %v3660_v12  ;;  %v3759_v62 = vadd.f32 %v3758_v34, %v3757_v50  ;;  %v3610_v25 = vrot.slane %v3609_v28, 1  ;;  %v3767_v63 = vmul.f32 %v6176_v41, %v6176_v41 }
 0x201   : > { %v3719_v0 = vrot.slane %v3718_v13, 4  ;;  %v3828_v48 = vrot.slane %v4385_v58, 7  ;;  %v3571_v1 = vadd.f32 %v3570_v10, %v6137_v47  ;;  %v3729_v2 = vsel %vm3394_vm7, %v3727_v45, 0.0 }
 0x202   : > { %v6217_v56 = vadd.f32 %v3687_v29, %v3686_v49  ;;  %v3699_v51 = vrot.slane %v3698_v35, 2  ;;  %v3728_v19 = vsel %vm3350_vm5, %v3726_v54, 0.0  ;;  %v3770_v7 = vsel %vm3394_vm7, %v3768_v31, 0.0 }
 0x203   : > { %3834 = vst.msk [vmem:[%s5962_s6 + $0x4c] sm:$0xe] %vm3525_vm12, %v3828_v48  ;;  %v3651_v18 = vrot.slane %v3650_v59, 1  ;;  %v3663_v53 = vrot.slane %v3662_v60, 1  ;;  %v3760_v41 = vrot.slane %v3759_v62, 4  ;;  %v4383_v42 = vpack.c.bf16 %v3779_v15, %v3779_v15 }
 0x204   : > { %v3611_v36 = vadd.f32 %v3610_v25, %v3609_v28  ;;  %v3769_v47 = vsel %vm3350_vm5, %v3767_v63, 0.0  ;;  %v3720_v26 = vadd.f32 %v3719_v0, %v3718_v13  ;;  %v3730_v5 = vadd.f32 %v3729_v2, %v3728_v19 }
 0x205   : > { %v3771_v17 = vadd.f32 %v3770_v7, %v3769_v47  ;;  %v3829_v4 = vrot.slane %v3828_v48, 4  ;;  %v3787_v20 = vrot.slane %v4383_v42, 6  ;;  %v4386_v12 = vpack.c.bf16 %v3821_v23, %v3821_v23 }
 0x206   : > { %v3689_v57 = vrot.slane %v6217_v56, 1  ;;  %v3700_v61 = vadd.f32 %v3699_v51, %v3698_v35  ;;  %v3612_v49 = vadd.f32 %v3611_v36, %v3571_v1  ;;  %v3652_v8 = vadd.f32 %v3651_v18, %v3650_v59 }
 0x207   : > { %v3664_v52 = vadd.f32 %v3663_v53, %v3662_v60  ;;  %v3761_v38 = vadd.f32 %v3760_v41, %v3759_v62  ;;  %3795 = vst.msk [vmem:[%s5962_s6 + $0x44] sm:$0xc] %vm3481_vm4, %v3787_v20  ;;  %v3830_v28 = vrot.slane %v4386_v12, 7  ;;  %v3721_v10 = vrot.slane %v3720_v26, 2 }
 0x208   : > { %v3731_v9 = vrot.slane %v3730_v5, 4  ;;  %v3788_v27 = vrot.slane %v3787_v20, 4  ;;  %v4384_v30 = vpack.c.bf16 %v3780_v39, %v3780_v39  ;;  %v3772_v21 = vrot.slane %v3771_v17, 4 }
 0x209   : > { %v3808_v33 = vmul.f32 %v3779_v15, %v3779_v15  ;;  %v3831_v22 = vsel %vm6039_vm9, %v3829_v4, %v3830_v28  ;;  %v3799_v34 = vsel %vm3394_vm7, %v3780_v39, 0.0  ;;  %v3798_v29 = vsel %vm3350_vm5, %v3779_v15, 0.0 }
 0x20a   : > { %3835 = vst.msk [vmem:[%s5962_s6 + $0x50] sm:$0xf] %vm3389_vm6, %v3831_v22  ;;  %v3837_v35 = vsel %vm3394_vm7, %v3821_v23, 0.0  ;;  %v3847_v13 = vmul.f32 %v3821_v23, %v3821_v23  ;;  %v3789_v45 = vrot.slane %v4384_v30, 6  ;;  %v3836_v50 = vsel %vm3350_vm5, %v6197_v3, 0.0 }
 0x20b   : > { %v3846_v54 = vmul.f32 %v6197_v3, %v6197_v3  ;;  %v3800_v46 = vadd.f32 %v3799_v34, %v3798_v29  ;;  %v3809_v31 = vmul.f32 %v3780_v39, %v3780_v39  ;;  %v3722_v58 = vadd.f32 %v3721_v10, %v3720_v26 }
 0x20c   : > { %v3732_v59 = vadd.f32 %v3731_v9, %v3730_v5  ;;  %v3790_v60 = vsel %vm6058_vm10, %v3788_v27, %v3789_v45  ;;  %v3791_v62 = vrot.slane %v3789_v45, 4  ;;  %v3762_v25 = vrot.slane %v3761_v38, 2 }
 0x20d   : > { %v3810_v63 = vsel %vm3350_vm5, %v3808_v33, 0.0  ;;  %v3838_v0 = vadd.f32 %v3837_v35, %v3836_v50  ;;  %3796 = vst.msk [vmem:[%s5962_s6 + $0x48] sm:$0xf] %vm3389_vm6, %v3790_v60  ;;  %v3811_v48 = vsel %vm3394_vm7, %v3809_v31, 0.0  ;;  %v3773_v15 = vadd.f32 %v3772_v21, %v3771_v17 }
 0x20e   : > { %v3849_v1 = vsel %vm3394_vm7, %v3847_v13, 0.0  ;;  %3797 = vst.msk [vmem:[%s5962_s6 + $0x4c] sm:$0x1] %vm3484_vm2, %v3791_v62  ;;  %v3812_v3 = vadd.f32 %v3811_v48, %v3810_v63  ;;  %v4909_v2 = vadd.f32 %v6154_v16, %v6104_v43  ;;  %v3848_v55 = vsel %vm3350_vm5, %v3846_v54, 0.0 }
 0x20f   : > { %v3801_v51 = vrot.slane %v3800_v46, 4  ;;  %v4910_v19 = vadd.f32 %v6158_v32, %v6112_v11  ;;  %v4911_v7 = vadd.f32 %v6160_v24, %v6117_v6  ;;  %v3723_v23 = vrot.slane %v3722_v58, 1 }
 0x210   : > { %v3733_v18 = vrot.slane %v3732_v59, 2  ;;  %v3813_v53 = vrot.slane %v3812_v3, 4  ;;  %3377 = vst.msk [vmem:[#allocation2 + $0xd0] sm:$0xff] %vm3350_vm5, %v4909_v2  ;;  %v4912_v41 = vadd.f32 %v6162_v44, %v6122_v37  ;;  %v3701_v42 = vrot.slane %v3700_v61, 1 }
 0x211   : > { %v3839_v36 = vrot.slane %v3838_v0, 4  ;;  %v3850_v43 = vadd.f32 %v3849_v1, %v3848_v55  ;;  %3375 = vst.msk [vmem:[#allocation2 + $0xc0] sm:$0xff] %vm3350_vm5, %v4910_v19  ;;  %3378 = vst.msk [vmem:[#allocation2 + $0xd8] sm:$0xff] %vm3350_vm5, %v4911_v7  ;;  %v3653_v16 = vadd.f32 %v3652_v8, %v3612_v49  ;;  %v3665_v11 = vadd.f32 %v3664_v52, %v6190_v14 }
 0x212   : > { %3376 = vst.msk [vmem:[#allocation2 + $0xc8] sm:$0xff] %vm3350_vm5, %v4912_v41  ;;  %v6261_v6 = vadd.f32 %v3762_v25, %v3761_v38  ;;  %v3802_v32 = vadd.f32 %v3801_v51, %v3800_v46  ;;  %v3814_v24 = vadd.f32 %v3813_v53, %v3812_v3  ;;  %v3690_v47 = vadd.f32 %v3689_v57, %v6217_v56 }
 0x213   : > { %v3774_v26 = vrot.slane %v3773_v15, 2  ;;  %v3724_v37 = vadd.f32 %v3723_v23, %v3722_v58  ;;  %v3734_v44 = vadd.f32 %v3733_v18, %v3732_v59  ;;  %v3702_v5 = vadd.f32 %v3701_v42, %v3700_v61 }
 0x214   : > { %v3840_v17 = vadd.f32 %v3839_v36, %v3838_v0  ;;  %v3851_v4 = vrot.slane %v3850_v43, 4  ;;  %v3691_v20 = vadd.f32 %v3690_v47, %v3653_v16  ;;  %v3764_v12 = vrot.slane %v6261_v6, 1 }
 0x215   : > { %v3703_v39 = vadd.f32 %v3702_v5, %v3665_v11  ;;  %v3803_v49 = vrot.slane %v3802_v32, 2  ;;  %v3815_v8 = vrot.slane %v3814_v24, 2  ;;  %v6265_v14 = vadd.f32 %v3774_v26, %v3773_v15 }
 0x216   : > { %v3725_v52 = vadd.f32 %v3724_v37, %v3691_v20  ;;  %v3735_v38 = vrot.slane %v3734_v44, 1  ;;  %v3841_v9 = vrot.slane %v3840_v17, 2  ;;  %v3852_v61 = vadd.f32 %v3851_v4, %v3850_v43 }
 0x217   : > { %v3892_v28 = vld [vmem:[#allocation2 + $0xd0] sm:$0xff]  ;;  %v3804_v35 = vadd.f32 %v3803_v49, %v3802_v32  ;;  %v3816_v13 = vadd.f32 %v3815_v8, %v3814_v24  ;;  %v3776_v42 = vrot.slane %v6265_v14, 1  ;;  %v3765_v11 = vadd.f32 %v3764_v12, %v6261_v6 }
 0x218   : > { %v4389_v10 = vpack.c.bf16 %v3892_v28, %v3892_v28  ;;  %v3858_v56 = vld [vmem:[#allocation2 + $0xc0] sm:$0xff]  ;;  %v3893_v57 = vld [vmem:[#allocation2 + $0xd8] sm:$0x3f]  ;;  %v3921_v27 = vmul.f32 %v3892_v28, %v3892_v28  ;;  %v3911_v33 = vsel %vm3350_vm5, %v3892_v28, 0.0  ;;  %v3736_v51 = vadd.f32 %v3735_v38, %v3734_v44 }
 0x219   : > { %v4387_v30 = vpack.c.bf16 %v3858_v56, %v3858_v56  ;;  %v4390_v22 = vpack.c.bf16 %v3893_v57, %v3893_v57  ;;  %v3912_v34 = vsel %vm3394_vm7, %v3893_v57, 0.0  ;;  %v3859_v29 = vld [vmem:[#allocation2 + $0xc8] sm:$0x3f]  ;;  %v3922_v50 = vmul.f32 %v3893_v57, %v3893_v57 }
 0x21a   : > { %v3900_v21 = vrot.slane %v4389_v10, 5  ;;  %v3913_v45 = vadd.f32 %v3912_v34, %v3911_v33  ;;  %v3923_v46 = vsel %vm3350_vm5, %v3921_v27, 0.0  ;;  %v3880_v31 = vmul.f32 %v3858_v56, %v3858_v56 }
 0x21b   : > { %3868 = vst.msk [vmem:[%s5962_s6 + $0x54] sm:$0xf] %vm3389_vm6, %v4387_v30  ;;  %v3902_v58 = vrot.slane %v4390_v22, 5  ;;  %v3924_v60 = vsel %vm3394_vm7, %v3922_v50, 0.0  ;;  %v4388_v62 = vpack.c.bf16 %v3859_v29, %v3859_v29  ;;  %v3871_v25 = vsel %vm3394_vm7, %v3859_v29, 0.0 }
 0x21c   : > { %v3901_v54 = vrot.slane %v3900_v21, 4  ;;  %3908 = vst.msk [vmem:[%s5962_s6 + $0x58] sm:$0x8] %vm3435_vm8, %v3900_v21  ;;  %v3914_v59 = vrot.slane %v3913_v45, 4  ;;  %v3870_v63 = vsel %vm3350_vm5, %v3858_v56, 0.0  ;;  %v3925_v15 = vadd.f32 %v3924_v60, %v3923_v46 }
 0x21d   : > { %v3904_v48 = vrot.slane %v3902_v58, 4  ;;  %v3805_v1 = vrot.slane %v3804_v35, 1  ;;  %3869 = vst.msk [vmem:[%s5962_s6 + $0x58] sm:$0x7] %vm3391_vm11, %v4388_v62  ;;  %v3872_v2 = vadd.f32 %v3871_v25, %v3870_v63  ;;  %v3881_v55 = vmul.f32 %v3859_v29, %v3859_v29 }
 0x21e   : > { %v3903_v0 = vsel %vm5999_vm15, %v3901_v54, %v3902_v58  ;;  %v3915_v3 = vadd.f32 %v3914_v59, %v3913_v45  ;;  %v3842_v19 = vadd.f32 %v3841_v9, %v3840_v17  ;;  %v3853_v7 = vrot.slane %v3852_v61, 2 }
 0x21f   : > { %3909 = vst.msk [vmem:[%s5962_s6 + $0x5c] sm:$0xf] %vm3389_vm6, %v3903_v0  ;;  %v3926_v23 = vrot.slane %v3925_v15, 4  ;;  %v3882_v18 = vsel %vm3350_vm5, %v3880_v31, 0.0  ;;  %v3873_v53 = vrot.slane %v3872_v2, 4  ;;  %v3883_v41 = vsel %vm3394_vm7, %v3881_v55, 0.0 }
 0x220   : > { %3910 = vst.msk [vmem:[%s5962_s6 + $0x60] sm:$0x3] %vm3438_vm3, %v3904_v48  ;;  %v3916_v40 = vrot.slane %v3915_v3, 2  ;;  %v3817_v36 = vrot.slane %v3816_v13, 1  ;;  %v3884_v16 = vadd.f32 %v3883_v41, %v3882_v18  ;;  %v3806_v32 = vadd.f32 %v3805_v1, %v3804_v35 }
 0x221   : > { %v3927_v43 = vadd.f32 %v3926_v23, %v3925_v15  ;;  %v3874_v24 = vadd.f32 %v3873_v53, %v3872_v2  ;;  %v3737_v47 = vadd.f32 %v3736_v51, %v3703_v39  ;;  %v3854_v26 = vadd.f32 %v3853_v7, %v3852_v61 }
 0x222   : > { %v3885_v44 = vrot.slane %v3884_v16, 4  ;;  %v3843_v5 = vrot.slane %v3842_v19, 1  ;;  %v3766_v17 = vadd.f32 %v3765_v11, %v3725_v52  ;;  %v3917_v4 = vadd.f32 %v3916_v40, %v3915_v3 }
 0x223   : > { %v3928_v37 = vrot.slane %v3927_v43, 2  ;;  %v3875_v20 = vrot.slane %v3874_v24, 2  ;;  %v3777_v49 = vadd.f32 %v3776_v42, %v6265_v14  ;;  %v3818_v8 = vadd.f32 %v3817_v36, %v3816_v13 }
 0x224   : > { %v3886_v28 = vadd.f32 %v3885_v44, %v3884_v16  ;;  %v3807_v38 = vadd.f32 %v3806_v32, %v3766_v17  ;;  %v3855_v56 = vrot.slane %v3854_v26, 1  ;;  %v3844_v9 = vadd.f32 %v3843_v5, %v3842_v19 }
 0x225   : > { %v3876_v10 = vadd.f32 %v3875_v20, %v3874_v24  ;;  %v3778_v57 = vadd.f32 %v3777_v49, %v3737_v47  ;;  %v3929_v6 = vadd.f32 %v3928_v37, %v3927_v43  ;;  %v3918_v39 = vrot.slane %v3917_v4, 1 }
 0x226   : > { %v3887_v12 = vrot.slane %v3886_v28, 2  ;;  %v3845_v52 = vadd.f32 %v3844_v9, %v3807_v38  ;;  %v3856_v33 = vadd.f32 %v3855_v56, %v3854_v26 }
 0x227   : > { %v3877_v61 = vrot.slane %v3876_v10, 1  ;;  %v3819_v27 = vadd.f32 %v3818_v8, %v3778_v57  ;;  %v3930_v22 = vrot.slane %v3929_v6, 1  ;;  %v3919_v14 = vadd.f32 %v3918_v39, %v3917_v4 }
 0x228   : > { %v3888_v30 = vadd.f32 %v3887_v12, %v3886_v28 }
 0x229   : > { %v3878_v21 = vadd.f32 %v3877_v61, %v3876_v10  ;;  %v3857_v35 = vadd.f32 %v3856_v33, %v3819_v27  ;;  %v3931_v50 = vadd.f32 %v3930_v22, %v3929_v6 }
 0x22a   : > { %v3889_v34 = vrot.slane %v3888_v30, 1 }
 0x22b   : > { %v3879_v29 = vadd.f32 %v3878_v21, %v3845_v52 }
 0x22c   : > { %v3890_v13 = vadd.f32 %v3889_v34, %v3888_v30 }
 0x22d   : > { %v3920_v45 = vadd.f32 %v3919_v14, %v3879_v29 }
 0x22e   : > { %v3891_v54 = vadd.f32 %v3890_v13, %v3857_v35 }
 0x22f   : > { %3935 = vst.msk [vmem:[%s235_s11] sm:$0x1] %vm3484_vm2, %v3920_v45 }
 0x230   : > { %v3932_v46 = vadd.f32 %v3931_v50, %v3891_v54 }
 0x232   : > { %3936 = vst.msk [vmem:[%s235_s11 + $0x1] sm:$0x1] %vm3484_vm2, %v3932_v46 }
 0x233 PF: > { %s16_s18 = sadd.s32 1, %s5243_s18  }
 0x234   : > { %p13_p4 = scmp.ge.s32.totalorder %s16_s18, 4  }
 0x236   :  { %15 = sbr.rel (!%p13_p4) target bundleno = 1 (0x1), region = 86 }

// kernel: tile.43
= control target key start
LH: loop header
LB: loop body
LE: loop exit
PB: predicated region body
PF: predicated region fallthrough
CT: control target
= control target key end

     0   :  { %s28_s0 = inlined_call_operand.vmem [shape: f32[8], index: 0, kind: input, shape index: {}]   ;;  %s29_s1 = inlined_call_operand.vmem [shape: f32[12,8], index: 1, kind: output, shape index: {}]  }
   0x1   :  { %v4_v0 = vld [vmem:[%s28_s0] ss:$0 sm:$0xff] }
   0x2   :  { %5 = vst [vmem:[%s29_s1] sm:$0xff] %v4_v0  ;;  %8 = vst [vmem:[%s29_s1 + $0x8] sm:$0xff] %v4_v0 }

// kernel: tile.44
= control target key start
LH: loop header
LB: loop body
LE: loop exit
PB: predicated region body
PF: predicated region fallthrough
CT: control target
= control target key end

     0   :  { %s99_s10 = smov 88   ;;  %s100_s11 = smov 72   ;;  %vm3_vm0 = vcmask 64512   ;;  %vm9_vm1 = vcmask 786112   ;;  %vm15_vm2 = vcmask 720512   ;;  %vm21_vm3 = vcmask 654912   ;;  %s159_s0 = inlined_call_operand.vmem [shape: f32[12,8], index: 0, kind: input, shape index: {}]   ;;  %s160_s1 = inlined_call_operand.vmem [shape: f32[1,96], index: 1, kind: output, shape index: {}]  }
   0x1   :  { %v77_v0 = vld [vmem:[%s159_s0 + $0xb] sm:$0x1]   ;;  %v79_v1 = vld [vmem:[%s159_s0 + $0x9] sm:$0x1]   ;;  %v78_v2 = vld [vmem:[%s159_s0 + $0xa] sm:$0x1]  }
   0x2   :  { %7 = vrot.lane.b32.xlu0 %v77_v0, %s99_s10  ;;  %19 = vrot.lane.b32.xlu1 %v79_v1, %s100_s11  ;;  %v80_v3 = vld [vmem:[%s159_s0 + $0x8] sm:$0x1]   ;;  %s101_s16 = smov 80   ;;  %s102_s17 = smov 64   ;;  %v81_v4 = vld [vmem:[%s159_s0 + $0x7] sm:$0x1]  }
   0x3   :  { %v2_v5 = vld [vmem:[%s159_s0] sm:$0x1]   ;;  %v82_v6 = vld [vmem:[%s159_s0 + $0x6] sm:$0x1]   ;;  %s103_s24 = smov 56   ;;  %s104_s25 = smov 48  }
   0x4   :  { %4 = vst.msk [vmem:[#allocation0] sm:$0x1] %vm3_vm0, %v2_v5   ;;  %v83_v7 = vld [vmem:[%s159_s0 + $0x5] sm:$0x1]   ;;  %v84_v8 = vld [vmem:[%s159_s0 + $0x4] sm:$0x1]  }
   0x5   :  { %s105_s30 = smov 40   ;;  %s106_s2 = smov 32   ;;  %v85_v9 = vld [vmem:[%s159_s0 + $0x3] sm:$0x1]   ;;  %v86_v10 = vld [vmem:[%s159_s0 + $0x2] sm:$0x1]  }
   0x6   :  { %13 = vrot.lane.b32.xlu0 %v78_v2, %s101_s16  ;;  %25 = vrot.lane.b32.xlu1 %v80_v3, %s102_s17  ;;  %s107_s7 = smov 24   ;;  %s108_s8 = smov 16   ;;  %v87_v11 = vld [vmem:[%s159_s0 + $0x1] sm:$0x1]   ;;  %vm27_vm4 = vcmask 589312   ;;  %vm33_vm5 = vcmask 523712  }
   0x7   :  { %s109_s0 = smov 8   ;;  %vm39_vm6 = vcmask 458112   ;;  %vm45_vm7 = vcmask 392512   ;;  %vm51_vm8 = vcmask 326912   ;;  %vm57_vm9 = vcmask 261312  }
   0x8   :  { %vm63_vm10 = vcmask 195712   ;;  %vm69_vm11 = vcmask 130112  }
   0xa   :  { %31 = vrot.lane.b32.xlu0 %v81_v4, %s103_s24  ;;  %37 = vrot.lane.b32.xlu1 %v82_v6, %s104_s25 }
   0xe   :  { %43 = vrot.lane.b32.xlu0 %v83_v7, %s105_s30  ;;  %49 = vrot.lane.b32.xlu1 %v84_v8, %s106_s2 }
  0x12   :  { %55 = vrot.lane.b32.xlu0 %v85_v9, %s107_s7  ;;  %61 = vrot.lane.b32.xlu1 %v86_v10, %s108_s8 }
  0x16   :  { %67 = vrot.lane.b32.xlu0 %v87_v11, %s109_s0 }
  0x74   :  { %v8_v12 = vpop.permute.xlu0 %7   ;;  %v20_v13 = vpop.permute.xlu1 %19  }
  0x75   :  { %10 = vst.msk [vmem:[#allocation0] sm:$0x1] %vm9_vm1, %v8_v12  }
  0x78   :  { %v14_v14 = vpop.permute.xlu0 %13   ;;  %v26_v15 = vpop.permute.xlu1 %25  }
  0x79   :  { %16 = vst.msk [vmem:[#allocation0] sm:$0x1] %vm15_vm2, %v14_v14  }
  0x7a   :  { %22 = vst.msk [vmem:[#allocation0] sm:$0x1] %vm21_vm3, %v20_v13  }
  0x7b   :  { %28 = vst.msk [vmem:[#allocation0] sm:$0x1] %vm27_vm4, %v26_v15  }
  0x7c   :  { %v32_v16 = vpop.permute.xlu0 %31   ;;  %v38_v17 = vpop.permute.xlu1 %37  }
  0x7d   :  { %34 = vst.msk [vmem:[#allocation0] sm:$0x1] %vm33_vm5, %v32_v16  }
  0x7e   :  { %40 = vst.msk [vmem:[#allocation0] sm:$0x1] %vm39_vm6, %v38_v17  }
  0x80   :  { %v44_v18 = vpop.permute.xlu0 %43   ;;  %v50_v19 = vpop.permute.xlu1 %49  }
  0x81   :  { %46 = vst.msk [vmem:[#allocation0] sm:$0x1] %vm45_vm7, %v44_v18  }
  0x82   :  { %52 = vst.msk [vmem:[#allocation0] sm:$0x1] %vm51_vm8, %v50_v19  }
  0x84   :  { %v56_v20 = vpop.permute.xlu0 %55   ;;  %v62_v21 = vpop.permute.xlu1 %61  }
  0x85   :  { %58 = vst.msk [vmem:[#allocation0] sm:$0x1] %vm57_vm9, %v56_v20  }
  0x86   :  { %64 = vst.msk [vmem:[#allocation0] sm:$0x1] %vm63_vm10, %v62_v21  }
  0x88   :  { %v68_v22 = vpop.permute.xlu0 %67  }
  0x89   :  { %70 = vst.msk [vmem:[#allocation0] sm:$0x1] %vm69_vm11, %v68_v22  }
  0x90   :  { %v74_v23 = vld [vmem:[#allocation0] sm:$0x1] }
  0x91   :  { %76 = vst [vmem:[%s160_s1] sm:$0x1] %v74_v23 }

// kernel: ucontracting_forward.6
= control target key start
LH: loop header
LB: loop body
LE: loop exit
PB: predicated region body
PF: predicated region fallthrough
CT: control target
= control target key end

     0   :  { %s5411_s18 = smov 0   ;;  %s6763_s0 = inlined_call_operand.vmem [shape: bf16[2,204,112], index: 0, kind: input, shape index: {}]   ;;  %s6764_s1 = inlined_call_operand.vmem [shape: bf16[9,112,96], index: 1, kind: input, shape index: {}]   ;;  %s6765_s2 = inlined_call_operand.vmem [shape: f32[1,112], index: 2, kind: input, shape index: {}]   ;;  %s6766_s3 = inlined_call_operand.vmem [shape: f32[1,112], index: 3, kind: input, shape index: {}]   ;;  %s6767_s4 = inlined_call_operand.vmem [shape: bf16[2,152,96], index: 4, kind: output, shape index: {0}]   ;;  %s6768_s5 = inlined_call_operand.vmem [shape: f32[2,2,96], index: 5, kind: output, shape index: {1}]  }
   0x1 LB: > { %s3722_s19 = sadd.s32 4294967295, %s5376_s18   ;;  %p3726_p0 = scmp.ge.s32.totalorder %s5376_s18, 1  ;;  %s5376_s18 = sphi %s5411_s18, %s16_s18  }
   0x2   : > { %p190_p1 = scmp.lt.s32.totalorder %s5376_s18, 3 }
   0x4   : > { %p191_p2 = pnand %p3726_p0, %p190_p1 }
   0x5   : > { %v5256_v0 = vld [vmem:[%s6764_s1 + $0xe0] sm:$0xff] (!%p191_p2)   ;;  %v5378_v1 = vmov (!%p191_p2), 0.0   ;;  %v5257_v2 = vld [vmem:[%s6764_s1 + $0x38] sm:$0xff] (!%p191_p2)   ;;  %v5258_v3 = vld [vmem:[%s6764_s1 + $0xe8] sm:$0xff] (!%p191_p2)   ;;  %vm5379_vm0 = vmmov (!%p191_p2), 0   ;;  %p222_p3 = scmp.lt.s32.totalorder (!%p191_p2), %s3722_s19, 1 }
   0x6   : > { %194 = sbr.rel (%p191_p2) target bundleno = 686 (0x2ae), region = 36  ;;  %4610 = vmatprep.subr.bf16.mxu0 (!%p191_p2), %v5378_v1  ;;  %4378 = vmatprep.subr.bf16.mxu1 (!%p191_p2), %v5378_v1  ;;  %v5259_v4 = vld [vmem:[%s6764_s1 + $0x40] sm:$0xff] (!%p191_p2)   ;;  %v5260_v5 = vld [vmem:[%s6764_s1 + $0xf0] sm:$0xff] (!%p191_p2)   ;;  %v5261_v6 = vld [vmem:[%s6764_s1 + $0x48] sm:$0xff] (!%p191_p2)   ;;  %vm3204_vm1 = vcmask (!%p191_p2), 781312   ;;  %v5380_v9 = vmov (!%p191_p2), 0  }
   0x7   : > { %4611 = vmatpush3.bf16.msra.mxu0 (!%p191_p2), %v5256_v0  ;;  %4392 = vmatprep.mubr.msk.bf16.mxu1 (!%p191_p2), %vm5379_vm0, %v5378_v1  ;;  %v5262_v7 = vld [vmem:[%s6764_s1 + $0xf8] sm:$0xff] (!%p191_p2)   ;;  %v5263_v8 = vld [vmem:[%s6764_s1 + $0x50] sm:$0xff] (!%p191_p2)   ;;  %v5264_v10 = vld [vmem:[%s6764_s1 + $0x100] sm:$0xff] (!%p191_p2)   ;;  %vm485_vm2 = vcmask (!%p191_p2), 912384   ;;  %vm619_vm3 = vsmask.f32 (!%p191_p2), 7424 }
   0x8   : > { %4379 = vmatpush3.bf16.msra.mxu1 (!%p191_p2), %v5257_v2  ;;  %4612 = vmatprep.subr.bf16.mxu0 (!%p191_p2), %v5378_v1  ;;  %v5265_v13 = vld [vmem:[%s6764_s1 + $0x58] sm:$0xff] (!%p191_p2)   ;;  %v5483_v18 = vld [vmem:[%s6765_s2] ss:$0 sm:$0xff] (!%p191_p2)  ;;  %v5266_v27 = vld [vmem:[%s6764_s1 + $0x108] sm:$0xff] (!%p191_p2)   ;;  %vm749_vm4 = vcmask (!%p191_p2), 916480   ;;  %vm2344_vm6 = vcmask (!%p191_p2), 1045504  }
   0x9   : > { %4380 = vmatprep.subr.bf16.mxu1 (!%p191_p2), %v5378_v1  ;;  %4624 = vmatprep.mubr.msk.bf16.mxu0 (!%p191_p2), %vm5379_vm0, %v5378_v1  ;;  %v5490_v20 = vld [vmem:[%s6766_s3] ss:$0 sm:$0xff] (!%p191_p2)  ;;  %v5268_v35 = vld [vmem:[%s6764_s1 + $0x110] sm:$0xff] (!%p191_p2)   ;;  %v5269_v47 = vld [vmem:[%s6764_s1 + $0x68] sm:$0xff] (!%p191_p2)   ;;  %vm1695_vm5 = vsmask.f32 (!%p191_p2), 4352 }
   0xa   : > { %v5267_v30 = vld [vmem:[%s6764_s1 + $0x60] sm:$0xff] (!%p191_p2)   ;;  %vm1108_vm7 = vcmask (!%p191_p2), 1046528   ;;  %vm1438_vm8 = vcmask (!%p191_p2), 1044480   ;;  %vm2601_vm9 = vsmask.f32 (!%p191_p2), 5376  ;;  %vm3172_vm10 = vcmask (!%p191_p2), 785408  }
   0xb   : > { %4613 = vmatpush3.bf16.msra.mxu0 (!%p191_p2), %v5258_v3  ;;  %vm3206_vm11 = vcmask (!%p191_p2), 779264   ;;  %vm3238_vm12 = vcmask (!%p191_p2), 1041408   ;;  %vm3239_vm13 = vcmask (!%p191_p2), 1045508   ;;  %vm3247_vm14 = vcmask (!%p191_p2), 781314  }
   0xc   : > { %4381 = vmatpush3.bf16.msra.mxu1 (!%p191_p2), %v5259_v4  ;;  %4614 = vmatprep.subr.bf16.mxu0 (!%p191_p2), %v5378_v1  ;;  %vm6551_vm15 = vmor (!%p191_p2), %vm3238_vm12, %vm3239_vm13 }
   0xd   : > { %s6772_s19 = smov (!%p222_p3, %s3722_s19), 1  ;;  %4382 = vmatprep.subr.bf16.mxu1 %v5378_v1 }
   0xe   : > { %s5243_s30 = smul.u32 104, %s6772_s19 }
   0xf   : > { %s5244_s8 = smul.u32 76, %s6772_s19  ;;  %4615 = vmatpush3.bf16.msra.mxu0 %v5260_v5 }
  0x10   : > { %4383 = vmatpush3.bf16.msra.mxu1 %v5261_v6  ;;  %4616 = vmatprep.subr.bf16.mxu0 %v5378_v1  ;;  %s5466_s20 = scalar_lea.vmem %s6763_s0, %s5243_s30 }
  0x11   : > { %s5457_s13 = scalar_lea.vmem %s6767_s4, %s5244_s8  ;;  %4384 = vmatprep.subr.bf16.mxu1 %v5378_v1  ;;  %v4158_v11 = vld [vmem:[%s5466_s20] sm:$0xff]   ;;  %v4205_v12 = vld [vmem:[%s5466_s20 + $0x8] sm:$0xff]   ;;  %v4206_v19 = vld [vmem:[%s5466_s20 + $0x10] sm:$0xff]  }
  0x12   : > { %3632 = vst.msk [vmem:[%s5457_s13 + $0x48] sm:$0xf] %vm3204_vm1, %v5380_v9  ;;  %v4159_v14 = vunpack.c.l.bf16 %v4158_v11  ;;  %v4160_v15 = vunpack.c.h.bf16 %v4158_v11  ;;  %v4163_v16 = vunpack.c.l.bf16 %v4205_v12  ;;  %v4164_v17 = vunpack.c.h.bf16 %v4205_v12  ;;  %v4207_v34 = vld [vmem:[%s5466_s20 + $0x18] sm:$0xff]   ;;  %v4208_v43 = vld [vmem:[%s5466_s20 + $0x20] sm:$0xff]   ;;  %v4209_v55 = vld [vmem:[%s5466_s20 + $0x28] sm:$0xff]  }
  0x13   : > { %4617 = vmatpush3.bf16.msra.mxu0 %v5262_v7  ;;  %v4167_v21 = vunpack.c.l.bf16 %v4206_v19  ;;  %v4168_v22 = vunpack.c.h.bf16 %v4206_v19  ;;  %v4171_v42 = vunpack.c.l.bf16 %v4207_v34  ;;  %v4172_v51 = vunpack.c.h.bf16 %v4207_v34  ;;  %v4210_v60 = vld [vmem:[%s5466_s20 + $0x30] sm:$0xff]  }
  0x14   : > { %4385 = vmatpush3.bf16.msra.mxu1 %v5263_v8  ;;  %4618 = vmatprep.subr.bf16.mxu0 %v5378_v1  ;;  %v296_v23 = vmul.f32 %v4159_v14, %v5483_v18  ;;  %v297_v24 = vmul.f32 %v4160_v15, %v5483_v18  ;;  %v298_v25 = vmul.f32 %v4163_v16, %v5483_v18  ;;  %v4175_v58 = vunpack.c.l.bf16 %v4208_v43  ;;  %v4211_v16 = vld [vmem:[%s5466_s20 + $0x38] sm:$0xff]  }
  0x15   : > { %4386 = vmatprep.subr.bf16.mxu1 %v5378_v1  ;;  %v299_v26 = vmul.f32 %v4164_v17, %v5483_v18  ;;  %v300_v28 = vmul.f32 %v4167_v21, %v5483_v18  ;;  %v301_v29 = vmul.f32 %v4168_v22, %v5483_v18  ;;  %v302_v56 = vmul.f32 %v4171_v42, %v5483_v18 }
  0x16   : > { %v329_v31 = vadd.f32 %v5490_v20, %v296_v23  ;;  %v330_v32 = vadd.f32 %v5490_v20, %v297_v24  ;;  %v331_v33 = vadd.f32 %v5490_v20, %v298_v25  ;;  %v303_v57 = vmul.f32 %v4172_v51, %v5483_v18 }
  0x17   : > { %4619 = vmatpush3.bf16.msra.mxu0 %v5264_v10  ;;  %v332_v36 = vadd.f32 %v5490_v20, %v299_v26  ;;  %v333_v37 = vadd.f32 %v5490_v20, %v300_v28  ;;  %v334_v38 = vadd.f32 %v5490_v20, %v301_v29  ;;  %v4176_v59 = vunpack.c.h.bf16 %v4208_v43 }
  0x18   : > { %4387 = vmatpush3.bf16.msra.mxu1 %v5265_v13  ;;  %4620 = vmatprep.subr.bf16.mxu0 %v5378_v1  ;;  %v355_v39 = vmax.f32 %v329_v31, 0.0  ;;  %v356_v40 = vmax.f32 %v330_v32, 0.0  ;;  %v357_v41 = vmax.f32 %v331_v33, 0.0  ;;  %v4179_v61 = vunpack.c.l.bf16 %v4209_v55 }
  0x19   : > { %4388 = vmatprep.subr.bf16.mxu1 %v5378_v1  ;;  %v358_v44 = vmax.f32 %v332_v36, 0.0  ;;  %v359_v45 = vmax.f32 %v333_v37, 0.0  ;;  %v360_v46 = vmax.f32 %v334_v38, 0.0  ;;  %v4180_v62 = vunpack.c.h.bf16 %v4209_v55 }
  0x1a   : > { %v4107_v48 = vpack.c.bf16 %v355_v39, %v355_v39  ;;  %v4108_v49 = vpack.c.bf16 %v356_v40, %v356_v40  ;;  %v4109_v50 = vpack.c.bf16 %v357_v41, %v357_v41  ;;  %v4183_v63 = vunpack.c.l.bf16 %v4210_v60 }
  0x1b   : > { %4621 = vmatpush3.bf16.msra.mxu0 %v5266_v27  ;;  %v4110_v52 = vpack.c.bf16 %v358_v44, %v358_v44  ;;  %v4111_v53 = vpack.c.bf16 %v359_v45, %v359_v45  ;;  %v4112_v54 = vpack.c.bf16 %v360_v46, %v360_v46  ;;  %v335_v0 = vadd.f32 %v5490_v20, %v302_v56  ;;  %v4212_v44 = vld [vmem:[%s5466_s20 + $0x40] sm:$0xff]  }
  0x1c   : > { %4389 = vmatpush3.bf16.msra.mxu1 %v5267_v30  ;;  %4622 = vmatprep.subr.bf16.mxu0 %v5378_v1  ;;  %486 = vst.msk [vmem:[#allocation3] sm:$0xf] %vm485_vm2, %v4107_v48  ;;  %487 = vst.msk [vmem:[#allocation3 + $0x4] sm:$0xf] %vm485_vm2, %v4108_v49  ;;  %v336_v2 = vadd.f32 %v5490_v20, %v303_v57  ;;  %v304_v3 = vmul.f32 %v4175_v58, %v5483_v18  ;;  %v4184_v5 = vunpack.c.h.bf16 %v4210_v60  ;;  %v5278_v56 = vld [vmem:[%s6764_s1] sm:$0xff]   ;;  %v5275_v60 = vld [vmem:[%s6764_s1 + $0x118] sm:$0xff]  }
  0x1d   : > { %4390 = vmatprep.subr.bf16.mxu1 %v5378_v1  ;;  %488 = vst.msk [vmem:[#allocation3 + $0x8] sm:$0xf] %vm485_vm2, %v4109_v50  ;;  %489 = vst.msk [vmem:[#allocation3 + $0xc] sm:$0xf] %vm485_vm2, %v4110_v52  ;;  %v305_v4 = vmul.f32 %v4176_v59, %v5483_v18  ;;  %v361_v6 = vmax.f32 %v335_v0, 0.0  ;;  %v306_v10 = vmul.f32 %v4179_v61, %v5483_v18  ;;  %v4187_v33 = vunpack.c.l.bf16 %v4211_v16 }
  0x1e   : > { %490 = vst.msk [vmem:[#allocation3 + $0x10] sm:$0xf] %vm485_vm2, %v4111_v53  ;;  %491 = vst.msk [vmem:[#allocation3 + $0x14] sm:$0xf] %vm485_vm2, %v4112_v54  ;;  %v362_v7 = vmax.f32 %v336_v2, 0.0  ;;  %v337_v8 = vadd.f32 %v5490_v20, %v304_v3  ;;  %v307_v11 = vmul.f32 %v4180_v62, %v5483_v18  ;;  %v308_v12 = vmul.f32 %v4183_v63, %v5483_v18 }
  0x1f   : > { %4623 = vmatpush3.bf16.msra.mxu0 %v5268_v35  ;;  %v338_v9 = vadd.f32 %v5490_v20, %v305_v4  ;;  %v4113_v13 = vpack.c.bf16 %v361_v6, %v361_v6  ;;  %v309_v21 = vmul.f32 %v4184_v5, %v5483_v18  ;;  %v5558_v30 = vadd.f32 %v5490_v20, %v306_v10 }
  0x20   : > { %4391 = vmatpush3.bf16.msra.mxu1 %v5269_v47  ;;  %4668 = vmatprep.subr.bf16.mxu0 %v5378_v1  ;;  %v4114_v14 = vpack.c.bf16 %v362_v7, %v362_v7  ;;  %v363_v15 = vmax.f32 %v337_v8, 0.0  ;;  %v5561_v31 = vadd.f32 %v5490_v20, %v307_v11  ;;  %v5564_v32 = vadd.f32 %v5490_v20, %v308_v12 }
  0x21   : > { %4436 = vmatprep.subr.bf16.mxu1 %v5378_v1  ;;  %492 = vst.msk [vmem:[#allocation3 + $0x18] sm:$0xf] %vm485_vm2, %v4113_v13  ;;  %v364_v26 = vmax.f32 %v338_v9, 0.0  ;;  %v5582_v42 = vadd.f32 %v5490_v20, %v309_v21  ;;  %v4188_v43 = vunpack.c.h.bf16 %v4211_v16  ;;  %v310_v57 = vmul.f32 %v4187_v33, %v5483_v18 }
  0x22   : > { %493 = vst.msk [vmem:[#allocation3 + $0x1c] sm:$0xf] %vm485_vm2, %v4114_v14  ;;  %v4115_v25 = vpack.c.bf16 %v363_v15, %v363_v15  ;;  %v4191_v63 = vunpack.c.l.bf16 %v4212_v44  ;;  %v4192_v5 = vunpack.c.h.bf16 %v4212_v44  ;;  %v5283_v15 = vld [vmem:[%s6764_s1 + $0x8] sm:$0xff]   ;;  %v366_v21 = vmax.f32 %v5561_v31, 0.0 }
  0x23   : > { %v513_v17 = vld [vmem:[#allocation3] sm:$0xf]  ;;  %v514_v19 = vld [vmem:[#allocation3 + $0x4] sm:$0xf]  ;;  %v4116_v41 = vpack.c.bf16 %v364_v26, %v364_v26  ;;  %v311_v62 = vmul.f32 %v4188_v43, %v5483_v18  ;;  %v343_v16 = vadd.f32 %v5490_v20, %v310_v57  ;;  %v367_v31 = vmax.f32 %v5564_v32, 0.0 }
  0x24   : > { %v5545_v22 = vcombine.low %v513_v17, %v514_v19  ;;  %v5547_v23 = vld [vmem:[#allocation3 + $0x8] sm:$0xff]   ;;  %v1346_v24 = vld [vmem:[#allocation3 + $0x4] sm:$0x8]  ;;  %494 = vst.msk [vmem:[#allocation3 + $0x20] sm:$0xf] %vm485_vm2, %v4115_v25  ;;  %v365_v19 = vmax.f32 %v5558_v30, 0.0 }
  0x25   : > { %v5551_v27 = vld [vmem:[#allocation3 + $0x8] sm:$0xf]  ;;  %v5553_v28 = vld [vmem:[#allocation3 + $0xc] sm:$0xf]  ;;  %v5555_v29 = vld [vmem:[#allocation3 + $0x10] sm:$0xf] }
  0x26   : > { %v621_v34 = vshrl.u32 %v5545_v22, 16  ;;  %v623_v35 = vshll.u32 %v5545_v22, 16  ;;  %v628_v36 = vshll.u32 %v5547_v23, 16  ;;  %v5570_v37 = vcombine.low %v1346_v24, %v5551_v27  ;;  %v5572_v38 = vld [vmem:[#allocation3 + $0x10] sm:$0xff]   ;;  %495 = vst.msk [vmem:[#allocation3 + $0x24] sm:$0xf] %vm485_vm2, %v4116_v41 }
  0x27   : > { %v5577_v39 = vcombine.low %v5553_v28, %v5555_v29  ;;  %v5579_v40 = vld [vmem:[#allocation3 + $0x14] sm:$0xf]  ;;  %v632_v51 = vshrl.u32 %v5547_v23, 16  ;;  %v636_v52 = vshll.u32 %v5572_v38, 16  ;;  %v640_v9 = vshrl.u32 %v5572_v38, 16  ;;  %v5276_v30 = vld [vmem:[%s6764_s1 + $0x120] sm:$0xff]  }
  0x28   : > { %v625_v45 = vrot.slane %v623_v35, 1  ;;  %v630_v46 = vrot.slane %v628_v36, 1  ;;  %v1697_v47 = vshrl.u32 %v5570_v37, 16  ;;  %v1700_v48 = vshll.u32 %v5570_v37, 16  ;;  %v5599_v61 = vld [vmem:[#allocation3 + $0x18] sm:$0xf] }
  0x29   : > { %v1705_v49 = vshrl.u32 %v5577_v39, 16  ;;  %v1708_v50 = vshll.u32 %v5577_v39, 16  ;;  %v5605_v3 = vcombine.low %v5579_v40, %v5599_v61  ;;  %v5607_v4 = vld [vmem:[#allocation3 + $0x1c] sm:$0xf]  ;;  %v638_v8 = vrot.slane %v636_v52, 1  ;;  %v5280_v32 = vld [vmem:[%s6764_s1 + $0x128] sm:$0xff]  }
  0x2a   : > { %v626_v53 = vor.u32 %v625_v45, %v621_v34  ;;  %v1699_v54 = vrot.slane %v1697_v47, 3  ;;  %v1702_v55 = vrot.slane %v1700_v48, 4  ;;  %v634_v7 = vor.u32 %v632_v51, %v630_v46  ;;  %v5617_v13 = vld [vmem:[#allocation3 + $0x18] sm:$0xff]   ;;  %v5290_v47 = vld [vmem:[%s6764_s1 + $0x10] sm:$0xff]   ;;  %v5658_v52 = vld [vmem:[%s5466_s20 + $0x48] sm:$0xff]  }
  0x2b   : > { %v1707_v58 = vrot.slane %v1705_v49, 3  ;;  %v1710_v59 = vrot.slane %v1708_v50, 4  ;;  %v5611_v10 = vld [vmem:[#allocation3 + $0x20] sm:$0xf]  ;;  %v1714_v11 = vshrl.u32 %v5605_v3, 16  ;;  %v1717_v12 = vshll.u32 %v5605_v3, 16 }
  0x2c   : > { %v631_v0 = vsel %vm619_vm3, %v626_v53, %v630_v46  ;;  %v1703_v2 = vor.u32 %v1702_v55, %v1699_v54  ;;  %v5621_v14 = vcombine.low %v5607_v4, %v5611_v10  ;;  %v344_v24 = vadd.f32 %v5490_v20, %v311_v62 }
  0x2d   : > { %4393 = vmatmul.mubr.msk.bf16.vlgmr.msra.gmra.mrb[0].mxu1 %vm749_vm4, %v631_v0  ;;  %v1711_v6 = vor.u32 %v1710_v59, %v1707_v58  ;;  %v1716_v25 = vrot.slane %v1714_v11, 3  ;;  %v1719_v26 = vrot.slane %v1717_v12, 4  ;;  %v4117_v35 = vpack.c.bf16 %v365_v19, %v365_v19  ;;  %v5284_v12 = vld [vmem:[%s6764_s1 + $0x130] sm:$0xff]  }
  0x2e   : > { %4396 = vmatprep.mubr.msk.bf16.mxu1 %vm5379_vm0, %v5378_v1  ;;  %4437 = vmatpush3.bf16.msra.mxu1 %v5278_v56  ;;  %v1723_v33 = vshrl.u32 %v5621_v14, 16  ;;  %v1726_v34 = vshll.u32 %v5621_v14, 16  ;;  %v312_v36 = vmul.f32 %v4191_v63, %v5483_v18  ;;  %v313_v41 = vmul.f32 %v4192_v5, %v5483_v18  ;;  %v5676_v63 = vld [vmem:[#allocation3 + $0x20] sm:$0xff]  }
  0x2f   : > { %v1712_v17 = vsel %vm1695_vm5, %v1703_v2, %v1711_v6  ;;  %4438 = vmatprep.subr.bf16.mxu1 %v5378_v1  ;;  %v639_v43 = vsel %vm619_vm3, %v634_v7, %v638_v8  ;;  %v5645_v44 = vor.u32 %v1719_v26, %v1716_v25  ;;  %v644_v45 = vshll.u32 %v5617_v13, 16  ;;  %496 = vst.msk [vmem:[#allocation3 + $0x28] sm:$0xf] %vm485_vm2, %v4117_v35  ;;  %v5299_v35 = vld [vmem:[%s6764_s1 + $0x20] sm:$0xff]  }
  0x30   : > { %4625 = vmatmul.mubr.msk.bf16.vlgmr.msra.gmra.mrb[0].mxu0 %vm749_vm4, %v1712_v17  ;;  %v4118_v46 = vpack.c.bf16 %v366_v21, %v366_v21  ;;  %v1725_v48 = vrot.slane %v1723_v33, 3  ;;  %v1728_v49 = vrot.slane %v1726_v34, 4  ;;  %v4119_v50 = vpack.c.bf16 %v367_v31, %v367_v31 }
  0x31   : > { %4669 = vmatpush3.bf16.msra.mxu0 %v5275_v60  ;;  %4628 = vmatprep.mubr.msk.bf16.mxu0 %vm5379_vm0, %v5378_v1  ;;  %v368_v51 = vmax.f32 %v5582_v42, 0.0  ;;  %v1721_v53 = vsel %vm1695_vm5, %v1711_v6, %v5645_v44  ;;  %v642_v54 = vor.u32 %v640_v9, %v638_v8  ;;  %v369_v55 = vmax.f32 %v343_v16, 0.0  ;;  %v5295_v42 = vld [vmem:[%s6764_s1 + $0x18] sm:$0xff]   ;;  %v5671_v60 = vld [vmem:[%s5466_s20 + $0x50] sm:$0xff]   ;;  %v5679_v6 = vld [vmem:[#allocation3 + $0x24] sm:$0xf] }
  0x32   : > { %4670 = vmatprep.subr.bf16.mxu0 %v5378_v1  ;;  %4439 = vmatpush3.bf16.msra.mxu1 %v5283_v15  ;;  %497 = vst.msk [vmem:[#allocation3 + $0x2c] sm:$0xf] %vm485_vm2, %v4118_v46  ;;  %v370_v56 = vmax.f32 %v344_v24, 0.0  ;;  %498 = vst.msk [vmem:[#allocation3 + $0x30] sm:$0xf] %vm485_vm2, %v4119_v50  ;;  %v345_v58 = vadd.f32 %v5490_v20, %v312_v36  ;;  %v346_v59 = vadd.f32 %v5490_v20, %v313_v41 }
  0x33   : > { %4440 = vmatprep.subr.bf16.mxu1 %v5378_v1  ;;  %v4120_v57 = vpack.c.bf16 %v368_v51, %v368_v51  ;;  %v646_v62 = vrot.slane %v644_v45, 1  ;;  %v4121_v0 = vpack.c.bf16 %v369_v55, %v369_v55  ;;  %v4195_v5 = vunpack.c.l.bf16 %v5658_v52 }
  0x34   : > { %v4122_v2 = vpack.c.bf16 %v370_v56, %v370_v56  ;;  %v371_v7 = vmax.f32 %v345_v58, 0.0  ;;  %v372_v8 = vmax.f32 %v346_v59, 0.0  ;;  %v5683_v9 = vor.u32 %v1728_v49, %v1725_v48 }
  0x35   : > { %4671 = vmatpush3.bf16.msra.mxu0 %v5276_v30  ;;  %4397 = vmatmul.mubr.msk.bf16.gmra.mrb[4].mxu1 %vm749_vm4, %v639_v43  ;;  %499 = vst.msk [vmem:[#allocation3 + $0x34] sm:$0xf] %vm485_vm2, %v4120_v57  ;;  %500 = vst.msk [vmem:[#allocation3 + $0x38] sm:$0xf] %vm485_vm2, %v4121_v0  ;;  %v314_v11 = vmul.f32 %v4195_v5, %v5483_v18  ;;  %v648_v15 = vshrl.u32 %v5617_v13, 16  ;;  %v4196_v19 = vunpack.c.h.bf16 %v5658_v52  ;;  %v652_v24 = vshll.u32 %v5676_v63, 16 }
  0x36   : > { %4672 = vmatprep.subr.bf16.mxu0 %v5378_v1  ;;  %4400 = vmatprep.mubr.msk.bf16.mxu1 %vm5379_vm0, %v5378_v1  ;;  %501 = vst.msk [vmem:[#allocation3 + $0x3c] sm:$0xf] %vm485_vm2, %v4122_v2  ;;  %v4123_v16 = vpack.c.bf16 %v371_v7, %v371_v7  ;;  %v4124_v17 = vpack.c.bf16 %v372_v8, %v372_v8  ;;  %v5699_v25 = vld [vmem:[#allocation3 + $0x28] sm:$0xf]  ;;  %v4199_v33 = vunpack.c.l.bf16 %v5671_v60  ;;  %v4200_v45 = vunpack.c.h.bf16 %v5671_v60  ;;  %v5302_v52 = vld [vmem:[%s6764_s1 + $0x28] sm:$0xff]   ;;  %v5291_v2 = vld [vmem:[%s6764_s1 + $0x140] sm:$0xff]  }
  0x37   : > { %4441 = vmatpush3.bf16.msra.mxu1 %v5290_v47  ;;  %v647_v21 = vsel %vm619_vm3, %v642_v54, %v646_v62  ;;  %v347_v26 = vadd.f32 %v5490_v20, %v314_v11  ;;  %v5705_v34 = vcombine.low %v5679_v6, %v5699_v25  ;;  %v1730_v31 = vsel %vm1695_vm5, %v5645_v44, %v5683_v9  ;;  %v5287_v44 = vld [vmem:[%s6764_s1 + $0x138] sm:$0xff]  }
  0x38   : > { %4629 = vmatmul.mubr.msk.bf16.gmra.mrb[4].mxu0 %vm749_vm4, %v1721_v53  ;;  %4442 = vmatprep.subr.bf16.mxu1 %v5378_v1  ;;  %502 = vst.msk [vmem:[#allocation3 + $0x40] sm:$0xf] %vm485_vm2, %v4123_v16  ;;  %503 = vst.msk [vmem:[#allocation3 + $0x44] sm:$0xf] %vm485_vm2, %v4124_v17  ;;  %v315_v48 = vmul.f32 %v4196_v19, %v5483_v18  ;;  %v650_v49 = vor.u32 %v648_v15, %v646_v62  ;;  %v654_v50 = vrot.slane %v652_v24, 1  ;;  %v5305_v15 = vld [vmem:[%s6764_s1 + $0x30] sm:$0xff]  }
  0x39   : > { %4673 = vmatpush3.bf16.msra.mxu0 %v5280_v32  ;;  %4632 = vmatprep.mubr.msk.bf16.mxu0 %vm5379_vm0, %v5378_v1  ;;  %v5707_v30 = vld [vmem:[#allocation3 + $0x2c] sm:$0xf]  ;;  %v5719_v41 = vld [vmem:[#allocation3 + $0x30] sm:$0xf]  ;;  %v373_v43 = vmax.f32 %v347_v26, 0.0  ;;  %v1732_v46 = vshrl.u32 %v5705_v34, 16  ;;  %v316_v53 = vmul.f32 %v4199_v33, %v5483_v18  ;;  %v317_v59 = vmul.f32 %v4200_v45, %v5483_v18 }
  0x3a   : > { %4674 = vmatprep.subr.bf16.mxu0 %v5378_v1  ;;  %v5717_v36 = vld [vmem:[#allocation3 + $0x28] sm:$0xff]   ;;  %v1735_v47 = vshll.u32 %v5705_v34, 16  ;;  %v5731_v32 = vcombine.low %v5707_v30, %v5719_v41  ;;  %v348_v5 = vadd.f32 %v5490_v20, %v315_v48  ;;  %v655_v7 = vsel %vm619_vm3, %v650_v49, %v654_v50  ;;  %v5294_v19 = vld [vmem:[%s6764_s1 + $0x148] sm:$0xff]  }
  0x3b   : > { %4443 = vmatpush3.bf16.msra.mxu1 %v5295_v42  ;;  %v4125_v51 = vpack.c.bf16 %v373_v43, %v373_v43  ;;  %v1734_v54 = vrot.slane %v1732_v46, 3  ;;  %v660_v42 = vshll.u32 %v5717_v36, 16  ;;  %v656_v8 = vshrl.u32 %v5676_v63, 16 }
  0x3c   : > { %4444 = vmatprep.subr.bf16.mxu1 %v5378_v1  ;;  %v1737_v55 = vrot.slane %v1735_v47, 4  ;;  %v5741_v56 = vld [vmem:[#allocation3 + $0x34] sm:$0xf]  ;;  %v5743_v57 = vld [vmem:[#allocation3 + $0x38] sm:$0xf]  ;;  %v1741_v62 = vshrl.u32 %v5731_v32, 16 }
  0x3d   : > { %4401 = vmatmul.mubr.msk.bf16.gmra.mrb[8].mxu1 %vm749_vm4, %v647_v21  ;;  %4675 = vmatpush3.bf16.msra.mxu0 %v5284_v12  ;;  %v5747_v58 = vld [vmem:[#allocation3 + $0x30] sm:$0xff]   ;;  %504 = vst.msk [vmem:[#allocation3 + $0x48] sm:$0xf] %vm485_vm2, %v4125_v51  ;;  %v1744_v0 = vshll.u32 %v5731_v32, 16  ;;  %v5765_v11 = vcombine.low %v5741_v56, %v5743_v57  ;;  %v349_v12 = vadd.f32 %v5490_v20, %v316_v53  ;;  %v662_v16 = vrot.slane %v660_v42, 1 }
  0x3e   : > { %4404 = vmatprep.mubr.msk.bf16.mxu1 %vm5379_vm0, %v5378_v1  ;;  %4676 = vmatprep.subr.bf16.mxu0 %v5378_v1  ;;  %v1738_v60 = vor.u32 %v1737_v55, %v1734_v54  ;;  %v668_v17 = vshll.u32 %v5747_v58, 16  ;;  %v350_v21 = vadd.f32 %v5490_v20, %v317_v59  ;;  %v1743_v26 = vrot.slane %v1741_v62, 3  ;;  %v5787_v47 = vld [vmem:[#allocation3 + $0x3c] sm:$0xf] }
  0x3f   : > { %4445 = vmatpush3.bf16.msra.mxu1 %v5299_v35  ;;  %v1746_v33 = vrot.slane %v1744_v0, 4  ;;  %v374_v35 = vmax.f32 %v348_v5, 0.0  ;;  %v658_v43 = vor.u32 %v656_v8, %v654_v50  ;;  %v1750_v45 = vshrl.u32 %v5765_v11, 16  ;;  %v5791_v48 = vld [vmem:[#allocation3 + $0x44] sm:$0xf] }
  0x40   : > { %4633 = vmatmul.mubr.msk.bf16.gmra.mrb[8].mxu0 %vm749_vm4, %v1730_v31  ;;  %4446 = vmatprep.subr.bf16.mxu1 %v5378_v1  ;;  %v1739_v24 = vsel %vm1695_vm5, %v5683_v9, %v1738_v60  ;;  %v5781_v31 = vld [vmem:[%s5466_s20 + $0x58] sm:$0xff]   ;;  %v375_v46 = vmax.f32 %v349_v12, 0.0  ;;  %v5789_v9 = vld [vmem:[#allocation3 + $0x40] sm:$0xf]  ;;  %v1753_v49 = vshll.u32 %v5765_v11, 16  ;;  %v376_v51 = vmax.f32 %v350_v21, 0.0 }
  0x41   : > { %4636 = vmatprep.mubr.msk.bf16.mxu0 %vm5379_vm0, %v5378_v1  ;;  %4677 = vmatpush3.bf16.msra.mxu0 %v5287_v44  ;;  %v4126_v44 = vpack.c.bf16 %v374_v35, %v374_v35  ;;  %v1747_v53 = vor.u32 %v1746_v33, %v1743_v26  ;;  %v5803_v54 = vcombine.low %v5787_v47, %v5789_v9  ;;  %v4203_v55 = vunpack.c.l.bf16 %v5781_v31 }
  0x42   : > { %4678 = vmatprep.subr.bf16.mxu0 %v5378_v1  ;;  %v663_v42 = vsel %vm619_vm3, %v658_v43, %v662_v16  ;;  %v664_v59 = vshrl.u32 %v5717_v36, 16  ;;  %v4128_v62 = vpack.c.bf16 %v376_v51, %v376_v51  ;;  %v670_v5 = vrot.slane %v668_v17, 1  ;;  %v5840_v43 = vld [vmem:[#allocation3 + $0x40] sm:$0xff]  }
  0x43   : > { %4447 = vmatpush3.bf16.msra.mxu1 %v5302_v52  ;;  %v4127_v52 = vpack.c.bf16 %v375_v46, %v375_v46  ;;  %505 = vst.msk [vmem:[#allocation3 + $0x4c] sm:$0xf] %vm485_vm2, %v4126_v44  ;;  %v1752_v8 = vrot.slane %v1750_v45, 3  ;;  %v1755_v12 = vrot.slane %v1753_v49, 4  ;;  %v684_v49 = vshll.u32 %v5840_v43, 16 }
  0x44   : > { %4448 = vmatprep.subr.bf16.mxu1 %v5378_v1  ;;  %v5796_v50 = vld [vmem:[#allocation3 + $0x48] sm:$0xf]  ;;  %507 = vst.msk [vmem:[#allocation3 + $0x54] sm:$0xf] %vm485_vm2, %v4128_v62  ;;  %v666_v21 = vor.u32 %v664_v59, %v662_v16 }
  0x45   : > { %4405 = vmatmul.mubr.msk.bf16.gmra.mrb[12].mxu1 %vm749_vm4, %v655_v7  ;;  %4679 = vmatpush3.bf16.msra.mxu0 %v5291_v2  ;;  %506 = vst.msk [vmem:[#allocation3 + $0x50] sm:$0xf] %vm485_vm2, %v4127_v52  ;;  %v5812_v0 = vcombine.low %v5791_v48, %v5796_v50  ;;  %v318_v2 = vmul.f32 %v4203_v55, %v5483_v18 }
  0x46   : > { %4408 = vmatprep.mubr.msk.bf16.mxu1 %vm5379_vm0, %v5378_v1  ;;  %4680 = vmatprep.subr.bf16.mxu0 %v5378_v1  ;;  %v1748_v7 = vsel %vm1695_vm5, %v1738_v60, %v1747_v53  ;;  %v5826_v18 = vor.u32 %v1755_v12, %v1752_v8  ;;  %v671_v33 = vsel %vm619_vm3, %v666_v21, %v670_v5  ;;  %v5304_v21 = vld [vmem:[%s6764_s1 + $0x160] sm:$0xff]  }
  0x47   : > { %4449 = vmatpush3.bf16.msra.mxu1 %v5305_v15  ;;  %v5818_v15 = vld [vmem:[#allocation3 + $0x38] sm:$0xff]   ;;  %v3943_v55 = vcombine.low %v5551_v27, %v5553_v28  ;;  %v688_v27 = vshrl.u32 %v5840_v43, 16  ;;  %v3944_v12 = vcombine.low %v5555_v29, %v5579_v40  ;;  %v5306_v40 = vld [vmem:[%s6764_s1 + $0x168] sm:$0xff]  }
  0x48   : > { %4637 = vmatmul.mubr.msk.bf16.gmra.mrb[12].mxu0 %vm749_vm4, %v1739_v24  ;;  %4494 = vmatprep.subr.bf16.mxu1 %v5378_v1  ;;  %v676_v35 = vshll.u32 %v5818_v15, 16  ;;  %v1757_v45 = vsel %vm1695_vm5, %v1747_v53, %v5826_v18  ;;  %v680_v52 = vshrl.u32 %v5818_v15, 16  ;;  %v5297_v53 = vld [vmem:[%s6764_s1 + $0x150] sm:$0xff]   ;;  %v261_v29 = vld [vmem:[%s5466_s20 + $0x60] sm:$0xf] }
  0x49   : > { %4640 = vmatprep.mubr.msk.bf16.mxu0 %vm5379_vm0, %v5378_v1  ;;  %4681 = vmatpush3.bf16.msra.mxu0 %v5294_v19  ;;  %v351_v19 = vadd.f32 %v5490_v20, %v318_v2  ;;  %v672_v20 = vshrl.u32 %v5747_v58, 16  ;;  %v5300_v2 = vld [vmem:[%s6764_s1 + $0x158] sm:$0xff]  }
  0x4a   : > { %4726 = vmatprep.subr.bf16.mxu0 %v5378_v1  ;;  %v5828_v17 = vld [vmem:[#allocation3 + $0x4c] sm:$0xf]  ;;  %v678_v44 = vrot.slane %v676_v35, 1 }
  0x4b   : > { %v377_v24 = vmax.f32 %v351_v19, 0.0  ;;  %v674_v46 = vor.u32 %v672_v20, %v670_v5  ;;  %v5859_v59 = vld [vmem:[#allocation3 + $0x48] sm:$0xff]   ;;  %v548_v8 = vld [vmem:[#allocation3 + $0x54] sm:$0x1]  ;;  %v287_v20 = vunpack.c.l.bf16 %v261_v29  ;;  %v3948_v29 = vcombine.low %v5719_v41, %v5741_v56  ;;  %v5320_v41 = vld [vmem:[%s6764_s1 + $0x88] sm:$0xff]  }
  0x4c   : > { %v5830_v60 = vld [vmem:[#allocation3 + $0x50] sm:$0xf]  ;;  %v682_v62 = vor.u32 %v680_v52, %v678_v44  ;;  %v692_v28 = vshll.u32 %v5859_v59, 16  ;;  %v3945_v52 = vcombine.low %v5599_v61, %v5607_v4  ;;  %v3950_v56 = vcombine.low %v5789_v9, %v5791_v48  ;;  %v6010_v9 = vld [vmem:[#allocation3 + $0x54] sm:$0xf] }
  0x4d   : > { %4409 = vmatmul.mubr.msk.bf16.gmra.mrb[16].mxu1 %vm749_vm4, %v663_v42  ;;  %v4129_v26 = vpack.c.bf16 %v377_v24, %v377_v24  ;;  %v5837_v16 = vcombine.low %v5828_v17, %v5830_v60  ;;  %v679_v51 = vsel %vm619_vm3, %v674_v46, %v678_v44  ;;  %v686_v42 = vrot.slane %v684_v49, 1  ;;  %v5871_v5 = vld [vmem:[#allocation3 + $0x50] sm:$0xf]  ;;  %v5357_v44 = vld [vmem:[%s6765_s2] ss:$0 sm:$0xff] }
  0x4e   : > { %4412 = vmatprep.mubr.msk.bf16.mxu1 %vm5379_vm0, %v5378_v1  ;;  %v694_v19 = vrot.slane %v692_v28, 1  ;;  %v3952_v48 = vcombine.low %v5830_v60, %v6010_v9 }
  0x4f   : > { %508 = vst.msk [vmem:[#allocation3 + $0x58] sm:$0xf] %vm485_vm2, %v4129_v26  ;;  %v690_v24 = vor.u32 %v688_v27, %v686_v42  ;;  %v5884_v26 = vcombine.low %v5871_v5, %v548_v8  ;;  %v5312_v27 = vld [vmem:[%s6764_s1 + $0x178] sm:$0xff]  }
  0x50   : > { %4641 = vmatmul.mubr.msk.bf16.gmra.mrb[16].mxu0 %vm749_vm4, %v1748_v7  ;;  %v687_v7 = vsel %vm619_vm3, %v682_v62, %v686_v42 }
  0x51   : > { %4644 = vmatprep.mubr.msk.bf16.mxu0 %vm5379_vm0, %v5378_v1  ;;  %v695_v35 = vsel %vm619_vm3, %v690_v24, %v694_v19  ;;  %v700_v46 = vshll.u32 %v5884_v26, 16  ;;  %v5307_v24 = vld [vmem:[%s6764_s1 + $0x70] sm:$0xff]  }
  0x55   : > { %4413 = vmatmul.mubr.msk.bf16.gmra.mrb[20].mxu1 %vm749_vm4, %v671_v33  ;;  %v4204_v33 = vunpack.c.h.bf16 %v5781_v31  ;;  %v5308_v31 = vld [vmem:[%s6764_s1 + $0x170] sm:$0xff]  }
  0x56   : > { %4416 = vmatprep.mubr.msk.bf16.mxu1 %vm5379_vm0, %v5378_v1 }
  0x57   : > { %v319_v49 = vmul.f32 %v5357_v44, %v4204_v33  ;;  %v6032_v33 = vld [vmem:[#allocation3 + $0x14] sm:$0xff]  }
  0x58   : > { %4645 = vmatmul.mubr.msk.bf16.gmra.mrb[20].mxu0 %vm749_vm4, %v1757_v45  ;;  %v696_v45 = vshrl.u32 %v5859_v59, 16 }
  0x59   : > { %4682 = vmatprep.mubr.msk.bf16.mxu0 %vm5379_vm0, %v5378_v1 }
  0x5a   : > { %v698_v62 = vor.u32 %v696_v45, %v694_v19  ;;  %v704_v19 = vshrl.u32 %v5884_v26, 16 }
  0x5d   : > { %4417 = vmatmul.mubr.msk.bf16.gmra.mrb[24].mxu1 %vm749_vm4, %v679_v51  ;;  %v320_v51 = vmul.f32 %v5357_v44, %v287_v20  ;;  %v6047_v44 = vld [vmem:[#allocation3 + $0x1c] sm:$0xff]  }
  0x5e   : > { %4420 = vmatprep.mubr.msk.bf16.mxu1 %vm5379_vm0, %v5378_v1 }
  0x60   : > { %4683 = vmatmul.mubr.msk.bf16.vlgmr.msra.gmra.mrb[0].mxu0 %vm749_vm4, %v3943_v55  ;;  %v5358_v55 = vld [vmem:[%s6766_s3] ss:$0 sm:$0xff] }
  0x61   : > { %4727 = vmatpush3.bf16.msra.mxu0 %v5297_v53  ;;  %4686 = vmatprep.mubr.msk.bf16.mxu0 %vm5379_vm0, %v5378_v1  ;;  %v352_v53 = vadd.f32 %v5358_v55, %v319_v49  ;;  %v353_v42 = vadd.f32 %v5358_v55, %v320_v51  ;;  %v2348_v49 = vrot.slane %v6047_v44, 2  ;;  %v5326_v51 = vld [vmem:[%s6764_s1 + $0x190] sm:$0xff]   ;;  %v5330_v55 = vld [vmem:[%s6764_s1 + $0x198] sm:$0xff]  }
  0x62   : > { %4728 = vmatprep.subr.bf16.mxu0 %v5378_v1 }
  0x63   : > { %v378_v61 = vmax.f32 %v352_v53, 0.0  ;;  %v379_v4 = vmax.f32 %v353_v42, 0.0  ;;  %v5333_v42 = vld [vmem:[%s6764_s1 + $0x1a0] sm:$0xff]  }
  0x65   : > { %4421 = vmatmul.mubr.msk.bf16.gmra.mrb[28].mxu1 %vm749_vm4, %v687_v7  ;;  %4729 = vmatpush3.bf16.msra.mxu0 %v5300_v2  ;;  %v702_v2 = vrot.slane %v700_v46, 1  ;;  %v4130_v28 = vpack.c.bf16 %v378_v61, %v378_v61  ;;  %v4131_v7 = vpack.c.bf16 %v379_v4, %v379_v4  ;;  %v5323_v46 = vld [vmem:[%s6764_s1 + $0x188] sm:$0xff]  }
  0x66   : > { %4424 = vmatprep.mubr.msk.bf16.mxu1 %vm5379_vm0, %v5378_v1  ;;  %4730 = vmatprep.subr.bf16.mxu0 %v5378_v1  ;;  %v5337_v61 = vld [vmem:[%s6764_s1 + $0x1a8] sm:$0xff]  }
  0x67   : > { %v703_v8 = vsel %vm619_vm3, %v698_v62, %v702_v2  ;;  %509 = vst.msk [vmem:[#allocation3 + $0x5c] sm:$0xf] %vm485_vm2, %v4130_v28  ;;  %510 = vst.msk [vmem:[#allocation3 + $0x60] sm:$0xf] %vm485_vm2, %v4131_v7  ;;  %v6100_v7 = vld [vmem:[#allocation3 + $0x34] sm:$0xff]  }
  0x68   : > { %4687 = vmatmul.mubr.msk.bf16.gmra.mrb[4].mxu0 %vm749_vm4, %v3944_v12  ;;  %v3946_v12 = vcombine.low %v5611_v10, %v5679_v6  ;;  %v706_v10 = vor.u32 %v704_v19, %v702_v2  ;;  %v3947_v6 = vcombine.low %v5699_v25, %v5707_v30  ;;  %v5311_v25 = vld [vmem:[%s6764_s1 + $0x78] sm:$0xff]   ;;  %v3949_v30 = vcombine.low %v5743_v57, %v5787_v47 }
  0x69   : > { %4690 = vmatprep.mubr.msk.bf16.mxu0 %vm5379_vm0, %v5378_v1  ;;  %4731 = vmatpush3.bf16.msra.mxu0 %v5304_v21  ;;  %v5318_v21 = vld [vmem:[%s6764_s1 + $0x180] sm:$0xff]   ;;  %v5328_v57 = vld [vmem:[%s6764_s1 + $0x98] sm:$0xff]   ;;  %v3951_v47 = vcombine.low %v5796_v50, %v5828_v17  ;;  %v2252_v50 = vld [vmem:[#allocation3 + $0xc] sm:$0xc]  ;;  %v3801_v19 = vcombine.low %v5871_v5, %v5871_v5 }
  0x6a   : > { %4732 = vmatprep.subr.bf16.mxu0 %v5378_v1  ;;  %v6023_v17 = vld [vmem:[#allocation3 + $0x10] sm:$0xf] }
  0x6b   : > { %v6030_v60 = vcombine.low %v2252_v50, %v6023_v17  ;;  %v6081_v2 = vld [vmem:[#allocation3 + $0x2c] sm:$0xff]  }
  0x6c   : > { %v2352_v4 = vrot.slane %v6081_v2, 2 }
  0x6d   : > { %4425 = vmatmul.mubr.msk.bf16.gmra.mrb[32].mxu1 %vm749_vm4, %v695_v35  ;;  %4733 = vmatpush3.bf16.msra.mxu0 %v5306_v40  ;;  %v2345_v20 = vrot.slane %v6030_v60, 2  ;;  %v2346_v35 = vrot.slane %v6032_v33, 2 }
  0x6e   : > { %4428 = vmatprep.mubr.msk.bf16.mxu1 %vm5379_vm0, %v5378_v1  ;;  %4734 = vmatprep.subr.bf16.mxu0 %v5378_v1 }
  0x6f   : > { %v2347_v45 = vsel %vm2344_vm6, %v2345_v20, %v2346_v35  ;;  %v5344_v20 = vld [vmem:[%s6764_s1 + $0xb8] sm:$0xff]  }
  0x70   : > { %4691 = vmatmul.mubr.msk.bf16.gmra.mrb[8].mxu0 %vm749_vm4, %v3945_v52  ;;  %v2349_v52 = vsel %vm2344_vm6, %v2346_v35, %v2348_v49 }
  0x71   : > { %4694 = vmatprep.mubr.msk.bf16.mxu0 %vm5379_vm0, %v5378_v1  ;;  %4735 = vmatpush3.bf16.msra.mxu0 %v5308_v31  ;;  %v6062_v31 = vld [vmem:[#allocation3 + $0x24] sm:$0xff]  }
  0x72   : > { %4736 = vmatprep.subr.bf16.mxu0 %v5378_v1  ;;  %v2350_v53 = vrot.slane %v6062_v31, 2 }
  0x74   : > { %v2351_v62 = vsel %vm2344_vm6, %v2348_v49, %v2350_v53  ;;  %v2353_v28 = vsel %vm2344_vm6, %v2350_v53, %v2352_v4  ;;  %v1454_v53 = vrot.slane %v5812_v0, 3 }
  0x75   : > { %4429 = vmatmul.mubr.msk.bf16.gmra.mrb[36].mxu1 %vm749_vm4, %v703_v8  ;;  %4737 = vmatpush3.bf16.msra.mxu0 %v5312_v27  ;;  %v5340_v27 = vld [vmem:[%s6764_s1 + $0x1b0] sm:$0xff]   ;;  %v5345_v8 = vld [vmem:[%s6764_s1 + $0x1b8] sm:$0xff]  }
  0x76   : > { %4432 = vmatprep.mubr.msk.bf16.mxu1 %vm5379_vm0, %v5378_v1  ;;  %4738 = vmatprep.subr.bf16.mxu0 %v5378_v1 }
  0x78   : > { %4695 = vmatmul.mubr.msk.bf16.gmra.mrb[12].mxu0 %vm749_vm4, %v3946_v12  ;;  %v1089_v12 = vld [vmem:[#allocation3] sm:$0xe] }
  0x79   : > { %4698 = vmatprep.mubr.msk.bf16.mxu0 %vm5379_vm0, %v5378_v1  ;;  %4739 = vmatpush3.bf16.msra.mxu0 %v5318_v21  ;;  %v2354_v21 = vrot.slane %v6100_v7, 2 }
  0x7a   : > { %4784 = vmatprep.subr.bf16.mxu0 %v5378_v1 }
  0x7d   : > { %4433 = vmatmul.mubr.msk.bf16.gmra.mrb[40].mxu1 %vm749_vm4, %v706_v10  ;;  %v5359_v10 = vld [vmem:[#allocation3 + $0x4] sm:$0xf] }
  0x7e   : > { %4450 = vmatprep.mubr.msk.bf16.mxu1 %vm5379_vm0, %v5378_v1 }
  0x80   : > { %4699 = vmatmul.mubr.msk.bf16.gmra.mrb[16].mxu0 %vm749_vm4, %v3947_v6  ;;  %v3834_v6 = vcombine.low %v1089_v12, %v5359_v10  ;;  %v6191_v10 = vld [vmem:[#allocation3 + $0x5c] sm:$0xf] }
  0x81   : > { %4702 = vmatprep.mubr.msk.bf16.mxu0 %vm5379_vm0, %v5378_v1 }
  0x85   : > { %4451 = vmatmul.mubr.msk.bf16.vlgmr.msra.gmra.mrb[0].mxu1 %vm749_vm4, %v5545_v22  ;;  %v5317_v22 = vld [vmem:[%s6764_s1 + $0x80] sm:$0xff]  }
  0x86   : > { %4454 = vmatprep.mubr.msk.bf16.mxu1 %vm5379_vm0, %v5378_v1  ;;  %4495 = vmatpush3.bf16.msra.mxu1 %v5307_v24  ;;  %v2355_v24 = vsel %vm2344_vm6, %v2352_v4, %v2354_v21 }
  0x87   : > { %4496 = vmatprep.subr.bf16.mxu1 %v5378_v1 }
  0x88   : > { %4703 = vmatmul.mubr.msk.bf16.gmra.mrb[20].mxu0 %vm749_vm4, %v3948_v29  ;;  %v6117_v29 = vld [vmem:[#allocation3 + $0x3c] sm:$0xff]  }
  0x89   : > { %4706 = vmatprep.mubr.msk.bf16.mxu0 %vm5379_vm0, %v5378_v1  ;;  %v2356_v5 = vrot.slane %v6117_v29, 2 }
  0x8a   : > { %4497 = vmatpush3.bf16.msra.mxu1 %v5311_v25  ;;  %v1109_v25 = vrot.slane %v3834_v6, 1  ;;  %v5352_v6 = vld [vmem:[%s6764_s1 + $0xd8] sm:$0xff]  }
  0x8b   : > { %4498 = vmatprep.subr.bf16.mxu1 %v5378_v1 }
  0x8d   : > { %4455 = vmatmul.mubr.msk.bf16.gmra.mrb[4].mxu1 %vm749_vm4, %v5547_v23  ;;  %v5325_v23 = vld [vmem:[%s6764_s1 + $0x90] sm:$0xff]  }
  0x8e   : > { %4458 = vmatprep.mubr.msk.bf16.mxu1 %vm5379_vm0, %v5378_v1  ;;  %4499 = vmatpush3.bf16.msra.mxu1 %v5317_v22  ;;  %v5360_v22 = vld [vmem:[#allocation3 + $0x8] sm:$0xff]  }
  0x8f   : > { %4500 = vmatprep.subr.bf16.mxu1 %v5378_v1 }
  0x90   : > { %4707 = vmatmul.mubr.msk.bf16.gmra.mrb[24].mxu0 %vm749_vm4, %v3949_v30  ;;  %v1110_v30 = vrot.slane %v5360_v22, 1 }
  0x91   : > { %4710 = vmatprep.mubr.msk.bf16.mxu0 %vm5379_vm0, %v5378_v1 }
  0x92   : > { %4501 = vmatpush3.bf16.msra.mxu1 %v5320_v41  ;;  %v1111_v41 = vsel %vm1108_vm7, %v1109_v25, %v1110_v30 }
  0x93   : > { %4502 = vmatprep.subr.bf16.mxu1 %v5378_v1 }
  0x95   : > { %4459 = vmatmul.mubr.msk.bf16.gmra.mrb[8].mxu1 %vm749_vm4, %v5572_v38  ;;  %v5332_v38 = vld [vmem:[%s6764_s1 + $0xa0] sm:$0xff]  }
  0x96   : > { %4462 = vmatprep.mubr.msk.bf16.mxu1 %vm5379_vm0, %v5378_v1  ;;  %4503 = vmatpush3.bf16.msra.mxu1 %v5325_v23  ;;  %v5335_v23 = vld [vmem:[%s6764_s1 + $0xa8] sm:$0xff]  }
  0x97   : > { %4504 = vmatprep.subr.bf16.mxu1 %v5378_v1 }
  0x98   : > { %4711 = vmatmul.mubr.msk.bf16.gmra.mrb[28].mxu0 %vm749_vm4, %v3950_v56  ;;  %v2357_v56 = vsel %vm2344_vm6, %v2354_v21, %v2356_v5 }
  0x99   : > { %4714 = vmatprep.mubr.msk.bf16.mxu0 %vm5379_vm0, %v5378_v1 }
  0x9a   : > { %4505 = vmatpush3.bf16.msra.mxu1 %v5328_v57  ;;  %v6131_v57 = vld [vmem:[#allocation3 + $0x44] sm:$0xff]  }
  0x9b   : > { %4506 = vmatprep.subr.bf16.mxu1 %v5378_v1  ;;  %v2358_v50 = vrot.slane %v6131_v57, 2 }
  0x9d   : > { %4463 = vmatmul.mubr.msk.bf16.gmra.mrb[12].mxu1 %vm749_vm4, %v5617_v13  ;;  %v6021_v13 = vld [vmem:[#allocation3 + $0x58] sm:$0xf]  ;;  %v2359_v35 = vsel %vm2344_vm6, %v2356_v5, %v2358_v50 }
  0x9e   : > { %4466 = vmatprep.mubr.msk.bf16.mxu1 %vm5379_vm0, %v5378_v1  ;;  %4507 = vmatpush3.bf16.msra.mxu1 %v5332_v38  ;;  %v3953_v40 = vcombine.low %v6021_v13, %v6021_v13  ;;  %v5361_v38 = vld [vmem:[#allocation3 + $0x10] sm:$0xff]  }
  0x9f   : > { %4552 = vmatprep.subr.bf16.mxu1 %v5378_v1 }
  0xa0   : > { %4715 = vmatmul.mubr.msk.bf16.gmra.mrb[32].mxu0 %vm749_vm4, %v3951_v47  ;;  %v1112_v47 = vrot.slane %v5361_v38, 1  ;;  %v2606_v38 = vshll.u32 %v6030_v60, 16 }
  0xa1   : > { %4718 = vmatprep.mubr.msk.bf16.mxu0 %vm5379_vm0, %v5378_v1 }
  0xa5   : > { %4467 = vmatmul.mubr.msk.bf16.gmra.mrb[16].mxu1 %vm749_vm4, %v5676_v63 }
  0xa6   : > { %4470 = vmatprep.mubr.msk.bf16.mxu1 %vm5379_vm0, %v5378_v1 }
  0xa8   : > { %4719 = vmatmul.mubr.msk.bf16.gmra.mrb[36].mxu0 %vm749_vm4, %v3952_v48  ;;  %v5339_v48 = vld [vmem:[%s6764_s1 + $0xb0] sm:$0xff]  }
  0xa9   : > { %4722 = vmatprep.mubr.msk.bf16.mxu0 %vm5379_vm0, %v5378_v1 }
  0xad   : > { %4471 = vmatmul.mubr.msk.bf16.gmra.mrb[20].mxu1 %vm749_vm4, %v5717_v36 }
  0xae   : > { %4474 = vmatprep.mubr.msk.bf16.mxu1 %vm5379_vm0, %v5378_v1 }
  0xb0   : > { %4723 = vmatmul.mubr.msk.bf16.gmra.mrb[40].mxu0 %vm749_vm4, %v3953_v40  ;;  %v1113_v40 = vsel %vm1108_vm7, %v1110_v30, %v1112_v47  ;;  %v1118_v30 = vrot.slane %v5717_v36, 1  ;;  %v1120_v36 = vrot.slane %v5747_v58, 1 }
  0xb1   : > { %4740 = vmatprep.mubr.msk.bf16.mxu0 %vm5379_vm0, %v5378_v1 }
  0xb5   : > { %4475 = vmatmul.mubr.msk.bf16.gmra.mrb[24].mxu1 %vm749_vm4, %v5747_v58 }
  0xb6   : > { %4478 = vmatprep.mubr.msk.bf16.mxu1 %vm5379_vm0, %v5378_v1 }
  0xb8   : > { %4741 = vmatmul.mubr.msk.bf16.vlgmr.msra.gmra.mrb[0].mxu0 %vm749_vm4, %v2347_v45  ;;  %v6150_v45 = vld [vmem:[#allocation3 + $0x4c] sm:$0xff]  }
  0xb9   : > { %4785 = vmatpush3.bf16.msra.mxu0 %v5323_v46  ;;  %4744 = vmatprep.mubr.msk.bf16.mxu0 %vm5379_vm0, %v5378_v1  ;;  %v5362_v46 = vld [vmem:[#allocation3 + $0x18] sm:$0xff]  }
  0xba   : > { %4786 = vmatprep.subr.bf16.mxu0 %v5378_v1  ;;  %v1114_v49 = vrot.slane %v5362_v46, 1  ;;  %v1122_v46 = vrot.slane %v5818_v15, 1 }
  0xbd   : > { %4479 = vmatmul.mubr.msk.bf16.gmra.mrb[28].mxu1 %vm749_vm4, %v5818_v15  ;;  %4787 = vmatpush3.bf16.msra.mxu0 %v5326_v51  ;;  %v5346_v51 = vld [vmem:[%s6764_s1 + $0xc0] sm:$0xff]  }
  0xbe   : > { %4482 = vmatprep.mubr.msk.bf16.mxu1 %vm5379_vm0, %v5378_v1  ;;  %4788 = vmatprep.subr.bf16.mxu0 %v5378_v1 }
  0xc0   : > { %4745 = vmatmul.mubr.msk.bf16.gmra.mrb[4].mxu0 %vm749_vm4, %v2349_v52  ;;  %v2360_v52 = vrot.slane %v6150_v45, 2 }
  0xc1   : > { %4748 = vmatprep.mubr.msk.bf16.mxu0 %vm5379_vm0, %v5378_v1  ;;  %4789 = vmatpush3.bf16.msra.mxu0 %v5330_v55  ;;  %v1452_v55 = vrot.slane %v5803_v54, 3 }
  0xc2   : > { %4790 = vmatprep.subr.bf16.mxu0 %v5378_v1  ;;  %v2361_v4 = vsel %vm2344_vm6, %v2358_v50, %v2360_v52  ;;  %v1121_v50 = vsel %vm1108_vm7, %v1118_v30, %v1120_v36 }
  0xc5   : > { %4483 = vmatmul.mubr.msk.bf16.gmra.mrb[32].mxu1 %vm749_vm4, %v5840_v43  ;;  %4791 = vmatpush3.bf16.msra.mxu0 %v5333_v42  ;;  %v1115_v42 = vsel %vm1108_vm7, %v1112_v47, %v1114_v49  ;;  %v2611_v47 = vshrl.u32 %v6032_v33, 16 }
  0xc6   : > { %4486 = vmatprep.mubr.msk.bf16.mxu1 %vm5379_vm0, %v5378_v1  ;;  %4792 = vmatprep.subr.bf16.mxu0 %v5378_v1 }
  0xc7   : > { %v2613_v58 = vrot.slane %v2611_v47, 2 }
  0xc8   : > { %4749 = vmatmul.mubr.msk.bf16.gmra.mrb[8].mxu0 %vm749_vm4, %v2351_v62  ;;  %v5348_v62 = vld [vmem:[%s6764_s1 + $0xc8] sm:$0xff]  }
  0xc9   : > { %4752 = vmatprep.mubr.msk.bf16.mxu0 %vm5379_vm0, %v5378_v1  ;;  %4793 = vmatpush3.bf16.msra.mxu0 %v5337_v61  ;;  %v6172_v61 = vsel %vm1438_vm8, %v1452_v55, %v1454_v53 }
  0xca   : > { %4794 = vmatprep.subr.bf16.mxu0 %v5378_v1 }
  0xcd   : > { %4487 = vmatmul.mubr.msk.bf16.gmra.mrb[36].mxu1 %vm749_vm4, %v5859_v59  ;;  %4795 = vmatpush3.bf16.msra.mxu0 %v5340_v27  ;;  %v6176_v27 = vld [vmem:[#allocation3 + $0x54] sm:$0xff]  }
  0xce   : > { %4490 = vmatprep.mubr.msk.bf16.mxu1 %vm5379_vm0, %v5378_v1  ;;  %4796 = vmatprep.subr.bf16.mxu0 %v5378_v1  ;;  %v2362_v12 = vrot.slane %v6176_v27, 2 }
  0xd0   : > { %4753 = vmatmul.mubr.msk.bf16.gmra.mrb[12].mxu0 %vm749_vm4, %v2353_v28  ;;  %v1116_v28 = vrot.slane %v5676_v63, 1  ;;  %v2273_v63 = vld [vmem:[#allocation3 + $0x60] sm:$0x3]  ;;  %v2363_v25 = vsel %vm2344_vm6, %v2360_v52, %v2362_v12 }
  0xd1   : > { %4756 = vmatprep.mubr.msk.bf16.mxu0 %vm5379_vm0, %v5378_v1  ;;  %4797 = vmatpush3.bf16.msra.mxu0 %v5345_v8  ;;  %v5350_v8 = vld [vmem:[%s6764_s1 + $0xd0] sm:$0xff]   ;;  %v3996_v22 = vcombine.low %v6191_v10, %v2273_v63 }
  0xd2   : > { %4842 = vmatprep.subr.bf16.mxu0 %v5378_v1  ;;  %v1117_v21 = vsel %vm1108_vm7, %v1114_v49, %v1116_v28  ;;  %v2623_v49 = vshll.u32 %v6047_v44, 16 }
  0xd3   : > { %v2364_v5 = vrot.slane %v3996_v22, 2  ;;  %v2629_v22 = vshrl.u32 %v6062_v31, 16 }
  0xd4   : > { %v2625_v15 = vrot.slane %v2623_v49, 3  ;;  %v1780_v49 = vshll.u32 %v5837_v16, 16 }
  0xd5   : > { %4491 = vmatmul.mubr.msk.bf16.gmra.mrb[40].mxu1 %vm749_vm4, %v3801_v19  ;;  %v1456_v19 = vrot.slane %v5837_v16, 3 }
  0xd6   : > { %4508 = vmatprep.mubr.msk.bf16.mxu1 %vm5379_vm0, %v5378_v1 }
  0xd8   : > { %4757 = vmatmul.mubr.msk.bf16.gmra.mrb[16].mxu0 %vm749_vm4, %v2355_v24  ;;  %v6200_v24 = vsel %vm1438_vm8, %v1454_v53, %v1456_v19  ;;  %v1123_v53 = vsel %vm1108_vm7, %v1120_v36, %v1122_v46 }
  0xd9   : > { %4760 = vmatprep.mubr.msk.bf16.mxu0 %vm5379_vm0, %v5378_v1 }
  0xdd   : > { %4509 = vmatmul.mubr.msk.bf16.vlgmr.msra.gmra.mrb[0].mxu1 %vm749_vm4, %v1111_v41  ;;  %v1119_v41 = vsel %vm1108_vm7, %v1116_v28, %v1118_v30  ;;  %v2632_v30 = vshll.u32 %v6062_v31, 16 }
  0xde   : > { %4512 = vmatprep.mubr.msk.bf16.mxu1 %vm5379_vm0, %v5378_v1  ;;  %4553 = vmatpush3.bf16.msra.mxu1 %v5335_v23  ;;  %v2365_v23 = vsel %vm2344_vm6, %v2362_v12, %v2364_v5  ;;  %v1124_v12 = vrot.slane %v5840_v43, 1  ;;  %v1771_v43 = vshll.u32 %v5812_v0, 16 }
  0xdf   : > { %4554 = vmatprep.subr.bf16.mxu1 %v5378_v1  ;;  %v2634_v47 = vrot.slane %v2632_v30, 3 }
  0xe0   : > { %4761 = vmatmul.mubr.msk.bf16.gmra.mrb[20].mxu0 %vm749_vm4, %v2357_v56  ;;  %v2603_v56 = vshrl.u32 %v6030_v60, 16  ;;  %v2620_v60 = vshrl.u32 %v6047_v44, 16  ;;  %v1773_v36 = vrot.slane %v1771_v43, 4 }
  0xe1   : > { %4764 = vmatprep.mubr.msk.bf16.mxu0 %vm5379_vm0, %v5378_v1 }
  0xe2   : > { %4555 = vmatpush3.bf16.msra.mxu1 %v5339_v48  ;;  %v2614_v48 = vshll.u32 %v6032_v33, 16 }
  0xe3   : > { %4556 = vmatprep.subr.bf16.mxu1 %v5378_v1 }
  0xe5   : > { %4513 = vmatmul.mubr.msk.bf16.gmra.mrb[4].mxu1 %vm749_vm4, %v1113_v40  ;;  %v2605_v40 = vrot.slane %v2603_v56, 2 }
  0xe6   : > { %4516 = vmatprep.mubr.msk.bf16.mxu1 %vm5379_vm0, %v5378_v1  ;;  %4557 = vmatpush3.bf16.msra.mxu1 %v5344_v20  ;;  %v2608_v20 = vrot.slane %v2606_v38, 3  ;;  %v2631_v38 = vrot.slane %v2629_v22, 2 }
  0xe7   : > { %4558 = vmatprep.subr.bf16.mxu1 %v5378_v1 }
  0xe8   : > { %4765 = vmatmul.mubr.msk.bf16.gmra.mrb[24].mxu0 %vm749_vm4, %v2359_v35  ;;  %v2616_v35 = vrot.slane %v2614_v48, 3  ;;  %v5351_v48 = vld [vmem:[%s6764_s1 + $0x1d0] sm:$0xff]  }
  0xe9   : > { %4768 = vmatprep.mubr.msk.bf16.mxu0 %vm5379_vm0, %v5378_v1 }
  0xea   : > { %4559 = vmatpush3.bf16.msra.mxu1 %v5346_v51  ;;  %v2609_v51 = vor.u32 %v2608_v20, %v2605_v40  ;;  %v2617_v52 = vor.u32 %v2616_v35, %v2613_v58  ;;  %v1126_v40 = vrot.slane %v5859_v59, 1  ;;  %v2638_v58 = vshrl.u32 %v6081_v2, 16  ;;  %v5353_v59 = vld [vmem:[%s6764_s1 + $0x1d8] sm:$0xff]  }
  0xeb   : > { %4560 = vmatprep.subr.bf16.mxu1 %v5378_v1  ;;  %v2641_v35 = vshll.u32 %v6081_v2, 16 }
  0xec   : > { %v2618_v28 = vsel %vm2601_vm9, %v2609_v51, %v2617_v52  ;;  %v1127_v51 = vsel %vm1108_vm7, %v1124_v12, %v1126_v40 }
  0xed   : > { %4517 = vmatmul.mubr.msk.bf16.gmra.mrb[8].mxu1 %vm749_vm4, %v1115_v42  ;;  %v1759_v42 = vshrl.u32 %v5803_v54, 16 }
  0xee   : > { %4520 = vmatprep.mubr.msk.bf16.mxu1 %vm5379_vm0, %v5378_v1  ;;  %4561 = vmatpush3.bf16.msra.mxu1 %v5348_v62  ;;  %v1762_v62 = vshll.u32 %v5803_v54, 16 }
  0xef   : > { %4562 = vmatprep.subr.bf16.mxu1 %v5378_v1 }
  0xf0   : > { %4769 = vmatmul.mubr.msk.bf16.gmra.mrb[28].mxu0 %vm749_vm4, %v2361_v4  ;;  %v2622_v4 = vrot.slane %v2620_v60, 2  ;;  %v1764_v63 = vrot.slane %v1762_v62, 4  ;;  %v1777_v60 = vshrl.u32 %v5837_v16, 16  ;;  %v2643_v62 = vrot.slane %v2641_v35, 3 }
  0xf1   : > { %4772 = vmatprep.mubr.msk.bf16.mxu0 %vm5379_vm0, %v5378_v1 }
  0xf2   : > { %4563 = vmatpush3.bf16.msra.mxu1 %v5350_v8  ;;  %v5347_v8 = vld [vmem:[%s6764_s1 + $0x1c0] sm:$0xff]  }
  0xf3   : > { %4564 = vmatprep.subr.bf16.mxu1 %v5378_v1 }
  0xf5   : > { %4521 = vmatmul.mubr.msk.bf16.gmra.mrb[12].mxu1 %vm749_vm4, %v1117_v21  ;;  %v1761_v21 = vrot.slane %v1759_v42, 3  ;;  %v2640_v42 = vrot.slane %v2638_v58, 2 }
  0xf6   : > { %4524 = vmatprep.mubr.msk.bf16.mxu1 %vm5379_vm0, %v5378_v1  ;;  %4565 = vmatpush3.bf16.msra.mxu1 %v5352_v6  ;;  %v2626_v6 = vor.u32 %v2625_v15, %v2622_v4  ;;  %v3910_v4 = vcombine.low %v6010_v9, %v6021_v13 }
  0xf7   : > { %4900 = vmatprep.subr.bf16.mxu1 %v5378_v1  ;;  %v2644_v13 = vor.u32 %v2643_v62, %v2640_v42 }
  0xf8   : > { %4773 = vmatmul.mubr.msk.bf16.gmra.mrb[32].mxu0 %vm749_vm4, %v2363_v25  ;;  %v5349_v25 = vld [vmem:[%s6764_s1 + $0x1c8] sm:$0xff]   ;;  %v2627_v56 = vsel %vm2601_vm9, %v2617_v52, %v2626_v6  ;;  %v1779_v52 = vrot.slane %v1777_v60, 3  ;;  %v1789_v22 = vshll.u32 %v3910_v4, 16  ;;  %v1440_v60 = vrot.slane %v5577_v39, 3 }
  0xf9   : > { %4776 = vmatprep.mubr.msk.bf16.mxu0 %vm5379_vm0, %v5378_v1  ;;  %v1442_v39 = vrot.slane %v5605_v3, 3  ;;  %v5364_v3 = vld [vmem:[%s6764_s1 + $0xe8] sm:$0xff]  }
  0xfa   : > { %v1791_v43 = vrot.slane %v1789_v22, 4 }
  0xfd   : > { %4525 = vmatmul.mubr.msk.bf16.gmra.mrb[16].mxu1 %vm749_vm4, %v1119_v41  ;;  %v1125_v41 = vsel %vm1108_vm7, %v1122_v46, %v1124_v12  ;;  %v2635_v46 = vor.u32 %v2634_v47, %v2631_v38  ;;  %v1128_v12 = vrot.slane %v5884_v26, 1  ;;  %v5355_v26 = vld [vmem:[%s6764_s1 + $0x1e8] sm:$0xff]  }
  0xfe   : > { %4528 = vmatprep.mubr.msk.bf16.mxu1 %vm5379_vm0, %v5378_v1 }
  0xff   : > { %v2636_v15 = vsel %vm2601_vm9, %v2626_v6, %v2635_v46  ;;  %v2650_v6 = vshll.u32 %v6100_v7, 16  ;;  %v1129_v30 = vsel %vm1108_vm7, %v1126_v40, %v1128_v12  ;;  %v2659_v40 = vshll.u32 %v6117_v29, 16 }
 0x100   : > { %4777 = vmatmul.mubr.msk.bf16.gmra.mrb[36].mxu0 %vm749_vm4, %v2365_v23 }
 0x101   : > { %4780 = vmatprep.mubr.msk.bf16.mxu0 %vm5379_vm0, %v5378_v1 }
 0x105   : > { %4529 = vmatmul.mubr.msk.bf16.gmra.mrb[20].mxu1 %vm749_vm4, %v1121_v50  ;;  %v6263_v50 = vor.u32 %v1764_v63, %v1761_v21  ;;  %v2647_v63 = vshrl.u32 %v6100_v7, 16 }
 0x106   : > { %4532 = vmatprep.mubr.msk.bf16.mxu1 %vm5379_vm0, %v5378_v1 }
 0x108   : > { %4781 = vmatmul.mubr.msk.bf16.gmra.mrb[40].mxu0 %vm749_vm4, %v2364_v5  ;;  %v1768_v5 = vshrl.u32 %v5812_v0, 16 }
 0x109   : > { %4798 = vmatprep.mubr.msk.bf16.mxu0 %vm5379_vm0, %v5378_v1 }
 0x10a   : > { %v1770_v23 = vrot.slane %v1768_v5, 3 }
 0x10c   : > { %v1774_v0 = vor.u32 %v1773_v36, %v1770_v23  ;;  %v2649_v23 = vrot.slane %v2647_v63, 2  ;;  %v2652_v36 = vrot.slane %v2650_v6, 3 }
 0x10d   : > { %4533 = vmatmul.mubr.msk.bf16.gmra.mrb[24].mxu1 %vm749_vm4, %v1123_v53  ;;  %v1782_v53 = vrot.slane %v1780_v49, 4 }
 0x10e   : > { %4536 = vmatprep.mubr.msk.bf16.mxu1 %vm5379_vm0, %v5378_v1  ;;  %v6271_v20 = vsel %vm1695_vm5, %v6263_v50, %v1774_v0 }
 0x110   : > { %4799 = vmatmul.mubr.msk.bf16.vlgmr.msra.gmra.mrb[0].mxu0 %vm749_vm4, %v2618_v28  ;;  %v5354_v28 = vld [vmem:[%s6764_s1 + $0x1e0] sm:$0xff]  }
 0x111   : > { %4843 = vmatpush3.bf16.msra.mxu0 %v5347_v8  ;;  %4802 = vmatprep.mubr.msk.bf16.mxu0 %vm5379_vm0, %v5378_v1  ;;  %v1783_v8 = vor.u32 %v1782_v53, %v1779_v52  ;;  %v2668_v52 = vshll.u32 %v6131_v57, 16 }
 0x112   : > { %4844 = vmatprep.subr.bf16.mxu0 %v5378_v1 }
 0x113   : > { %v6297_v21 = vsel %vm1695_vm5, %v1774_v0, %v1783_v8  ;;  %v2656_v0 = vshrl.u32 %v6117_v29, 16 }
 0x115   : > { %4537 = vmatmul.mubr.msk.bf16.gmra.mrb[28].mxu1 %vm749_vm4, %v1125_v41  ;;  %4845 = vmatpush3.bf16.msra.mxu0 %v5349_v25  ;;  %v1786_v25 = vshrl.u32 %v3910_v4, 16  ;;  %v2645_v41 = vsel %vm2601_vm9, %v2635_v46, %v2644_v13  ;;  %v2658_v35 = vrot.slane %v2656_v0, 2  ;;  %v2661_v46 = vrot.slane %v2659_v40, 3  ;;  %v5363_v4 = vld [vmem:[%s6764_s1 + $0xe0] sm:$0xff]  }
 0x116   : > { %4540 = vmatprep.mubr.msk.bf16.mxu1 %vm5379_vm0, %v5378_v1  ;;  %4846 = vmatprep.subr.bf16.mxu0 %v5378_v1  ;;  %v1446_v0 = vrot.slane %v5705_v34, 3  ;;  %v5367_v40 = vld [vmem:[%s6764_s1 + $0x100] sm:$0xff]   ;;  %v5368_v34 = vld [vmem:[%s6764_s1 + $0x108] sm:$0xff]  }
 0x117   : > { %v1788_v5 = vrot.slane %v1786_v25, 3  ;;  %v2662_v49 = vor.u32 %v2661_v46, %v2658_v35  ;;  %v5365_v25 = vld [vmem:[%s6764_s1 + $0xf0] sm:$0xff]  }
 0x118   : > { %4803 = vmatmul.mubr.msk.bf16.gmra.mrb[4].mxu0 %vm749_vm4, %v2627_v56  ;;  %v5356_v56 = vld [vmem:[%s6764_s1 + $0x1f0] sm:$0xff]  }
 0x119   : > { %4806 = vmatprep.mubr.msk.bf16.mxu0 %vm5379_vm0, %v5378_v1  ;;  %4847 = vmatpush3.bf16.msra.mxu0 %v5351_v48  ;;  %v6314_v38 = vor.u32 %v1791_v43, %v1788_v5  ;;  %v2653_v48 = vor.u32 %v2652_v36, %v2649_v23  ;;  %v2686_v5 = vshll.u32 %v6176_v27, 16  ;;  %v2582_v43 = vld [vmem:[#allocation3 + $0x60] sm:$0x7] }
 0x11a   : > { %4848 = vmatprep.subr.bf16.mxu0 %v5378_v1  ;;  %v6379_v23 = vcombine.low %v6191_v10, %v2582_v43 }
 0x11b   : > { %v6321_v47 = vsel %vm1695_vm5, %v1783_v8, %v6314_v38  ;;  %v2654_v58 = vsel %vm2601_vm9, %v2644_v13, %v2653_v48  ;;  %v2663_v42 = vsel %vm2601_vm9, %v2653_v48, %v2662_v49  ;;  %v2677_v8 = vshll.u32 %v6150_v45, 16 }
 0x11c   : > { %v2688_v48 = vrot.slane %v2686_v5, 3  ;;  %v2695_v35 = vshll.u32 %v6379_v23, 16 }
 0x11d   : > { %4541 = vmatmul.mubr.msk.bf16.gmra.mrb[32].mxu1 %vm749_vm4, %v1127_v51  ;;  %4849 = vmatpush3.bf16.msra.mxu0 %v5353_v59  ;;  %v1439_v59 = vrot.slane %v5570_v37, 3  ;;  %v2665_v51 = vshrl.u32 %v6131_v57, 16  ;;  %v2670_v37 = vrot.slane %v2668_v52, 3  ;;  %v2679_v6 = vrot.slane %v2677_v8, 3  ;;  %v5369_v52 = vld [vmem:[%s6764_s1 + $0x110] sm:$0xff]  }
 0x11e   : > { %4544 = vmatprep.mubr.msk.bf16.mxu1 %vm5379_vm0, %v5378_v1  ;;  %4850 = vmatprep.subr.bf16.mxu0 %v5378_v1 }
 0x11f   : > { %v1441_v53 = vsel %vm1438_vm8, %v1439_v59, %v1440_v60  ;;  %v2667_v62 = vrot.slane %v2665_v51, 2  ;;  %v1448_v51 = vrot.slane %v5731_v32, 3  ;;  %v1450_v32 = vrot.slane %v5765_v11, 3 }
 0x120   : > { %4807 = vmatmul.mubr.msk.bf16.gmra.mrb[8].mxu0 %vm749_vm4, %v2636_v15 }
 0x121   : > { %4810 = vmatprep.mubr.msk.bf16.mxu0 %vm5379_vm0, %v5378_v1  ;;  %4851 = vmatpush3.bf16.msra.mxu0 %v5354_v28  ;;  %v2671_v15 = vor.u32 %v2670_v37, %v2667_v62  ;;  %v2674_v28 = vshrl.u32 %v6150_v45, 16  ;;  %v1451_v37 = vsel %vm1438_vm8, %v1448_v51, %v1450_v32 }
 0x122   : > { %4852 = vmatprep.subr.bf16.mxu0 %v5378_v1 }
 0x123   : > { %v2672_v13 = vsel %vm2601_vm9, %v2662_v49, %v2671_v15  ;;  %v2676_v63 = vrot.slane %v2674_v28, 2  ;;  %v2697_v49 = vrot.slane %v2695_v35, 3  ;;  %v1453_v28 = vsel %vm1438_vm8, %v1450_v32, %v1452_v55 }
 0x124   : > { %v2940_v55 = vrot.slane %v6062_v31, 3 }
 0x125   : > { %4545 = vmatmul.mubr.msk.bf16.gmra.mrb[36].mxu1 %vm749_vm4, %v1129_v30  ;;  %4853 = vmatpush3.bf16.msra.mxu0 %v5355_v26  ;;  %v1444_v26 = vrot.slane %v5621_v14, 3  ;;  %v2680_v22 = vor.u32 %v2679_v6, %v2676_v63  ;;  %v2683_v30 = vshrl.u32 %v6176_v27, 16 }
 0x126   : > { %4548 = vmatprep.mubr.msk.bf16.mxu1 %vm5379_vm0, %v5378_v1  ;;  %4854 = vmatprep.subr.bf16.mxu0 %v5378_v1 }
 0x127   : > { %v1445_v14 = vsel %vm1438_vm8, %v1442_v39, %v1444_v26  ;;  %v2681_v36 = vsel %vm2601_vm9, %v2671_v15, %v2680_v22  ;;  %v1447_v46 = vsel %vm1438_vm8, %v1444_v26, %v1446_v0  ;;  %v2936_v15 = vrot.slane %v6032_v33, 3  ;;  %v1367_v33 = vld [vmem:[#allocation3 + $0x58] sm:$0x7] }
 0x128   : > { %4811 = vmatmul.mubr.msk.bf16.gmra.mrb[12].mxu0 %vm749_vm4, %v2645_v41  ;;  %v5366_v41 = vld [vmem:[%s6764_s1 + $0xf8] sm:$0xff]  }
 0x129   : > { %4814 = vmatprep.mubr.msk.bf16.mxu0 %vm5379_vm0, %v5378_v1  ;;  %4855 = vmatpush3.bf16.msra.mxu0 %v5356_v56  ;;  %v2685_v56 = vrot.slane %v2683_v30, 2 }
 0x12b   : > { %v2689_v10 = vor.u32 %v2688_v48, %v2685_v56 }
 0x12d   : > { %4549 = vmatmul.mubr.msk.bf16.gmra.mrb[40].mxu1 %vm749_vm4, %v1128_v12  ;;  %v1443_v12 = vsel %vm1438_vm8, %v1440_v60, %v1442_v39  ;;  %v2690_v59 = vsel %vm2601_vm9, %v2680_v22, %v2689_v10  ;;  %v2916_v39 = vld [vmem:[#allocation3 + $0xc] sm:$0x8] }
 0x12e   : > { %4566 = vmatprep.mubr.msk.bf16.mxu1 %vm5379_vm0, %v5378_v1 }
 0x130   : > { %4815 = vmatmul.mubr.msk.bf16.gmra.mrb[16].mxu0 %vm749_vm4, %v2654_v58  ;;  %v2692_v58 = vshrl.u32 %v6379_v23, 16 }
 0x131   : > { %4818 = vmatprep.mubr.msk.bf16.mxu0 %vm5379_vm0, %v5378_v1 }
 0x132   : > { %v2694_v60 = vrot.slane %v2692_v58, 2 }
 0x135   : > { %4567 = vmatmul.mubr.msk.bf16.vlgmr.msra.gmra.mrb[0].mxu1 %vm749_vm4, %v1441_v53  ;;  %v2698_v53 = vor.u32 %v2697_v49, %v2694_v60 }
 0x136   : > { %4570 = vmatprep.mubr.msk.bf16.mxu1 %vm5379_vm0, %v5378_v1  ;;  %4907 = vmatpush3.bf16.msra.mxu1 %v5363_v4  ;;  %v4062_v4 = vcombine.low %v2916_v39, %v6023_v17  ;;  %v2938_v17 = vrot.slane %v6047_v44, 3 }
 0x137   : > { %4901 = vmatprep.subr.bf16.mxu1 %v5378_v1  ;;  %v2699_v62 = vsel %vm2601_vm9, %v2689_v10, %v2698_v53 }
 0x138   : > { %4819 = vmatmul.mubr.msk.bf16.gmra.mrb[20].mxu0 %vm749_vm4, %v2663_v42  ;;  %v1449_v42 = vsel %vm1438_vm8, %v1446_v0, %v1448_v51  ;;  %v2935_v11 = vrot.slane %v4062_v4, 3  ;;  %v2939_v54 = vsel %vm1438_vm8, %v2936_v15, %v2938_v17  ;;  %v2941_v44 = vsel %vm1438_vm8, %v2938_v17, %v2940_v55 }
 0x139   : > { %4822 = vmatprep.mubr.msk.bf16.mxu0 %vm5379_vm0, %v5378_v1 }
 0x13a   : > { %4908 = vmatpush3.bf16.msra.mxu1 %v5364_v3  ;;  %v2937_v8 = vsel %vm1438_vm8, %v2935_v11, %v2936_v15  ;;  %v2942_v3 = vrot.slane %v6081_v2, 3  ;;  %v2946_v2 = vrot.slane %v6117_v29, 3 }
 0x13b   : > { %4902 = vmatprep.subr.bf16.mxu1 %v5378_v1 }
 0x13c   : > { %v2943_v31 = vsel %vm1438_vm8, %v2940_v55, %v2942_v3 }
 0x13d   : > { %4571 = vmatmul.mubr.msk.bf16.gmra.mrb[4].mxu1 %vm749_vm4, %v1443_v12  ;;  %v3877_v12 = vcombine.low %v6010_v9, %v1367_v33 }
 0x13e   : > { %4574 = vmatprep.mubr.msk.bf16.mxu1 %vm5379_vm0, %v5378_v1  ;;  %4909 = vmatpush3.bf16.msra.mxu1 %v5365_v25 }
 0x13f   : > { %4903 = vmatprep.subr.bf16.mxu1 %v5378_v1 }
 0x140   : > { %4823 = vmatmul.mubr.msk.bf16.gmra.mrb[24].mxu0 %vm749_vm4, %v2672_v13  ;;  %v2948_v13 = vrot.slane %v6131_v57, 3 }
 0x141   : > { %4826 = vmatprep.mubr.msk.bf16.mxu0 %vm5379_vm0, %v5378_v1 }
 0x142   : > { %4910 = vmatpush3.bf16.msra.mxu1 %v5366_v41  ;;  %v2949_v29 = vsel %vm1438_vm8, %v2946_v2, %v2948_v13 }
 0x143   : > { %4904 = vmatprep.subr.bf16.mxu1 %v5378_v1 }
 0x145   : > { %4575 = vmatmul.mubr.msk.bf16.gmra.mrb[8].mxu1 %vm749_vm4, %v1445_v14 }
 0x146   : > { %4578 = vmatprep.mubr.msk.bf16.mxu1 %vm5379_vm0, %v5378_v1  ;;  %4911 = vmatpush3.bf16.msra.mxu1 %v5367_v40 }
 0x147   : > { %4905 = vmatprep.subr.bf16.mxu1 %v5378_v1 }
 0x148   : > { %4827 = vmatmul.mubr.msk.bf16.gmra.mrb[28].mxu0 %vm749_vm4, %v2681_v36 }
 0x149   : > { %4830 = vmatprep.mubr.msk.bf16.mxu0 %vm5379_vm0, %v5378_v1 }
 0x14a   : > { %4912 = vmatpush3.bf16.msra.mxu1 %v5368_v34 }
 0x14b   : > { %4906 = vmatprep.subr.bf16.mxu1 %v5378_v1 }
 0x14d   : > { %4579 = vmatmul.mubr.msk.bf16.gmra.mrb[12].mxu1 %vm749_vm4, %v1447_v46 }
 0x14e   : > { %4582 = vmatprep.mubr.msk.bf16.mxu1 %vm5379_vm0, %v5378_v1  ;;  %4913 = vmatpush3.bf16.msra.mxu1 %v5369_v52 }
 0x150   : > { %4831 = vmatmul.mubr.msk.bf16.gmra.mrb[32].mxu0 %vm749_vm4, %v2690_v59 }
 0x151   : > { %4834 = vmatprep.mubr.msk.bf16.mxu0 %vm5379_vm0, %v5378_v1 }
 0x155   : > { %4583 = vmatmul.mubr.msk.bf16.gmra.mrb[16].mxu1 %vm749_vm4, %v1449_v42 }
 0x156   : > { %4586 = vmatprep.mubr.msk.bf16.mxu1 %vm5379_vm0, %v5378_v1 }
 0x158   : > { %4835 = vmatmul.mubr.msk.bf16.gmra.mrb[36].mxu0 %vm749_vm4, %v2699_v62 }
 0x159   : > { %4838 = vmatprep.mubr.msk.bf16.mxu0 %vm5379_vm0, %v5378_v1 }
 0x15d   : > { %4587 = vmatmul.mubr.msk.bf16.gmra.mrb[20].mxu1 %vm749_vm4, %v1451_v37 }
 0x15e   : > { %4590 = vmatprep.mubr.msk.bf16.mxu1 %vm5379_vm0, %v5378_v1 }
 0x160   : > { %4839 = vmatmul.mubr.msk.bf16.gmra.mrb[40].mxu0 %vm749_vm4, %v2698_v53 }
 0x161   : > { %4856 = vmatprep.mubr.msk.bf16.mxu0 %vm5379_vm0, %v5378_v1 }
 0x165   : > { %4591 = vmatmul.mubr.msk.bf16.gmra.mrb[24].mxu1 %vm749_vm4, %v1453_v28 }
 0x166   : > { %4594 = vmatprep.mubr.msk.bf16.mxu1 %vm5379_vm0, %v5378_v1 }
 0x168   : > { %4857 = vmatmul.mubr.msk.bf16.vlgmr.msra.gmra.mrb[0].mxu0 %vm749_vm4, %v2937_v8 }
 0x169   : > { %4860 = vmatprep.mubr.msk.bf16.mxu0 %vm5379_vm0, %v5378_v1 }
 0x16d   : > { %4595 = vmatmul.mubr.msk.bf16.gmra.mrb[28].mxu1 %vm749_vm4, %v6172_v61  ;;  %v1458_v61 = vrot.slane %v3877_v12, 3 }
 0x16e   : > { %4598 = vmatprep.mubr.msk.bf16.mxu1 %vm5379_vm0, %v5378_v1 }
 0x16f   : > { %v1459_v9 = vsel %vm1438_vm8, %v1456_v19, %v1458_v61  ;;  %v1766_v19 = vsel %vm1695_vm5, %v5826_v18, %v6263_v50  ;;  %v2950_v18 = vrot.slane %v6150_v45, 3  ;;  %v2952_v50 = vrot.slane %v6176_v27, 3 }
 0x170   : > { %4861 = vmatmul.mubr.msk.bf16.gmra.mrb[4].mxu0 %vm749_vm4, %v2939_v54 }
 0x171   : > { %4864 = vmatprep.mubr.msk.bf16.mxu0 %vm5379_vm0, %v5378_v1  ;;  %v2951_v57 = vsel %vm1438_vm8, %v2948_v13, %v2950_v18  ;;  %v2953_v45 = vsel %vm1438_vm8, %v2950_v18, %v2952_v50 }
 0x175   : > { %4599 = vmatmul.mubr.msk.bf16.gmra.mrb[32].mxu1 %vm749_vm4, %v6200_v24  ;;  %v2944_v24 = vrot.slane %v6100_v7, 3 }
 0x176   : > { %4602 = vmatprep.mubr.msk.bf16.mxu1 %vm5379_vm0, %v5378_v1 }
 0x177   : > { %v2945_v16 = vsel %vm1438_vm8, %v2942_v3, %v2944_v24  ;;  %v2947_v7 = vsel %vm1438_vm8, %v2944_v24, %v2946_v2 }
 0x178   : > { %4865 = vmatmul.mubr.msk.bf16.gmra.mrb[8].mxu0 %vm749_vm4, %v2941_v44 }
 0x179   : > { %4868 = vmatprep.mubr.msk.bf16.mxu0 %vm5379_vm0, %v5378_v1 }
 0x17d   : > { %4603 = vmatmul.mubr.msk.bf16.gmra.mrb[36].mxu1 %vm749_vm4, %v1459_v9 }
 0x17e   : > { %4606 = vmatprep.mubr.msk.bf16.mxu1 %vm5379_vm0, %v5378_v1 }
 0x180   : > { %4869 = vmatmul.mubr.msk.bf16.gmra.mrb[12].mxu0 %vm749_vm4, %v2943_v31 }
 0x181   : > { %4872 = vmatprep.mubr.msk.bf16.mxu0 %vm5379_vm0, %v5378_v1 }
 0x185   : > { %4607 = vmatmul.mubr.msk.bf16.gmra.mrb[40].mxu1 %vm749_vm4, %v1458_v61 }
 0x186   : > { %4648 = vmatprep.mubr.msk.bf16.mxu1 %vm5379_vm0, %v5378_v1 }
 0x188   : > { %4873 = vmatmul.mubr.msk.bf16.gmra.mrb[16].mxu0 %vm749_vm4, %v2945_v16 }
 0x189   : > { %4876 = vmatprep.mubr.msk.bf16.mxu0 %vm5379_vm0, %v5378_v1 }
 0x18d   : > { %4649 = vmatmul.mubr.msk.bf16.vlgmr.msra.gmra.mrb[24].mxu1 %vm749_vm4, %v1766_v19 }
 0x18e   : > { %4652 = vmatprep.mubr.msk.bf16.mxu1 %vm5379_vm0, %v5378_v1 }
 0x190   : > { %4877 = vmatmul.mubr.msk.bf16.gmra.mrb[20].mxu0 %vm749_vm4, %v2947_v7 }
 0x191   : > { %4880 = vmatprep.mubr.msk.bf16.mxu0 %vm5379_vm0, %v5378_v1 }
 0x195   : > { %4653 = vmatmul.mubr.msk.bf16.gmra.mrb[28].mxu1 %vm749_vm4, %v6271_v20  ;;  %v2954_v20 = vrot.slane %v6379_v23, 3 }
 0x196   : > { %4656 = vmatprep.mubr.msk.bf16.mxu1 %vm5379_vm0, %v5378_v1 }
 0x197   : > { %v2955_v27 = vsel %vm1438_vm8, %v2952_v50, %v2954_v20 }
 0x198   : > { %4881 = vmatmul.mubr.msk.bf16.gmra.mrb[24].mxu0 %vm749_vm4, %v2949_v29 }
 0x199   : > { %4884 = vmatprep.mubr.msk.bf16.mxu0 %vm5379_vm0, %v5378_v1 }
 0x19d   : > { %4657 = vmatmul.mubr.msk.bf16.gmra.mrb[32].mxu1 %vm749_vm4, %v6297_v21 }
 0x19e   : > { %4660 = vmatprep.mubr.msk.bf16.mxu1 %vm5379_vm0, %v5378_v1 }
 0x1a0   : > { %4885 = vmatmul.mubr.msk.bf16.gmra.mrb[28].mxu0 %vm749_vm4, %v2951_v57 }
 0x1a1   : > { %4888 = vmatprep.mubr.msk.bf16.mxu0 %vm5379_vm0, %v5378_v1 }
 0x1a5   : > { %4661 = vmatmul.mubr.msk.bf16.gmra.mrb[36].mxu1 %vm749_vm4, %v6321_v47 }
 0x1a6   : > { %4664 = vmatprep.mubr.msk.bf16.mxu1 %vm5379_vm0, %v5378_v1 }
 0x1a8   : > { %4889 = vmatmul.mubr.msk.bf16.gmra.mrb[32].mxu0 %vm749_vm4, %v2953_v45 }
 0x1a9   : > { %4892 = vmatprep.mubr.msk.bf16.mxu0 %vm5379_vm0, %v5378_v1 }
 0x1ad   : > { %4665 = vmatmul.mubr.msk.bf16.gmra.mrb[40].mxu1 %vm749_vm4, %v6314_v38 }
 0x1b0   : > { %4893 = vmatmul.mubr.msk.bf16.gmra.mrb[36].mxu0 %vm749_vm4, %v2955_v27 }
 0x1b1   : > { %4896 = vmatprep.mubr.msk.bf16.mxu0 %vm5379_vm0, %v5378_v1  ;;  %vm3633_vm0 = vcmask 778240  }
 0x1b8   : > { %4897 = vmatmul.mubr.msk.bf16.gmra.mrb[40].mxu0 %vm749_vm4, %v2954_v20 }
 0x208   : > { %v1569_v21 = vpop.f32.mrb[0].mxu1 }
 0x209   : > { %v4568_v47 = vpop.f32.mrb[1].mxu1 }
 0x20a   : > { %v1572_v63 = vpop.f32.mrb[2].mxu1 }
 0x20b   : > { %v4569_v6 = vpop.f32.mrb[3].mxu1 }
 0x210   : > { %v1577_v26 = vpop.f32.mrb[4].mxu1 }
 0x211   : > { %v4572_v25 = vpop.f32.mrb[5].mxu1 }
 0x212   : > { %v1580_v22 = vpop.f32.mrb[6].mxu1 }
 0x213   : > { %v4573_v30 = vpop.f32.mrb[7].mxu1 }
 0x218   : > { %v1585_v5 = vpop.f32.mrb[8].mxu1 }
 0x219   : > { %v4576_v43 = vpop.f32.mrb[9].mxu1 }
 0x21a   : > { %v1588_v38 = vpop.f32.mrb[10].mxu1 }
 0x21b   : > { %v4577_v14 = vpop.f32.mrb[11].mxu1 }
 0x220   : > { %v6523_v41 = vpop.f32.mrb[12].mxu1 }
 0x221   : > { %v4580_v23 = vpop.f32.mrb[13].mxu1 }
 0x222   : > { %v6525_v36 = vpop.f32.mrb[14].mxu1 }
 0x223   : > { %v4581_v1 = vpop.f32.mrb[15].mxu1 }
 0x228   : > { %v6527_v56 = vpop.f32.mrb[16].mxu1 }
 0x229   : > { %v4584_v48 = vpop.f32.mrb[17].mxu1 }
 0x22a   : > { %v6529_v0 = vpop.f32.mrb[18].mxu1 }
 0x22b   : > { %v4585_v40 = vpop.f32.mrb[19].mxu1 }
 0x230   : > { %v6531_v10 = vpop.f32.mrb[20].mxu1 }
 0x231   : > { %v4588_v58 = vpop.f32.mrb[21].mxu1 }
 0x232   : > { %v6533_v35 = vpop.f32.mrb[22].mxu1 }
 0x233   : > { %v4589_v46 = vpop.f32.mrb[23].mxu1 }
 0x23b   : > { %v3065_v34 = vpop.f32.mrb[0].mxu0 }
 0x23c   : > { %v4914_v59 = vadd.f32 %v3065_v34, %v1569_v21  ;;  %v4858_v60 = vpop.f32.mrb[1].mxu0 }
 0x23d   : > { %v3068_v49 = vpop.f32.mrb[2].mxu0 }
 0x23e   : > { %3173 = vst.msk [vmem:[#allocation2] sm:$0xff] %vm3172_vm10, %v4914_v59  ;;  %v4915_v51 = vadd.f32 %v3068_v49, %v1572_v63  ;;  %v4859_v52 = vpop.f32.mrb[3].mxu0 }
 0x240   : > { %3174 = vst.msk [vmem:[#allocation2 + $0x8] sm:$0xff] %vm3172_vm10, %v4915_v51 }
 0x243   : > { %v3073_v53 = vpop.f32.mrb[4].mxu0 }
 0x244   : > { %v4916_v42 = vadd.f32 %v3073_v53, %v1577_v26  ;;  %v4862_v62 = vpop.f32.mrb[5].mxu0 }
 0x245   : > { %v3194_v32 = vld [vmem:[#allocation2] sm:$0xff]  ;;  %v3076_v37 = vpop.f32.mrb[6].mxu0 }
 0x246   : > { %v4133_v39 = vpack.c.bf16 %v3194_v32, %v3194_v32  ;;  %v3218_v4 = vmul.f32 %v3194_v32, %v3194_v32  ;;  %3175 = vst.msk [vmem:[#allocation2 + $0x10] sm:$0xff] %vm3172_vm10, %v4916_v42  ;;  %v4917_v11 = vadd.f32 %v3076_v37, %v1580_v22  ;;  %v4863_v15 = vpop.f32.mrb[7].mxu0  ;;  %v3208_v8 = vsel %vm3172_vm10, %v3194_v32, 0.0 }
 0x247   : > { %v3195_v28 = vld [vmem:[#allocation2 + $0x8] sm:$0xf] }
 0x248   : > { %3205 = vst.msk [vmem:[%s5457_s13] sm:$0xf] %vm3204_vm1, %v4133_v39  ;;  %v4134_v17 = vpack.c.bf16 %v3195_v28, %v3195_v28  ;;  %v3209_v54 = vsel %vm3204_vm1, %v3195_v28, 0.0  ;;  %v3219_v33 = vmul.f32 %v3195_v28, %v3195_v28  ;;  %v3220_v12 = vsel %vm3172_vm10, %v3218_v4, 0.0 }
 0x249   : > { %3176 = vst.msk [vmem:[#allocation2 + $0x18] sm:$0xff] %vm3172_vm10, %v4917_v11  ;;  %v6543_v55 = vadd.f32 %v3209_v54, %v3208_v8 }
 0x24a   : > { %3207 = vst.msk [vmem:[%s5457_s13 + $0x4] sm:$0x3] %vm3206_vm11, %v4134_v17  ;;  %v3221_v44 = vsel %vm3204_vm1, %v3219_v33, 0.0 }
 0x24b   : > { %v3222_v61 = vadd.f32 %v3221_v44, %v3220_v12  ;;  %v3081_v3 = vpop.f32.mrb[8].mxu0 }
 0x24c   : > { %v4918_v9 = vadd.f32 %v3081_v3, %v1585_v5  ;;  %v4866_v31 = vpop.f32.mrb[9].mxu0 }
 0x24d   : > { %v3223_v24 = vrot.slane %v3222_v61, 4  ;;  %v3230_v16 = vld [vmem:[#allocation2 + $0xe] sm:$0xff]  ;;  %v3084_v2 = vpop.f32.mrb[10].mxu0 }
 0x24e   : > { %v4135_v19 = vpack.c.bf16 %v3230_v16, %v3230_v16  ;;  %3177 = vst.msk [vmem:[#allocation2 + $0x20] sm:$0xff] %vm3172_vm10, %v4918_v9  ;;  %v4919_v7 = vadd.f32 %v3084_v2, %v1588_v38  ;;  %v4867_v13 = vpop.f32.mrb[11].mxu0  ;;  %v3260_v29 = vmul.f32 %v3230_v16, %v3230_v16  ;;  %v3250_v8 = vsel %vm3172_vm10, %v3230_v16, 0.0 }
 0x24f   : > { %v3224_v57 = vadd.f32 %v3223_v24, %v3222_v61 }
 0x250   : > { %v3231_v18 = vld [vmem:[#allocation2 + $0x16] sm:$0xf]  ;;  %v3241_v50 = vrot.slane %v4135_v19, 6  ;;  %3178 = vst.msk [vmem:[#allocation2 + $0x28] sm:$0xff] %vm3172_vm10, %v4919_v7  ;;  %v3262_v63 = vsel %vm3172_vm10, %v3260_v29, 0.0 }
 0x251   : > { %v4136_v45 = vpack.c.bf16 %v3231_v18, %v3231_v18  ;;  %v3261_v27 = vmul.f32 %v3231_v18, %v3231_v18  ;;  %v3225_v25 = vrot.slane %v3224_v57, 2  ;;  %v3251_v42 = vsel %vm3204_vm1, %v3231_v18, 0.0 }
 0x252   : > { %v3242_v21 = vrot.slane %v3241_v50, 4  ;;  %3248 = vst.msk [vmem:[%s5457_s13 + $0x4] sm:$0xc] %vm3247_vm14, %v3241_v50  ;;  %v3252_v54 = vadd.f32 %v3251_v42, %v3250_v8 }
 0x253   : > { %v3243_v47 = vrot.slane %v4136_v45, 6  ;;  %v3263_v6 = vsel %vm3204_vm1, %v3261_v27, 0.0  ;;  %v3089_v26 = vpop.f32.mrb[12].mxu0  ;;  %v3226_v46 = vadd.f32 %v3225_v25, %v3224_v57  ;;  %v3211_v57 = vrot.slane %v6543_v55, 4 }
 0x254   : > { %v3264_v30 = vadd.f32 %v3263_v6, %v3262_v63  ;;  %v4920_v5 = vadd.f32 %v3089_v26, %v6523_v41  ;;  %v4870_v43 = vpop.f32.mrb[13].mxu0 }
 0x255   : > { %v3244_v22 = vsel %vm6551_vm15, %v3242_v21, %v3243_v47  ;;  %v3272_v38 = vld [vmem:[#allocation2 + $0x1c] sm:$0xff]  ;;  %v3273_v14 = vld [vmem:[#allocation2 + $0x24] sm:$0xf]  ;;  %v3092_v23 = vpop.f32.mrb[14].mxu0  ;;  %v3227_v49 = vrot.slane %v3226_v46, 1  ;;  %v3253_v47 = vrot.slane %v3252_v54, 4 }
 0x256   : > { %3249 = vst.msk [vmem:[%s5457_s13 + $0x8] sm:$0xf] %vm3204_vm1, %v3244_v22  ;;  %v3265_v1 = vrot.slane %v3264_v30, 4  ;;  %v4137_v48 = vpack.c.bf16 %v3272_v38, %v3272_v38  ;;  %v4138_v40 = vpack.c.bf16 %v3273_v14, %v3273_v14  ;;  %v4871_v58 = vpop.f32.mrb[15].mxu0  ;;  %v4921_v41 = vadd.f32 %v3092_v23, %v6525_v36 }
 0x257   : > { %3179 = vst.msk [vmem:[#allocation2 + $0x30] sm:$0xff] %vm3172_vm10, %v4920_v5  ;;  %v3294_v62 = vmul.f32 %v3272_v38, %v3272_v38  ;;  %v3295_v32 = vmul.f32 %v3273_v14, %v3273_v14  ;;  %v3228_v17 = vadd.f32 %v3227_v49, %v3226_v46  ;;  %v3284_v44 = vsel %vm3172_vm10, %v3272_v38, 0.0 }
 0x258   : > { %v3266_v34 = vadd.f32 %v3265_v1, %v3264_v30  ;;  %3282 = vst.msk [vmem:[%s5457_s13 + $0xc] sm:$0xf] %vm3204_vm1, %v4137_v48  ;;  %v3285_v61 = vsel %vm3204_vm1, %v3273_v14, 0.0  ;;  %v3254_v58 = vadd.f32 %v3253_v47, %v3252_v54 }
 0x259   : > { %3283 = vst.msk [vmem:[%s5457_s13 + $0x10] sm:$0x3] %vm3206_vm11, %v4138_v40  ;;  %v3296_v3 = vsel %vm3172_vm10, %v3294_v62, 0.0  ;;  %v3297_v9 = vsel %vm3204_vm1, %v3295_v32, 0.0  ;;  %v3286_v63 = vadd.f32 %v3285_v61, %v3284_v44  ;;  %v3212_v40 = vadd.f32 %v3211_v57, %v6543_v55 }
 0x25a   : > { %v3267_v59 = vrot.slane %v3266_v34, 2  ;;  %3180 = vst.msk [vmem:[#allocation2 + $0x38] sm:$0xff] %vm3172_vm10, %v4921_v41  ;;  %v3298_v6 = vadd.f32 %v3297_v9, %v3296_v3  ;;  %v3255_v55 = vrot.slane %v3254_v58, 2 }
 0x25b   : > { %v3097_v60 = vpop.f32.mrb[16].mxu0  ;;  %v3287_v46 = vrot.slane %v3286_v63, 4  ;;  %v3213_v42 = vrot.slane %v3212_v40, 2 }
 0x25c   : > { %v3268_v51 = vadd.f32 %v3267_v59, %v3266_v34  ;;  %v4922_v52 = vadd.f32 %v3097_v60, %v6527_v56  ;;  %v4874_v53 = vpop.f32.mrb[17].mxu0  ;;  %v3299_v34 = vrot.slane %v3298_v6, 4  ;;  %v3256_v44 = vadd.f32 %v3255_v55, %v3254_v58 }
 0x25d   : > { %v3100_v4 = vpop.f32.mrb[18].mxu0  ;;  %v3288_v62 = vadd.f32 %v3287_v46, %v3286_v63 }
 0x25e   : > { %v3306_v37 = vld [vmem:[#allocation2 + $0x2a] sm:$0xff]  ;;  %v3307_v39 = vld [vmem:[#allocation2 + $0x32] sm:$0xf]  ;;  %v3269_v11 = vrot.slane %v3268_v51, 1  ;;  %3181 = vst.msk [vmem:[#allocation2 + $0x40] sm:$0xff] %vm3172_vm10, %v4922_v52  ;;  %v4875_v36 = vpop.f32.mrb[19].mxu0  ;;  %v4923_v25 = vadd.f32 %v3100_v4, %v6529_v0  ;;  %v3300_v32 = vadd.f32 %v3299_v34, %v3298_v6 }
 0x25f   : > { %v4139_v15 = vpack.c.bf16 %v3306_v37, %v3306_v37  ;;  %v4140_v28 = vpack.c.bf16 %v3307_v39, %v3307_v39  ;;  %v3332_v45 = vmul.f32 %v3306_v37, %v3306_v37  ;;  %v3333_v27 = vmul.f32 %v3307_v39, %v3307_v39 }
 0x260   : > { %v3270_v56 = vadd.f32 %v3269_v11, %v3268_v51  ;;  %v1951_v12 = vpop.f32.mrb[24].mxu1  ;;  %v3322_v43 = vsel %vm3172_vm10, %v3306_v37, 0.0  ;;  %v3323_v38 = vsel %vm3204_vm1, %v3307_v39, 0.0  ;;  %3182 = vst.msk [vmem:[#allocation2 + $0x48] sm:$0xff] %vm3172_vm10, %v4923_v25 }
 0x261   : > { %v3314_v33 = vrot.slane %v4139_v15, 6  ;;  %v3344_v31 = vld [vmem:[#allocation2 + $0x38] sm:$0xff]  ;;  %v4650_v24 = vpop.f32.mrb[25].mxu1  ;;  %v3316_v16 = vrot.slane %v4140_v28, 6  ;;  %v3334_v14 = vsel %vm3172_vm10, %v3332_v45, 0.0  ;;  %v3335_v23 = vsel %vm3204_vm1, %v3333_v27, 0.0 }
 0x262   : > { %v6579_v2 = vadd.f32 %v3270_v56, %v3228_v17  ;;  %v4141_v7 = vpack.c.bf16 %v3344_v31, %v3344_v31  ;;  %v1954_v13 = vpop.f32.mrb[26].mxu1  ;;  %v3324_v59 = vadd.f32 %v3323_v38, %v3322_v43  ;;  %v3336_v49 = vadd.f32 %v3335_v23, %v3334_v14 }
 0x263   : > { %v3315_v19 = vrot.slane %v3314_v33, 4  ;;  %3320 = vst.msk [vmem:[%s5457_s13 + $0x10] sm:$0xc] %vm3247_vm14, %v3314_v33  ;;  %v3105_v29 = vpop.f32.mrb[20].mxu0  ;;  %v4651_v18 = vpop.f32.mrb[27].mxu1  ;;  %v3356_v4 = vsel %vm3172_vm10, %v3344_v31, 0.0  ;;  %v3366_v17 = vmul.f32 %v3344_v31, %v3344_v31 }
 0x264   : > { %3354 = vst.msk [vmem:[%s5457_s13 + $0x18] sm:$0xf] %vm3204_vm1, %v4141_v7  ;;  %v4878_v21 = vpop.f32.mrb[21].mxu0  ;;  %v4924_v1 = vadd.f32 %v3105_v29, %v6531_v10  ;;  %v3325_v39 = vrot.slane %v3324_v59, 4  ;;  %v3337_v8 = vrot.slane %v3336_v49, 4  ;;  %v3289_v24 = vrot.slane %v3288_v62, 2 }
 0x265   : > { %v3317_v50 = vsel %vm6551_vm15, %v3315_v19, %v3316_v16  ;;  %v3345_v26 = vld [vmem:[#allocation2 + $0x40] sm:$0xf]  ;;  %v3108_v22 = vpop.f32.mrb[22].mxu0  ;;  %v3301_v19 = vrot.slane %v3300_v32, 2  ;;  %v3368_v57 = vsel %vm3172_vm10, %v3366_v17, 0.0 }
 0x266   : > { %3321 = vst.msk [vmem:[%s5457_s13 + $0x14] sm:$0xf] %vm3204_vm1, %v3317_v50  ;;  %v4142_v30 = vpack.c.bf16 %v3345_v26, %v3345_v26  ;;  %v4879_v5 = vpop.f32.mrb[23].mxu0  ;;  %v4925_v48 = vadd.f32 %v3108_v22, %v6533_v35  ;;  %v3357_v35 = vsel %vm3204_vm1, %v3345_v26, 0.0  ;;  %v3367_v11 = vmul.f32 %v3345_v26, %v3345_v26 }
 0x267   : > { %3183 = vst.msk [vmem:[#allocation2 + $0x50] sm:$0xff] %vm3172_vm10, %v4924_v1  ;;  %v3378_v15 = vld [vmem:[#allocation2 + $0x46] sm:$0xff]  ;;  %v3358_v54 = vadd.f32 %v3357_v35, %v3356_v4  ;;  %v3326_v29 = vadd.f32 %v3325_v39, %v3324_v59  ;;  %v3338_v18 = vadd.f32 %v3337_v8, %v3336_v49  ;;  %v3290_v38 = vadd.f32 %v3289_v24, %v3288_v62 }
 0x268   : > { %3355 = vst.msk [vmem:[%s5457_s13 + $0x1c] sm:$0x3] %vm3206_vm11, %v4142_v30  ;;  %v6600_v0 = vpop.f32.mrb[28].mxu1  ;;  %v4143_v56 = vpack.c.bf16 %v3378_v15, %v3378_v15  ;;  %v3369_v16 = vsel %vm3204_vm1, %v3367_v11, 0.0  ;;  %v3302_v14 = vadd.f32 %v3301_v19, %v3300_v32  ;;  %v3404_v34 = vmul.f32 %v3378_v15, %v3378_v15 }
 0x269   : > { %v4654_v41 = vpop.f32.mrb[29].mxu1  ;;  %3184 = vst.msk [vmem:[#allocation2 + $0x58] sm:$0xff] %vm3172_vm10, %v4925_v48  ;;  %v3359_v50 = vrot.slane %v3358_v54, 4  ;;  %v3370_v30 = vadd.f32 %v3369_v16, %v3368_v57  ;;  %v3339_v58 = vrot.slane %v3338_v18, 2  ;;  %v3257_v49 = vrot.slane %v3256_v44, 1 }
 0x26a   : > { %v6605_v60 = vpop.f32.mrb[30].mxu1  ;;  %v3386_v61 = vrot.slane %v4143_v56, 6  ;;  %v3303_v39 = vrot.slane %v3302_v14, 1  ;;  %v3406_v8 = vsel %vm3172_vm10, %v3404_v34, 0.0 }
 0x26b   : > { %v3113_v51 = vpop.f32.mrb[24].mxu0  ;;  %v4655_v10 = vpop.f32.mrb[31].mxu1  ;;  %v3360_v46 = vadd.f32 %v3359_v50, %v3358_v54  ;;  %v3258_v56 = vadd.f32 %v3257_v49, %v3256_v44 }
 0x26c   : > { %v4926_v52 = vadd.f32 %v3113_v51, %v1951_v12  ;;  %v4882_v53 = vpop.f32.mrb[25].mxu0  ;;  %v3214_v12 = vadd.f32 %v3213_v42, %v3212_v40  ;;  %3392 = vst.msk [vmem:[%s5457_s13 + $0x1c] sm:$0xc] %vm3247_vm14, %v3386_v61  ;;  %v3387_v21 = vrot.slane %v3386_v61, 4  ;;  %v3327_v40 = vrot.slane %v3326_v29, 2 }
 0x26d   : > { %v3116_v37 = vpop.f32.mrb[26].mxu0  ;;  %v3394_v51 = vsel %vm3172_vm10, %v3378_v15, 0.0  ;;  %v3371_v53 = vrot.slane %v3370_v30, 4 }
 0x26e   : > { %3185 = vst.msk [vmem:[#allocation2 + $0x60] sm:$0xff] %vm3172_vm10, %v4926_v52  ;;  %v4927_v28 = vadd.f32 %v3116_v37, %v1954_v13  ;;  %v4883_v36 = vpop.f32.mrb[27].mxu0  ;;  %v3379_v3 = vld [vmem:[#allocation2 + $0x4e] sm:$0xf]  ;;  %v3215_v22 = vrot.slane %v3214_v12, 1  ;;  %v3291_v37 = vrot.slane %v3290_v38, 1  ;;  %v3328_v15 = vadd.f32 %v3327_v40, %v3326_v29 }
 0x26f   : > { %v4144_v7 = vpack.c.bf16 %v3379_v3, %v3379_v3  ;;  %v3405_v5 = vmul.f32 %v3379_v3, %v3379_v3  ;;  %v3395_v1 = vsel %vm3204_vm1, %v3379_v3, 0.0  ;;  %v3361_v36 = vrot.slane %v3360_v46, 2 }
 0x270   : > { %3186 = vst.msk [vmem:[#allocation2 + $0x68] sm:$0xff] %vm3172_vm10, %v4927_v28  ;;  %v6611_v33 = vpop.f32.mrb[32].mxu1  ;;  %v6613_v9 = vld [vmem:[#allocation2 + $0x54] sm:$0xff]  ;;  %v6616_v13 = vld [vmem:[#allocation2 + $0x5c] sm:$0xf]  ;;  %v3396_v42 = vadd.f32 %v3395_v1, %v3394_v51  ;;  %v3216_v32 = vadd.f32 %v3215_v22, %v3214_v12  ;;  %v3340_v28 = vadd.f32 %v3339_v58, %v3338_v18  ;;  %v3372_v19 = vadd.f32 %v3371_v53, %v3370_v30 }
 0x271   : > { %v4658_v31 = vpop.f32.mrb[33].mxu1  ;;  %v3388_v47 = vrot.slane %v4144_v7, 6  ;;  %v4145_v63 = vpack.c.bf16 %v6613_v9, %v6613_v9  ;;  %v4146_v6 = vpack.c.bf16 %v6616_v13, %v6616_v13  ;;  %v3407_v55 = vsel %vm3204_vm1, %v3405_v5, 0.0 }
 0x272   : > { %v6623_v27 = vpop.f32.mrb[34].mxu1  ;;  %v3408_v61 = vadd.f32 %v3407_v55, %v3406_v8  ;;  %v3397_v16 = vrot.slane %v3396_v42, 4  ;;  %v3428_v7 = vsel %vm3172_vm10, %v6613_v9, 0.0  ;;  %v3429_v31 = vsel %vm3204_vm1, %v6616_v13, 0.0 }
 0x273   : > { %v6621_v45 = vpop.f32.mrb[28].mxu0  ;;  %v4659_v25 = vpop.f32.mrb[35].mxu1  ;;  %v3389_v23 = vsel %vm6551_vm15, %v3387_v21, %v3388_v47  ;;  %3426 = vst.msk [vmem:[%s5457_s13 + $0x24] sm:$0xf] %vm3204_vm1, %v4145_v63  ;;  %v3292_v18 = vadd.f32 %v3291_v37, %v3290_v38  ;;  %v3438_v44 = vmul.f32 %v6613_v9, %v6613_v9  ;;  %v3439_v57 = vmul.f32 %v6616_v13, %v6616_v13 }
 0x274   : > { %v4886_v26 = vpop.f32.mrb[29].mxu0  ;;  %3427 = vst.msk [vmem:[%s5457_s13 + $0x28] sm:$0x3] %vm3206_vm11, %v4146_v6  ;;  %v3304_v47 = vadd.f32 %v3303_v39, %v3302_v14  ;;  %v3329_v63 = vrot.slane %v3328_v15, 1  ;;  %v3341_v6 = vrot.slane %v3340_v28, 1  ;;  %v3409_v25 = vrot.slane %v3408_v61, 4 }
 0x275   : > { %v3124_v43 = vpop.f32.mrb[30].mxu0  ;;  %3393 = vst.msk [vmem:[%s5457_s13 + $0x20] sm:$0xf] %vm3204_vm1, %v3389_v23  ;;  %v3362_v26 = vadd.f32 %v3361_v36, %v3360_v46  ;;  %v3430_v22 = vadd.f32 %v3429_v31, %v3428_v7  ;;  %v4928_v30 = vadd.f32 %v6621_v45, %v6600_v0  ;;  %v3259_v13 = vadd.f32 %v3258_v56, %v3216_v32 }
 0x276   : > { %v4887_v48 = vpop.f32.mrb[31].mxu0  ;;  %v4929_v9 = vadd.f32 %v3124_v43, %v6605_v60  ;;  %v3373_v38 = vrot.slane %v3372_v19, 2  ;;  %v3398_v23 = vadd.f32 %v3397_v16, %v3396_v42  ;;  %v3440_v14 = vsel %vm3172_vm10, %v3438_v44, 0.0 }
 0x277   : > { %v6638_v41 = vld [vmem:[#allocation2 + $0x62] sm:$0xff]  ;;  %v6640_v59 = vld [vmem:[#allocation2 + $0x6a] sm:$0xf]  ;;  %v3441_v48 = vsel %vm3204_vm1, %v3439_v57, 0.0  ;;  %3187 = vst.msk [vmem:[#allocation2 + $0x70] sm:$0xff] %vm3172_vm10, %v4928_v30  ;;  %v3293_v60 = vadd.f32 %v3292_v18, %v3259_v13  ;;  %v3305_v43 = vadd.f32 %v3304_v47, %v6579_v2  ;;  %v3330_v58 = vadd.f32 %v3329_v63, %v3328_v15 }
 0x278   : > { %v4147_v10 = vpack.c.bf16 %v6638_v41, %v6638_v41  ;;  %v4148_v35 = vpack.c.bf16 %v6640_v59, %v6640_v59  ;;  %v6647_v52 = vpop.f32.mrb[36].mxu1  ;;  %3188 = vst.msk [vmem:[#allocation2 + $0x78] sm:$0xff] %vm3172_vm10, %v4929_v9  ;;  %v3342_v46 = vadd.f32 %v3341_v6, %v3340_v28  ;;  %v3363_v51 = vrot.slane %v3362_v26, 1 }
 0x279   : > { %v4662_v62 = vpop.f32.mrb[37].mxu1  ;;  %v6682_v42 = vadd.f32 %v3373_v38, %v3372_v19  ;;  %v3442_v55 = vadd.f32 %v3441_v48, %v3440_v14  ;;  %v3466_v2 = vsel %vm3172_vm10, %v6638_v41, 0.0  ;;  %v3467_v32 = vsel %vm3204_vm1, %v6640_v59, 0.0 }
 0x27a   : > { %v3458_v4 = vrot.slane %v4147_v10, 6  ;;  %v6650_v11 = vpop.f32.mrb[38].mxu1  ;;  %v3460_v24 = vrot.slane %v4148_v35, 6  ;;  %v3410_v10 = vadd.f32 %v3409_v25, %v3408_v61  ;;  %v3431_v35 = vrot.slane %v3430_v22, 4 }
 0x27b   : > { %v3129_v17 = vpop.f32.mrb[32].mxu0  ;;  %v4663_v54 = vpop.f32.mrb[39].mxu1  ;;  %v3476_v37 = vmul.f32 %v6638_v41, %v6638_v41  ;;  %v3477_v39 = vmul.f32 %v6640_v59, %v6640_v59  ;;  %v6694_v15 = vadd.f32 %v3330_v58, %v3293_v60  ;;  %v6696_v28 = vadd.f32 %v3342_v46, %v3305_v43 }
 0x27c   : > { %v3459_v3 = vrot.slane %v3458_v4, 4  ;;  %3464 = vst.msk [vmem:[%s5457_s13 + $0x28] sm:$0xc] %vm3247_vm14, %v3458_v4  ;;  %v4890_v12 = vpop.f32.mrb[33].mxu0  ;;  %v4930_v40 = vadd.f32 %v3129_v17, %v6611_v33  ;;  %v6698_v36 = vadd.f32 %v3363_v51, %v3362_v26  ;;  %v3411_v8 = vrot.slane %v3410_v10, 2 }
 0x27d   : > { %v3132_v29 = vpop.f32.mrb[34].mxu0  ;;  %v3432_v17 = vadd.f32 %v3431_v35, %v3430_v22  ;;  %v3375_v41 = vrot.slane %v6682_v42, 1  ;;  %v3443_v59 = vrot.slane %v3442_v55, 4  ;;  %v3468_v56 = vadd.f32 %v3467_v32, %v3466_v2 }
 0x27e   : > { %v3461_v50 = vsel %vm6551_vm15, %v3459_v3, %v3460_v24  ;;  %v4891_v21 = vpop.f32.mrb[35].mxu0  ;;  %v4931_v0 = vadd.f32 %v3132_v29, %v6623_v27  ;;  %3189 = vst.msk [vmem:[#allocation2 + $0x80] sm:$0xff] %vm3172_vm10, %v4930_v40  ;;  %v3399_v27 = vrot.slane %v3398_v23, 2  ;;  %v3488_v61 = vld [vmem:[#allocation2 + $0x70] sm:$0xff]  ;;  %v3478_v3 = vsel %vm3172_vm10, %v3476_v37, 0.0 }
 0x27f   : > { %3465 = vst.msk [vmem:[%s5457_s13 + $0x2c] sm:$0xf] %vm3204_vm1, %v3461_v50  ;;  %v3479_v24 = vsel %vm3204_vm1, %v3477_v39, 0.0  ;;  %v4149_v12 = vpack.c.bf16 %v3488_v61, %v3488_v61  ;;  %v3500_v19 = vsel %vm3172_vm10, %v3488_v61, 0.0  ;;  %v3510_v16 = vmul.f32 %v3488_v61, %v3488_v61 }
 0x280   : > { %v6670_v5 = vpop.f32.mrb[40].mxu1  ;;  %3190 = vst.msk [vmem:[#allocation2 + $0x88] sm:$0xff] %vm3172_vm10, %v4931_v0  ;;  %v6702_v54 = vadd.f32 %v3399_v27, %v3398_v23  ;;  %v6708_v57 = vadd.f32 %v3411_v8, %v3410_v10  ;;  %v3433_v50 = vrot.slane %v3432_v17, 2  ;;  %v3469_v26 = vrot.slane %v3468_v56, 4 }
 0x281   : > { %v4666_v1 = vpop.f32.mrb[41].mxu1  ;;  %3498 = vst.msk [vmem:[%s5457_s13 + $0x30] sm:$0xf] %vm3204_vm1, %v4149_v12  ;;  %v3512_v25 = vsel %vm3172_vm10, %v3510_v16, 0.0  ;;  %v3444_v9 = vadd.f32 %v3443_v59, %v3442_v55  ;;  %v3480_v13 = vadd.f32 %v3479_v24, %v3478_v3 }
 0x282   : > { %v1986_v45 = vpop.f32.mrb[42].mxu1  ;;  %v3470_v27 = vadd.f32 %v3469_v26, %v3468_v56  ;;  %v3413_v24 = vrot.slane %v6708_v57, 1 }
 0x283   : > { %v3137_v34 = vpop.f32.mrb[36].mxu0  ;;  %v4667_v49 = vpop.f32.mrb[43].mxu1  ;;  %v3481_v55 = vrot.slane %v3480_v13, 4 }
 0x284   : > { %v4932_v53 = vadd.f32 %v3137_v34, %v6647_v52  ;;  %v4894_v33 = vpop.f32.mrb[37].mxu0  ;;  %v3414_v26 = vadd.f32 %v3413_v24, %v6708_v57 }
 0x285   : > { %v3140_v62 = vpop.f32.mrb[38].mxu0  ;;  %v3522_v18 = vld [vmem:[#allocation2 + $0x7e] sm:$0xff]  ;;  %v3445_v33 = vrot.slane %v3444_v9, 2 }
 0x286   : > { %3191 = vst.msk [vmem:[#allocation2 + $0x90] sm:$0xff] %vm3172_vm10, %v4932_v53  ;;  %v4933_v52 = vadd.f32 %v3140_v62, %v6650_v11  ;;  %v4895_v4 = vpop.f32.mrb[39].mxu0  ;;  %v3489_v11 = vld [vmem:[#allocation2 + $0x78] sm:$0xf]  ;;  %v4151_v47 = vpack.c.bf16 %v3522_v18, %v3522_v18  ;;  %v3548_v30 = vmul.f32 %v3522_v18, %v3522_v18  ;;  %v3538_v23 = vsel %vm3172_vm10, %v3522_v18, 0.0 }
 0x287   : > { %v4150_v7 = vpack.c.bf16 %v3489_v11, %v3489_v11  ;;  %v3501_v31 = vsel %vm3204_vm1, %v3489_v11, 0.0  ;;  %v3511_v29 = vmul.f32 %v3489_v11, %v3489_v11  ;;  %v3523_v63 = vld [vmem:[#allocation2 + $0x86] sm:$0xf]  ;;  %v3434_v4 = vadd.f32 %v3433_v50, %v3432_v17 }
 0x288   : > { %3192 = vst.msk [vmem:[#allocation2 + $0x98] sm:$0xff] %vm3172_vm10, %v4933_v52  ;;  %v3502_v21 = vadd.f32 %v3501_v31, %v3500_v19  ;;  %v3530_v38 = vrot.slane %v4151_v47, 6  ;;  %v4152_v0 = vpack.c.bf16 %v3523_v63, %v3523_v63  ;;  %v3539_v45 = vsel %vm3204_vm1, %v3523_v63, 0.0 }
 0x289   : > { %3499 = vst.msk [vmem:[%s5457_s13 + $0x34] sm:$0x3] %vm3206_vm11, %v4150_v7  ;;  %v3513_v22 = vsel %vm3204_vm1, %v3511_v29, 0.0  ;;  %v3549_v60 = vmul.f32 %v3523_v63, %v3523_v63  ;;  %v3550_v34 = vsel %vm3172_vm10, %v3548_v30, 0.0  ;;  %v3540_v49 = vadd.f32 %v3539_v45, %v3538_v23 }
 0x28a   : > { %v3503_v40 = vrot.slane %v3502_v21, 4  ;;  %v3514_v58 = vadd.f32 %v3513_v22, %v3512_v25  ;;  %v3531_v46 = vrot.slane %v3530_v38, 4  ;;  %3536 = vst.msk [vmem:[%s5457_s13 + $0x34] sm:$0xc] %vm3247_vm14, %v3530_v38  ;;  %v3532_v51 = vrot.slane %v4152_v0, 6 }
 0x28b   : > { %v3145_v44 = vpop.f32.mrb[40].mxu0  ;;  %v3551_v10 = vsel %vm3204_vm1, %v3549_v60, 0.0  ;;  %v3401_v52 = vrot.slane %v6702_v54, 1  ;;  %v3541_v59 = vrot.slane %v3540_v49, 4  ;;  %v3446_v12 = vadd.f32 %v3445_v33, %v3444_v9 }
 0x28c   : > { %v4898_v6 = vpop.f32.mrb[41].mxu0  ;;  %v3552_v2 = vadd.f32 %v3551_v10, %v3550_v34  ;;  %v3533_v62 = vsel %vm6551_vm15, %v3531_v46, %v3532_v51  ;;  %v3504_v8 = vadd.f32 %v3503_v40, %v3502_v21  ;;  %v3515_v56 = vrot.slane %v3514_v58, 4 }
 0x28d   : > { %v3560_v1 = vld [vmem:[#allocation2 + $0x8c] sm:$0xff]  ;;  %v3561_v14 = vld [vmem:[#allocation2 + $0x94] sm:$0xf]  ;;  %v3148_v48 = vpop.f32.mrb[42].mxu0  ;;  %3537 = vst.msk [vmem:[%s5457_s13 + $0x38] sm:$0xf] %vm3204_vm1, %v3533_v62  ;;  %v4934_v3 = vadd.f32 %v3145_v44, %v6670_v5  ;;  %v3482_v7 = vadd.f32 %v3481_v55, %v3480_v13  ;;  %v3365_v18 = vadd.f32 %v6698_v36, %v6694_v15  ;;  %v3376_v5 = vadd.f32 %v3375_v41, %v6682_v42 }
 0x28e   : > { %v4899_v43 = vpop.f32.mrb[43].mxu0  ;;  %v4153_v35 = vpack.c.bf16 %v3560_v1, %v3560_v1  ;;  %v4154_v53 = vpack.c.bf16 %v3561_v14, %v3561_v14  ;;  %v3572_v32 = vsel %vm3172_vm10, %v3560_v1, 0.0  ;;  %v3573_v37 = vsel %vm3204_vm1, %v3561_v14, 0.0 }
 0x28f   : > { %v3582_v39 = vmul.f32 %v3560_v1, %v3560_v1  ;;  %v3574_v61 = vadd.f32 %v3573_v37, %v3572_v32  ;;  %v3583_v11 = vmul.f32 %v3561_v14, %v3561_v14  ;;  %v3471_v19 = vrot.slane %v3470_v27, 2  ;;  %3193 = vst.msk [vmem:[#allocation2 + $0xa0] sm:$0xff] %vm3172_vm10, %v4934_v3 }
 0x290   : > { %3570 = vst.msk [vmem:[%s5457_s13 + $0x3c] sm:$0xf] %vm3204_vm1, %v4153_v35  ;;  %v3553_v31 = vrot.slane %v3552_v2, 4  ;;  %v3402_v44 = vadd.f32 %v3401_v52, %v6702_v54  ;;  %v3542_v50 = vadd.f32 %v3541_v59, %v3540_v49  ;;  %v3435_v21 = vrot.slane %v3434_v4, 1 }
 0x291   : > { %3571 = vst.msk [vmem:[%s5457_s13 + $0x40] sm:$0x3] %vm3206_vm11, %v4154_v53  ;;  %v3584_v16 = vsel %vm3172_vm10, %v3582_v39, 0.0  ;;  %v3575_v29 = vrot.slane %v3574_v61, 4  ;;  %v3585_v17 = vsel %vm3204_vm1, %v3583_v11, 0.0  ;;  %v3505_v47 = vrot.slane %v3504_v8, 2 }
 0x292   : > { %v3516_v63 = vadd.f32 %v3515_v56, %v3514_v58  ;;  %v3586_v6 = vadd.f32 %v3585_v17, %v3584_v16  ;;  %v3447_v25 = vrot.slane %v3446_v12, 1  ;;  %v3472_v22 = vadd.f32 %v3471_v19, %v3470_v27 }
 0x293   : > { %v3576_v30 = vadd.f32 %v3575_v29, %v3574_v61  ;;  %v3483_v9 = vrot.slane %v3482_v7, 2  ;;  %v3554_v13 = vadd.f32 %v3553_v31, %v3552_v2  ;;  %v3377_v15 = vadd.f32 %v3376_v5, %v6696_v28 }
 0x294   : > { %v3587_v38 = vrot.slane %v3586_v6, 4  ;;  %v3403_v36 = vadd.f32 %v3402_v44, %v3365_v18  ;;  %v3543_v23 = vrot.slane %v3542_v50, 2  ;;  %v3436_v42 = vadd.f32 %v3435_v21, %v3434_v4 }
 0x295   : > { %v3506_v41 = vadd.f32 %v3505_v47, %v3504_v8  ;;  %v3517_v54 = vrot.slane %v3516_v63, 2  ;;  %v3415_v14 = vadd.f32 %v3414_v26, %v3377_v15  ;;  %v3448_v48 = vadd.f32 %v3447_v25, %v3446_v12 }
 0x296   : > { %v3588_v1 = vadd.f32 %v3587_v38, %v3586_v6  ;;  %v3473_v40 = vrot.slane %v3472_v22, 1  ;;  %v3577_v0 = vrot.slane %v3576_v30, 2  ;;  %v3594_v45 = vld [vmem:[#allocation2 + $0x9a] sm:$0xff]  ;;  %v3595_v57 = vld [vmem:[#allocation2 + $0xa2] sm:$0xf]  ;;  %v3484_v60 = vadd.f32 %v3483_v9, %v3482_v7 }
 0x297   : > { %v3555_v43 = vrot.slane %v3554_v13, 2  ;;  %v4155_v58 = vpack.c.bf16 %v3594_v45, %v3594_v45  ;;  %v4156_v46 = vpack.c.bf16 %v3595_v57, %v3595_v57  ;;  %v3544_v34 = vadd.f32 %v3543_v23, %v3542_v50 }
 0x298   : > { %v3610_v28 = vsel %vm3172_vm10, %v3594_v45, 0.0  ;;  %v3611_v49 = vsel %vm3204_vm1, %v3595_v57, 0.0  ;;  %v3620_v51 = vmul.f32 %v3594_v45, %v3594_v45  ;;  %v3507_v10 = vrot.slane %v3506_v41, 1 }
 0x299   : > { %v3518_v35 = vadd.f32 %v3517_v54, %v3516_v63  ;;  %v3589_v53 = vrot.slane %v3588_v1, 2  ;;  %v3602_v33 = vrot.slane %v4155_v58, 6  ;;  %v3578_v27 = vadd.f32 %v3577_v0, %v3576_v30 }
 0x29a   : > { %v3612_v55 = vadd.f32 %v3611_v49, %v3610_v28  ;;  %v3621_v2 = vmul.f32 %v3595_v57, %v3595_v57  ;;  %v3622_v62 = vsel %vm3172_vm10, %v3620_v51, 0.0  ;;  %v3485_v32 = vrot.slane %v3484_v60, 1 }
 0x29b   : > { %v3556_v37 = vadd.f32 %v3555_v43, %v3554_v13  ;;  %v3603_v39 = vrot.slane %v3602_v33, 4  ;;  %v3604_v52 = vrot.slane %v4156_v46, 6  ;;  %3608 = vst.msk [vmem:[%s5457_s13 + $0x40] sm:$0xc] %vm3247_vm14, %v3602_v33  ;;  %v3474_v4 = vadd.f32 %v3473_v40, %v3472_v22 }
 0x29c   : > { %v3545_v8 = vrot.slane %v3544_v34, 1  ;;  %v3613_v59 = vrot.slane %v3612_v55, 4  ;;  %v3623_v56 = vsel %vm3204_vm1, %v3621_v2, 0.0  ;;  %v3519_v61 = vrot.slane %v3518_v35, 1 }
 0x29d   : > { %v3590_v11 = vadd.f32 %v3589_v53, %v3588_v1  ;;  %v3605_v3 = vsel %vm6551_vm15, %v3603_v39, %v3604_v52  ;;  %v3624_v24 = vadd.f32 %v3623_v56, %v3622_v62  ;;  %v3437_v12 = vadd.f32 %v3436_v42, %v3403_v36 }
 0x29e   : > { %v3508_v19 = vadd.f32 %v3507_v10, %v3506_v41  ;;  %v3579_v16 = vrot.slane %v3578_v27, 1  ;;  %3609 = vst.msk [vmem:[%s5457_s13 + $0x44] sm:$0xf] %vm3204_vm1, %v3605_v3  ;;  %v3614_v7 = vadd.f32 %v3613_v59, %v3612_v55  ;;  %v3486_v31 = vadd.f32 %v3485_v32, %v3484_v60  ;;  %s3729_s13 = sshll.u32 %s6772_s19, 1 }
 0x29f   : > { %v3557_v29 = vrot.slane %v3556_v37, 1  ;;  %v3625_v17 = vrot.slane %v3624_v24, 4  ;;  %v3475_v18 = vadd.f32 %v3474_v4, %v3437_v12  ;;  %v3546_v5 = vadd.f32 %v3545_v8, %v3544_v34  ;;  %s235_s25 = scalar_lea.vmem %s6768_s5, %s3729_s13 }
 0x2a0   : > { %v3615_v44 = vrot.slane %v3614_v7, 2  ;;  %v3449_v50 = vadd.f32 %v3448_v48, %v3415_v14  ;;  %v3520_v21 = vadd.f32 %v3519_v61, %v3518_v35  ;;  %v3591_v47 = vrot.slane %v3590_v11, 1 }
 0x2a1   : > { %v3626_v63 = vadd.f32 %v3625_v17, %v3624_v24  ;;  %v3509_v20 = vadd.f32 %v3508_v19, %v3475_v18  ;;  %v3580_v6 = vadd.f32 %v3579_v16, %v3578_v27  ;;  %v3558_v22 = vadd.f32 %v3557_v29, %v3556_v37 }
 0x2a2   : > { %v3616_v26 = vadd.f32 %v3615_v44, %v3614_v7  ;;  %v3487_v25 = vadd.f32 %v3486_v31, %v3449_v50  ;;  %v3592_v15 = vadd.f32 %v3591_v47, %v3590_v11 }
 0x2a3   : > { %v3627_v30 = vrot.slane %v3626_v63, 2  ;;  %v3547_v9 = vadd.f32 %v3546_v5, %v3509_v20 }
 0x2a4   : > { %v3617_v13 = vrot.slane %v3616_v26, 1  ;;  %v3521_v38 = vadd.f32 %v3520_v21, %v3487_v25 }
 0x2a5   : > { %v3628_v36 = vadd.f32 %v3627_v30, %v3626_v63  ;;  %v3581_v23 = vadd.f32 %v3580_v6, %v3547_v9 }
 0x2a6   : > { %v3618_v42 = vadd.f32 %v3617_v13, %v3616_v26  ;;  %v3559_v41 = vadd.f32 %v3558_v22, %v3521_v38 }
 0x2a7   : > { %v3629_v54 = vrot.slane %v3628_v36, 1 }
 0x2a8   : > { %v3619_v1 = vadd.f32 %v3618_v42, %v3581_v23  ;;  %v3593_v14 = vadd.f32 %v3592_v15, %v3559_v41 }
 0x2a9   : > { %v3630_v48 = vadd.f32 %v3629_v54, %v3628_v36 }
 0x2aa   : > { %3634 = vst.msk [vmem:[%s235_s25] sm:$0x1] %vm3633_vm0, %v3619_v1 }
 0x2ab   : > { %v3631_v40 = vadd.f32 %v3630_v48, %v3593_v14 }
 0x2ad   : > { %3635 = vst.msk [vmem:[%s235_s25 + $0x1] sm:$0x1] %vm3633_vm0, %v3631_v40 }
 0x2ae PF: > { %s16_s18 = sadd.s32 1, %s5376_s18  }
 0x2af   : > { %p13_p4 = scmp.ge.s32.totalorder %s16_s18, 4  }
 0x2b1   :  { %15 = sbr.rel (!%p13_p4) target bundleno = 1 (0x1), region = 86 }

// kernel: ucontracting_forward.7
= control target key start
LH: loop header
LB: loop body
LE: loop exit
PB: predicated region body
PF: predicated region fallthrough
CT: control target
= control target key end

     0   :  { %s2001_s27 = smov 0   ;;  %s2340_s0 = inlined_call_operand.vmem [shape: bf16[2,152,96], index: 0, kind: input, shape index: {}]   ;;  %s2341_s1 = inlined_call_operand.vmem [shape: f32[1,96], index: 1, kind: input, shape index: {}]   ;;  %s2342_s2 = inlined_call_operand.vmem [shape: f32[1,96], index: 2, kind: input, shape index: {}]   ;;  %s2343_s3 = inlined_call_operand.vmem [shape: bf16[6,12], index: 3, kind: input, shape index: {}]   ;;  %s2344_s4 = inlined_call_operand.vmem [shape: bf16[6,12], index: 4, kind: input, shape index: {}]   ;;  %s2345_s5 = inlined_call_operand.vmem [shape: bf16[96,48], index: 5, kind: input, shape index: {}]   ;;  %s2346_s6 = inlined_call_operand.vmem [shape: bf16[96,48], index: 6, kind: input, shape index: {}]   ;;  %s2347_s7 = inlined_call_operand.vmem [shape: bf16[2,144,96], index: 7, kind: output, shape index: {0}]   ;;  %s2348_s8 = inlined_call_operand.vmem [shape: bf16[2,44,48], index: 8, kind: output, shape index: {1}]  }
   0x1 LB: > { %s1599_s28 = sadd.s32 4294967295, %s1951_s27   ;;  %p1603_p0 = scmp.ge.s32.totalorder %s1951_s27, 1  ;;  %s1951_s27 = sphi %s2001_s27, %s19_s27  }
   0x2   : > { %p265_p1 = scmp.lt.s32.totalorder %s1951_s27, 3 }
   0x4   : > { %p266_p2 = pnand %p1603_p0, %p265_p1 }
   0x5   : > { %p304_p3 = scmp.lt.s32.totalorder (!%p266_p2), %s1599_s28, 1  ;;  %v1953_v0 = vmov (!%p266_p2), 0.0   ;;  %vm1954_vm0 = vmmov (!%p266_p2), 0   ;;  %v2026_v1 = vld [vmem:[%s2341_s1] ss:$0 sm:$0xff] (!%p266_p2)  ;;  %vm496_vm1 = vcmask (!%p266_p2), 781312  }
   0x6   : > { %269 = sbr.rel (%p266_p2) target bundleno = 540 (0x21c), region = 48  ;;  %1796 = vmatprep.subr.bf16.mxu0 (!%p266_p2), %v1953_v0  ;;  %1802 = vmatprep.subr.bf16.mxu1 (!%p266_p2), %v1953_v0  ;;  %v2037_v11 = vld [vmem:[%s2342_s2] ss:$0 sm:$0xff] (!%p266_p2)  ;;  %vm521_vm2 = vcmask (!%p266_p2), 1041408   ;;  %vm522_vm3 = vcmask (!%p266_p2), 1045508   ;;  %vm543_vm4 = vcmask (!%p266_p2), 1045504  }
   0x7   : > { %1798 = vmatprep.mubr.msk.bf16.mxu0 (!%p266_p2), %vm1954_vm0, %v1953_v0  ;;  %1804 = vmatprep.mubr.msk.bf16.mxu1 (!%p266_p2), %vm1954_vm0, %v1953_v0  ;;  %vm2102_vm5 = vmor (!%p266_p2), %vm521_vm2, %vm522_vm3  ;;  %vm539_vm6 = vcmask (!%p266_p2), 97280   ;;  %vm633_vm7 = vcmask (!%p266_p2), 780288   ;;  %vm755_vm8 = vcmask (!%p266_p2), 781315   ;;  %vm757_vm9 = vcmask (!%p266_p2), 779264  }
   0x8   : > { %vm879_vm10 = vcmask (!%p266_p2), 781314   ;;  %vm881_vm11 = vcmask (!%p266_p2), 778240   ;;  %vm1001_vm12 = vcmask (!%p266_p2), 781313   ;;  %vm1305_vm13 = vcmask (!%p266_p2), 785408  }
   0x9   : > { %vm1506_vm14 = vcmask (!%p266_p2), 386048   ;;  %vm1508_vm15 = vcmask (!%p266_p2), 388098  }
   0xd   : > { %s2352_s28 = smov (!%p304_p3, %s1599_s28), 1 }
   0xe   : > { %s1916_s29 = smul.u32 76, %s2352_s28 }
   0xf   : > { %s1917_s13 = smul.u32 72, %s2352_s28 }
  0x10   : > { %s2021_s10 = scalar_lea.vmem %s2340_s0, %s1916_s29  ;;  %s1918_s29 = smul.u32 24, %s2352_s28 }
  0x11   : > { %v1711_v2 = vld [vmem:[%s2021_s10] sm:$0xff]   ;;  %v1746_v3 = vld [vmem:[%s2021_s10 + $0x8] sm:$0xff]   ;;  %v1747_v4 = vld [vmem:[%s2021_s10 + $0x10] sm:$0xff]   ;;  %s2059_s18 = scalar_lea.vmem %s2347_s7, %s1917_s13 }
  0x12   : > { %v1712_v5 = vunpack.c.l.bf16 %v1711_v2  ;;  %v1713_v6 = vunpack.c.h.bf16 %v1711_v2  ;;  %v1716_v7 = vunpack.c.l.bf16 %v1746_v3  ;;  %v1717_v8 = vunpack.c.h.bf16 %v1746_v3  ;;  %v1748_v9 = vld [vmem:[%s2021_s10 + $0x18] sm:$0xff]   ;;  %v1749_v10 = vld [vmem:[%s2021_s10 + $0x20] sm:$0xff]   ;;  %v1750_v32 = vld [vmem:[%s2021_s10 + $0x28] sm:$0xff]  }
  0x13   : > { %v1720_v12 = vunpack.c.l.bf16 %v1747_v4  ;;  %v1721_v13 = vunpack.c.h.bf16 %v1747_v4  ;;  %v1724_v14 = vunpack.c.l.bf16 %v1748_v9  ;;  %v1725_v15 = vunpack.c.h.bf16 %v1748_v9  ;;  %v1751_v37 = vld [vmem:[%s2021_s10 + $0x30] sm:$0xff]   ;;  %v1752_v54 = vld [vmem:[%s2021_s10 + $0x38] sm:$0xff]   ;;  %v1753_v63 = vld [vmem:[%s2021_s10 + $0x40] sm:$0xff]   ;;  %s2322_s10 = scalar_lea.vmem %s2348_s8, %s1918_s29 }
  0x14   : > { %v363_v16 = vmul.f32 %v1712_v5, %v2026_v1  ;;  %v364_v17 = vmul.f32 %v1713_v6, %v2026_v1  ;;  %v365_v18 = vmul.f32 %v1716_v7, %v2026_v1  ;;  %v366_v19 = vmul.f32 %v1717_v8, %v2026_v1 }
  0x15   : > { %v367_v20 = vmul.f32 %v1720_v12, %v2026_v1  ;;  %v368_v21 = vmul.f32 %v1721_v13, %v2026_v1  ;;  %v1728_v22 = vunpack.c.l.bf16 %v1749_v10  ;;  %v369_v23 = vmul.f32 %v1724_v14, %v2026_v1 }
  0x16   : > { %v388_v24 = vadd.f32 %v2037_v11, %v363_v16  ;;  %v389_v25 = vadd.f32 %v2037_v11, %v364_v17  ;;  %v390_v26 = vadd.f32 %v2037_v11, %v365_v18  ;;  %v391_v27 = vadd.f32 %v2037_v11, %v366_v19 }
  0x17   : > { %v392_v28 = vadd.f32 %v2037_v11, %v367_v20  ;;  %v393_v29 = vadd.f32 %v2037_v11, %v368_v21  ;;  %v370_v30 = vmul.f32 %v1725_v15, %v2026_v1  ;;  %v371_v31 = vmul.f32 %v1728_v22, %v2026_v1 }
  0x18   : > { %v406_v33 = vmax.f32 %v388_v24, 0.0  ;;  %v407_v34 = vmax.f32 %v389_v25, 0.0  ;;  %v408_v35 = vmax.f32 %v390_v26, 0.0  ;;  %v409_v36 = vmax.f32 %v391_v27, 0.0 }
  0x19   : > { %v410_v38 = vmax.f32 %v392_v28, 0.0  ;;  %v411_v39 = vmax.f32 %v393_v29, 0.0  ;;  %v394_v40 = vadd.f32 %v2037_v11, %v369_v23  ;;  %v395_v41 = vadd.f32 %v2037_v11, %v370_v30 }
  0x1a   : > { %v1683_v42 = vpack.c.bf16 %v406_v33, %v406_v33  ;;  %v1684_v43 = vpack.c.bf16 %v407_v34, %v407_v34  ;;  %v1685_v44 = vpack.c.bf16 %v408_v35, %v408_v35  ;;  %v1686_v45 = vpack.c.bf16 %v409_v36, %v409_v36 }
  0x1b   : > { %v1687_v46 = vpack.c.bf16 %v410_v38, %v410_v38  ;;  %v1688_v47 = vpack.c.bf16 %v411_v39, %v411_v39  ;;  %v396_v48 = vadd.f32 %v2037_v11, %v371_v31  ;;  %v412_v49 = vmax.f32 %v394_v40, 0.0 }
  0x1c   : > { %497 = vst.msk [vmem:[%s2059_s18] sm:$0xf] %vm496_vm1, %v1683_v42  ;;  %498 = vst.msk [vmem:[%s2059_s18 + $0x4] sm:$0xf] %vm496_vm1, %v1684_v43  ;;  %v413_v50 = vmax.f32 %v395_v41, 0.0  ;;  %v1729_v51 = vunpack.c.h.bf16 %v1749_v10  ;;  %v1732_v52 = vunpack.c.l.bf16 %v1750_v32  ;;  %v1733_v53 = vunpack.c.h.bf16 %v1750_v32 }
  0x1d   : > { %499 = vst.msk [vmem:[%s2059_s18 + $0x8] sm:$0xf] %vm496_vm1, %v1685_v44  ;;  %500 = vst.msk [vmem:[%s2059_s18 + $0xc] sm:$0xf] %vm496_vm1, %v1686_v45  ;;  %v414_v55 = vmax.f32 %v396_v48, 0.0  ;;  %v1689_v56 = vpack.c.bf16 %v412_v49, %v412_v49  ;;  %v1736_v57 = vunpack.c.l.bf16 %v1751_v37  ;;  %v1737_v58 = vunpack.c.h.bf16 %v1751_v37 }
  0x1e   : > { %501 = vst.msk [vmem:[%s2059_s18 + $0x10] sm:$0xf] %vm496_vm1, %v1687_v46  ;;  %502 = vst.msk [vmem:[%s2059_s18 + $0x14] sm:$0xf] %vm496_vm1, %v1688_v47  ;;  %v1690_v59 = vpack.c.bf16 %v413_v50, %v413_v50  ;;  %v372_v60 = vmul.f32 %v1729_v51, %v2026_v1  ;;  %v373_v61 = vmul.f32 %v1732_v52, %v2026_v1  ;;  %v1740_v3 = vunpack.c.l.bf16 %v1752_v54 }
  0x1f   : > { %v374_v62 = vmul.f32 %v1733_v53, %v2026_v1  ;;  %v1691_v2 = vpack.c.bf16 %v414_v55, %v414_v55  ;;  %503 = vst.msk [vmem:[%s2059_s18 + $0x18] sm:$0xf] %vm496_vm1, %v1689_v56  ;;  %v375_v4 = vmul.f32 %v1736_v57, %v2026_v1  ;;  %v376_v5 = vmul.f32 %v1737_v58, %v2026_v1 }
  0x20   : > { %504 = vst.msk [vmem:[%s2059_s18 + $0x1c] sm:$0xf] %vm496_vm1, %v1690_v59  ;;  %v397_v6 = vadd.f32 %v2037_v11, %v372_v60  ;;  %v398_v7 = vadd.f32 %v2037_v11, %v373_v61  ;;  %v1741_v9 = vunpack.c.h.bf16 %v1752_v54  ;;  %v377_v10 = vmul.f32 %v1740_v3, %v2026_v1 }
  0x21   : > { %v399_v8 = vadd.f32 %v2037_v11, %v374_v62  ;;  %505 = vst.msk [vmem:[%s2059_s18 + $0x20] sm:$0xf] %vm496_vm1, %v1691_v2  ;;  %v400_v12 = vadd.f32 %v2037_v11, %v375_v4  ;;  %v401_v13 = vadd.f32 %v2037_v11, %v376_v5  ;;  %v1744_v14 = vunpack.c.l.bf16 %v1753_v63 }
  0x22   : > { %v415_v15 = vmax.f32 %v397_v6, 0.0  ;;  %v416_v16 = vmax.f32 %v398_v7, 0.0  ;;  %v1745_v18 = vunpack.c.h.bf16 %v1753_v63  ;;  %v402_v20 = vadd.f32 %v2037_v11, %v377_v10 }
  0x23   : > { %v417_v17 = vmax.f32 %v399_v8, 0.0  ;;  %v517_v19 = vld [vmem:[%s2059_s18 + $0x4] sm:$0xc]  ;;  %v378_v21 = vmul.f32 %v1741_v9, %v2026_v1  ;;  %v379_v22 = vmul.f32 %v1744_v14, %v2026_v1  ;;  %v515_v29 = vld [vmem:[%s2059_s18] sm:$0xf]  ;;  %v418_v32 = vmax.f32 %v400_v12, 0.0 }
  0x24   : > { %v518_v23 = vld [vmem:[%s2059_s18 + $0x8] sm:$0xf]  ;;  %v1627_v25 = vrot.slane %v517_v19, 10  ;;  %v1692_v26 = vpack.c.bf16 %v415_v15, %v415_v15  ;;  %v1693_v27 = vpack.c.bf16 %v416_v16, %v416_v16  ;;  %v380_v33 = vmul.f32 %v1745_v18, %v2026_v1  ;;  %v516_v34 = vld [vmem:[%s2059_s18 + $0x4] sm:$0x3] }
  0x25   : > { %v1694_v28 = vpack.c.bf16 %v417_v17, %v417_v17  ;;  %v526_v30 = vrot.slane %v518_v23, 6  ;;  %v637_v31 = vld [vmem:[%s2059_s18 + $0x10] sm:$0xc]  ;;  %v638_v35 = vld [vmem:[%s2059_s18 + $0x14] sm:$0xf]  ;;  %v419_v37 = vmax.f32 %v401_v13, 0.0  ;;  %v403_v38 = vadd.f32 %v2037_v11, %v378_v21 }
  0x26   : > { %v1631_v36 = vrot.slane %v637_v31, 10  ;;  %506 = vst.msk [vmem:[%s2059_s18 + $0x24] sm:$0xf] %vm496_vm1, %v1692_v26  ;;  %507 = vst.msk [vmem:[%s2059_s18 + $0x28] sm:$0xf] %vm496_vm1, %v1693_v27  ;;  %v404_v39 = vadd.f32 %v2037_v11, %v379_v22  ;;  %v643_v42 = vrot.slane %v638_v35, 6  ;;  %v1695_v44 = vpack.c.bf16 %v418_v32, %v418_v32 }
  0x27   : > { %508 = vst.msk [vmem:[%s2059_s18 + $0x2c] sm:$0xf] %vm496_vm1, %v1694_v28  ;;  %v527_v40 = vsel %vm2102_vm5, %v1627_v25, %v526_v30  ;;  %v528_v1 = vrot.slane %v526_v30, 4  ;;  %v635_v41 = vld [vmem:[%s2059_s18 + $0xc] sm:$0xf]  ;;  %v420_v49 = vmax.f32 %v402_v20, 0.0  ;;  %v1696_v50 = vpack.c.bf16 %v419_v37, %v419_v37 }
  0x28   : > { %v761_v43 = vld [vmem:[%s2059_s18 + $0x1c] sm:$0xc]  ;;  %v531_v45 = vmax.bf16 %v527_v40, %v515_v29  ;;  %v636_v46 = vld [vmem:[%s2059_s18 + $0x10] sm:$0x3]  ;;  %v762_v47 = vld [vmem:[%s2059_s18 + $0x20] sm:$0xf]  ;;  %v644_v52 = vsel %vm2102_vm5, %v1631_v36, %v643_v42  ;;  %v405_v57 = vadd.f32 %v2037_v11, %v380_v33 }
  0x29   : > { %v1636_v48 = vrot.slane %v761_v43, 10  ;;  %v532_v51 = vmax.bf16 %v528_v1, %v516_v34  ;;  %v645_v53 = vrot.slane %v643_v42, 4  ;;  %v767_v54 = vrot.slane %v762_v47, 6  ;;  %509 = vst.msk [vmem:[%s2059_s18 + $0x30] sm:$0xf] %vm496_vm1, %v1695_v44 }
  0x2a   : > { %v648_v55 = vmax.bf16 %v644_v52, %v635_v41  ;;  %v1697_v56 = vpack.c.bf16 %v420_v49, %v420_v49  ;;  %510 = vst.msk [vmem:[%s2059_s18 + $0x34] sm:$0xf] %vm496_vm1, %v1696_v50  ;;  %v421_v58 = vmax.f32 %v403_v38, 0.0  ;;  %v759_v62 = vld [vmem:[%s2059_s18 + $0x18] sm:$0xf]  ;;  %v422_v3 = vmax.f32 %v404_v39, 0.0 }
  0x2b   : > { %v1628_v59 = vcombine.low %v531_v45, %v532_v51  ;;  %v649_v60 = vmax.bf16 %v645_v53, %v636_v46  ;;  %v769_v61 = vrot.slane %v767_v54, 4  ;;  %v760_v63 = vld [vmem:[%s2059_s18 + $0x1c] sm:$0x3]  ;;  %v768_v2 = vsel %vm2102_vm5, %v1636_v48, %v767_v54  ;;  %v533_v11 = vld [vmem:[%s2343_s3] sm:$0x7] }
  0x2c   : > { %511 = vst.msk [vmem:[%s2059_s18 + $0x38] sm:$0xf] %vm496_vm1, %v1697_v56  ;;  %v423_v4 = vmax.f32 %v405_v57, 0.0  ;;  %v1698_v5 = vpack.c.bf16 %v421_v58, %v421_v58  ;;  %v587_v8 = vld [vmem:[%s2344_s4] sm:$0x7]  ;;  %v1699_v12 = vpack.c.bf16 %v422_v3, %v422_v3  ;;  %v772_v15 = vmax.bf16 %v768_v2, %v759_v62  ;;  %v1932_v2 = vld [vmem:[%s2345_s5 + $0x8] sm:$0xff]  }
  0x2d   : > { %v545_v6 = vsel %vm543_vm4, %v1628_v59, 0  ;;  %v1632_v7 = vcombine.low %v648_v55, %v649_v60  ;;  %v885_v9 = vld [vmem:[%s2059_s18 + $0x28] sm:$0xc]  ;;  %v773_v16 = vmax.bf16 %v769_v61, %v760_v63  ;;  %v883_v21 = vld [vmem:[%s2059_s18 + $0x24] sm:$0xf] }
  0x2e   : > { %1797 = vmatpush3.bf16.msra.mxu0 %v545_v6  ;;  %1803 = vmatpush3.bf16.msra.mxu1 %v545_v6  ;;  %v886_v10 = vld [vmem:[%s2059_s18 + $0x2c] sm:$0xf]  ;;  %v1700_v13 = vpack.c.bf16 %v423_v4, %v423_v4  ;;  %512 = vst.msk [vmem:[%s2059_s18 + $0x3c] sm:$0xf] %vm496_vm1, %v1698_v5  ;;  %v1641_v18 = vrot.slane %v885_v9, 10  ;;  %v1930_v62 = vld [vmem:[%s2345_s5] sm:$0xff]  }
  0x2f   : > { %1808 = vmatprep.subr.bf16.mxu0 %v1953_v0  ;;  %1814 = vmatprep.subr.bf16.mxu1 %v1953_v0  ;;  %v660_v14 = vsel %vm543_vm4, %v1632_v7, 0  ;;  %v891_v17 = vrot.slane %v886_v10, 6  ;;  %513 = vst.msk [vmem:[%s2059_s18 + $0x40] sm:$0xf] %vm496_vm1, %v1699_v12  ;;  %v1637_v19 = vcombine.low %v772_v15, %v773_v16  ;;  %v884_v22 = vld [vmem:[%s2059_s18 + $0x28] sm:$0x3] }
  0x30   : > { %514 = vst.msk [vmem:[%s2059_s18 + $0x44] sm:$0xf] %vm496_vm1, %v1700_v13  ;;  %v650_v27 = vld [vmem:[%s2343_s3] sm:$0x7]  ;;  %v1003_v36 = vld [vmem:[%s2059_s18 + $0x30] sm:$0xf] }
  0x31   : > { %1799 = vmatmul.mubr.msk.bf16.vlgmr.msra.gmra.mrb[0].mxu0 %vm539_vm6, %v533_v11  ;;  %1805 = vmatmul.mubr.msk.bf16.vlgmr.msra.gmra.mrb[0].mxu1 %vm539_vm6, %v587_v8  ;;  %v893_v20 = vrot.slane %v891_v17, 4  ;;  %v892_v23 = vsel %vm2102_vm5, %v1641_v18, %v891_v17  ;;  %v1005_v26 = vld [vmem:[%s2059_s18 + $0x34] sm:$0xc]  ;;  %v702_v28 = vld [vmem:[%s2344_s4] sm:$0x7]  ;;  %v784_v29 = vsel %vm543_vm4, %v1637_v19, 0 }
  0x32   : > { %1809 = vmatpush3.bf16.msra.mxu0 %v660_v14  ;;  %1815 = vmatpush3.bf16.msra.mxu1 %v660_v14  ;;  %v896_v30 = vmax.bf16 %v892_v23, %v883_v21  ;;  %v1646_v33 = vrot.slane %v1005_v26, 10  ;;  %v1004_v37 = vld [vmem:[%s2059_s18 + $0x34] sm:$0x3]  ;;  %v774_v1 = vld [vmem:[%s2343_s3] sm:$0x7]  ;;  %v1933_v3 = vld [vmem:[%s2346_s6 + $0x8] sm:$0xff]  }
  0x33   : > { %1810 = vmatprep.mubr.msk.bf16.mxu0 %vm1954_vm0, %v1953_v0  ;;  %1816 = vmatprep.mubr.msk.bf16.mxu1 %vm1954_vm0, %v1953_v0  ;;  %v1006_v25 = vld [vmem:[%s2059_s18 + $0x38] sm:$0xf]  ;;  %v897_v31 = vmax.bf16 %v893_v20, %v884_v22  ;;  %v826_v41 = vld [vmem:[%s2344_s4] sm:$0x7]  ;;  %v1934_v4 = vld [vmem:[%s2345_s5 + $0x10] sm:$0xff]  }
  0x34   : > { %1820 = vmatprep.subr.bf16.mxu0 %v1953_v0  ;;  %1826 = vmatprep.subr.bf16.mxu1 %v1953_v0  ;;  %v1011_v32 = vrot.slane %v1006_v25, 6  ;;  %v898_v52 = vld [vmem:[%s2343_s3] sm:$0x7]  ;;  %v1935_v5 = vld [vmem:[%s2346_s6 + $0x10] sm:$0xff]   ;;  %v1936_v6 = vld [vmem:[%s2345_s5 + $0x18] sm:$0xff]  }
  0x35   : > { %v1642_v34 = vcombine.low %v896_v30, %v897_v31  ;;  %v1117_v49 = vld [vmem:[%s2059_s18 + $0x3c] sm:$0xf]  ;;  %v950_v53 = vld [vmem:[%s2344_s4] sm:$0x7]  ;;  %v1940_v9 = vld [vmem:[%s2345_s5 + $0x28] sm:$0xff]  }
  0x36   : > { %v1013_v35 = vrot.slane %v1011_v32, 4  ;;  %v1012_v38 = vsel %vm2102_vm5, %v1646_v33, %v1011_v32  ;;  %v1119_v40 = vld [vmem:[%s2059_s18 + $0x40] sm:$0xc]  ;;  %v1118_v50 = vld [vmem:[%s2059_s18 + $0x40] sm:$0x3]  ;;  %v1937_v11 = vld [vmem:[%s2346_s6 + $0x18] sm:$0xff]  }
  0x37   : > { %v1120_v39 = vld [vmem:[%s2059_s18 + $0x44] sm:$0xf]  ;;  %v908_v42 = vsel %vm543_vm4, %v1642_v34, 0  ;;  %v1016_v43 = vmax.bf16 %v1012_v38, %v1003_v36  ;;  %v1650_v46 = vrot.slane %v1119_v40, 10  ;;  %v1018_v57 = vld [vmem:[%s2343_s3] sm:$0x7] }
  0x38   : > { %v1017_v44 = vmax.bf16 %v1013_v35, %v1004_v37  ;;  %v1125_v45 = vrot.slane %v1120_v39, 6  ;;  %v1070_v58 = vld [vmem:[%s2344_s4] sm:$0x7]  ;;  %v1941_v10 = vld [vmem:[%s2346_s6 + $0x28] sm:$0xff]  }
  0x39   : > { %1811 = vmatmul.mubr.msk.bf16.vlgmr.msra.gmra.mrb[4].mxu0 %vm539_vm6, %v650_v27  ;;  %1817 = vmatmul.mubr.msk.bf16.vlgmr.msra.gmra.mrb[4].mxu1 %vm539_vm6, %v702_v28  ;;  %v1132_v60 = vld [vmem:[%s2343_s3] sm:$0x7] }
  0x3a   : > { %1821 = vmatpush3.bf16.msra.mxu0 %v784_v29  ;;  %1827 = vmatpush3.bf16.msra.mxu1 %v784_v29  ;;  %v1647_v47 = vcombine.low %v1016_v43, %v1017_v44  ;;  %v1127_v48 = vrot.slane %v1125_v45, 4  ;;  %v1126_v51 = vsel %vm2102_vm5, %v1650_v46, %v1125_v45  ;;  %v1184_v61 = vld [vmem:[%s2344_s4] sm:$0x7] }
  0x3b   : > { %1822 = vmatprep.mubr.msk.bf16.mxu0 %vm1954_vm0, %v1953_v0  ;;  %1828 = vmatprep.mubr.msk.bf16.mxu1 %vm1954_vm0, %v1953_v0  ;;  %v1130_v55 = vmax.bf16 %v1126_v51, %v1117_v49  ;;  %v1931_v63 = vld [vmem:[%s2346_s6] sm:$0xff]  }
  0x3c   : > { %1832 = vmatprep.subr.bf16.mxu0 %v1953_v0  ;;  %1838 = vmatprep.subr.bf16.mxu1 %v1953_v0  ;;  %v1028_v54 = vsel %vm543_vm4, %v1647_v47, 0  ;;  %v1131_v56 = vmax.bf16 %v1127_v48, %v1118_v50  ;;  %v1938_v7 = vld [vmem:[%s2345_s5 + $0x20] sm:$0xff]  }
  0x3d   : > { %v1939_v8 = vld [vmem:[%s2346_s6 + $0x20] sm:$0xff]  }
  0x3e   : > { %v1651_v24 = vcombine.low %v1130_v55, %v1131_v56 }
  0x40   : > { %v1142_v59 = vsel %vm543_vm4, %v1651_v24, 0 }
  0x41   : > { %1823 = vmatmul.mubr.msk.bf16.vlgmr.msra.gmra.mrb[8].mxu0 %vm539_vm6, %v774_v1  ;;  %1829 = vmatmul.mubr.msk.bf16.vlgmr.msra.gmra.mrb[8].mxu1 %vm539_vm6, %v826_v41 }
  0x42   : > { %1833 = vmatpush3.bf16.msra.mxu0 %v908_v42  ;;  %1839 = vmatpush3.bf16.msra.mxu1 %v908_v42 }
  0x43   : > { %1834 = vmatprep.mubr.msk.bf16.mxu0 %vm1954_vm0, %v1953_v0  ;;  %1840 = vmatprep.mubr.msk.bf16.mxu1 %vm1954_vm0, %v1953_v0 }
  0x44   : > { %1844 = vmatprep.subr.bf16.mxu0 %v1953_v0  ;;  %1850 = vmatprep.subr.bf16.mxu1 %v1953_v0 }
  0x49   : > { %1835 = vmatmul.mubr.msk.bf16.vlgmr.msra.gmra.mrb[12].mxu0 %vm539_vm6, %v898_v52  ;;  %1841 = vmatmul.mubr.msk.bf16.vlgmr.msra.gmra.mrb[12].mxu1 %vm539_vm6, %v950_v53 }
  0x4a   : > { %1845 = vmatpush3.bf16.msra.mxu0 %v1028_v54  ;;  %1851 = vmatpush3.bf16.msra.mxu1 %v1028_v54 }
  0x4b   : > { %1846 = vmatprep.mubr.msk.bf16.mxu0 %vm1954_vm0, %v1953_v0  ;;  %1852 = vmatprep.mubr.msk.bf16.mxu1 %vm1954_vm0, %v1953_v0 }
  0x4c   : > { %1856 = vmatprep.subr.bf16.mxu0 %v1953_v0  ;;  %1862 = vmatprep.subr.bf16.mxu1 %v1953_v0 }
  0x51   : > { %1847 = vmatmul.mubr.msk.bf16.vlgmr.msra.gmra.mrb[16].mxu0 %vm539_vm6, %v1018_v57  ;;  %1853 = vmatmul.mubr.msk.bf16.vlgmr.msra.gmra.mrb[16].mxu1 %vm539_vm6, %v1070_v58 }
  0x52   : > { %1857 = vmatpush3.bf16.msra.mxu0 %v1142_v59  ;;  %1863 = vmatpush3.bf16.msra.mxu1 %v1142_v59 }
  0x53   : > { %1858 = vmatprep.mubr.msk.bf16.mxu0 %vm1954_vm0, %v1953_v0  ;;  %1864 = vmatprep.mubr.msk.bf16.mxu1 %vm1954_vm0, %v1953_v0 }
  0x54   : > { %1868 = vmatprep.subr.bf16.mxu0 %v1953_v0  ;;  %1892 = vmatprep.subr.bf16.mxu1 %v1953_v0 }
  0x59   : > { %1859 = vmatmul.mubr.msk.bf16.vlgmr.msra.gmra.mrb[20].mxu0 %vm539_vm6, %v1132_v60  ;;  %1865 = vmatmul.mubr.msk.bf16.vlgmr.msra.gmra.mrb[20].mxu1 %vm539_vm6, %v1184_v61 }
  0x5a   : > { %1880 = vmatprep.mubr.msk.bf16.mxu0 %vm1954_vm0, %v1953_v0  ;;  %1904 = vmatprep.mubr.msk.bf16.mxu1 %vm1954_vm0, %v1953_v0 }
  0x5b   : > { %1869 = vmatpush3.bf16.msra.mxu0 %v1930_v62  ;;  %1893 = vmatpush3.bf16.msra.mxu1 %v1931_v63 }
  0x5c   : > { %1870 = vmatprep.subr.bf16.mxu0 %v1953_v0  ;;  %1894 = vmatprep.subr.bf16.mxu1 %v1953_v0 }
  0x5f   : > { %1871 = vmatpush3.bf16.msra.mxu0 %v1932_v2  ;;  %1895 = vmatpush3.bf16.msra.mxu1 %v1933_v3 }
  0x60   : > { %1872 = vmatprep.subr.bf16.mxu0 %v1953_v0  ;;  %1896 = vmatprep.subr.bf16.mxu1 %v1953_v0 }
  0x63   : > { %1873 = vmatpush3.bf16.msra.mxu0 %v1934_v4  ;;  %1897 = vmatpush3.bf16.msra.mxu1 %v1935_v5 }
  0x64   : > { %1874 = vmatprep.subr.bf16.mxu0 %v1953_v0  ;;  %1898 = vmatprep.subr.bf16.mxu1 %v1953_v0 }
  0x67   : > { %1875 = vmatpush3.bf16.msra.mxu0 %v1936_v6  ;;  %1899 = vmatpush3.bf16.msra.mxu1 %v1937_v11 }
  0x68   : > { %1876 = vmatprep.subr.bf16.mxu0 %v1953_v0  ;;  %1900 = vmatprep.subr.bf16.mxu1 %v1953_v0 }
  0x6b   : > { %1877 = vmatpush3.bf16.msra.mxu0 %v1938_v7  ;;  %1901 = vmatpush3.bf16.msra.mxu1 %v1939_v8 }
  0x6c   : > { %1878 = vmatprep.subr.bf16.mxu0 %v1953_v0  ;;  %1902 = vmatprep.subr.bf16.mxu1 %v1953_v0 }
  0x6f   : > { %1879 = vmatpush3.bf16.msra.mxu0 %v1940_v9  ;;  %1903 = vmatpush3.bf16.msra.mxu1 %v1941_v10 }
 0x104   : > { %v581_v12 = vpop.f32.mrb[0].mxu0  ;;  %v625_v13 = vpop.f32.mrb[0].mxu1 }
 0x105   : > { %v631_v14 = vmax.f32 %v581_v12, %v625_v13  ;;  %v1800_v15 = vpop.f32.mrb[1].mxu0  ;;  %v1806_v16 = vpop.f32.mrb[1].mxu1 }
 0x106   : > { %v584_v17 = vpop.f32.mrb[2].mxu0  ;;  %v628_v18 = vpop.f32.mrb[2].mxu1 }
 0x107   : > { %v632_v19 = vpack.c.bf16 %v631_v14, %v631_v14  ;;  %v1801_v20 = vpop.f32.mrb[3].mxu0  ;;  %v1807_v21 = vpop.f32.mrb[3].mxu1 }
 0x109   : > { %634 = vst.msk [vmem:[#allocation2] sm:$0x7] %vm633_vm7, %v632_v19  ;;  %v1955_v19 = vmov 0  }
 0x10a   : > { %1509 = vst.msk [vmem:[%s2322_s10 + $0x10] sm:$0xc] %vm1508_vm15, %v1955_v19 }
 0x10b   : > { %1510 = vst.msk [vmem:[%s2322_s10 + $0x14] sm:$0x3] %vm1506_vm14, %v1955_v19 }
 0x10c   : > { %v696_v22 = vpop.f32.mrb[4].mxu0  ;;  %v740_v23 = vpop.f32.mrb[4].mxu1 }
 0x10d   : > { %v746_v25 = vmax.f32 %v696_v22, %v740_v23  ;;  %v1812_v26 = vpop.f32.mrb[5].mxu0  ;;  %v1818_v27 = vpop.f32.mrb[5].mxu1 }
 0x10e   : > { %v699_v28 = vpop.f32.mrb[6].mxu0  ;;  %v743_v29 = vpop.f32.mrb[6].mxu1 }
 0x10f   : > { %v1701_v30 = vpack.c.bf16 %v746_v25, %v746_v25  ;;  %v1813_v31 = vpop.f32.mrb[7].mxu0  ;;  %v1819_v32 = vpop.f32.mrb[7].mxu1 }
 0x111   : > { %v751_v33 = vrot.slane %v1701_v30, 5 }
 0x113   : > { %v752_v34 = vrot.slane %v751_v33, 4  ;;  %756 = vst.msk [vmem:[#allocation2] sm:$0x8] %vm755_vm8, %v751_v33 }
 0x114   : > { %v820_v35 = vpop.f32.mrb[8].mxu0  ;;  %v864_v36 = vpop.f32.mrb[8].mxu1 }
 0x115   : > { %758 = vst.msk [vmem:[#allocation2 + $0x4] sm:$0x3] %vm757_vm9, %v752_v34  ;;  %v870_v37 = vmax.f32 %v820_v35, %v864_v36  ;;  %v1824_v38 = vpop.f32.mrb[9].mxu0  ;;  %v1830_v39 = vpop.f32.mrb[9].mxu1 }
 0x116   : > { %v823_v40 = vpop.f32.mrb[10].mxu0  ;;  %v867_v1 = vpop.f32.mrb[10].mxu1 }
 0x117   : > { %v1702_v41 = vpack.c.bf16 %v870_v37, %v870_v37  ;;  %v1825_v42 = vpop.f32.mrb[11].mxu0  ;;  %v1831_v43 = vpop.f32.mrb[11].mxu1 }
 0x119   : > { %v875_v44 = vrot.slane %v1702_v41, 6 }
 0x11b   : > { %v876_v45 = vrot.slane %v875_v44, 4  ;;  %880 = vst.msk [vmem:[#allocation2 + $0x4] sm:$0xc] %vm879_vm10, %v875_v44 }
 0x11c   : > { %v944_v46 = vpop.f32.mrb[12].mxu0  ;;  %v988_v47 = vpop.f32.mrb[12].mxu1 }
 0x11d   : > { %882 = vst.msk [vmem:[#allocation2 + $0x8] sm:$0x1] %vm881_vm11, %v876_v45  ;;  %v994_v48 = vmax.f32 %v944_v46, %v988_v47  ;;  %v1836_v49 = vpop.f32.mrb[13].mxu0  ;;  %v1842_v50 = vpop.f32.mrb[13].mxu1 }
 0x11e   : > { %v947_v51 = vpop.f32.mrb[14].mxu0  ;;  %v991_v52 = vpop.f32.mrb[14].mxu1 }
 0x11f   : > { %v1703_v53 = vpack.c.bf16 %v994_v48, %v994_v48  ;;  %v1837_v54 = vpop.f32.mrb[15].mxu0  ;;  %v1843_v55 = vpop.f32.mrb[15].mxu1 }
 0x121   : > { %v999_v56 = vrot.slane %v1703_v53, 7 }
 0x122   : > { %v1942_v24 = vld [vmem:[#allocation2] sm:$0xff]  }
 0x123   : > { %1002 = vst.msk [vmem:[#allocation2 + $0x8] sm:$0xe] %vm1001_vm12, %v999_v56  ;;  %1881 = vmatmul.mubr.msk.bf16.vlgmr.msra.gmra.mrb[24].mxu0 %vm1305_vm13, %v1942_v24  ;;  %1905 = vmatmul.mubr.msk.bf16.vlgmr.msra.gmra.mrb[24].mxu1 %vm1305_vm13, %v1942_v24 }
 0x124   : > { %v1064_v57 = vpop.f32.mrb[16].mxu0  ;;  %v1108_v58 = vpop.f32.mrb[16].mxu1  ;;  %1884 = vmatprep.mubr.msk.bf16.mxu0 %vm1954_vm0, %v1953_v0  ;;  %1908 = vmatprep.mubr.msk.bf16.mxu1 %vm1954_vm0, %v1953_v0 }
 0x125   : > { %v1114_v59 = vmax.f32 %v1064_v57, %v1108_v58  ;;  %v1848_v60 = vpop.f32.mrb[17].mxu0  ;;  %v1854_v61 = vpop.f32.mrb[17].mxu1 }
 0x126   : > { %v1067_v62 = vpop.f32.mrb[18].mxu0  ;;  %v1111_v63 = vpop.f32.mrb[18].mxu1 }
 0x127   : > { %v1115_v2 = vpack.c.bf16 %v1114_v59, %v1114_v59  ;;  %v1849_v3 = vpop.f32.mrb[19].mxu0  ;;  %v1855_v4 = vpop.f32.mrb[19].mxu1 }
 0x129   : > { %1116 = vst.msk [vmem:[#allocation2 + $0xc] sm:$0x7] %vm633_vm7, %v1115_v2 }
 0x12c   : > { %v1178_v5 = vpop.f32.mrb[20].mxu0  ;;  %v1222_v6 = vpop.f32.mrb[20].mxu1 }
 0x12d   : > { %v1228_v11 = vmax.f32 %v1178_v5, %v1222_v6  ;;  %v1860_v7 = vpop.f32.mrb[21].mxu0  ;;  %v1866_v8 = vpop.f32.mrb[21].mxu1 }
 0x12e   : > { %v1181_v9 = vpop.f32.mrb[22].mxu0  ;;  %v1225_v10 = vpop.f32.mrb[22].mxu1 }
 0x12f   : > { %v1704_v12 = vpack.c.bf16 %v1228_v11, %v1228_v11  ;;  %v1861_v13 = vpop.f32.mrb[23].mxu0  ;;  %v1867_v14 = vpop.f32.mrb[23].mxu1 }
 0x131   : > { %v1233_v15 = vrot.slane %v1704_v12, 5 }
 0x133   : > { %v1234_v16 = vrot.slane %v1233_v15, 4  ;;  %1237 = vst.msk [vmem:[#allocation2 + $0xc] sm:$0x8] %vm755_vm8, %v1233_v15 }
 0x135   : > { %1238 = vst.msk [vmem:[#allocation2 + $0x10] sm:$0x3] %vm757_vm9, %v1234_v16 }
 0x13a   : > { %v1943_v17 = vld [vmem:[#allocation2 + $0x8] sm:$0xff]  }
 0x13b   : > { %1885 = vmatmul.mubr.msk.bf16.gmra.mrb[28].mxu0 %vm1305_vm13, %v1943_v17  ;;  %1909 = vmatmul.mubr.msk.bf16.gmra.mrb[28].mxu1 %vm1305_vm13, %v1943_v17 }
 0x13c   : > { %1888 = vmatprep.mubr.msk.bf16.mxu0 %vm1954_vm0, %v1953_v0  ;;  %1912 = vmatprep.mubr.msk.bf16.mxu1 %vm1954_vm0, %v1953_v0  ;;  %v1944_v18 = vld [vmem:[#allocation2 + $0x10] ss:$0 sps:$4 sm:$0x33]   ;;  %vm1501_vm0 = vcmask 388096  }
 0x143   : > { %1889 = vmatmul.mubr.msk.bf16.gmra.mrb[32].mxu0 %vm1305_vm13, %v1944_v18  ;;  %1913 = vmatmul.mubr.msk.bf16.gmra.mrb[32].mxu1 %vm1305_vm13, %v1944_v18 }
 0x1f6   : > { %v1349_v0 = vpop.f32.mrb[24].mxu0  ;;  %v1453_v20 = vpop.f32.mrb[24].mxu1 }
 0x1f7   : > { %v1475_v21 = vmax.f32 %v1349_v0, %v1453_v20  ;;  %v1882_v22 = vpop.f32.mrb[25].mxu0  ;;  %v1906_v23 = vpop.f32.mrb[25].mxu1 }
 0x1f8   : > { %v1352_v25 = vpop.f32.mrb[26].mxu0  ;;  %v1456_v26 = vpop.f32.mrb[26].mxu1 }
 0x1f9   : > { %v1705_v27 = vpack.c.bf16 %v1475_v21, %v1475_v21  ;;  %v1476_v28 = vmax.f32 %v1352_v25, %v1456_v26  ;;  %v1883_v29 = vpop.f32.mrb[27].mxu0  ;;  %v1907_v30 = vpop.f32.mrb[27].mxu1 }
 0x1fb   : > { %1502 = vst.msk [vmem:[%s2322_s10] sm:$0xf] %vm1501_vm0, %v1705_v27  ;;  %v1706_v31 = vpack.c.bf16 %v1476_v28, %v1476_v28 }
 0x1fd   : > { %1503 = vst.msk [vmem:[%s2322_s10 + $0x4] sm:$0xf] %vm1501_vm0, %v1706_v31 }
 0x20e   : > { %v1357_v32 = vpop.f32.mrb[28].mxu0  ;;  %v1461_v33 = vpop.f32.mrb[28].mxu1 }
 0x20f   : > { %v1477_v34 = vmax.f32 %v1357_v32, %v1461_v33  ;;  %v1886_v35 = vpop.f32.mrb[29].mxu0  ;;  %v1910_v36 = vpop.f32.mrb[29].mxu1 }
 0x210   : > { %v1360_v37 = vpop.f32.mrb[30].mxu0  ;;  %v1464_v38 = vpop.f32.mrb[30].mxu1 }
 0x211   : > { %v1707_v39 = vpack.c.bf16 %v1477_v34, %v1477_v34  ;;  %v1478_v40 = vmax.f32 %v1360_v37, %v1464_v38  ;;  %v1887_v1 = vpop.f32.mrb[31].mxu0  ;;  %v1911_v41 = vpop.f32.mrb[31].mxu1 }
 0x213   : > { %1504 = vst.msk [vmem:[%s2322_s10 + $0x8] sm:$0xf] %vm1501_vm0, %v1707_v39  ;;  %v1708_v42 = vpack.c.bf16 %v1478_v40, %v1478_v40 }
 0x215   : > { %1505 = vst.msk [vmem:[%s2322_s10 + $0xc] sm:$0xf] %vm1501_vm0, %v1708_v42 }
 0x216   : > { %v1365_v43 = vpop.f32.mrb[32].mxu0  ;;  %v1469_v44 = vpop.f32.mrb[32].mxu1 }
 0x217   : > { %v1479_v45 = vmax.f32 %v1365_v43, %v1469_v44  ;;  %v1890_v46 = vpop.f32.mrb[33].mxu0  ;;  %v1914_v47 = vpop.f32.mrb[33].mxu1 }
 0x218   : > { %v1368_v48 = vpop.f32.mrb[34].mxu0  ;;  %v1472_v49 = vpop.f32.mrb[34].mxu1 }
 0x219   : > { %v1709_v50 = vpack.c.bf16 %v1479_v45, %v1479_v45  ;;  %v1891_v51 = vpop.f32.mrb[35].mxu0  ;;  %v1915_v52 = vpop.f32.mrb[35].mxu1 }
 0x21b   : > { %1507 = vst.msk [vmem:[%s2322_s10 + $0x10] sm:$0x3] %vm1506_vm14, %v1709_v50 }
 0x21c PF: > { %s19_s27 = sadd.s32 1, %s1951_s27  }
 0x21d   : > { %p16_p4 = scmp.ge.s32.totalorder %s19_s27, 4  }
 0x21f   :  { %18 = sbr.rel (!%p16_p4) target bundleno = 1 (0x1), region = 90 }

// kernel: ucontracting_forward.8
= control target key start
LH: loop header
LB: loop body
LE: loop exit
PB: predicated region body
PF: predicated region fallthrough
CT: control target
= control target key end

     0   :  { %s1653_s18 = smov 0   ;;  %s1859_s0 = inlined_call_operand.vmem [shape: bf16[2,44,48], index: 0, kind: input, shape index: {}]   ;;  %s1860_s1 = inlined_call_operand.vmem [shape: bf16[9,48,64], index: 1, kind: input, shape index: {}]   ;;  %s1861_s2 = inlined_call_operand.vmem [shape: f32[1,48], index: 2, kind: input, shape index: {}]   ;;  %s1862_s3 = inlined_call_operand.vmem [shape: f32[1,48], index: 3, kind: input, shape index: {}]   ;;  %s1863_s4 = inlined_call_operand.vmem [shape: bf16[2,24,64], index: 4, kind: output, shape index: {0}]   ;;  %s1864_s5 = inlined_call_operand.vmem [shape: f32[2,2,64], index: 5, kind: output, shape index: {1}]  }
   0x1 LB: > { %s1277_s2 = sadd.s32 4294967295, %s1620_s18   ;;  %p1281_p0 = scmp.ge.s32.totalorder %s1620_s18, 1  ;;  %s1620_s18 = sphi %s1653_s18, %s16_s18  }
   0x2   : > { %p190_p1 = scmp.lt.s32.totalorder %s1620_s18, 3 }
   0x4   : > { %p191_p2 = pnand %p1281_p0, %p190_p1 }
   0x5   : > { %v1574_v0 = vld [vmem:[%s1860_s1 + $0x60] sm:$0xff] (!%p191_p2)   ;;  %p222_p3 = scmp.lt.s32.totalorder (!%p191_p2), %s1277_s2, 1  ;;  %v1575_v1 = vld [vmem:[%s1860_s1 + $0x18] sm:$0xff] (!%p191_p2)   ;;  %v1576_v2 = vld [vmem:[%s1860_s1 + $0x68] sm:$0xff] (!%p191_p2)   ;;  %vm264_vm0 = vsmask.f32 (!%p191_p2), 7424 }
   0x6   : > { %194 = sbr.rel (%p191_p2) target bundleno = 328 (0x148), region = 36  ;;  %1482 = vmatprep.subr.bf16.mxu0 (!%p191_p2), %v1574_v0  ;;  %1442 = vmatprep.subr.bf16.mxu1 (!%p191_p2), %v1575_v1  ;;  %v1577_v3 = vld [vmem:[%s1860_s1 + $0x20] sm:$0xff] (!%p191_p2)   ;;  %v1578_v4 = vld [vmem:[%s1860_s1 + $0x70] sm:$0xff] (!%p191_p2)   ;;  %v1579_v5 = vld [vmem:[%s1860_s1 + $0x28] sm:$0xff] (!%p191_p2)   ;;  %vm620_vm1 = vsmask.f32 (!%p191_p2), 4352 }
   0x7   : > { %1483 = vmatpush3.bf16.msra.mxu0 (!%p191_p2), %v1574_v0  ;;  %1443 = vmatpush3.bf16.msra.mxu1 (!%p191_p2), %v1575_v1  ;;  %v1585_v16 = vld [vmem:[%s1860_s1 + $0x78] sm:$0xff] (!%p191_p2)   ;;  %v1586_v19 = vld [vmem:[%s1860_s1] sm:$0xff] (!%p191_p2)   ;;  %vm298_vm2 = vcmask (!%p191_p2), 392192   ;;  %v1588_v37 = vld [vmem:[%s1860_s1 + $0x8] sm:$0xff] (!%p191_p2)   ;;  %vm436_vm3 = vcmask (!%p191_p2), 1046528   ;;  %vm818_vm4 = vcmask (!%p191_p2), 1045504  }
   0x8   : > { %1484 = vmatprep.subr.bf16.mxu0 (!%p191_p2), %v1576_v2  ;;  %1444 = vmatprep.subr.bf16.mxu1 (!%p191_p2), %v1577_v3  ;;  %v1587_v39 = vld [vmem:[%s1860_s1 + $0x80] sm:$0xff] (!%p191_p2)   ;;  %v1590_v41 = vld [vmem:[%s1860_s1 + $0x10] sm:$0xff] (!%p191_p2)   ;;  %v1589_v42 = vld [vmem:[%s1860_s1 + $0x88] sm:$0xff] (!%p191_p2)   ;;  %vm530_vm5 = vcmask (!%p191_p2), 1044480   ;;  %vm908_vm6 = vsmask.f32 (!%p191_p2), 5376 }
   0x9   : > { %v1594_v43 = vld [vmem:[%s1860_s1 + $0x30] sm:$0xff] (!%p191_p2)   ;;  %v1596_v61 = vld [vmem:[%s1860_s1 + $0x38] sm:$0xff] (!%p191_p2)   ;;  %vm1098_vm7 = vcmask (!%p191_p2), 519168   ;;  %vm1090_vm8 = vcmask (!%p191_p2), 523264   ;;  %vm1123_vm9 = vcmask (!%p191_p2), 519170   ;;  %vm1096_vm10 = vcmask (!%p191_p2), 517120  }
   0xa   : > { %v1592_v55 = vld [vmem:[%s1860_s1 + $0x90] sm:$0xff] (!%p191_p2)   ;;  %v1595_v63 = vld [vmem:[%s1860_s1 + $0x98] sm:$0xff] (!%p191_p2)   ;;  %vm1188_vm11 = vcmask (!%p191_p2), 516096  }
   0xb   : > { %1485 = vmatpush3.bf16.msra.mxu0 (!%p191_p2), %v1576_v2  ;;  %1445 = vmatpush3.bf16.msra.mxu1 (!%p191_p2), %v1577_v3 }
   0xc   : > { %1486 = vmatprep.subr.bf16.mxu0 (!%p191_p2), %v1578_v4  ;;  %1446 = vmatprep.subr.bf16.mxu1 (!%p191_p2), %v1579_v5 }
   0xd   : > { %s1866_s2 = smov (!%p222_p3, %s1277_s2), 1 }
   0xe   : > { %s1563_s28 = smul.u32 24, %s1866_s2  ;;  %s1284_s30 = sshll.u32 %s1866_s2, 1 }
   0xf   : > { %1487 = vmatpush3.bf16.msra.mxu0 %v1578_v4  ;;  %1447 = vmatpush3.bf16.msra.mxu1 %v1579_v5  ;;  %v1598_v4 = vld [vmem:[%s1860_s1 + $0x40] sm:$0xff]   ;;  %s1564_s26 = smul.u32 12, %s1866_s2  ;;  %s235_s9 = scalar_lea.vmem %s1864_s5, %s1284_s30 }
  0x10   : > { %s1685_s8 = scalar_lea.vmem %s1859_s0, %s1563_s28  ;;  %1492 = vmatprep.subr.bf16.mxu0 %v1585_v16  ;;  %1452 = vmatprep.subr.bf16.mxu1 %v1586_v19 }
  0x11   : > { %v237_v6 = vld [vmem:[%s1685_s8] sm:$0xf]  ;;  %v1689_v7 = vld [vmem:[%s1685_s8 + $0x4] sm:$0xf]  ;;  %v1692_v8 = vld [vmem:[%s1685_s8 + $0x8] sm:$0xf]  ;;  %s1832_s29 = scalar_lea.vmem %s1863_s4, %s1564_s26 }
  0x12   : > { %v246_v9 = vld [vmem:[%s1685_s8 + $0xc] sm:$0x1]  ;;  %v1291_v10 = vcombine.low %v237_v6, %v1689_v7  ;;  %v515_v11 = vld [vmem:[%s1685_s8] sm:$0x8]  ;;  %v1347_v40 = vcombine.low %v1689_v7, %v1692_v8  ;;  %v797_v46 = vld [vmem:[%s1685_s8 + $0x4] sm:$0xc]  ;;  %v1298_v56 = vcombine.low %v1692_v8, %v1692_v8 }
  0x13   : > { %v1698_v12 = vld [vmem:[%s1685_s8 + $0xc] sm:$0xf]  ;;  %v1701_v13 = vcombine.low %v1692_v8, %v246_v9  ;;  %v1704_v14 = vcombine.low %v515_v11, %v1689_v7  ;;  %v425_v44 = vld [vmem:[%s1685_s8] sm:$0xe]  ;;  %v1748_v48 = vld [vmem:[%s1685_s8 + $0x8] sm:$0xf] }
  0x14   : > { %v1335_v15 = vcombine.low %v1692_v8, %v1698_v12  ;;  %v266_v17 = vshrl.u32 %v1291_v10, 16  ;;  %v268_v18 = vshll.u32 %v1291_v10, 16  ;;  %v1310_v47 = vcombine.low %v425_v44, %v1689_v7  ;;  %v799_v49 = vld [vmem:[%s1685_s8 + $0xc] sm:$0xf]  ;;  %v800_v50 = vld [vmem:[%s1685_s8 + $0x10] sm:$0x3] }
  0x15   : > { %v273_v20 = vshll.u32 %v1701_v13, 16  ;;  %v277_v21 = vshrl.u32 %v1701_v13, 16  ;;  %v622_v22 = vshrl.u32 %v1704_v14, 16  ;;  %v625_v23 = vshll.u32 %v1704_v14, 16  ;;  %v897_v53 = vld [vmem:[%s1685_s8 + $0x10] sm:$0x7] }
  0x16   : > { %v270_v24 = vrot.slane %v268_v18, 1  ;;  %v630_v25 = vshrl.u32 %v1335_v15, 16  ;;  %v633_v26 = vshll.u32 %v1335_v15, 16  ;;  %v438_v45 = vrot.slane %v1701_v13, 1  ;;  %v516_v1 = vld [vmem:[%s1685_s8 + $0xc] sm:$0x7] }
  0x17   : > { %v275_v27 = vrot.slane %v273_v20, 1  ;;  %v624_v28 = vrot.slane %v622_v22, 3  ;;  %v627_v29 = vrot.slane %v625_v23, 4  ;;  %v1360_v51 = vcombine.low %v797_v46, %v1748_v48  ;;  %v1597_v9 = vld [vmem:[%s1860_s1 + $0xa0] sm:$0xff]   ;;  %v1603_v18 = vld [vmem:[%s1860_s1 + $0xa8] sm:$0xff]   ;;  %v1605_v22 = vld [vmem:[%s1860_s1 + $0xb0] sm:$0xff]  }
  0x18   : > { %v271_v30 = vor.u32 %v270_v24, %v266_v17  ;;  %v632_v31 = vrot.slane %v630_v25, 3  ;;  %v635_v32 = vrot.slane %v633_v26, 4  ;;  %v1361_v52 = vcombine.low %v799_v49, %v800_v50  ;;  %v1001_v24 = vld [vmem:[%s1685_s8 + $0x4] sm:$0x8]  ;;  %v1608_v25 = vld [vmem:[%s1860_s1 + $0x58] sm:$0xff]  }
  0x19   : > { %v279_v33 = vor.u32 %v277_v21, %v275_v27  ;;  %v628_v34 = vor.u32 %v627_v29, %v624_v28  ;;  %v437_v54 = vrot.slane %v1310_v47, 1  ;;  %v819_v57 = vrot.slane %v1360_v51, 2  ;;  %v1606_v21 = vld [vmem:[%s1860_s1 + $0x50] sm:$0xff]   ;;  %v1607_v13 = vld [vmem:[%s1860_s1 + $0xb8] sm:$0xff]  }
  0x1a   : > { %v276_v35 = vsel %vm264_vm0, %v271_v30, %v275_v27  ;;  %v636_v36 = vor.u32 %v635_v32, %v632_v31  ;;  %v820_v58 = vrot.slane %v1361_v52, 2  ;;  %v1759_v59 = vcombine.low %v799_v49, %v897_v53  ;;  %v1610_v27 = vld [vmem:[%s1860_s1 + $0xc0] sm:$0xff]   ;;  %v1611_v30 = vld [vmem:[%s1860_s1 + $0xc8] sm:$0xff]   ;;  %v1612_v32 = vld [vmem:[%s1860_s1 + $0xd0] sm:$0xff]  }
  0x1b   : > { %1448 = vmatprep.mubr.msk.bf16.mxu1 %vm298_vm2, %v276_v35  ;;  %v1348_v60 = vcombine.low %v1698_v12, %v1698_v12  ;;  %v439_v62 = vsel %vm436_vm3, %v437_v54, %v438_v45  ;;  %v910_v2 = vshrl.u32 %v1360_v51, 16  ;;  %v913_v3 = vshll.u32 %v1360_v51, 16 }
  0x1c   : > { %v637_v38 = vsel %vm620_vm1, %v628_v34, %v636_v36  ;;  %1449 = vmatmul.mubr.msk.bf16.vlgmr.msra.gmra.mrb[0].mxu1 %vm298_vm2, %v279_v33  ;;  %v821_v0 = vsel %vm818_vm4, %v819_v57, %v820_v58  ;;  %v918_v5 = vshrl.u32 %v1759_v59, 16  ;;  %v921_v6 = vshll.u32 %v1759_v59, 16 }
  0x1d   : > { %1488 = vmatprep.mubr.msk.bf16.mxu0 %vm298_vm2, %v637_v38  ;;  %1453 = vmatpush3.bf16.msra.mxu1 %v1586_v19  ;;  %v1323_v7 = vcombine.low %v1692_v8, %v516_v1  ;;  %v915_v11 = vrot.slane %v913_v3, 3  ;;  %v531_v8 = vrot.slane %v1704_v14, 3  ;;  %v1385_v26 = vcombine.low %v1001_v24, %v1748_v48 }
  0x1e   : > { %1489 = vmatmul.mubr.msk.bf16.vlgmr.msra.gmra.mrb[0].mxu0 %vm298_vm2, %v636_v36  ;;  %1454 = vmatprep.subr.bf16.mxu1 %v1588_v37  ;;  %v920_v12 = vrot.slane %v918_v5, 2  ;;  %v923_v15 = vrot.slane %v921_v6, 3  ;;  %v1013_v29 = vrot.slane %v1759_v59, 3  ;;  %v1622_v33 = vmov 0  }
  0x1f   : > { %1493 = vmatpush3.bf16.msra.mxu0 %v1585_v16  ;;  %1458 = vmatprep.mubr.msk.bf16.mxu1 %vm298_vm2, %v1291_v10  ;;  %v912_v10 = vrot.slane %v910_v2, 2  ;;  %v1604_v16 = vld [vmem:[%s1860_s1 + $0x48] sm:$0xff]   ;;  %v532_v17 = vrot.slane %v1323_v7, 3  ;;  %v1012_v28 = vrot.slane %v1385_v26, 3  ;;  %1187 = vst.msk [vmem:[%s1832_s29 + $0x8] sm:$0xf] %vm1098_vm7, %v1622_v33 }
  0x20   : > { %1494 = vmatprep.subr.bf16.mxu0 %v1587_v39  ;;  %1498 = vmatprep.mubr.msk.bf16.mxu0 %vm298_vm2, %v1347_v40  ;;  %v924_v20 = vor.u32 %v923_v15, %v920_v12 }
  0x21   : > { %1455 = vmatpush3.bf16.msra.mxu1 %v1588_v37  ;;  %v916_v19 = vor.u32 %v915_v11, %v912_v10  ;;  %v533_v14 = vsel %vm530_vm5, %v531_v8, %v532_v17  ;;  %v1014_v31 = vsel %vm530_vm5, %v1012_v28, %v1013_v29 }
  0x22   : > { %1456 = vmatprep.subr.bf16.mxu1 %v1590_v41 }
  0x23   : > { %1495 = vmatpush3.bf16.msra.mxu0 %v1587_v39  ;;  %v925_v23 = vsel %vm908_vm6, %v916_v19, %v924_v20 }
  0x24   : > { %1496 = vmatprep.subr.bf16.mxu0 %v1589_v42 }
  0x25   : > { %1457 = vmatpush3.bf16.msra.mxu1 %v1590_v41 }
  0x26   : > { %1462 = vmatprep.subr.bf16.mxu1 %v1594_v43 }
  0x27   : > { %1497 = vmatpush3.bf16.msra.mxu0 %v1589_v42 }
  0x28   : > { %1502 = vmatprep.subr.bf16.mxu0 %v1592_v55  ;;  %1459 = vmatmul.mubr.msk.bf16.vlgmr.msra.gmra.mrb[0].mxu1 %vm298_vm2, %v1298_v56 }
  0x29   : > { %1463 = vmatpush3.bf16.msra.mxu1 %v1594_v43  ;;  %1468 = vmatprep.mubr.msk.bf16.mxu1 %vm298_vm2, %v439_v62 }
  0x2a   : > { %1499 = vmatmul.mubr.msk.bf16.vlgmr.msra.gmra.mrb[0].mxu0 %vm298_vm2, %v1348_v60  ;;  %1464 = vmatprep.subr.bf16.mxu1 %v1596_v61 }
  0x2b   : > { %1503 = vmatpush3.bf16.msra.mxu0 %v1592_v55  ;;  %1508 = vmatprep.mubr.msk.bf16.mxu0 %vm298_vm2, %v821_v0 }
  0x2c   : > { %1504 = vmatprep.subr.bf16.mxu0 %v1595_v63 }
  0x2d   : > { %1465 = vmatpush3.bf16.msra.mxu1 %v1596_v61 }
  0x2e   : > { %1466 = vmatprep.subr.bf16.mxu1 %v1598_v4 }
  0x2f   : > { %1505 = vmatpush3.bf16.msra.mxu0 %v1595_v63 }
  0x30   : > { %1506 = vmatprep.subr.bf16.mxu0 %v1597_v9 }
  0x31   : > { %1467 = vmatpush3.bf16.msra.mxu1 %v1598_v4 }
  0x32   : > { %1472 = vmatprep.subr.bf16.mxu1 %v1604_v16 }
  0x33   : > { %1507 = vmatpush3.bf16.msra.mxu0 %v1597_v9 }
  0x34   : > { %1512 = vmatprep.subr.bf16.mxu0 %v1603_v18  ;;  %1469 = vmatmul.mubr.msk.bf16.vlgmr.msra.gmra.mrb[0].mxu1 %vm298_vm2, %v438_v45 }
  0x35   : > { %1473 = vmatpush3.bf16.msra.mxu1 %v1604_v16  ;;  %1478 = vmatprep.mubr.msk.bf16.mxu1 %vm298_vm2, %v533_v14 }
  0x36   : > { %1509 = vmatmul.mubr.msk.bf16.vlgmr.msra.gmra.mrb[0].mxu0 %vm298_vm2, %v820_v58  ;;  %1474 = vmatprep.subr.bf16.mxu1 %v1606_v21 }
  0x37   : > { %1513 = vmatpush3.bf16.msra.mxu0 %v1603_v18  ;;  %1518 = vmatprep.mubr.msk.bf16.mxu0 %vm298_vm2, %v925_v23 }
  0x38   : > { %1514 = vmatprep.subr.bf16.mxu0 %v1605_v22 }
  0x39   : > { %1475 = vmatpush3.bf16.msra.mxu1 %v1606_v21 }
  0x3a   : > { %1476 = vmatprep.subr.bf16.mxu1 %v1608_v25 }
  0x3b   : > { %1515 = vmatpush3.bf16.msra.mxu0 %v1605_v22 }
  0x3c   : > { %1516 = vmatprep.subr.bf16.mxu0 %v1607_v13 }
  0x3d   : > { %1477 = vmatpush3.bf16.msra.mxu1 %v1608_v25 }
  0x3f   : > { %1517 = vmatpush3.bf16.msra.mxu0 %v1607_v13 }
  0x40   : > { %1522 = vmatprep.subr.bf16.mxu0 %v1610_v27  ;;  %1479 = vmatmul.mubr.msk.bf16.vlgmr.msra.gmra.mrb[0].mxu1 %vm298_vm2, %v532_v17 }
  0x42   : > { %1519 = vmatmul.mubr.msk.bf16.vlgmr.msra.gmra.mrb[0].mxu0 %vm298_vm2, %v924_v20 }
  0x43   : > { %1523 = vmatpush3.bf16.msra.mxu0 %v1610_v27  ;;  %1528 = vmatprep.mubr.msk.bf16.mxu0 %vm298_vm2, %v1014_v31 }
  0x44   : > { %1524 = vmatprep.subr.bf16.mxu0 %v1611_v30 }
  0x47   : > { %1525 = vmatpush3.bf16.msra.mxu0 %v1611_v30 }
  0x48   : > { %1526 = vmatprep.subr.bf16.mxu0 %v1612_v32 }
  0x4b   : > { %1527 = vmatpush3.bf16.msra.mxu0 %v1612_v32 }
  0x4e   : > { %1529 = vmatmul.mubr.msk.bf16.vlgmr.msra.gmra.mrb[0].mxu0 %vm298_vm2, %v1013_v29 }
 0x113   : > { %v1480_v34 = vpop.f32.mrb[0].mxu1 }
 0x114   : > { %v592_v35 = vpop.f32.mrb[1].mxu1 }
 0x115   : > { %v1481_v36 = vpop.f32.mrb[2].mxu1 }
 0x116   : > { %v595_v37 = vpop.f32.mrb[3].mxu1 }
 0x121   : > { %v1530_v38 = vpop.f32.mrb[0].mxu0 }
 0x122   : > { %v1532_v39 = vadd.f32 %v1530_v38, %v1480_v34  ;;  %v1073_v40 = vpop.f32.mrb[1].mxu0 }
 0x123   : > { %v1533_v41 = vadd.f32 %v1073_v40, %v592_v35  ;;  %v1531_v42 = vpop.f32.mrb[2].mxu0 }
 0x124   : > { %1093 = vst.msk [vmem:[#allocation2 + $0x10] sm:$0xff] %vm1090_vm8, %v1532_v39  ;;  %v1076_v43 = vpop.f32.mrb[3].mxu0 }
 0x125   : > { %1091 = vst.msk [vmem:[#allocation2] sm:$0xff] %vm1090_vm8, %v1533_v41  ;;  %v1534_v44 = vadd.f32 %v1076_v43, %v595_v37 }
 0x127   : > { %1092 = vst.msk [vmem:[#allocation2 + $0x8] sm:$0xff] %vm1090_vm8, %v1534_v44 }
 0x12b   : > { %v1162_v45 = vld [vmem:[#allocation2 + $0x12] sm:$0xf] }
 0x12c   : > { %v1396_v46 = vpack.c.bf16 %v1162_v45, %v1162_v45  ;;  %v1170_v47 = vsel %vm1098_vm7, %v1162_v45, 0.0  ;;  %v1178_v48 = vmul.f32 %v1162_v45, %v1162_v45  ;;  %v1094_v49 = vld [vmem:[#allocation2] sm:$0xf] }
 0x12d   : > { %v1171_v50 = vrot.slane %v1170_v47, 4  ;;  %v1095_v51 = vpack.c.bf16 %v1094_v49, %v1094_v49  ;;  %v1099_v52 = vsel %vm1098_vm7, %v1094_v49, 0.0  ;;  %v1107_v53 = vmul.f32 %v1094_v49, %v1094_v49 }
 0x12e   : > { %v1167_v54 = vrot.slane %v1396_v46, 6  ;;  %v1179_v55 = vsel %vm1098_vm7, %v1178_v48, 0.0  ;;  %v1100_v56 = vrot.slane %v1099_v52, 4  ;;  %v1116_v57 = vld [vmem:[#allocation2 + $0x6] sm:$0xf] }
 0x12f   : > { %v1180_v58 = vrot.slane %v1179_v55, 4  ;;  %1097 = vst.msk [vmem:[%s1832_s29] sm:$0x3] %vm1096_vm10, %v1095_v51  ;;  %v1108_v59 = vsel %vm1098_vm7, %v1107_v53, 0.0  ;;  %v1395_v60 = vpack.c.bf16 %v1116_v57, %v1116_v57  ;;  %v1142_v61 = vld [vmem:[#allocation2 + $0xc] sm:$0xf]  ;;  %v1133_v1 = vmul.f32 %v1116_v57, %v1116_v57 }
 0x130   : > { %1169 = vst.msk [vmem:[%s1832_s29 + $0x4] sm:$0xc] %vm1123_vm9, %v1167_v54  ;;  %v1101_v62 = vadd.f32 %v1100_v56, %v1099_v52  ;;  %v1109_v63 = vrot.slane %v1108_v59, 4  ;;  %v1125_v0 = vsel %vm1098_vm7, %v1116_v57, 0.0  ;;  %v1172_v2 = vadd.f32 %v1171_v50, %v1170_v47 }
 0x131   : > { %v1121_v3 = vrot.slane %v1395_v60, 6  ;;  %v1126_v4 = vrot.slane %v1125_v0, 4  ;;  %v1134_v7 = vsel %vm1098_vm7, %v1133_v1, 0.0  ;;  %v1143_v9 = vpack.c.bf16 %v1142_v61, %v1142_v61 }
 0x132   : > { %v1102_v5 = vrot.slane %v1101_v62, 2  ;;  %v1110_v6 = vadd.f32 %v1109_v63, %v1108_v59  ;;  %v1181_v10 = vadd.f32 %v1180_v58, %v1179_v55  ;;  %v1135_v12 = vrot.slane %v1134_v7, 4 }
 0x133   : > { %1124 = vst.msk [vmem:[%s1832_s29] sm:$0xc] %vm1123_vm9, %v1121_v3  ;;  %v1127_v11 = vadd.f32 %v1126_v4, %v1125_v0  ;;  %v1145_v8 = vsel %vm1098_vm7, %v1142_v61, 0.0  ;;  %v1153_v17 = vmul.f32 %v1142_v61, %v1142_v61  ;;  %v1173_v18 = vrot.slane %v1172_v2, 2 }
 0x134   : > { %v1103_v15 = vadd.f32 %v1102_v5, %v1101_v62  ;;  %v1111_v16 = vrot.slane %v1110_v6, 2  ;;  %1144 = vst.msk [vmem:[%s1832_s29 + $0x4] sm:$0x3] %vm1096_vm10, %v1143_v9  ;;  %v1136_v20 = vadd.f32 %v1135_v12, %v1134_v7  ;;  %v1146_v14 = vrot.slane %v1145_v8, 4 }
 0x135   : > { %v1128_v19 = vrot.slane %v1127_v11, 2  ;;  %v1154_v22 = vsel %vm1098_vm7, %v1153_v17, 0.0  ;;  %v1182_v25 = vrot.slane %v1181_v10, 2  ;;  %v1174_v28 = vadd.f32 %v1173_v18, %v1172_v2 }
 0x136   : > { %v1112_v21 = vadd.f32 %v1111_v16, %v1110_v6  ;;  %v1137_v24 = vrot.slane %v1136_v20, 2  ;;  %v1104_v13 = vrot.slane %v1103_v15, 1  ;;  %v1147_v26 = vadd.f32 %v1146_v14, %v1145_v8 }
 0x137   : > { %v1129_v23 = vadd.f32 %v1128_v19, %v1127_v11  ;;  %v1155_v27 = vrot.slane %v1154_v22, 4  ;;  %v1183_v36 = vadd.f32 %v1182_v25, %v1181_v10  ;;  %v1175_v40 = vrot.slane %v1174_v28, 1 }
 0x138   : > { %v1138_v30 = vadd.f32 %v1137_v24, %v1136_v20  ;;  %v1113_v31 = vrot.slane %v1112_v21, 1  ;;  %v1148_v32 = vrot.slane %v1147_v26, 2  ;;  %v1105_v37 = vadd.f32 %v1104_v13, %v1103_v15 }
 0x139   : > { %v1130_v29 = vrot.slane %v1129_v23, 1  ;;  %v1156_v33 = vadd.f32 %v1155_v27, %v1154_v22  ;;  %v1184_v46 = vrot.slane %v1183_v36, 1  ;;  %v1176_v50 = vadd.f32 %v1175_v40, %v1174_v28 }
 0x13a   : > { %v1139_v35 = vrot.slane %v1138_v30, 1  ;;  %v1149_v38 = vadd.f32 %v1148_v32, %v1147_v26  ;;  %v1114_v42 = vadd.f32 %v1113_v31, %v1112_v21 }
 0x13b   : > { %v1131_v34 = vadd.f32 %v1130_v29, %v1129_v23  ;;  %v1157_v39 = vrot.slane %v1156_v33, 2  ;;  %v1185_v53 = vadd.f32 %v1184_v46, %v1183_v36 }
 0x13c   : > { %v1140_v41 = vadd.f32 %v1139_v35, %v1138_v30  ;;  %v1150_v44 = vrot.slane %v1149_v38, 1 }
 0x13d   : > { %v1132_v43 = vadd.f32 %v1131_v34, %v1105_v37  ;;  %v1158_v45 = vadd.f32 %v1157_v39, %v1156_v33 }
 0x13e   : > { %v1141_v47 = vadd.f32 %v1140_v41, %v1114_v42  ;;  %v1151_v48 = vadd.f32 %v1150_v44, %v1149_v38 }
 0x13f   : > { %v1159_v49 = vrot.slane %v1158_v45, 1 }
 0x140   : > { %v1152_v51 = vadd.f32 %v1151_v48, %v1132_v43 }
 0x141   : > { %v1160_v52 = vadd.f32 %v1159_v49, %v1158_v45 }
 0x142   : > { %v1177_v55 = vadd.f32 %v1176_v50, %v1152_v51 }
 0x143   : > { %v1161_v54 = vadd.f32 %v1160_v52, %v1141_v47 }
 0x144   : > { %1189 = vst.msk [vmem:[%s235_s9] sm:$0x1] %vm1188_vm11, %v1177_v55 }
 0x145   : > { %v1186_v56 = vadd.f32 %v1185_v53, %v1161_v54 }
 0x147   : > { %1190 = vst.msk [vmem:[%s235_s9 + $0x1] sm:$0x1] %vm1188_vm11, %v1186_v56 }
 0x148 PF: > { %s16_s18 = sadd.s32 1, %s1620_s18  }
 0x149   : > { %p13_p4 = scmp.ge.s32.totalorder %s16_s18, 4  }
 0x14b   :  { %15 = sbr.rel (!%p13_p4) target bundleno = 1 (0x1), region = 86 }

// kernel: tile.53
= control target key start
LH: loop header
LB: loop body
LE: loop exit
PB: predicated region body
PF: predicated region fallthrough
CT: control target
= control target key end

     0   :  { %s22_s0 = inlined_call_operand.vmem [shape: f32[16], index: 0, kind: input, shape index: {}]   ;;  %s23_s1 = inlined_call_operand.vmem [shape: f32[4,16], index: 1, kind: output, shape index: {}]  }
   0x1   :  { %v4_v0 = vld [vmem:[%s22_s0] ss:$0 sm:$0xff] }
   0x2   :  { %5 = vst [vmem:[%s23_s1] sm:$0xf] %v4_v0 }

// kernel: tile.54
= control target key start
LH: loop header
LB: loop body
LE: loop exit
PB: predicated region body
PF: predicated region fallthrough
CT: control target
= control target key end

     0   :  { %vm7_vm0 = vcmask 130048   ;;  %s37_s8 = smov 16   ;;  %s38_s9 = smov 32   ;;  %vm13_vm1 = vcmask 523648   ;;  %vm19_vm2 = vcmask 392448   ;;  %vm25_vm3 = vcmask 261248   ;;  %s55_s0 = inlined_call_operand.vmem [shape: f32[4,16], index: 0, kind: input, shape index: {}]   ;;  %s56_s1 = inlined_call_operand.vmem [shape: f32[1,64], index: 1, kind: output, shape index: {}]  }
   0x1   :  { %v4_v0 = vld [vmem:[%s55_s0] sm:$0xf]  ;;  %s36_s0 = smov 48  }
   0x2   :  { %5 = vst [vmem:[#allocation1] sm:$0xf] %v4_v0 }
   0x9   :  { %v10_v1 = vld [vmem:[#allocation1 + $0x3] sm:$0x1]   ;;  %v22_v2 = vld [vmem:[#allocation1 + $0x1] sm:$0x1]   ;;  %v6_v3 = vld [vmem:[#allocation1] sm:$0x1]  }
   0xa   :  { %11 = vrot.lane.b32.xlu0 %v10_v1, %s36_s0  ;;  %23 = vrot.lane.b32.xlu1 %v22_v2, %s37_s8  ;;  %v16_v4 = vld [vmem:[#allocation1 + $0x2] sm:$0x1]   ;;  %8 = vst.msk [vmem:[#allocation0] sm:$0x1] %vm7_vm0, %v6_v3  }
   0xe   :  { %17 = vrot.lane.b32.xlu0 %v16_v4, %s38_s9 }
  0x7c   :  { %v12_v5 = vpop.permute.xlu0 %11   ;;  %v24_v6 = vpop.permute.xlu1 %23  }
  0x7d   :  { %14 = vst.msk [vmem:[#allocation0] sm:$0x1] %vm13_vm1, %v12_v5  }
  0x80   :  { %v18_v7 = vpop.permute.xlu0 %17  }
  0x81   :  { %20 = vst.msk [vmem:[#allocation0] sm:$0x1] %vm19_vm2, %v18_v7  }
  0x82   :  { %26 = vst.msk [vmem:[#allocation0] sm:$0x1] %vm25_vm3, %v24_v6  }
  0x89   :  { %v30_v8 = vld [vmem:[#allocation0] sm:$0x1] }
  0x8a   :  { %32 = vst [vmem:[%s56_s1] sm:$0x1] %v30_v8 }

// kernel: ucontracting_forward.9
= control target key start
LH: loop header
LB: loop body
LE: loop exit
PB: predicated region body
PF: predicated region fallthrough
CT: control target
= control target key end

     0   :  { %s999_s27 = smov 0   ;;  %s1097_s0 = inlined_call_operand.vmem [shape: bf16[2,24,64], index: 0, kind: input, shape index: {}]   ;;  %s1098_s1 = inlined_call_operand.vmem [shape: f32[1,64], index: 1, kind: input, shape index: {}]   ;;  %s1099_s2 = inlined_call_operand.vmem [shape: f32[1,64], index: 2, kind: input, shape index: {}]   ;;  %s1100_s3 = inlined_call_operand.vmem [shape: bf16[2,4], index: 3, kind: input, shape index: {}]   ;;  %s1101_s4 = inlined_call_operand.vmem [shape: bf16[2,4], index: 4, kind: input, shape index: {}]   ;;  %s1102_s5 = inlined_call_operand.vmem [shape: bf16[64,32], index: 5, kind: input, shape index: {}]   ;;  %s1103_s6 = inlined_call_operand.vmem [shape: bf16[64,32], index: 6, kind: input, shape index: {}]   ;;  %s1104_s7 = inlined_call_operand.vmem [shape: bf16[2,16,64], index: 7, kind: output, shape index: {0}]   ;;  %s1105_s8 = inlined_call_operand.vmem [shape: bf16[2,12,32], index: 8, kind: output, shape index: {1}]  }
   0x1 LB: > { %s815_s28 = sadd.s32 4294967295, %s948_s27   ;;  %p819_p0 = scmp.ge.s32.totalorder %s948_s27, 1  ;;  %s948_s27 = sphi %s999_s27, %s19_s27  }
   0x2   : > { %p265_p1 = scmp.lt.s32.totalorder %s948_s27, 3 }
   0x4   : > { %p266_p2 = pnand %p819_p0, %p265_p1 }
   0x5   : > { %p304_p3 = scmp.lt.s32.totalorder (!%p266_p2), %s815_s28, 1  ;;  %v950_v0 = vmov (!%p266_p2), 0.0   ;;  %vm951_vm0 = vmmov (!%p266_p2), 0   ;;  %v825_v1 = vld [vmem:[%s1098_s1] ss:$0 sm:$0xff] (!%p266_p2)  ;;  %vm352_vm1 = vcmask (!%p266_p2), 519168   ;;  %v563_v43 = vlaneseq (!%p266_p2) }
   0x6   : > { %269 = sbr.rel (%p266_p2) target bundleno = 497 (0x1f1), region = 48  ;;  %873 = vmatprep.subr.bf16.mxu0 (!%p266_p2), %v950_v0  ;;  %879 = vmatprep.subr.bf16.mxu1 (!%p266_p2), %v950_v0  ;;  %v826_v5 = vld [vmem:[%s1099_s2] ss:$0 sm:$0xff] (!%p266_p2)  ;;  %vm367_vm2 = vcmask (!%p266_p2), 1041408   ;;  %vm363_vm3 = vcmask (!%p266_p2), 31744   ;;  %v936_v30 = vld [vmem:[%s1102_s5 + $0x8] sm:$0xff] (!%p266_p2)  }
   0x7   : > { %875 = vmatprep.mubr.msk.bf16.mxu0 (!%p266_p2), %vm951_vm0, %v950_v0  ;;  %881 = vmatprep.mubr.msk.bf16.mxu1 (!%p266_p2), %vm951_vm0, %v950_v0  ;;  %v362_v23 = vld [vmem:[%s1100_s3] sm:$0x1] (!%p266_p2)  ;;  %v937_v31 = vld [vmem:[%s1103_s6 + $0x8] sm:$0xff] (!%p266_p2)   ;;  %v938_v32 = vld [vmem:[%s1102_s5 + $0x10] sm:$0xff] (!%p266_p2)   ;;  %v952_v41 = vmov (!%p266_p2), 1983009808  }
   0x8   : > { %v411_v24 = vld [vmem:[%s1101_s4] sm:$0x1] (!%p266_p2)  ;;  %v939_v33 = vld [vmem:[%s1103_s6 + $0x10] sm:$0xff] (!%p266_p2)   ;;  %v940_v34 = vld [vmem:[%s1102_s5 + $0x18] sm:$0xff] (!%p266_p2)   ;;  %v561_v42 = vunpack.c.l.s4 (!%p266_p2), %v952_v41  ;;  %vm457_vm4 = vcmask (!%p266_p2), 516096   ;;  %v564_v50 = vshrl.u32 (!%p266_p2), %v563_v43, 7 }
   0x9   : > { %v466_v26 = vld [vmem:[%s1100_s3] sm:$0x1] (!%p266_p2)  ;;  %v941_v35 = vld [vmem:[%s1103_s6 + $0x18] sm:$0xff] (!%p266_p2)   ;;  %vm569_vm5 = vcmask (!%p266_p2), 517121   ;;  %vm604_vm6 = vcmask (!%p266_p2), 523264   ;;  %vm722_vm7 = vcmask (!%p266_p2), 254976  }
   0xa   : > { %v513_v27 = vld [vmem:[%s1101_s4] sm:$0x1] (!%p266_p2)  ;;  %v562_v49 = vunpack.c.0.s8 (!%p266_p2), %v561_v42  ;;  %vm724_vm8 = vcmask (!%p266_p2), 257026  }
   0xb   : > { %v934_v28 = vld [vmem:[%s1102_s5] sm:$0xff] (!%p266_p2)  }
   0xc   : > { %v935_v29 = vld [vmem:[%s1103_s6] sm:$0xff] (!%p266_p2)   ;;  %v565_v54 = vsub.s32 (!%p266_p2), %v562_v49, %v564_v50 }
   0xd   : > { %s1107_s28 = smov (!%p304_p3, %s815_s28), 1 }
   0xe   : > { %s921_s29 = smul.u32 12, %s1107_s28  ;;  %s847_s15 = sshll.u32 %s1107_s28, 3 }
   0xf   : > { %s313_s18 = scalar_lea.vmem %s1104_s7, %s847_s15  ;;  %s318_s26 = scalar_lea.vmem %s1105_s8, %s847_s15 }
  0x10   : > { %s308_s12 = scalar_lea.vmem %s1097_s0, %s921_s29 }
  0x11   : > { %v852_v2 = vld [vmem:[%s308_s12] sm:$0xff]  }
  0x12   : > { %v853_v3 = vunpack.c.l.bf16 %v852_v2  ;;  %v854_v4 = vunpack.c.h.bf16 %v852_v2 }
  0x14   : > { %v331_v6 = vmul.f32 %v853_v3, %v825_v1  ;;  %v332_v7 = vmul.f32 %v854_v4, %v825_v1  ;;  %v953_v1 = vmov 0  }
  0x15   : > { %725 = vst.msk [vmem:[%s318_s26] sm:$0xc] %vm724_vm8, %v953_v1 }
  0x16   : > { %v340_v8 = vadd.f32 %v826_v5, %v331_v6  ;;  %v341_v9 = vadd.f32 %v826_v5, %v332_v7  ;;  %726 = vst.msk [vmem:[%s318_s26 + $0x4] sm:$0x3] %vm722_vm7, %v953_v1 }
  0x18   : > { %v342_v10 = vmax.f32 %v340_v8, 0.0  ;;  %v343_v11 = vmax.f32 %v341_v9, 0.0 }
  0x1a   : > { %v849_v12 = vpack.c.bf16 %v342_v10, %v342_v10  ;;  %v850_v13 = vpack.c.bf16 %v343_v11, %v343_v11 }
  0x1c   : > { %353 = vst.msk [vmem:[%s313_s18] sm:$0xf] %vm352_vm1, %v849_v12  ;;  %354 = vst.msk [vmem:[%s313_s18 + $0x4] sm:$0xf] %vm352_vm1, %v850_v13 }
  0x23   : > { %v355_v14 = vld [vmem:[%s313_s18] sm:$0x3]  ;;  %v356_v15 = vld [vmem:[%s313_s18] sm:$0xc]  ;;  %v459_v17 = vld [vmem:[%s313_s18 + $0x4] sm:$0x3] }
  0x24   : > { %v829_v16 = vrot.slane %v356_v15, 10  ;;  %v460_v18 = vld [vmem:[%s313_s18 + $0x4] sm:$0xc] }
  0x25   : > { %v832_v19 = vrot.slane %v460_v18, 10 }
  0x26   : > { %v361_v20 = vmax.bf16 %v829_v16, %v355_v14 }
  0x27   : > { %v465_v21 = vmax.bf16 %v832_v19, %v459_v17 }
  0x28   : > { %v369_v22 = vsel %vm367_vm2, %v361_v20, 0 }
  0x29   : > { %874 = vmatpush3.bf16.msra.mxu0 %v369_v22  ;;  %880 = vmatpush3.bf16.msra.mxu1 %v369_v22  ;;  %v471_v25 = vsel %vm367_vm2, %v465_v21, 0 }
  0x2a   : > { %885 = vmatprep.subr.bf16.mxu0 %v950_v0  ;;  %891 = vmatprep.subr.bf16.mxu1 %v950_v0 }
  0x2c   : > { %876 = vmatmul.mubr.msk.bf16.vlgmr.msra.gmra.mrb[0].mxu0 %vm363_vm3, %v362_v23  ;;  %882 = vmatmul.mubr.msk.bf16.vlgmr.msra.gmra.mrb[0].mxu1 %vm363_vm3, %v411_v24 }
  0x2d   : > { %886 = vmatpush3.bf16.msra.mxu0 %v471_v25  ;;  %892 = vmatpush3.bf16.msra.mxu1 %v471_v25 }
  0x2e   : > { %887 = vmatprep.mubr.msk.bf16.mxu0 %vm951_vm0, %v950_v0  ;;  %893 = vmatprep.mubr.msk.bf16.mxu1 %vm951_vm0, %v950_v0 }
  0x2f   : > { %897 = vmatprep.subr.bf16.mxu0 %v950_v0  ;;  %909 = vmatprep.subr.bf16.mxu1 %v950_v0 }
  0x34   : > { %888 = vmatmul.mubr.msk.bf16.vlgmr.msra.gmra.mrb[4].mxu0 %vm363_vm3, %v466_v26  ;;  %894 = vmatmul.mubr.msk.bf16.vlgmr.msra.gmra.mrb[4].mxu1 %vm363_vm3, %v513_v27 }
  0x35   : > { %905 = vmatprep.mubr.msk.bf16.mxu0 %vm951_vm0, %v950_v0  ;;  %917 = vmatprep.mubr.msk.bf16.mxu1 %vm951_vm0, %v950_v0 }
  0x36   : > { %898 = vmatpush3.bf16.msra.mxu0 %v934_v28  ;;  %910 = vmatpush3.bf16.msra.mxu1 %v935_v29 }
  0x37   : > { %899 = vmatprep.subr.bf16.mxu0 %v950_v0  ;;  %911 = vmatprep.subr.bf16.mxu1 %v950_v0 }
  0x3a   : > { %900 = vmatpush3.bf16.msra.mxu0 %v936_v30  ;;  %912 = vmatpush3.bf16.msra.mxu1 %v937_v31 }
  0x3b   : > { %901 = vmatprep.subr.bf16.mxu0 %v950_v0  ;;  %913 = vmatprep.subr.bf16.mxu1 %v950_v0 }
  0x3e   : > { %902 = vmatpush3.bf16.msra.mxu0 %v938_v32  ;;  %914 = vmatpush3.bf16.msra.mxu1 %v939_v33 }
  0x3f   : > { %903 = vmatprep.subr.bf16.mxu0 %v950_v0  ;;  %915 = vmatprep.subr.bf16.mxu1 %v950_v0 }
  0x42   : > { %904 = vmatpush3.bf16.msra.mxu0 %v940_v34  ;;  %916 = vmatpush3.bf16.msra.mxu1 %v941_v35 }
  0xff   : > { %v405_v36 = vpop.f32.mrb[0].mxu0  ;;  %v449_v37 = vpop.f32.mrb[0].mxu1 }
 0x100   : > { %v455_v38 = vmax.f32 %v405_v36, %v449_v37  ;;  %v877_v39 = vpop.f32.mrb[1].mxu0  ;;  %v883_v40 = vpop.f32.mrb[1].mxu1 }
 0x101   : > { %v408_v44 = vpop.f32.mrb[2].mxu0  ;;  %v452_v45 = vpop.f32.mrb[2].mxu1 }
 0x102   : > { %v456_v46 = vpack.c.bf16 %v455_v38, %v455_v38  ;;  %v878_v47 = vpop.f32.mrb[3].mxu0  ;;  %v884_v48 = vpop.f32.mrb[3].mxu1 }
 0x104   : > { %458 = vst.msk [vmem:[#allocation2] sm:$0x1] %vm457_vm4, %v456_v46 }
 0x107   : > { %v507_v51 = vpop.f32.mrb[4].mxu0  ;;  %v551_v52 = vpop.f32.mrb[4].mxu1 }
 0x108   : > { %v557_v53 = vmax.f32 %v507_v51, %v551_v52  ;;  %v889_v55 = vpop.f32.mrb[5].mxu0  ;;  %v895_v56 = vpop.f32.mrb[5].mxu1 }
 0x109   : > { %v510_v57 = vpop.f32.mrb[6].mxu0  ;;  %v554_v58 = vpop.f32.mrb[6].mxu1 }
 0x10a   : > { %v558_v59 = vpack.c.bf16 %v557_v53, %v557_v53  ;;  %v890_v60 = vpop.f32.mrb[7].mxu0  ;;  %v896_v61 = vpop.f32.mrb[7].mxu1 }
 0x10c   : > { %v566_v62 = vrot.slane %v558_v59, %v565_v54 }
 0x10e   : > { %v567_v63 = vrot.slane %v566_v62, 7 }
 0x110   : > { %570 = vst.msk [vmem:[#allocation2] sm:$0x2] %vm569_vm5, %v567_v63 }
 0x117   : > { %v571_v0 = vld [vmem:[#allocation2] sm:$0x3] }
 0x118   : > { %906 = vmatmul.mubr.msk.bf16.vlgmr.msra.gmra.mrb[8].mxu0 %vm604_vm6, %v571_v0  ;;  %918 = vmatmul.mubr.msk.bf16.vlgmr.msra.gmra.mrb[8].mxu1 %vm604_vm6, %v571_v0 }
 0x1eb   : > { %v642_v2 = vpop.f32.mrb[8].mxu0  ;;  %v714_v3 = vpop.f32.mrb[8].mxu1 }
 0x1ec   : > { %v720_v4 = vmax.f32 %v642_v2, %v714_v3  ;;  %v907_v5 = vpop.f32.mrb[9].mxu0  ;;  %v919_v6 = vpop.f32.mrb[9].mxu1 }
 0x1ed   : > { %v645_v7 = vpop.f32.mrb[10].mxu0  ;;  %v717_v8 = vpop.f32.mrb[10].mxu1 }
 0x1ee   : > { %v721_v9 = vpack.c.bf16 %v720_v4, %v720_v4  ;;  %v908_v10 = vpop.f32.mrb[11].mxu0  ;;  %v920_v11 = vpop.f32.mrb[11].mxu1 }
 0x1f0   : > { %723 = vst.msk [vmem:[%s318_s26] sm:$0x3] %vm722_vm7, %v721_v9 }
 0x1f1 PF: > { %s19_s27 = sadd.s32 1, %s948_s27  }
 0x1f2   : > { %p16_p4 = scmp.ge.s32.totalorder %s19_s27, 4  }
 0x1f4   :  { %18 = sbr.rel (!%p16_p4) target bundleno = 1 (0x1), region = 90 }

</bundles_post_ra>
